<compile_context>
chip_gen: v7x
topology: tpu7x:2x2x1
jax: 0.10.0
libtpu: 0.0.40
codegen_flags: <defaults>
</compile_context>

<pallas_src>
import functools

import jax
import jax.numpy as jnp
from jax.experimental import pallas as pl
from jax.experimental.pallas import tpu as pltpu

CP = 128          # padded channel width (lane-dense layout everywhere)
BN_EPS = 1e-5


def _pick_tm(m):
    """Largest M-tile in {512,256,128} that divides m and keeps >=4 grid steps."""
    for t in (512, 256, 128):
        if m % t == 0 and (m // t >= 4 or t == 128):
            return t
    return m


# ----------------------------- Pallas kernels -----------------------------

def _mm_stats_kernel(x_ref, w_ref, s_ref, b_ref, y_ref, ps_ref, pq_ref, *,
                     prologue):
    """One M-tile of Y = act(X) @ W (bf16 on MXU, f32 acc) + column stats.

    prologue=True: the input is first normalized with the previous layer's
    batch-norm scale/shift and ReLU'd in-register (fused BN, no extra pass).
    """
    x = x_ref[...]
    if prologue:
        x = jnp.maximum(x.astype(jnp.float32) * s_ref[...] + b_ref[...],
                        0.0).astype(jnp.bfloat16)
    acc = jnp.dot(x, w_ref[...], preferred_element_type=jnp.float32)
    y_ref[...] = acc.astype(y_ref.dtype)
    ps_ref[0] = jnp.sum(acc, axis=0, keepdims=True)
    pq_ref[0] = jnp.sum(acc * acc, axis=0, keepdims=True)


def matmul_stats(x, w, scale=None, shift=None):
    """x: (M, CP) bf16, w: (CP, CP) bf16 -> (y bf16, per-tile sum, sum-of-sq).

    If scale/shift are given, relu(x*scale+shift) is applied as a prologue.
    """
    M, K = x.shape
    assert K == CP and w.shape == (CP, CP)
    prologue = scale is not None
    if not prologue:
        scale = jnp.ones((1, CP), jnp.float32)
        shift = jnp.zeros((1, CP), jnp.float32)
    tm = _pick_tm(M)
    nmt = M // tm
    kernel = functools.partial(_mm_stats_kernel, prologue=prologue)
    flops = 2 * M * CP * CP
    bytes_acc = M * CP * 2 * 2 + CP * CP * 2 + 2 * nmt * CP * 4 + 2 * CP * 4
    return pl.pallas_call(
        kernel,
        out_shape=(jax.ShapeDtypeStruct((M, CP), jnp.bfloat16),
                   jax.ShapeDtypeStruct((nmt, 1, CP), jnp.float32),
                   jax.ShapeDtypeStruct((nmt, 1, CP), jnp.float32)),
        grid=(nmt,),
        in_specs=[pl.BlockSpec((tm, CP), lambda i: (i, 0)),
                  pl.BlockSpec((CP, CP), lambda i: (0, 0)),
                  pl.BlockSpec((1, CP), lambda i: (0, 0)),
                  pl.BlockSpec((1, CP), lambda i: (0, 0))],
        out_specs=(pl.BlockSpec((tm, CP), lambda i: (i, 0)),
                   pl.BlockSpec((1, 1, CP), lambda i: (i, 0, 0)),
                   pl.BlockSpec((1, 1, CP), lambda i: (i, 0, 0))),
        compiler_params=pltpu.CompilerParams(
            dimension_semantics=("parallel",)),
        cost_estimate=pl.CostEstimate(flops=int(flops), transcendentals=0,
                                      bytes_accessed=int(bytes_acc)),
    )(x, w, scale, shift)


def _conv3x3_kernel(x_ref, w_ref, y_ref, ps_ref, pq_ref, *, stride, hc, Wo):
    """Grouped 3x3 conv, one (batch, row-chunk) grid step.

    x_ref: (1, P, Hs, Ws, CP) bf16 padded / parity-relayout input (resident
           across the row-chunk axis).  stride 1: P=1; stride 2: P=4 planes.
    w_ref: (9, CP, CP) bf16 per-tap block-diagonal (grouped) weights.
    y_ref: (hc*Wo, CP) bf16.  ps/pq: (1, 1, CP) f32 per-chunk partial stats.
    """
    r0 = pl.program_id(1) * hc
    acc = jnp.zeros((hc * Wo, CP), jnp.float32)
    if stride == 1:
        # Window rows r0 .. r0+hc+2 of the padded plane, cast to f32 ONCE per
        # chunk so the 9 shifted tap slices stay on unpacked sublanes.
        win = x_ref[0, 0, pl.ds(r0, hc + 2), :, :].astype(jnp.float32)
        for t in range(9):
            kh, kw = divmod(t, 3)
            v = win[kh:kh + hc, kw:kw + Wo, :]
            v = v.reshape(hc * Wo, CP).astype(jnp.bfloat16)
            acc = acc + jnp.dot(v, w_ref[t],
                                preferred_element_type=jnp.float32)
    else:
        win = x_ref[0, :, pl.ds(r0, hc + 1), :, :].astype(jnp.float32)
        for t in range(9):
            kh, kw = divmod(t, 3)
            p = (kh % 2) * 2 + (kw % 2)
            v = win[p, kh // 2:kh // 2 + hc, kw // 2:kw // 2 + Wo, :]
            v = v.reshape(hc * Wo, CP).astype(jnp.bfloat16)
            acc = acc + jnp.dot(v, w_ref[t],
                                preferred_element_type=jnp.float32)
    y_ref[...] = acc.astype(y_ref.dtype)
    ps_ref[0] = jnp.sum(acc, axis=0, keepdims=True)
    pq_ref[0] = jnp.sum(acc * acc, axis=0, keepdims=True)


def conv3x3_grouped(prep, w_taps, stride, Ho, Wo):
    """prep: (N, P, Hs, Ws, CP) bf16 -> (y (N*Ho*Wo, CP) bf16, psum, psumsq)."""
    N, P, Hs, Ws, _ = prep.shape
    hc = min(Ho, max(1, 256 // Wo))           # ~256-row MXU chunks
    while Ho % hc:
        hc -= 1
    if Ho // hc == 1 and Ho % 2 == 0:
        hc = Ho // 2                          # keep >=2 chunks for pipelining
    R = Ho // hc
    kernel = functools.partial(_conv3x3_kernel, stride=stride, hc=hc, Wo=Wo)
    flops = 2 * N * Ho * Wo * CP * CP * 9
    bytes_acc = (N * P * Hs * Ws * CP * 2 + 9 * CP * CP * 2
                 + N * Ho * Wo * CP * 2 + 2 * N * R * CP * 4)
    return pl.pallas_call(
        kernel,
        out_shape=(jax.ShapeDtypeStruct((N * Ho * Wo, CP), jnp.bfloat16),
                   jax.ShapeDtypeStruct((N * R, 1, CP), jnp.float32),
                   jax.ShapeDtypeStruct((N * R, 1, CP), jnp.float32)),
        grid=(N, R),
        in_specs=[pl.BlockSpec((1, P, Hs, Ws, CP),
                               lambda n, r: (n, 0, 0, 0, 0)),
                  pl.BlockSpec((9, CP, CP), lambda n, r: (0, 0, 0))],
        out_specs=(pl.BlockSpec((hc * Wo, CP), lambda n, r: (n * R + r, 0)),
                   pl.BlockSpec((1, 1, CP), lambda n, r: (n * R + r, 0, 0)),
                   pl.BlockSpec((1, 1, CP), lambda n, r: (n * R + r, 0, 0))),
        compiler_params=pltpu.CompilerParams(
            dimension_semantics=("parallel", "arbitrary"),
            vmem_limit_bytes=32 * 1024 * 1024),
        cost_estimate=pl.CostEstimate(flops=int(flops), transcendentals=0,
                                      bytes_accessed=int(bytes_acc)),
    )(prep, w_taps)


def _apply_kernel(y_ref, s_ref, b_ref, r_ref, ss_ref, bs_ref, o_ref, *,
                  has_res, affine_res):
    """Fused bn(y) [+ bn(residual) or + residual] + ReLU -> bf16 block output."""
    v = y_ref[...].astype(jnp.float32) * s_ref[...] + b_ref[...]
    if has_res:
        res = r_ref[...].astype(jnp.float32)
        if affine_res:
            res = res * ss_ref[...] + bs_ref[...]
        v = v + res
    o_ref[...] = jnp.maximum(v, 0.0).astype(o_ref.dtype)


def bn_apply(y, scale, shift, residual=None, res_scale=None, res_shift=None):
    M, C = y.shape
    has_res = residual is not None
    affine_res = res_scale is not None
    tm = _pick_tm(M)
    nmt = M // tm
    if residual is None:
        residual = jnp.zeros((1, C), jnp.bfloat16)
        res_spec = pl.BlockSpec((1, C), lambda i: (0, 0))
    else:
        res_spec = pl.BlockSpec((tm, C), lambda i: (i, 0))
    if res_scale is None:
        res_scale = jnp.ones((1, C), jnp.float32)
        res_shift = jnp.zeros((1, C), jnp.float32)
    kernel = functools.partial(_apply_kernel, has_res=has_res,
                               affine_res=affine_res)
    return pl.pallas_call(
        kernel,
        out_shape=jax.ShapeDtypeStruct((M, C), jnp.bfloat16),
        grid=(nmt,),
        in_specs=[pl.BlockSpec((tm, C), lambda i: (i, 0)),
                  pl.BlockSpec((1, C), lambda i: (0, 0)),
                  pl.BlockSpec((1, C), lambda i: (0, 0)),
                  res_spec,
                  pl.BlockSpec((1, C), lambda i: (0, 0)),
                  pl.BlockSpec((1, C), lambda i: (0, 0))],
        out_specs=pl.BlockSpec((tm, C), lambda i: (i, 0)),
        compiler_params=pltpu.CompilerParams(
            dimension_semantics=("parallel",)),
    )(y, scale, shift, residual, res_scale, res_shift)


def _pool_linear_kernel(x_ref, w_ref, b_ref, o_ref, *, n, hw):
    """Fused global avg-pool + linear: pool FIRST (VPU), then one tiny matmul."""
    x = x_ref[...].astype(jnp.float32).reshape(n, hw, CP)
    pooled = jnp.mean(x, axis=1).astype(jnp.bfloat16)          # (n, CP)
    z = jnp.dot(pooled, w_ref[...], preferred_element_type=jnp.float32)
    o_ref[...] = z + b_ref[...]


def pool_linear(x, w, b, n, hw):
    """x: (N*HW, CP) bf16 -> logits (N, CP) f32 (F.avg_pool2d(.,8) + linear)."""
    M, C = x.shape
    kernel = functools.partial(_pool_linear_kernel, n=n, hw=hw)
    return pl.pallas_call(
        kernel,
        out_shape=jax.ShapeDtypeStruct((n, C), jnp.float32),
        grid=(1,),
        in_specs=[pl.BlockSpec((M, C), lambda i: (0, 0)),
                  pl.BlockSpec((C, C), lambda i: (0, 0)),
                  pl.BlockSpec((1, C), lambda i: (0, 0))],
        out_specs=pl.BlockSpec((n, C), lambda i: (0, 0)),
    )(x, w, b)


# ----------------------- small host-side glue (jnp) -------------------------

def bn_coeffs(ps, pq, gamma, beta, count):
    """Reduce per-tile partial sums to per-channel scale/shift (batch stats)."""
    s = jnp.sum(ps, axis=0)                                    # (1, CP)
    q = jnp.sum(pq, axis=0)
    mean = s / count
    var = jnp.maximum(q / count - mean * mean, 0.0)
    scale = gamma * jax.lax.rsqrt(var + BN_EPS)
    shift = beta - mean * scale
    return scale, shift


def prep_conv2_input(y1, scale, shift, N, H, W, stride):
    """bn1+ReLU fused with the conv2 zero-pad (+ stride-2 parity relayout), bf16.

    stride 1: (N, 1, H+2, W+2, CP);  stride 2: (N, 4, Ho+1, Wo+1, CP) parity
    planes so every stride-2 tap becomes a plain shift inside the kernel.
    """
    a = jnp.maximum(
        y1.reshape(N, H, W, CP).astype(jnp.float32) * scale + shift,
        0.0).astype(jnp.bfloat16)
    a = jnp.pad(a, ((0, 0), (1, 1), (1, 1), (0, 0)))
    if stride == 1:
        return a.reshape(N, 1, H + 2, W + 2, CP)
    Ho, Wo = H // 2, W // 2
    a = a.reshape(N, Ho + 1, 2, Wo + 1, 2, CP).transpose(0, 2, 4, 1, 3, 5)
    return a.reshape(N, 4, Ho + 1, Wo + 1, CP)


# ----------------------- init-time weight preprocessing ---------------------

def conv_w(key, cout, cin, k):
    fan_in = cin * k * k
    bound = 1.0 / (fan_in ** 0.5)
    return jax.random.uniform(key, (cout, cin, k, k), jnp.float32, -bound, bound)


def pack_1x1(w):
    """(Cout, Cin, 1, 1) conv weight -> padded (CP, CP) bf16 matmul matrix."""
    cout, cin = w.shape[0], w.shape[1]
    m = jnp.zeros((CP, CP), jnp.float32)
    m = m.at[:cin, :cout].set(w.reshape(cout, cin).T)
    return m.astype(jnp.bfloat16)


def pack_grouped_taps(w, cardinality):
    """(Cout, Cin_g, 3, 3) grouped conv weight -> (9, CP, CP) bf16 per-tap
    block-diagonal matrices (group structure folded into one MXU tile)."""
    cout, cin_g = w.shape[0], w.shape[1]
    cout_g = cout // cardinality
    taps = jnp.zeros((9, CP, CP), jnp.float32)
    for t in range(9):
        kh, kw = divmod(t, 3)
        for g in range(cardinality):
            blk = w[g * cout_g:(g + 1) * cout_g, :, kh, kw].T   # (Cin_g, Cout_g)
            taps = taps.at[t,
                           g * cin_g:(g + 1) * cin_g,
                           g * cout_g:(g + 1) * cout_g].set(blk)
    return taps.astype(jnp.bfloat16)


def bn_params():
    # padded gamma entries are harmless (padded channels stay exactly zero)
    return jnp.ones((1, CP), jnp.float32), jnp.zeros((1, CP), jnp.float32)


def init_block(key, in_planes, cardinality, bw, stride):
    gw = cardinality * bw
    ks = jax.random.split(key, 4)
    p = {"stride": stride, "c_out": 2 * gw}
    p["w1"] = pack_1x1(conv_w(ks[0], gw, in_planes, 1))
    p["g1"], p["b1"] = bn_params()
    p["w2t"] = pack_grouped_taps(conv_w(ks[1], gw, gw // cardinality, 3),
                                 cardinality)
    p["g2"], p["b2"] = bn_params()
    p["w3"] = pack_1x1(conv_w(ks[2], 2 * gw, gw, 1))
    p["g3"], p["b3"] = bn_params()
    if stride != 1 or in_planes != 2 * gw:
        p["ws"] = pack_1x1(conv_w(ks[3], 2 * gw, in_planes, 1))
        p["gs"], p["bs"] = bn_params()
    return p


def init_resnext(key, num_blocks, cardinality, bottleneck_width, num_classes=10):
    n_keys = 1 + sum(num_blocks) + 2
    keys = jax.random.split(key, n_keys)
    params = {"conv1_w": pack_1x1(conv_w(keys[0], 64, 3, 1)),
              "num_classes": num_classes}
    params["bn1_g"], params["bn1_b"] = bn_params()
    in_planes, bw, kidx, layers = 64, bottleneck_width, 1, []
    for nb, stride0 in zip(num_blocks, (1, 2, 2)):
        blocks = []
        for s in [stride0] + [1] * (nb - 1):
            blocks.append(init_block(keys[kidx], in_planes, cardinality, bw, s))
            kidx += 1
            in_planes = 2 * cardinality * bw
        bw *= 2
        layers.append(blocks)
    params["layers"] = layers
    lin_in = cardinality * bottleneck_width * 8
    bound = 1.0 / (lin_in ** 0.5)
    lw = jax.random.uniform(keys[kidx], (num_classes, lin_in), jnp.float32,
                            -bound, bound)
    lb = jax.random.uniform(keys[kidx + 1], (num_classes,), jnp.float32,
                            -bound, bound)
    params["lin_w"] = (jnp.zeros((CP, CP), jnp.float32)
                       .at[:lin_in, :num_classes].set(lw.T)).astype(jnp.bfloat16)
    params["lin_b"] = jnp.zeros((1, CP), jnp.float32).at[0, :num_classes].set(lb)
    return params


# ------------------------------ model forward -------------------------------

def block_forward(x, p):
    """ResNeXt bottleneck block; x is (N, H, W, CP) bf16 (padded channels)."""
    N, H, W, _ = x.shape
    s = p["stride"]
    Ho, Wo = H // s, W // s
    M = N * H * W
    Mo = N * Ho * Wo

    # conv1 (1x1): raw output + stats; bn1+relu is fused into the conv2 prep
    y1, ps, pq = matmul_stats(x.reshape(M, CP), p["w1"])
    sc1, sh1 = bn_coeffs(ps, pq, p["g1"], p["b1"], M)
    prep = prep_conv2_input(y1, sc1, sh1, N, H, W, s)

    # conv2 (grouped 3x3, stride) -- stats emitted, bn2+relu fused downstream
    y2, ps, pq = conv3x3_grouped(prep, p["w2t"], s, Ho, Wo)
    sc2, sh2 = bn_coeffs(ps, pq, p["g2"], p["b2"], Mo)

    # conv3 (1x1) with bn2+relu applied as an in-kernel prologue
    y3, ps, pq = matmul_stats(y2, p["w3"], scale=sc2, shift=sh2)
    sc3, sh3 = bn_coeffs(ps, pq, p["g3"], p["b3"], Mo)

    # shortcut + final bn3(+bn_s)+residual+relu, one fused apply pass
    if "ws" in p:
        # small XLA strided copy for the downsampled shortcut input
        xs = x[:, ::s, ::s, :].reshape(Mo, CP)
        ysc, ps, pq = matmul_stats(xs, p["ws"])
        scs, shs = bn_coeffs(ps, pq, p["gs"], p["bs"], Mo)
        o = bn_apply(y3, sc3, sh3, residual=ysc,
                     res_scale=scs, res_shift=shs)
    else:
        o = bn_apply(y3, sc3, sh3, residual=x.reshape(M, CP))
    return o.reshape(N, Ho, Wo, CP)


def export_feature(o, c_real):
    """Match PyTorch's x.view(N, -1) of the NCHW tensor (real channels only)."""
    n = o.shape[0]
    f = o[:, :, :, :c_real].astype(jnp.float32)
    return jnp.transpose(f, (0, 3, 1, 2)).reshape(n, -1)


def resnext_forward(params, x_nchw):
    """Returns [feat_layer1, feat_layer2, feat_layer3, logits] (fc_out=False)."""
    x = jnp.transpose(x_nchw, (0, 2, 3, 1)).astype(jnp.float32)  # NCHW -> NHWC
    N, H, W, C = x.shape
    # pad channels to the lane-dense width ONCE for the whole network
    x = jnp.pad(x, ((0, 0), (0, 0), (0, 0), (0, CP - C))).astype(jnp.bfloat16)

    # stem: conv1 (1x1) -> bn1 -> relu (materialized: feeds conv1 + shortcut)
    y, ps, pq = matmul_stats(x.reshape(N * H * W, CP), params["conv1_w"])
    sc, sh = bn_coeffs(ps, pq, params["bn1_g"], params["bn1_b"], N * H * W)
    o = bn_apply(y, sc, sh).reshape(N, H, W, CP)

    feats = []
    for blocks in params["layers"]:
        for bp in blocks:
            o = block_forward(o, bp)
        feats.append(export_feature(o, blocks[-1]["c_out"]))

    # F.avg_pool2d(out, 8) on the 8x8 map + linear, fused (pool-then-matmul)
    Nn, Hf, Wf, _ = o.shape
    logits_pad = pool_linear(o.reshape(Nn * Hf * Wf, CP),
                             params["lin_w"], params["lin_b"], Nn, Hf * Wf)
    feats.append(logits_pad[:, :params["num_classes"]])
    return feats


# ---------------------------------- main -----------------------------------

if __name__ == "__main__":
    key = jax.random.PRNGKey(0)
    pkey, xkey = jax.random.split(key)

    num_blocks = [1, 1, 1]       # small synthetic config
    cardinality = 2
    bottleneck_width = 4
    num_classes = 10

    params = init_resnext(pkey, num_blocks, cardinality, bottleneck_width,
                          num_classes=num_classes)
    # 32x32 input so that after the two stride-2 stages the map is 8x8
    # (required by F.avg_pool2d(out, 8)).
    x = jax.random.normal(xkey, (2, 3, 32, 32), jnp.float32)

    fwd = jax.jit(lambda inp: resnext_forward(params, inp))
    feats = jax.block_until_ready(fwd(x))

    assert feats[0].shape == (2, 16 * 32 * 32)
    assert feats[1].shape == (2, 32 * 16 * 16)
    assert feats[2].shape == (2, 64 * 8 * 8)
    assert feats[3].shape == (2, num_classes)
    assert all(bool(jnp.all(jnp.isfinite(f))) for f in feats)

    print("KERNEL_OK")
</pallas_src>

<mosaic_0001>
module attributes {stable_mosaic.version = 11 : i64} {
  func.func @_mm_stats_kernel(%arg0: i32, %arg1: memref<512x128xbf16, #tpu.memory_space<vmem>>, %arg2: memref<128x128xbf16, #tpu.memory_space<vmem>>, %arg3: memref<1x128xf32, #tpu.memory_space<vmem>>, %arg4: memref<1x128xf32, #tpu.memory_space<vmem>>, %arg5: memref<512x128xbf16, #tpu.memory_space<vmem>>, %arg6: memref<1x1x128xf32, #tpu.memory_space<vmem>>, %arg7: memref<1x1x128xf32, #tpu.memory_space<vmem>>) attributes {dimension_semantics = [#tpu.dimension_semantics<parallel>], iteration_bounds = array<i64: 4>, scalar_prefetch = 0 : i64, scratch_operands = 0 : i64, tpu.core_type = #tpu.core_type<tc>, window_params = [{transform_indices = @transform_0, window_bounds = array<i64: 512, 128>}, {pipeline_mode = #tpu.pipeline_mode<synchronous>, transform_indices = @transform_1, window_bounds = array<i64: 128, 128>}, {pipeline_mode = #tpu.pipeline_mode<synchronous>, transform_indices = @transform_2, window_bounds = array<i64: 1, 128>}, {pipeline_mode = #tpu.pipeline_mode<synchronous>, transform_indices = @transform_3, window_bounds = array<i64: 1, 128>}, {transform_indices = @transform_4, window_bounds = array<i64: 512, 128>}, {transform_indices = @transform_5, window_bounds = array<i64: 1, 1, 128>}, {transform_indices = @transform_6, window_bounds = array<i64: 1, 1, 128>}]} {
    %c0 = arith.constant 0 : index
    %c0_0 = arith.constant 0 : index
    %0 = vector.load %arg1[%c0, %c0_0] : memref<512x128xbf16, #tpu.memory_space<vmem>>, vector<512x128xbf16>
    %c0_1 = arith.constant 0 : index
    %c0_2 = arith.constant 0 : index
    %1 = vector.load %arg2[%c0_1, %c0_2] : memref<128x128xbf16, #tpu.memory_space<vmem>>, vector<128x128xbf16>
    %cst = arith.constant dense<0.000000e+00> : vector<512x128xf32>
    %2 = tpu.matmul %0, %1, %cst {dimension_numbers = #tpu.dot_dimension_numbers<[1], [0], [0], [1], [0, 0, 1, 1], [], []>} : vector<512x128xbf16>, vector<128x128xbf16>, vector<512x128xf32> -> vector<512x128xf32>
    %3 = arith.truncf %2 : vector<512x128xf32> to vector<512x128xbf16>
    %c0_3 = arith.constant 0 : index
    %c0_4 = arith.constant 0 : index
    %4 = vector.load %arg5[%c0_3, %c0_4] : memref<512x128xbf16, #tpu.memory_space<vmem>>, vector<512x128xbf16>
    tpu.vector_store %arg5[%c0_3, %c0_4], %3 {strides = array<i32>} : memref<512x128xbf16, #tpu.memory_space<vmem>>, vector<512x128xbf16>,
    %cst_5 = arith.constant dense<0.000000e+00> : vector<128xf32>
    %5 = vector.multi_reduction <add>, %2, %cst_5 [0] : vector<512x128xf32> to vector<128xf32>
    %6 = vector.shape_cast %5 : vector<128xf32> to vector<1x128xf32>
    %c0_6 = arith.constant 0 : index
    %c0_7 = arith.constant 0 : index
    %c0_8 = arith.constant 0 : index
    %7 = vector.load %arg6[%c0_6, %c0_7, %c0_8] : memref<1x1x128xf32, #tpu.memory_space<vmem>>, vector<1x1x128xf32>
    %8 = vector.shape_cast %7 : vector<1x1x128xf32> to vector<1x128xf32>
    %9 = vector.shape_cast %6 : vector<1x128xf32> to vector<1x1x128xf32>
    tpu.vector_store %arg6[%c0_6, %c0_7, %c0_8], %9 {strides = array<i32>} : memref<1x1x128xf32, #tpu.memory_space<vmem>>, vector<1x1x128xf32>,
    %10 = arith.mulf %2, %2 : vector<512x128xf32>
    %cst_9 = arith.constant dense<0.000000e+00> : vector<128xf32>
    %11 = vector.multi_reduction <add>, %10, %cst_9 [0] : vector<512x128xf32> to vector<128xf32>
    %12 = vector.shape_cast %11 : vector<128xf32> to vector<1x128xf32>
    %c0_10 = arith.constant 0 : index
    %c0_11 = arith.constant 0 : index
    %c0_12 = arith.constant 0 : index
    %13 = vector.load %arg7[%c0_10, %c0_11, %c0_12] : memref<1x1x128xf32, #tpu.memory_space<vmem>>, vector<1x1x128xf32>
    %14 = vector.shape_cast %13 : vector<1x1x128xf32> to vector<1x128xf32>
    %15 = vector.shape_cast %12 : vector<1x128xf32> to vector<1x1x128xf32>
    tpu.vector_store %arg7[%c0_10, %c0_11, %c0_12], %15 {strides = array<i32>} : memref<1x1x128xf32, #tpu.memory_space<vmem>>, vector<1x1x128xf32>,
    return
  }
  func.func @transform_0(%arg0: i32) -> (i32, i32) {
    %c0_i32 = arith.constant 0 : i32
    %c0_i32_0 = arith.constant 0 : i32
    return %arg0, %c0_i32 : i32, i32
  }
  func.func @transform_1(%arg0: i32) -> (i32, i32) {
    %c0_i32 = arith.constant 0 : i32
    %c0_i32_0 = arith.constant 0 : i32
    %c0_i32_1 = arith.constant 0 : i32
    return %c0_i32, %c0_i32_0 : i32, i32
  }
  func.func @transform_2(%arg0: i32) -> (i32, i32) {
    %c0_i32 = arith.constant 0 : i32
    %c0_i32_0 = arith.constant 0 : i32
    %c0_i32_1 = arith.constant 0 : i32
    return %c0_i32, %c0_i32_0 : i32, i32
  }
  func.func @transform_3(%arg0: i32) -> (i32, i32) {
    %c0_i32 = arith.constant 0 : i32
    %c0_i32_0 = arith.constant 0 : i32
    %c0_i32_1 = arith.constant 0 : i32
    return %c0_i32, %c0_i32_0 : i32, i32
  }
  func.func @transform_4(%arg0: i32) -> (i32, i32) {
    %c0_i32 = arith.constant 0 : i32
    %c0_i32_0 = arith.constant 0 : i32
    return %arg0, %c0_i32 : i32, i32
  }
  func.func @transform_5(%arg0: i32) -> (i32, i32, i32) {
    %c0_i32 = arith.constant 0 : i32
    %c0_i32_0 = arith.constant 0 : i32
    %c0_i32_1 = arith.constant 0 : i32
    return %arg0, %c0_i32, %c0_i32_0 : i32, i32, i32
  }
  func.func @transform_6(%arg0: i32) -> (i32, i32, i32) {
    %c0_i32 = arith.constant 0 : i32
    %c0_i32_0 = arith.constant 0 : i32
    %c0_i32_1 = arith.constant 0 : i32
    return %arg0, %c0_i32, %c0_i32_0 : i32, i32, i32
  }
}

module attributes {stable_mosaic.version = 11 : i64} {
  func.func @_apply_kernel(%arg0: i32, %arg1: memref<512x128xbf16, #tpu.memory_space<vmem>>, %arg2: memref<1x128xf32, #tpu.memory_space<vmem>>, %arg3: memref<1x128xf32, #tpu.memory_space<vmem>>, %arg4: memref<1x128xbf16, #tpu.memory_space<vmem>>, %arg5: memref<1x128xf32, #tpu.memory_space<vmem>>, %arg6: memref<1x128xf32, #tpu.memory_space<vmem>>, %arg7: memref<512x128xbf16, #tpu.memory_space<vmem>>) attributes {dimension_semantics = [#tpu.dimension_semantics<parallel>], iteration_bounds = array<i64: 4>, scalar_prefetch = 0 : i64, scratch_operands = 0 : i64, tpu.core_type = #tpu.core_type<tc>, window_params = [{transform_indices = @transform_0, window_bounds = array<i64: 512, 128>}, {pipeline_mode = #tpu.pipeline_mode<synchronous>, transform_indices = @transform_1, window_bounds = array<i64: 1, 128>}, {pipeline_mode = #tpu.pipeline_mode<synchronous>, transform_indices = @transform_2, window_bounds = array<i64: 1, 128>}, {pipeline_mode = #tpu.pipeline_mode<synchronous>, transform_indices = @transform_3, window_bounds = array<i64: 1, 128>}, {pipeline_mode = #tpu.pipeline_mode<synchronous>, transform_indices = @transform_4, window_bounds = array<i64: 1, 128>}, {pipeline_mode = #tpu.pipeline_mode<synchronous>, transform_indices = @transform_5, window_bounds = array<i64: 1, 128>}, {transform_indices = @transform_6, window_bounds = array<i64: 512, 128>}]} {
    %c0 = arith.constant 0 : index
    %c0_0 = arith.constant 0 : index
    %0 = vector.load %arg1[%c0, %c0_0] : memref<512x128xbf16, #tpu.memory_space<vmem>>, vector<512x128xbf16>
    %1 = arith.extf %0 : vector<512x128xbf16> to vector<512x128xf32>
    %c0_1 = arith.constant 0 : index
    %c0_2 = arith.constant 0 : index
    %2 = vector.load %arg2[%c0_1, %c0_2] : memref<1x128xf32, #tpu.memory_space<vmem>>, vector<1x128xf32>
    %3 = vector.broadcast %2 : vector<1x128xf32> to vector<512x128xf32>
    %4 = arith.mulf %1, %3 : vector<512x128xf32>
    %c0_3 = arith.constant 0 : index
    %c0_4 = arith.constant 0 : index
    %5 = vector.load %arg3[%c0_3, %c0_4] : memref<1x128xf32, #tpu.memory_space<vmem>>, vector<1x128xf32>
    %6 = vector.broadcast %5 : vector<1x128xf32> to vector<512x128xf32>
    %7 = arith.addf %4, %6 : vector<512x128xf32>
    %cst = arith.constant 0.000000e+00 : f32
    %8 = vector.broadcast %cst : f32 to vector<512x128xf32>
    %9 = arith.maximumf %7, %8 : vector<512x128xf32>
    %10 = arith.truncf %9 : vector<512x128xf32> to vector<512x128xbf16>
    %c0_5 = arith.constant 0 : index
    %c0_6 = arith.constant 0 : index
    %11 = vector.load %arg7[%c0_5, %c0_6] : memref<512x128xbf16, #tpu.memory_space<vmem>>, vector<512x128xbf16>
    tpu.vector_store %arg7[%c0_5, %c0_6], %10 {strides = array<i32>} : memref<512x128xbf16, #tpu.memory_space<vmem>>, vector<512x128xbf16>,
    return
  }
  func.func @transform_0(%arg0: i32) -> (i32, i32) {
    %c0_i32 = arith.constant 0 : i32
    %c0_i32_0 = arith.constant 0 : i32
    return %arg0, %c0_i32 : i32, i32
  }
  func.func @transform_1(%arg0: i32) -> (i32, i32) {
    %c0_i32 = arith.constant 0 : i32
    %c0_i32_0 = arith.constant 0 : i32
    %c0_i32_1 = arith.constant 0 : i32
    return %c0_i32, %c0_i32_0 : i32, i32
  }
  func.func @transform_2(%arg0: i32) -> (i32, i32) {
    %c0_i32 = arith.constant 0 : i32
    %c0_i32_0 = arith.constant 0 : i32
    %c0_i32_1 = arith.constant 0 : i32
    return %c0_i32, %c0_i32_0 : i32, i32
  }
  func.func @transform_3(%arg0: i32) -> (i32, i32) {
    %c0_i32 = arith.constant 0 : i32
    %c0_i32_0 = arith.constant 0 : i32
    %c0_i32_1 = arith.constant 0 : i32
    return %c0_i32, %c0_i32_0 : i32, i32
  }
  func.func @transform_4(%arg0: i32) -> (i32, i32) {
    %c0_i32 = arith.constant 0 : i32
    %c0_i32_0 = arith.constant 0 : i32
    %c0_i32_1 = arith.constant 0 : i32
    return %c0_i32, %c0_i32_0 : i32, i32
  }
  func.func @transform_5(%arg0: i32) -> (i32, i32) {
    %c0_i32 = arith.constant 0 : i32
    %c0_i32_0 = arith.constant 0 : i32
    %c0_i32_1 = arith.constant 0 : i32
    return %c0_i32, %c0_i32_0 : i32, i32
  }
  func.func @transform_6(%arg0: i32) -> (i32, i32) {
    %c0_i32 = arith.constant 0 : i32
    %c0_i32_0 = arith.constant 0 : i32
    return %arg0, %c0_i32 : i32, i32
  }
}

module attributes {stable_mosaic.version = 11 : i64} {
  func.func @_conv3x3_kernel(%arg0: i32, %arg1: i32, %arg2: memref<1x1x34x34x128xbf16, #tpu.memory_space<vmem>>, %arg3: memref<9x128x128xbf16, #tpu.memory_space<vmem>>, %arg4: memref<256x128xbf16, #tpu.memory_space<vmem>>, %arg5: memref<1x1x128xf32, #tpu.memory_space<vmem>>, %arg6: memref<1x1x128xf32, #tpu.memory_space<vmem>>) attributes {dimension_semantics = [#tpu.dimension_semantics<parallel>, #tpu.dimension_semantics<arbitrary>], iteration_bounds = array<i64: 2, 4>, scalar_prefetch = 0 : i64, scratch_operands = 0 : i64, tpu.core_type = #tpu.core_type<tc>, window_params = [{transform_indices = @transform_0, window_bounds = array<i64: 1, 1, 34, 34, 128>}, {pipeline_mode = #tpu.pipeline_mode<synchronous>, transform_indices = @transform_1, window_bounds = array<i64: 9, 128, 128>}, {transform_indices = @transform_2, window_bounds = array<i64: 256, 128>}, {transform_indices = @transform_3, window_bounds = array<i64: 1, 1, 128>}, {transform_indices = @transform_4, window_bounds = array<i64: 1, 1, 128>}]} {
    %c8_i32 = arith.constant 8 : i32
    %0 = arith.muli %arg1, %c8_i32 : i32
    %cst = arith.constant 0.000000e+00 : f32
    %1 = vector.broadcast %cst : f32 to vector<256x128xf32>
    %c0 = arith.constant 0 : index
    %c0_0 = arith.constant 0 : index
    %2 = arith.index_cast %0 : i32 to index
    %c0_1 = arith.constant 0 : index
    %c0_2 = arith.constant 0 : index
    %3 = vector.load %arg2[%c0, %c0_0, %2, %c0_1, %c0_2] : memref<1x1x34x34x128xbf16, #tpu.memory_space<vmem>>, vector<1x1x10x34x128xbf16>
    %4 = vector.shape_cast %3 : vector<1x1x10x34x128xbf16> to vector<10x34x128xbf16>
    %5 = arith.extf %4 : vector<10x34x128xbf16> to vector<10x34x128xf32>
    %6 = vector.extract_strided_slice %5 {offsets = [0, 0, 0], sizes = [8, 32, 128], strides = [1, 1, 1]} : vector<10x34x128xf32> to vector<8x32x128xf32>
    %7 = vector.shape_cast %6 : vector<8x32x128xf32> to vector<256x128xf32>
    %8 = arith.truncf %7 : vector<256x128xf32> to vector<256x128xbf16>
    %c0_3 = arith.constant 0 : index
    %c0_4 = arith.constant 0 : index
    %c0_5 = arith.constant 0 : index
    %9 = vector.load %arg3[%c0_3, %c0_4, %c0_5] : memref<9x128x128xbf16, #tpu.memory_space<vmem>>, vector<1x128x128xbf16>
    %10 = vector.shape_cast %9 : vector<1x128x128xbf16> to vector<128x128xbf16>
    %cst_6 = arith.constant dense<0.000000e+00> : vector<256x128xf32>
    %11 = tpu.matmul %8, %10, %cst_6 {dimension_numbers = #tpu.dot_dimension_numbers<[1], [0], [0], [1], [0, 0, 1, 1], [], []>} : vector<256x128xbf16>, vector<128x128xbf16>, vector<256x128xf32> -> vector<256x128xf32>
    %12 = arith.addf %1, %11 : vector<256x128xf32>
    %13 = vector.extract_strided_slice %5 {offsets = [0, 1, 0], sizes = [8, 32, 128], strides = [1, 1, 1]} : vector<10x34x128xf32> to vector<8x32x128xf32>
    %14 = vector.shape_cast %13 : vector<8x32x128xf32> to vector<256x128xf32>
    %15 = arith.truncf %14 : vector<256x128xf32> to vector<256x128xbf16>
    %c1 = arith.constant 1 : index
    %c0_7 = arith.constant 0 : index
    %c0_8 = arith.constant 0 : index
    %16 = vector.load %arg3[%c1, %c0_7, %c0_8] : memref<9x128x128xbf16, #tpu.memory_space<vmem>>, vector<1x128x128xbf16>
    %17 = vector.shape_cast %16 : vector<1x128x128xbf16> to vector<128x128xbf16>
    %cst_9 = arith.constant dense<0.000000e+00> : vector<256x128xf32>
    %18 = tpu.matmul %15, %17, %cst_9 {dimension_numbers = #tpu.dot_dimension_numbers<[1], [0], [0], [1], [0, 0, 1, 1], [], []>} : vector<256x128xbf16>, vector<128x128xbf16>, vector<256x128xf32> -> vector<256x128xf32>
    %19 = arith.addf %12, %18 : vector<256x128xf32>
    %20 = vector.extract_strided_slice %5 {offsets = [0, 2, 0], sizes = [8, 32, 128], strides = [1, 1, 1]} : vector<10x34x128xf32> to vector<8x32x128xf32>
    %21 = vector.shape_cast %20 : vector<8x32x128xf32> to vector<256x128xf32>
    %22 = arith.truncf %21 : vector<256x128xf32> to vector<256x128xbf16>
    %c2 = arith.constant 2 : index
    %c0_10 = arith.constant 0 : index
    %c0_11 = arith.constant 0 : index
    %23 = vector.load %arg3[%c2, %c0_10, %c0_11] : memref<9x128x128xbf16, #tpu.memory_space<vmem>>, vector<1x128x128xbf16>
    %24 = vector.shape_cast %23 : vector<1x128x128xbf16> to vector<128x128xbf16>
    %cst_12 = arith.constant dense<0.000000e+00> : vector<256x128xf32>
    %25 = tpu.matmul %22, %24, %cst_12 {dimension_numbers = #tpu.dot_dimension_numbers<[1], [0], [0], [1], [0, 0, 1, 1], [], []>} : vector<256x128xbf16>, vector<128x128xbf16>, vector<256x128xf32> -> vector<256x128xf32>
    %26 = arith.addf %19, %25 : vector<256x128xf32>
    %27 = vector.extract_strided_slice %5 {offsets = [1, 0, 0], sizes = [8, 32, 128], strides = [1, 1, 1]} : vector<10x34x128xf32> to vector<8x32x128xf32>
    %28 = vector.shape_cast %27 : vector<8x32x128xf32> to vector<256x128xf32>
    %29 = arith.truncf %28 : vector<256x128xf32> to vector<256x128xbf16>
    %c3 = arith.constant 3 : index
    %c0_13 = arith.constant 0 : index
    %c0_14 = arith.constant 0 : index
    %30 = vector.load %arg3[%c3, %c0_13, %c0_14] : memref<9x128x128xbf16, #tpu.memory_space<vmem>>, vector<1x128x128xbf16>
    %31 = vector.shape_cast %30 : vector<1x128x128xbf16> to vector<128x128xbf16>
    %cst_15 = arith.constant dense<0.000000e+00> : vector<256x128xf32>
    %32 = tpu.matmul %29, %31, %cst_15 {dimension_numbers = #tpu.dot_dimension_numbers<[1], [0], [0], [1], [0, 0, 1, 1], [], []>} : vector<256x128xbf16>, vector<128x128xbf16>, vector<256x128xf32> -> vector<256x128xf32>
    %33 = arith.addf %26, %32 : vector<256x128xf32>
    %34 = vector.extract_strided_slice %5 {offsets = [1, 1, 0], sizes = [8, 32, 128], strides = [1, 1, 1]} : vector<10x34x128xf32> to vector<8x32x128xf32>
    %35 = vector.shape_cast %34 : vector<8x32x128xf32> to vector<256x128xf32>
    %36 = arith.truncf %35 : vector<256x128xf32> to vector<256x128xbf16>
    %c4 = arith.constant 4 : index
    %c0_16 = arith.constant 0 : index
    %c0_17 = arith.constant 0 : index
    %37 = vector.load %arg3[%c4, %c0_16, %c0_17] : memref<9x128x128xbf16, #tpu.memory_space<vmem>>, vector<1x128x128xbf16>
    %38 = vector.shape_cast %37 : vector<1x128x128xbf16> to vector<128x128xbf16>
    %cst_18 = arith.constant dense<0.000000e+00> : vector<256x128xf32>
    %39 = tpu.matmul %36, %38, %cst_18 {dimension_numbers = #tpu.dot_dimension_numbers<[1], [0], [0], [1], [0, 0, 1, 1], [], []>} : vector<256x128xbf16>, vector<128x128xbf16>, vector<256x128xf32> -> vector<256x128xf32>
    %40 = arith.addf %33, %39 : vector<256x128xf32>
    %41 = vector.extract_strided_slice %5 {offsets = [1, 2, 0], sizes = [8, 32, 128], strides = [1, 1, 1]} : vector<10x34x128xf32> to vector<8x32x128xf32>
    %42 = vector.shape_cast %41 : vector<8x32x128xf32> to vector<256x128xf32>
    %43 = arith.truncf %42 : vector<256x128xf32> to vector<256x128xbf16>
    %c5 = arith.constant 5 : index
    %c0_19 = arith.constant 0 : index
    %c0_20 = arith.constant 0 : index
    %44 = vector.load %arg3[%c5, %c0_19, %c0_20] : memref<9x128x128xbf16, #tpu.memory_space<vmem>>, vector<1x128x128xbf16>
    %45 = vector.shape_cast %44 : vector<1x128x128xbf16> to vector<128x128xbf16>
    %cst_21 = arith.constant dense<0.000000e+00> : vector<256x128xf32>
    %46 = tpu.matmul %43, %45, %cst_21 {dimension_numbers = #tpu.dot_dimension_numbers<[1], [0], [0], [1], [0, 0, 1, 1], [], []>} : vector<256x128xbf16>, vector<128x128xbf16>, vector<256x128xf32> -> vector<256x128xf32>
    %47 = arith.addf %40, %46 : vector<256x128xf32>
    %48 = vector.extract_strided_slice %5 {offsets = [2, 0, 0], sizes = [8, 32, 128], strides = [1, 1, 1]} : vector<10x34x128xf32> to vector<8x32x128xf32>
    %49 = vector.shape_cast %48 : vector<8x32x128xf32> to vector<256x128xf32>
    %50 = arith.truncf %49 : vector<256x128xf32> to vector<256x128xbf16>
    %c6 = arith.constant 6 : index
    %c0_22 = arith.constant 0 : index
    %c0_23 = arith.constant 0 : index
    %51 = vector.load %arg3[%c6, %c0_22, %c0_23] : memref<9x128x128xbf16, #tpu.memory_space<vmem>>, vector<1x128x128xbf16>
    %52 = vector.shape_cast %51 : vector<1x128x128xbf16> to vector<128x128xbf16>
    %cst_24 = arith.constant dense<0.000000e+00> : vector<256x128xf32>
    %53 = tpu.matmul %50, %52, %cst_24 {dimension_numbers = #tpu.dot_dimension_numbers<[1], [0], [0], [1], [0, 0, 1, 1], [], []>} : vector<256x128xbf16>, vector<128x128xbf16>, vector<256x128xf32> -> vector<256x128xf32>
    %54 = arith.addf %47, %53 : vector<256x128xf32>
    %55 = vector.extract_strided_slice %5 {offsets = [2, 1, 0], sizes = [8, 32, 128], strides = [1, 1, 1]} : vector<10x34x128xf32> to vector<8x32x128xf32>
    %56 = vector.shape_cast %55 : vector<8x32x128xf32> to vector<256x128xf32>
    %57 = arith.truncf %56 : vector<256x128xf32> to vector<256x128xbf16>
    %c7 = arith.constant 7 : index
    %c0_25 = arith.constant 0 : index
    %c0_26 = arith.constant 0 : index
    %58 = vector.load %arg3[%c7, %c0_25, %c0_26] : memref<9x128x128xbf16, #tpu.memory_space<vmem>>, vector<1x128x128xbf16>
    %59 = vector.shape_cast %58 : vector<1x128x128xbf16> to vector<128x128xbf16>
    %cst_27 = arith.constant dense<0.000000e+00> : vector<256x128xf32>
    %60 = tpu.matmul %57, %59, %cst_27 {dimension_numbers = #tpu.dot_dimension_numbers<[1], [0], [0], [1], [0, 0, 1, 1], [], []>} : vector<256x128xbf16>, vector<128x128xbf16>, vector<256x128xf32> -> vector<256x128xf32>
    %61 = arith.addf %54, %60 : vector<256x128xf32>
    %62 = vector.extract_strided_slice %5 {offsets = [2, 2, 0], sizes = [8, 32, 128], strides = [1, 1, 1]} : vector<10x34x128xf32> to vector<8x32x128xf32>
    %63 = vector.shape_cast %62 : vector<8x32x128xf32> to vector<256x128xf32>
    %64 = arith.truncf %63 : vector<256x128xf32> to vector<256x128xbf16>
    %c8 = arith.constant 8 : index
    %c0_28 = arith.constant 0 : index
    %c0_29 = arith.constant 0 : index
    %65 = vector.load %arg3[%c8, %c0_28, %c0_29] : memref<9x128x128xbf16, #tpu.memory_space<vmem>>, vector<1x128x128xbf16>
    %66 = vector.shape_cast %65 : vector<1x128x128xbf16> to vector<128x128xbf16>
    %cst_30 = arith.constant dense<0.000000e+00> : vector<256x128xf32>
    %67 = tpu.matmul %64, %66, %cst_30 {dimension_numbers = #tpu.dot_dimension_numbers<[1], [0], [0], [1], [0, 0, 1, 1], [], []>} : vector<256x128xbf16>, vector<128x128xbf16>, vector<256x128xf32> -> vector<256x128xf32>
    %68 = arith.addf %61, %67 : vector<256x128xf32>
    %69 = arith.truncf %68 : vector<256x128xf32> to vector<256x128xbf16>
    %c0_31 = arith.constant 0 : index
    %c0_32 = arith.constant 0 : index
    %70 = vector.load %arg4[%c0_31, %c0_32] : memref<256x128xbf16, #tpu.memory_space<vmem>>, vector<256x128xbf16>
    tpu.vector_store %arg4[%c0_31, %c0_32], %69 {strides = array<i32>} : memref<256x128xbf16, #tpu.memory_space<vmem>>, vector<256x128xbf16>,
    %cst_33 = arith.constant dense<0.000000e+00> : vector<128xf32>
    %71 = vector.multi_reduction <add>, %68, %cst_33 [0] : vector<256x128xf32> to vector<128xf32>
    %72 = vector.shape_cast %71 : vector<128xf32> to vector<1x128xf32>
    %c0_34 = arith.constant 0 : index
    %c0_35 = arith.constant 0 : index
    %c0_36 = arith.constant 0 : index
    %73 = vector.load %arg5[%c0_34, %c0_35, %c0_36] : memref<1x1x128xf32, #tpu.memory_space<vmem>>, vector<1x1x128xf32>
    %74 = vector.shape_cast %73 : vector<1x1x128xf32> to vector<1x128xf32>
    %75 = vector.shape_cast %72 : vector<1x128xf32> to vector<1x1x128xf32>
    tpu.vector_store %arg5[%c0_34, %c0_35, %c0_36], %75 {strides = array<i32>} : memref<1x1x128xf32, #tpu.memory_space<vmem>>, vector<1x1x128xf32>,
    %76 = arith.mulf %68, %68 : vector<256x128xf32>
    %cst_37 = arith.constant dense<0.000000e+00> : vector<128xf32>
    %77 = vector.multi_reduction <add>, %76, %cst_37 [0] : vector<256x128xf32> to vector<128xf32>
    %78 = vector.shape_cast %77 : vector<128xf32> to vector<1x128xf32>
    %c0_38 = arith.constant 0 : index
    %c0_39 = arith.constant 0 : index
    %c0_40 = arith.constant 0 : index
    %79 = vector.load %arg6[%c0_38, %c0_39, %c0_40] : memref<1x1x128xf32, #tpu.memory_space<vmem>>, vector<1x1x128xf32>
    %80 = vector.shape_cast %79 : vector<1x1x128xf32> to vector<1x128xf32>
    %81 = vector.shape_cast %78 : vector<1x128xf32> to vector<1x1x128xf32>
    tpu.vector_store %arg6[%c0_38, %c0_39, %c0_40], %81 {strides = array<i32>} : memref<1x1x128xf32, #tpu.memory_space<vmem>>, vector<1x1x128xf32>,
    return
  }
  func.func @transform_0(%arg0: i32, %arg1: i32) -> (i32, i32, i32, i32, i32) {
    %c0_i32 = arith.constant 0 : i32
    %c0_i32_0 = arith.constant 0 : i32
    %c0_i32_1 = arith.constant 0 : i32
    %c0_i32_2 = arith.constant 0 : i32
    %c0_i32_3 = arith.constant 0 : i32
    return %arg0, %c0_i32, %c0_i32_0, %c0_i32_1, %c0_i32_2 : i32, i32, i32, i32, i32
  }
  func.func @transform_1(%arg0: i32, %arg1: i32) -> (i32, i32, i32) {
    %c0_i32 = arith.constant 0 : i32
    %c0_i32_0 = arith.constant 0 : i32
    %c0_i32_1 = arith.constant 0 : i32
    %c0_i32_2 = arith.constant 0 : i32
    return %c0_i32, %c0_i32_0, %c0_i32_1 : i32, i32, i32
  }
  func.func @transform_2(%arg0: i32, %arg1: i32) -> (i32, i32) {
    %c4_i32 = arith.constant 4 : i32
    %0 = arith.muli %arg0, %c4_i32 : i32
    %1 = arith.addi %0, %arg1 : i32
    %c0_i32 = arith.constant 0 : i32
    %c0_i32_0 = arith.constant 0 : i32
    return %1, %c0_i32 : i32, i32
  }
  func.func @transform_3(%arg0: i32, %arg1: i32) -> (i32, i32, i32) {
    %c4_i32 = arith.constant 4 : i32
    %0 = arith.muli %arg0, %c4_i32 : i32
    %1 = arith.addi %0, %arg1 : i32
    %c0_i32 = arith.constant 0 : i32
    %c0_i32_0 = arith.constant 0 : i32
    %c0_i32_1 = arith.constant 0 : i32
    return %1, %c0_i32, %c0_i32_0 : i32, i32, i32
  }
  func.func @transform_4(%arg0: i32, %arg1: i32) -> (i32, i32, i32) {
    %c4_i32 = arith.constant 4 : i32
    %0 = arith.muli %arg0, %c4_i32 : i32
    %1 = arith.addi %0, %arg1 : i32
    %c0_i32 = arith.constant 0 : i32
    %c0_i32_0 = arith.constant 0 : i32
    %c0_i32_1 = arith.constant 0 : i32
    return %1, %c0_i32, %c0_i32_0 : i32, i32, i32
  }
}

module attributes {stable_mosaic.version = 11 : i64} {
  func.func @_mm_stats_kernel(%arg0: i32, %arg1: memref<512x128xbf16, #tpu.memory_space<vmem>>, %arg2: memref<128x128xbf16, #tpu.memory_space<vmem>>, %arg3: memref<1x128xf32, #tpu.memory_space<vmem>>, %arg4: memref<1x128xf32, #tpu.memory_space<vmem>>, %arg5: memref<512x128xbf16, #tpu.memory_space<vmem>>, %arg6: memref<1x1x128xf32, #tpu.memory_space<vmem>>, %arg7: memref<1x1x128xf32, #tpu.memory_space<vmem>>) attributes {dimension_semantics = [#tpu.dimension_semantics<parallel>], iteration_bounds = array<i64: 4>, scalar_prefetch = 0 : i64, scratch_operands = 0 : i64, tpu.core_type = #tpu.core_type<tc>, window_params = [{transform_indices = @transform_0, window_bounds = array<i64: 512, 128>}, {pipeline_mode = #tpu.pipeline_mode<synchronous>, transform_indices = @transform_1, window_bounds = array<i64: 128, 128>}, {pipeline_mode = #tpu.pipeline_mode<synchronous>, transform_indices = @transform_2, window_bounds = array<i64: 1, 128>}, {pipeline_mode = #tpu.pipeline_mode<synchronous>, transform_indices = @transform_3, window_bounds = array<i64: 1, 128>}, {transform_indices = @transform_4, window_bounds = array<i64: 512, 128>}, {transform_indices = @transform_5, window_bounds = array<i64: 1, 1, 128>}, {transform_indices = @transform_6, window_bounds = array<i64: 1, 1, 128>}]} {
    %c0 = arith.constant 0 : index
    %c0_0 = arith.constant 0 : index
    %0 = vector.load %arg1[%c0, %c0_0] : memref<512x128xbf16, #tpu.memory_space<vmem>>, vector<512x128xbf16>
    %1 = arith.extf %0 : vector<512x128xbf16> to vector<512x128xf32>
    %c0_1 = arith.constant 0 : index
    %c0_2 = arith.constant 0 : index
    %2 = vector.load %arg3[%c0_1, %c0_2] : memref<1x128xf32, #tpu.memory_space<vmem>>, vector<1x128xf32>
    %3 = vector.broadcast %2 : vector<1x128xf32> to vector<512x128xf32>
    %4 = arith.mulf %1, %3 : vector<512x128xf32>
    %c0_3 = arith.constant 0 : index
    %c0_4 = arith.constant 0 : index
    %5 = vector.load %arg4[%c0_3, %c0_4] : memref<1x128xf32, #tpu.memory_space<vmem>>, vector<1x128xf32>
    %6 = vector.broadcast %5 : vector<1x128xf32> to vector<512x128xf32>
    %7 = arith.addf %4, %6 : vector<512x128xf32>
    %cst = arith.constant 0.000000e+00 : f32
    %8 = vector.broadcast %cst : f32 to vector<512x128xf32>
    %9 = arith.maximumf %7, %8 : vector<512x128xf32>
    %10 = arith.truncf %9 : vector<512x128xf32> to vector<512x128xbf16>
    %c0_5 = arith.constant 0 : index
    %c0_6 = arith.constant 0 : index
    %11 = vector.load %arg2[%c0_5, %c0_6] : memref<128x128xbf16, #tpu.memory_space<vmem>>, vector<128x128xbf16>
    %cst_7 = arith.constant dense<0.000000e+00> : vector<512x128xf32>
    %12 = tpu.matmul %10, %11, %cst_7 {dimension_numbers = #tpu.dot_dimension_numbers<[1], [0], [0], [1], [0, 0, 1, 1], [], []>} : vector<512x128xbf16>, vector<128x128xbf16>, vector<512x128xf32> -> vector<512x128xf32>
    %13 = arith.truncf %12 : vector<512x128xf32> to vector<512x128xbf16>
    %c0_8 = arith.constant 0 : index
    %c0_9 = arith.constant 0 : index
    %14 = vector.load %arg5[%c0_8, %c0_9] : memref<512x128xbf16, #tpu.memory_space<vmem>>, vector<512x128xbf16>
    tpu.vector_store %arg5[%c0_8, %c0_9], %13 {strides = array<i32>} : memref<512x128xbf16, #tpu.memory_space<vmem>>, vector<512x128xbf16>,
    %cst_10 = arith.constant dense<0.000000e+00> : vector<128xf32>
    %15 = vector.multi_reduction <add>, %12, %cst_10 [0] : vector<512x128xf32> to vector<128xf32>
    %16 = vector.shape_cast %15 : vector<128xf32> to vector<1x128xf32>
    %c0_11 = arith.constant 0 : index
    %c0_12 = arith.constant 0 : index
    %c0_13 = arith.constant 0 : index
    %17 = vector.load %arg6[%c0_11, %c0_12, %c0_13] : memref<1x1x128xf32, #tpu.memory_space<vmem>>, vector<1x1x128xf32>
    %18 = vector.shape_cast %17 : vector<1x1x128xf32> to vector<1x128xf32>
    %19 = vector.shape_cast %16 : vector<1x128xf32> to vector<1x1x128xf32>
    tpu.vector_store %arg6[%c0_11, %c0_12, %c0_13], %19 {strides = array<i32>} : memref<1x1x128xf32, #tpu.memory_space<vmem>>, vector<1x1x128xf32>,
    %20 = arith.mulf %12, %12 : vector<512x128xf32>
    %cst_14 = arith.constant dense<0.000000e+00> : vector<128xf32>
    %21 = vector.multi_reduction <add>, %20, %cst_14 [0] : vector<512x128xf32> to vector<128xf32>
    %22 = vector.shape_cast %21 : vector<128xf32> to vector<1x128xf32>
    %c0_15 = arith.constant 0 : index
    %c0_16 = arith.constant 0 : index
    %c0_17 = arith.constant 0 : index
    %23 = vector.load %arg7[%c0_15, %c0_16, %c0_17] : memref<1x1x128xf32, #tpu.memory_space<vmem>>, vector<1x1x128xf32>
    %24 = vector.shape_cast %23 : vector<1x1x128xf32> to vector<1x128xf32>
    %25 = vector.shape_cast %22 : vector<1x128xf32> to vector<1x1x128xf32>
    tpu.vector_store %arg7[%c0_15, %c0_16, %c0_17], %25 {strides = array<i32>} : memref<1x1x128xf32, #tpu.memory_space<vmem>>, vector<1x1x128xf32>,
    return
  }
  func.func @transform_0(%arg0: i32) -> (i32, i32) {
    %c0_i32 = arith.constant 0 : i32
    %c0_i32_0 = arith.constant 0 : i32
    return %arg0, %c0_i32 : i32, i32
  }
  func.func @transform_1(%arg0: i32) -> (i32, i32) {
    %c0_i32 = arith.constant 0 : i32
    %c0_i32_0 = arith.constant 0 : i32
    %c0_i32_1 = arith.constant 0 : i32
    return %c0_i32, %c0_i32_0 : i32, i32
  }
  func.func @transform_2(%arg0: i32) -> (i32, i32) {
    %c0_i32 = arith.constant 0 : i32
    %c0_i32_0 = arith.constant 0 : i32
    %c0_i32_1 = arith.constant 0 : i32
    return %c0_i32, %c0_i32_0 : i32, i32
  }
  func.func @transform_3(%arg0: i32) -> (i32, i32) {
    %c0_i32 = arith.constant 0 : i32
    %c0_i32_0 = arith.constant 0 : i32
    %c0_i32_1 = arith.constant 0 : i32
    return %c0_i32, %c0_i32_0 : i32, i32
  }
  func.func @transform_4(%arg0: i32) -> (i32, i32) {
    %c0_i32 = arith.constant 0 : i32
    %c0_i32_0 = arith.constant 0 : i32
    return %arg0, %c0_i32 : i32, i32
  }
  func.func @transform_5(%arg0: i32) -> (i32, i32, i32) {
    %c0_i32 = arith.constant 0 : i32
    %c0_i32_0 = arith.constant 0 : i32
    %c0_i32_1 = arith.constant 0 : i32
    return %arg0, %c0_i32, %c0_i32_0 : i32, i32, i32
  }
  func.func @transform_6(%arg0: i32) -> (i32, i32, i32) {
    %c0_i32 = arith.constant 0 : i32
    %c0_i32_0 = arith.constant 0 : i32
    %c0_i32_1 = arith.constant 0 : i32
    return %arg0, %c0_i32, %c0_i32_0 : i32, i32, i32
  }
}

module attributes {stable_mosaic.version = 11 : i64} {
  func.func @_apply_kernel(%arg0: i32, %arg1: memref<512x128xbf16, #tpu.memory_space<vmem>>, %arg2: memref<1x128xf32, #tpu.memory_space<vmem>>, %arg3: memref<1x128xf32, #tpu.memory_space<vmem>>, %arg4: memref<512x128xbf16, #tpu.memory_space<vmem>>, %arg5: memref<1x128xf32, #tpu.memory_space<vmem>>, %arg6: memref<1x128xf32, #tpu.memory_space<vmem>>, %arg7: memref<512x128xbf16, #tpu.memory_space<vmem>>) attributes {dimension_semantics = [#tpu.dimension_semantics<parallel>], iteration_bounds = array<i64: 4>, scalar_prefetch = 0 : i64, scratch_operands = 0 : i64, tpu.core_type = #tpu.core_type<tc>, window_params = [{transform_indices = @transform_0, window_bounds = array<i64: 512, 128>}, {pipeline_mode = #tpu.pipeline_mode<synchronous>, transform_indices = @transform_1, window_bounds = array<i64: 1, 128>}, {pipeline_mode = #tpu.pipeline_mode<synchronous>, transform_indices = @transform_2, window_bounds = array<i64: 1, 128>}, {transform_indices = @transform_3, window_bounds = array<i64: 512, 128>}, {pipeline_mode = #tpu.pipeline_mode<synchronous>, transform_indices = @transform_4, window_bounds = array<i64: 1, 128>}, {pipeline_mode = #tpu.pipeline_mode<synchronous>, transform_indices = @transform_5, window_bounds = array<i64: 1, 128>}, {transform_indices = @transform_6, window_bounds = array<i64: 512, 128>}]} {
    %c0 = arith.constant 0 : index
    %c0_0 = arith.constant 0 : index
    %0 = vector.load %arg1[%c0, %c0_0] : memref<512x128xbf16, #tpu.memory_space<vmem>>, vector<512x128xbf16>
    %1 = arith.extf %0 : vector<512x128xbf16> to vector<512x128xf32>
    %c0_1 = arith.constant 0 : index
    %c0_2 = arith.constant 0 : index
    %2 = vector.load %arg2[%c0_1, %c0_2] : memref<1x128xf32, #tpu.memory_space<vmem>>, vector<1x128xf32>
    %3 = vector.broadcast %2 : vector<1x128xf32> to vector<512x128xf32>
    %4 = arith.mulf %1, %3 : vector<512x128xf32>
    %c0_3 = arith.constant 0 : index
    %c0_4 = arith.constant 0 : index
    %5 = vector.load %arg3[%c0_3, %c0_4] : memref<1x128xf32, #tpu.memory_space<vmem>>, vector<1x128xf32>
    %6 = vector.broadcast %5 : vector<1x128xf32> to vector<512x128xf32>
    %7 = arith.addf %4, %6 : vector<512x128xf32>
    %c0_5 = arith.constant 0 : index
    %c0_6 = arith.constant 0 : index
    %8 = vector.load %arg4[%c0_5, %c0_6] : memref<512x128xbf16, #tpu.memory_space<vmem>>, vector<512x128xbf16>
    %9 = arith.extf %8 : vector<512x128xbf16> to vector<512x128xf32>
    %c0_7 = arith.constant 0 : index
    %c0_8 = arith.constant 0 : index
    %10 = vector.load %arg5[%c0_7, %c0_8] : memref<1x128xf32, #tpu.memory_space<vmem>>, vector<1x128xf32>
    %11 = vector.broadcast %10 : vector<1x128xf32> to vector<512x128xf32>
    %12 = arith.mulf %9, %11 : vector<512x128xf32>
    %c0_9 = arith.constant 0 : index
    %c0_10 = arith.constant 0 : index
    %13 = vector.load %arg6[%c0_9, %c0_10] : memref<1x128xf32, #tpu.memory_space<vmem>>, vector<1x128xf32>
    %14 = vector.broadcast %13 : vector<1x128xf32> to vector<512x128xf32>
    %15 = arith.addf %12, %14 : vector<512x128xf32>
    %16 = arith.addf %7, %15 : vector<512x128xf32>
    %cst = arith.constant 0.000000e+00 : f32
    %17 = vector.broadcast %cst : f32 to vector<512x128xf32>
    %18 = arith.maximumf %16, %17 : vector<512x128xf32>
    %19 = arith.truncf %18 : vector<512x128xf32> to vector<512x128xbf16>
    %c0_11 = arith.constant 0 : index
    %c0_12 = arith.constant 0 : index
    %20 = vector.load %arg7[%c0_11, %c0_12] : memref<512x128xbf16, #tpu.memory_space<vmem>>, vector<512x128xbf16>
    tpu.vector_store %arg7[%c0_11, %c0_12], %19 {strides = array<i32>} : memref<512x128xbf16, #tpu.memory_space<vmem>>, vector<512x128xbf16>,
    return
  }
  func.func @transform_0(%arg0: i32) -> (i32, i32) {
    %c0_i32 = arith.constant 0 : i32
    %c0_i32_0 = arith.constant 0 : i32
    return %arg0, %c0_i32 : i32, i32
  }
  func.func @transform_1(%arg0: i32) -> (i32, i32) {
    %c0_i32 = arith.constant 0 : i32
    %c0_i32_0 = arith.constant 0 : i32
    %c0_i32_1 = arith.constant 0 : i32
    return %c0_i32, %c0_i32_0 : i32, i32
  }
  func.func @transform_2(%arg0: i32) -> (i32, i32) {
    %c0_i32 = arith.constant 0 : i32
    %c0_i32_0 = arith.constant 0 : i32
    %c0_i32_1 = arith.constant 0 : i32
    return %c0_i32, %c0_i32_0 : i32, i32
  }
  func.func @transform_3(%arg0: i32) -> (i32, i32) {
    %c0_i32 = arith.constant 0 : i32
    %c0_i32_0 = arith.constant 0 : i32
    return %arg0, %c0_i32 : i32, i32
  }
  func.func @transform_4(%arg0: i32) -> (i32, i32) {
    %c0_i32 = arith.constant 0 : i32
    %c0_i32_0 = arith.constant 0 : i32
    %c0_i32_1 = arith.constant 0 : i32
    return %c0_i32, %c0_i32_0 : i32, i32
  }
  func.func @transform_5(%arg0: i32) -> (i32, i32) {
    %c0_i32 = arith.constant 0 : i32
    %c0_i32_0 = arith.constant 0 : i32
    %c0_i32_1 = arith.constant 0 : i32
    return %c0_i32, %c0_i32_0 : i32, i32
  }
  func.func @transform_6(%arg0: i32) -> (i32, i32) {
    %c0_i32 = arith.constant 0 : i32
    %c0_i32_0 = arith.constant 0 : i32
    return %arg0, %c0_i32 : i32, i32
  }
}

module attributes {stable_mosaic.version = 11 : i64} {
  func.func @_mm_stats_kernel(%arg0: i32, %arg1: memref<128x128xbf16, #tpu.memory_space<vmem>>, %arg2: memref<128x128xbf16, #tpu.memory_space<vmem>>, %arg3: memref<1x128xf32, #tpu.memory_space<vmem>>, %arg4: memref<1x128xf32, #tpu.memory_space<vmem>>, %arg5: memref<128x128xbf16, #tpu.memory_space<vmem>>, %arg6: memref<1x1x128xf32, #tpu.memory_space<vmem>>, %arg7: memref<1x1x128xf32, #tpu.memory_space<vmem>>) attributes {dimension_semantics = [#tpu.dimension_semantics<parallel>], iteration_bounds = array<i64: 4>, scalar_prefetch = 0 : i64, scratch_operands = 0 : i64, tpu.core_type = #tpu.core_type<tc>, window_params = [{transform_indices = @transform_0, window_bounds = array<i64: 128, 128>}, {pipeline_mode = #tpu.pipeline_mode<synchronous>, transform_indices = @transform_1, window_bounds = array<i64: 128, 128>}, {pipeline_mode = #tpu.pipeline_mode<synchronous>, transform_indices = @transform_2, window_bounds = array<i64: 1, 128>}, {pipeline_mode = #tpu.pipeline_mode<synchronous>, transform_indices = @transform_3, window_bounds = array<i64: 1, 128>}, {transform_indices = @transform_4, window_bounds = array<i64: 128, 128>}, {transform_indices = @transform_5, window_bounds = array<i64: 1, 1, 128>}, {transform_indices = @transform_6, window_bounds = array<i64: 1, 1, 128>}]} {
    %c0 = arith.constant 0 : index
    %c0_0 = arith.constant 0 : index
    %0 = vector.load %arg1[%c0, %c0_0] : memref<128x128xbf16, #tpu.memory_space<vmem>>, vector<128x128xbf16>
    %c0_1 = arith.constant 0 : index
    %c0_2 = arith.constant 0 : index
    %1 = vector.load %arg2[%c0_1, %c0_2] : memref<128x128xbf16, #tpu.memory_space<vmem>>, vector<128x128xbf16>
    %cst = arith.constant dense<0.000000e+00> : vector<128x128xf32>
    %2 = tpu.matmul %0, %1, %cst {dimension_numbers = #tpu.dot_dimension_numbers<[1], [0], [0], [1], [0, 0, 1, 1], [], []>} : vector<128x128xbf16>, vector<128x128xbf16>, vector<128x128xf32> -> vector<128x128xf32>
    %3 = arith.truncf %2 : vector<128x128xf32> to vector<128x128xbf16>
    %c0_3 = arith.constant 0 : index
    %c0_4 = arith.constant 0 : index
    %4 = vector.load %arg5[%c0_3, %c0_4] : memref<128x128xbf16, #tpu.memory_space<vmem>>, vector<128x128xbf16>
    tpu.vector_store %arg5[%c0_3, %c0_4], %3 {strides = array<i32>} : memref<128x128xbf16, #tpu.memory_space<vmem>>, vector<128x128xbf16>,
    %cst_5 = arith.constant dense<0.000000e+00> : vector<128xf32>
    %5 = vector.multi_reduction <add>, %2, %cst_5 [0] : vector<128x128xf32> to vector<128xf32>
    %6 = vector.shape_cast %5 : vector<128xf32> to vector<1x128xf32>
    %c0_6 = arith.constant 0 : index
    %c0_7 = arith.constant 0 : index
    %c0_8 = arith.constant 0 : index
    %7 = vector.load %arg6[%c0_6, %c0_7, %c0_8] : memref<1x1x128xf32, #tpu.memory_space<vmem>>, vector<1x1x128xf32>
    %8 = vector.shape_cast %7 : vector<1x1x128xf32> to vector<1x128xf32>
    %9 = vector.shape_cast %6 : vector<1x128xf32> to vector<1x1x128xf32>
    tpu.vector_store %arg6[%c0_6, %c0_7, %c0_8], %9 {strides = array<i32>} : memref<1x1x128xf32, #tpu.memory_space<vmem>>, vector<1x1x128xf32>,
    %10 = arith.mulf %2, %2 : vector<128x128xf32>
    %cst_9 = arith.constant dense<0.000000e+00> : vector<128xf32>
    %11 = vector.multi_reduction <add>, %10, %cst_9 [0] : vector<128x128xf32> to vector<128xf32>
    %12 = vector.shape_cast %11 : vector<128xf32> to vector<1x128xf32>
    %c0_10 = arith.constant 0 : index
    %c0_11 = arith.constant 0 : index
    %c0_12 = arith.constant 0 : index
    %13 = vector.load %arg7[%c0_10, %c0_11, %c0_12] : memref<1x1x128xf32, #tpu.memory_space<vmem>>, vector<1x1x128xf32>
    %14 = vector.shape_cast %13 : vector<1x1x128xf32> to vector<1x128xf32>
    %15 = vector.shape_cast %12 : vector<1x128xf32> to vector<1x1x128xf32>
    tpu.vector_store %arg7[%c0_10, %c0_11, %c0_12], %15 {strides = array<i32>} : memref<1x1x128xf32, #tpu.memory_space<vmem>>, vector<1x1x128xf32>,
    return
  }
  func.func @transform_0(%arg0: i32) -> (i32, i32) {
    %c0_i32 = arith.constant 0 : i32
    %c0_i32_0 = arith.constant 0 : i32
    return %arg0, %c0_i32 : i32, i32
  }
  func.func @transform_1(%arg0: i32) -> (i32, i32) {
    %c0_i32 = arith.constant 0 : i32
    %c0_i32_0 = arith.constant 0 : i32
    %c0_i32_1 = arith.constant 0 : i32
    return %c0_i32, %c0_i32_0 : i32, i32
  }
  func.func @transform_2(%arg0: i32) -> (i32, i32) {
    %c0_i32 = arith.constant 0 : i32
    %c0_i32_0 = arith.constant 0 : i32
    %c0_i32_1 = arith.constant 0 : i32
    return %c0_i32, %c0_i32_0 : i32, i32
  }
  func.func @transform_3(%arg0: i32) -> (i32, i32) {
    %c0_i32 = arith.constant 0 : i32
    %c0_i32_0 = arith.constant 0 : i32
    %c0_i32_1 = arith.constant 0 : i32
    return %c0_i32, %c0_i32_0 : i32, i32
  }
  func.func @transform_4(%arg0: i32) -> (i32, i32) {
    %c0_i32 = arith.constant 0 : i32
    %c0_i32_0 = arith.constant 0 : i32
    return %arg0, %c0_i32 : i32, i32
  }
  func.func @transform_5(%arg0: i32) -> (i32, i32, i32) {
    %c0_i32 = arith.constant 0 : i32
    %c0_i32_0 = arith.constant 0 : i32
    %c0_i32_1 = arith.constant 0 : i32
    return %arg0, %c0_i32, %c0_i32_0 : i32, i32, i32
  }
  func.func @transform_6(%arg0: i32) -> (i32, i32, i32) {
    %c0_i32 = arith.constant 0 : i32
    %c0_i32_0 = arith.constant 0 : i32
    %c0_i32_1 = arith.constant 0 : i32
    return %arg0, %c0_i32, %c0_i32_0 : i32, i32, i32
  }
}

module attributes {stable_mosaic.version = 11 : i64} {
  func.func @_conv3x3_kernel(%arg0: i32, %arg1: i32, %arg2: memref<1x4x17x17x128xbf16, #tpu.memory_space<vmem>>, %arg3: memref<9x128x128xbf16, #tpu.memory_space<vmem>>, %arg4: memref<128x128xbf16, #tpu.memory_space<vmem>>, %arg5: memref<1x1x128xf32, #tpu.memory_space<vmem>>, %arg6: memref<1x1x128xf32, #tpu.memory_space<vmem>>) attributes {dimension_semantics = [#tpu.dimension_semantics<parallel>, #tpu.dimension_semantics<arbitrary>], iteration_bounds = array<i64: 2, 2>, scalar_prefetch = 0 : i64, scratch_operands = 0 : i64, tpu.core_type = #tpu.core_type<tc>, window_params = [{transform_indices = @transform_0, window_bounds = array<i64: 1, 4, 17, 17, 128>}, {pipeline_mode = #tpu.pipeline_mode<synchronous>, transform_indices = @transform_1, window_bounds = array<i64: 9, 128, 128>}, {transform_indices = @transform_2, window_bounds = array<i64: 128, 128>}, {transform_indices = @transform_3, window_bounds = array<i64: 1, 1, 128>}, {transform_indices = @transform_4, window_bounds = array<i64: 1, 1, 128>}]} {
    %c8_i32 = arith.constant 8 : i32
    %0 = arith.muli %arg1, %c8_i32 : i32
    %cst = arith.constant 0.000000e+00 : f32
    %1 = vector.broadcast %cst : f32 to vector<128x128xf32>
    %c0 = arith.constant 0 : index
    %c0_0 = arith.constant 0 : index
    %2 = arith.index_cast %0 : i32 to index
    %c0_1 = arith.constant 0 : index
    %c0_2 = arith.constant 0 : index
    %3 = vector.load %arg2[%c0, %c0_0, %2, %c0_1, %c0_2] : memref<1x4x17x17x128xbf16, #tpu.memory_space<vmem>>, vector<1x4x9x17x128xbf16>
    %4 = vector.shape_cast %3 : vector<1x4x9x17x128xbf16> to vector<4x9x17x128xbf16>
    %5 = arith.extf %4 : vector<4x9x17x128xbf16> to vector<4x9x17x128xf32>
    %6 = vector.extract_strided_slice %5 {offsets = [0, 0, 0, 0], sizes = [1, 8, 16, 128], strides = [1, 1, 1, 1]} : vector<4x9x17x128xf32> to vector<1x8x16x128xf32>
    %7 = vector.shape_cast %6 : vector<1x8x16x128xf32> to vector<8x16x128xf32>
    %8 = vector.shape_cast %7 : vector<8x16x128xf32> to vector<128x128xf32>
    %9 = arith.truncf %8 : vector<128x128xf32> to vector<128x128xbf16>
    %c0_3 = arith.constant 0 : index
    %c0_4 = arith.constant 0 : index
    %c0_5 = arith.constant 0 : index
    %10 = vector.load %arg3[%c0_3, %c0_4, %c0_5] : memref<9x128x128xbf16, #tpu.memory_space<vmem>>, vector<1x128x128xbf16>
    %11 = vector.shape_cast %10 : vector<1x128x128xbf16> to vector<128x128xbf16>
    %cst_6 = arith.constant dense<0.000000e+00> : vector<128x128xf32>
    %12 = tpu.matmul %9, %11, %cst_6 {dimension_numbers = #tpu.dot_dimension_numbers<[1], [0], [0], [1], [0, 0, 1, 1], [], []>} : vector<128x128xbf16>, vector<128x128xbf16>, vector<128x128xf32> -> vector<128x128xf32>
    %13 = arith.addf %1, %12 : vector<128x128xf32>
    %14 = vector.extract_strided_slice %5 {offsets = [1, 0, 0, 0], sizes = [1, 8, 16, 128], strides = [1, 1, 1, 1]} : vector<4x9x17x128xf32> to vector<1x8x16x128xf32>
    %15 = vector.shape_cast %14 : vector<1x8x16x128xf32> to vector<8x16x128xf32>
    %16 = vector.shape_cast %15 : vector<8x16x128xf32> to vector<128x128xf32>
    %17 = arith.truncf %16 : vector<128x128xf32> to vector<128x128xbf16>
    %c1 = arith.constant 1 : index
    %c0_7 = arith.constant 0 : index
    %c0_8 = arith.constant 0 : index
    %18 = vector.load %arg3[%c1, %c0_7, %c0_8] : memref<9x128x128xbf16, #tpu.memory_space<vmem>>, vector<1x128x128xbf16>
    %19 = vector.shape_cast %18 : vector<1x128x128xbf16> to vector<128x128xbf16>
    %cst_9 = arith.constant dense<0.000000e+00> : vector<128x128xf32>
    %20 = tpu.matmul %17, %19, %cst_9 {dimension_numbers = #tpu.dot_dimension_numbers<[1], [0], [0], [1], [0, 0, 1, 1], [], []>} : vector<128x128xbf16>, vector<128x128xbf16>, vector<128x128xf32> -> vector<128x128xf32>
    %21 = arith.addf %13, %20 : vector<128x128xf32>
    %22 = vector.extract_strided_slice %5 {offsets = [0, 0, 1, 0], sizes = [1, 8, 16, 128], strides = [1, 1, 1, 1]} : vector<4x9x17x128xf32> to vector<1x8x16x128xf32>
    %23 = vector.shape_cast %22 : vector<1x8x16x128xf32> to vector<8x16x128xf32>
    %24 = vector.shape_cast %23 : vector<8x16x128xf32> to vector<128x128xf32>
    %25 = arith.truncf %24 : vector<128x128xf32> to vector<128x128xbf16>
    %c2 = arith.constant 2 : index
    %c0_10 = arith.constant 0 : index
    %c0_11 = arith.constant 0 : index
    %26 = vector.load %arg3[%c2, %c0_10, %c0_11] : memref<9x128x128xbf16, #tpu.memory_space<vmem>>, vector<1x128x128xbf16>
    %27 = vector.shape_cast %26 : vector<1x128x128xbf16> to vector<128x128xbf16>
    %cst_12 = arith.constant dense<0.000000e+00> : vector<128x128xf32>
    %28 = tpu.matmul %25, %27, %cst_12 {dimension_numbers = #tpu.dot_dimension_numbers<[1], [0], [0], [1], [0, 0, 1, 1], [], []>} : vector<128x128xbf16>, vector<128x128xbf16>, vector<128x128xf32> -> vector<128x128xf32>
    %29 = arith.addf %21, %28 : vector<128x128xf32>
    %30 = vector.extract_strided_slice %5 {offsets = [2, 0, 0, 0], sizes = [1, 8, 16, 128], strides = [1, 1, 1, 1]} : vector<4x9x17x128xf32> to vector<1x8x16x128xf32>
    %31 = vector.shape_cast %30 : vector<1x8x16x128xf32> to vector<8x16x128xf32>
    %32 = vector.shape_cast %31 : vector<8x16x128xf32> to vector<128x128xf32>
    %33 = arith.truncf %32 : vector<128x128xf32> to vector<128x128xbf16>
    %c3 = arith.constant 3 : index
    %c0_13 = arith.constant 0 : index
    %c0_14 = arith.constant 0 : index
    %34 = vector.load %arg3[%c3, %c0_13, %c0_14] : memref<9x128x128xbf16, #tpu.memory_space<vmem>>, vector<1x128x128xbf16>
    %35 = vector.shape_cast %34 : vector<1x128x128xbf16> to vector<128x128xbf16>
    %cst_15 = arith.constant dense<0.000000e+00> : vector<128x128xf32>
    %36 = tpu.matmul %33, %35, %cst_15 {dimension_numbers = #tpu.dot_dimension_numbers<[1], [0], [0], [1], [0, 0, 1, 1], [], []>} : vector<128x128xbf16>, vector<128x128xbf16>, vector<128x128xf32> -> vector<128x128xf32>
    %37 = arith.addf %29, %36 : vector<128x128xf32>
    %38 = vector.extract_strided_slice %5 {offsets = [3, 0, 0, 0], sizes = [1, 8, 16, 128], strides = [1, 1, 1, 1]} : vector<4x9x17x128xf32> to vector<1x8x16x128xf32>
    %39 = vector.shape_cast %38 : vector<1x8x16x128xf32> to vector<8x16x128xf32>
    %40 = vector.shape_cast %39 : vector<8x16x128xf32> to vector<128x128xf32>
    %41 = arith.truncf %40 : vector<128x128xf32> to vector<128x128xbf16>
    %c4 = arith.constant 4 : index
    %c0_16 = arith.constant 0 : index
    %c0_17 = arith.constant 0 : index
    %42 = vector.load %arg3[%c4, %c0_16, %c0_17] : memref<9x128x128xbf16, #tpu.memory_space<vmem>>, vector<1x128x128xbf16>
    %43 = vector.shape_cast %42 : vector<1x128x128xbf16> to vector<128x128xbf16>
    %cst_18 = arith.constant dense<0.000000e+00> : vector<128x128xf32>
    %44 = tpu.matmul %41, %43, %cst_18 {dimension_numbers = #tpu.dot_dimension_numbers<[1], [0], [0], [1], [0, 0, 1, 1], [], []>} : vector<128x128xbf16>, vector<128x128xbf16>, vector<128x128xf32> -> vector<128x128xf32>
    %45 = arith.addf %37, %44 : vector<128x128xf32>
    %46 = vector.extract_strided_slice %5 {offsets = [2, 0, 1, 0], sizes = [1, 8, 16, 128], strides = [1, 1, 1, 1]} : vector<4x9x17x128xf32> to vector<1x8x16x128xf32>
    %47 = vector.shape_cast %46 : vector<1x8x16x128xf32> to vector<8x16x128xf32>
    %48 = vector.shape_cast %47 : vector<8x16x128xf32> to vector<128x128xf32>
    %49 = arith.truncf %48 : vector<128x128xf32> to vector<128x128xbf16>
    %c5 = arith.constant 5 : index
    %c0_19 = arith.constant 0 : index
    %c0_20 = arith.constant 0 : index
    %50 = vector.load %arg3[%c5, %c0_19, %c0_20] : memref<9x128x128xbf16, #tpu.memory_space<vmem>>, vector<1x128x128xbf16>
    %51 = vector.shape_cast %50 : vector<1x128x128xbf16> to vector<128x128xbf16>
    %cst_21 = arith.constant dense<0.000000e+00> : vector<128x128xf32>
    %52 = tpu.matmul %49, %51, %cst_21 {dimension_numbers = #tpu.dot_dimension_numbers<[1], [0], [0], [1], [0, 0, 1, 1], [], []>} : vector<128x128xbf16>, vector<128x128xbf16>, vector<128x128xf32> -> vector<128x128xf32>
    %53 = arith.addf %45, %52 : vector<128x128xf32>
    %54 = vector.extract_strided_slice %5 {offsets = [0, 1, 0, 0], sizes = [1, 8, 16, 128], strides = [1, 1, 1, 1]} : vector<4x9x17x128xf32> to vector<1x8x16x128xf32>
    %55 = vector.shape_cast %54 : vector<1x8x16x128xf32> to vector<8x16x128xf32>
    %56 = vector.shape_cast %55 : vector<8x16x128xf32> to vector<128x128xf32>
    %57 = arith.truncf %56 : vector<128x128xf32> to vector<128x128xbf16>
    %c6 = arith.constant 6 : index
    %c0_22 = arith.constant 0 : index
    %c0_23 = arith.constant 0 : index
    %58 = vector.load %arg3[%c6, %c0_22, %c0_23] : memref<9x128x128xbf16, #tpu.memory_space<vmem>>, vector<1x128x128xbf16>
    %59 = vector.shape_cast %58 : vector<1x128x128xbf16> to vector<128x128xbf16>
    %cst_24 = arith.constant dense<0.000000e+00> : vector<128x128xf32>
    %60 = tpu.matmul %57, %59, %cst_24 {dimension_numbers = #tpu.dot_dimension_numbers<[1], [0], [0], [1], [0, 0, 1, 1], [], []>} : vector<128x128xbf16>, vector<128x128xbf16>, vector<128x128xf32> -> vector<128x128xf32>
    %61 = arith.addf %53, %60 : vector<128x128xf32>
    %62 = vector.extract_strided_slice %5 {offsets = [1, 1, 0, 0], sizes = [1, 8, 16, 128], strides = [1, 1, 1, 1]} : vector<4x9x17x128xf32> to vector<1x8x16x128xf32>
    %63 = vector.shape_cast %62 : vector<1x8x16x128xf32> to vector<8x16x128xf32>
    %64 = vector.shape_cast %63 : vector<8x16x128xf32> to vector<128x128xf32>
    %65 = arith.truncf %64 : vector<128x128xf32> to vector<128x128xbf16>
    %c7 = arith.constant 7 : index
    %c0_25 = arith.constant 0 : index
    %c0_26 = arith.constant 0 : index
    %66 = vector.load %arg3[%c7, %c0_25, %c0_26] : memref<9x128x128xbf16, #tpu.memory_space<vmem>>, vector<1x128x128xbf16>
    %67 = vector.shape_cast %66 : vector<1x128x128xbf16> to vector<128x128xbf16>
    %cst_27 = arith.constant dense<0.000000e+00> : vector<128x128xf32>
    %68 = tpu.matmul %65, %67, %cst_27 {dimension_numbers = #tpu.dot_dimension_numbers<[1], [0], [0], [1], [0, 0, 1, 1], [], []>} : vector<128x128xbf16>, vector<128x128xbf16>, vector<128x128xf32> -> vector<128x128xf32>
    %69 = arith.addf %61, %68 : vector<128x128xf32>
    %70 = vector.extract_strided_slice %5 {offsets = [0, 1, 1, 0], sizes = [1, 8, 16, 128], strides = [1, 1, 1, 1]} : vector<4x9x17x128xf32> to vector<1x8x16x128xf32>
    %71 = vector.shape_cast %70 : vector<1x8x16x128xf32> to vector<8x16x128xf32>
    %72 = vector.shape_cast %71 : vector<8x16x128xf32> to vector<128x128xf32>
    %73 = arith.truncf %72 : vector<128x128xf32> to vector<128x128xbf16>
    %c8 = arith.constant 8 : index
    %c0_28 = arith.constant 0 : index
    %c0_29 = arith.constant 0 : index
    %74 = vector.load %arg3[%c8, %c0_28, %c0_29] : memref<9x128x128xbf16, #tpu.memory_space<vmem>>, vector<1x128x128xbf16>
    %75 = vector.shape_cast %74 : vector<1x128x128xbf16> to vector<128x128xbf16>
    %cst_30 = arith.constant dense<0.000000e+00> : vector<128x128xf32>
    %76 = tpu.matmul %73, %75, %cst_30 {dimension_numbers = #tpu.dot_dimension_numbers<[1], [0], [0], [1], [0, 0, 1, 1], [], []>} : vector<128x128xbf16>, vector<128x128xbf16>, vector<128x128xf32> -> vector<128x128xf32>
    %77 = arith.addf %69, %76 : vector<128x128xf32>
    %78 = arith.truncf %77 : vector<128x128xf32> to vector<128x128xbf16>
    %c0_31 = arith.constant 0 : index
    %c0_32 = arith.constant 0 : index
    %79 = vector.load %arg4[%c0_31, %c0_32] : memref<128x128xbf16, #tpu.memory_space<vmem>>, vector<128x128xbf16>
    tpu.vector_store %arg4[%c0_31, %c0_32], %78 {strides = array<i32>} : memref<128x128xbf16, #tpu.memory_space<vmem>>, vector<128x128xbf16>,
    %cst_33 = arith.constant dense<0.000000e+00> : vector<128xf32>
    %80 = vector.multi_reduction <add>, %77, %cst_33 [0] : vector<128x128xf32> to vector<128xf32>
    %81 = vector.shape_cast %80 : vector<128xf32> to vector<1x128xf32>
    %c0_34 = arith.constant 0 : index
    %c0_35 = arith.constant 0 : index
    %c0_36 = arith.constant 0 : index
    %82 = vector.load %arg5[%c0_34, %c0_35, %c0_36] : memref<1x1x128xf32, #tpu.memory_space<vmem>>, vector<1x1x128xf32>
    %83 = vector.shape_cast %82 : vector<1x1x128xf32> to vector<1x128xf32>
    %84 = vector.shape_cast %81 : vector<1x128xf32> to vector<1x1x128xf32>
    tpu.vector_store %arg5[%c0_34, %c0_35, %c0_36], %84 {strides = array<i32>} : memref<1x1x128xf32, #tpu.memory_space<vmem>>, vector<1x1x128xf32>,
    %85 = arith.mulf %77, %77 : vector<128x128xf32>
    %cst_37 = arith.constant dense<0.000000e+00> : vector<128xf32>
    %86 = vector.multi_reduction <add>, %85, %cst_37 [0] : vector<128x128xf32> to vector<128xf32>
    %87 = vector.shape_cast %86 : vector<128xf32> to vector<1x128xf32>
    %c0_38 = arith.constant 0 : index
    %c0_39 = arith.constant 0 : index
    %c0_40 = arith.constant 0 : index
    %88 = vector.load %arg6[%c0_38, %c0_39, %c0_40] : memref<1x1x128xf32, #tpu.memory_space<vmem>>, vector<1x1x128xf32>
    %89 = vector.shape_cast %88 : vector<1x1x128xf32> to vector<1x128xf32>
    %90 = vector.shape_cast %87 : vector<1x128xf32> to vector<1x1x128xf32>
    tpu.vector_store %arg6[%c0_38, %c0_39, %c0_40], %90 {strides = array<i32>} : memref<1x1x128xf32, #tpu.memory_space<vmem>>, vector<1x1x128xf32>,
    return
  }
  func.func @transform_0(%arg0: i32, %arg1: i32) -> (i32, i32, i32, i32, i32) {
    %c0_i32 = arith.constant 0 : i32
    %c0_i32_0 = arith.constant 0 : i32
    %c0_i32_1 = arith.constant 0 : i32
    %c0_i32_2 = arith.constant 0 : i32
    %c0_i32_3 = arith.constant 0 : i32
    return %arg0, %c0_i32, %c0_i32_0, %c0_i32_1, %c0_i32_2 : i32, i32, i32, i32, i32
  }
  func.func @transform_1(%arg0: i32, %arg1: i32) -> (i32, i32, i32) {
    %c0_i32 = arith.constant 0 : i32
    %c0_i32_0 = arith.constant 0 : i32
    %c0_i32_1 = arith.constant 0 : i32
    %c0_i32_2 = arith.constant 0 : i32
    return %c0_i32, %c0_i32_0, %c0_i32_1 : i32, i32, i32
  }
  func.func @transform_2(%arg0: i32, %arg1: i32) -> (i32, i32) {
    %c2_i32 = arith.constant 2 : i32
    %0 = arith.muli %arg0, %c2_i32 : i32
    %1 = arith.addi %0, %arg1 : i32
    %c0_i32 = arith.constant 0 : i32
    %c0_i32_0 = arith.constant 0 : i32
    return %1, %c0_i32 : i32, i32
  }
  func.func @transform_3(%arg0: i32, %arg1: i32) -> (i32, i32, i32) {
    %c2_i32 = arith.constant 2 : i32
    %0 = arith.muli %arg0, %c2_i32 : i32
    %1 = arith.addi %0, %arg1 : i32
    %c0_i32 = arith.constant 0 : i32
    %c0_i32_0 = arith.constant 0 : i32
    %c0_i32_1 = arith.constant 0 : i32
    return %1, %c0_i32, %c0_i32_0 : i32, i32, i32
  }
  func.func @transform_4(%arg0: i32, %arg1: i32) -> (i32, i32, i32) {
    %c2_i32 = arith.constant 2 : i32
    %0 = arith.muli %arg0, %c2_i32 : i32
    %1 = arith.addi %0, %arg1 : i32
    %c0_i32 = arith.constant 0 : i32
    %c0_i32_0 = arith.constant 0 : i32
    %c0_i32_1 = arith.constant 0 : i32
    return %1, %c0_i32, %c0_i32_0 : i32, i32, i32
  }
}

module attributes {stable_mosaic.version = 11 : i64} {
  func.func @_mm_stats_kernel(%arg0: i32, %arg1: memref<128x128xbf16, #tpu.memory_space<vmem>>, %arg2: memref<128x128xbf16, #tpu.memory_space<vmem>>, %arg3: memref<1x128xf32, #tpu.memory_space<vmem>>, %arg4: memref<1x128xf32, #tpu.memory_space<vmem>>, %arg5: memref<128x128xbf16, #tpu.memory_space<vmem>>, %arg6: memref<1x1x128xf32, #tpu.memory_space<vmem>>, %arg7: memref<1x1x128xf32, #tpu.memory_space<vmem>>) attributes {dimension_semantics = [#tpu.dimension_semantics<parallel>], iteration_bounds = array<i64: 4>, scalar_prefetch = 0 : i64, scratch_operands = 0 : i64, tpu.core_type = #tpu.core_type<tc>, window_params = [{transform_indices = @transform_0, window_bounds = array<i64: 128, 128>}, {pipeline_mode = #tpu.pipeline_mode<synchronous>, transform_indices = @transform_1, window_bounds = array<i64: 128, 128>}, {pipeline_mode = #tpu.pipeline_mode<synchronous>, transform_indices = @transform_2, window_bounds = array<i64: 1, 128>}, {pipeline_mode = #tpu.pipeline_mode<synchronous>, transform_indices = @transform_3, window_bounds = array<i64: 1, 128>}, {transform_indices = @transform_4, window_bounds = array<i64: 128, 128>}, {transform_indices = @transform_5, window_bounds = array<i64: 1, 1, 128>}, {transform_indices = @transform_6, window_bounds = array<i64: 1, 1, 128>}]} {
    %c0 = arith.constant 0 : index
    %c0_0 = arith.constant 0 : index
    %0 = vector.load %arg1[%c0, %c0_0] : memref<128x128xbf16, #tpu.memory_space<vmem>>, vector<128x128xbf16>
    %1 = arith.extf %0 : vector<128x128xbf16> to vector<128x128xf32>
    %c0_1 = arith.constant 0 : index
    %c0_2 = arith.constant 0 : index
    %2 = vector.load %arg3[%c0_1, %c0_2] : memref<1x128xf32, #tpu.memory_space<vmem>>, vector<1x128xf32>
    %3 = vector.broadcast %2 : vector<1x128xf32> to vector<128x128xf32>
    %4 = arith.mulf %1, %3 : vector<128x128xf32>
    %c0_3 = arith.constant 0 : index
    %c0_4 = arith.constant 0 : index
    %5 = vector.load %arg4[%c0_3, %c0_4] : memref<1x128xf32, #tpu.memory_space<vmem>>, vector<1x128xf32>
    %6 = vector.broadcast %5 : vector<1x128xf32> to vector<128x128xf32>
    %7 = arith.addf %4, %6 : vector<128x128xf32>
    %cst = arith.constant 0.000000e+00 : f32
    %8 = vector.broadcast %cst : f32 to vector<128x128xf32>
    %9 = arith.maximumf %7, %8 : vector<128x128xf32>
    %10 = arith.truncf %9 : vector<128x128xf32> to vector<128x128xbf16>
    %c0_5 = arith.constant 0 : index
    %c0_6 = arith.constant 0 : index
    %11 = vector.load %arg2[%c0_5, %c0_6] : memref<128x128xbf16, #tpu.memory_space<vmem>>, vector<128x128xbf16>
    %cst_7 = arith.constant dense<0.000000e+00> : vector<128x128xf32>
    %12 = tpu.matmul %10, %11, %cst_7 {dimension_numbers = #tpu.dot_dimension_numbers<[1], [0], [0], [1], [0, 0, 1, 1], [], []>} : vector<128x128xbf16>, vector<128x128xbf16>, vector<128x128xf32> -> vector<128x128xf32>
    %13 = arith.truncf %12 : vector<128x128xf32> to vector<128x128xbf16>
    %c0_8 = arith.constant 0 : index
    %c0_9 = arith.constant 0 : index
    %14 = vector.load %arg5[%c0_8, %c0_9] : memref<128x128xbf16, #tpu.memory_space<vmem>>, vector<128x128xbf16>
    tpu.vector_store %arg5[%c0_8, %c0_9], %13 {strides = array<i32>} : memref<128x128xbf16, #tpu.memory_space<vmem>>, vector<128x128xbf16>,
    %cst_10 = arith.constant dense<0.000000e+00> : vector<128xf32>
    %15 = vector.multi_reduction <add>, %12, %cst_10 [0] : vector<128x128xf32> to vector<128xf32>
    %16 = vector.shape_cast %15 : vector<128xf32> to vector<1x128xf32>
    %c0_11 = arith.constant 0 : index
    %c0_12 = arith.constant 0 : index
    %c0_13 = arith.constant 0 : index
    %17 = vector.load %arg6[%c0_11, %c0_12, %c0_13] : memref<1x1x128xf32, #tpu.memory_space<vmem>>, vector<1x1x128xf32>
    %18 = vector.shape_cast %17 : vector<1x1x128xf32> to vector<1x128xf32>
    %19 = vector.shape_cast %16 : vector<1x128xf32> to vector<1x1x128xf32>
    tpu.vector_store %arg6[%c0_11, %c0_12, %c0_13], %19 {strides = array<i32>} : memref<1x1x128xf32, #tpu.memory_space<vmem>>, vector<1x1x128xf32>,
    %20 = arith.mulf %12, %12 : vector<128x128xf32>
    %cst_14 = arith.constant dense<0.000000e+00> : vector<128xf32>
    %21 = vector.multi_reduction <add>, %20, %cst_14 [0] : vector<128x128xf32> to vector<128xf32>
    %22 = vector.shape_cast %21 : vector<128xf32> to vector<1x128xf32>
    %c0_15 = arith.constant 0 : index
    %c0_16 = arith.constant 0 : index
    %c0_17 = arith.constant 0 : index
    %23 = vector.load %arg7[%c0_15, %c0_16, %c0_17] : memref<1x1x128xf32, #tpu.memory_space<vmem>>, vector<1x1x128xf32>
    %24 = vector.shape_cast %23 : vector<1x1x128xf32> to vector<1x128xf32>
    %25 = vector.shape_cast %22 : vector<1x128xf32> to vector<1x1x128xf32>
    tpu.vector_store %arg7[%c0_15, %c0_16, %c0_17], %25 {strides = array<i32>} : memref<1x1x128xf32, #tpu.memory_space<vmem>>, vector<1x1x128xf32>,
    return
  }
  func.func @transform_0(%arg0: i32) -> (i32, i32) {
    %c0_i32 = arith.constant 0 : i32
    %c0_i32_0 = arith.constant 0 : i32
    return %arg0, %c0_i32 : i32, i32
  }
  func.func @transform_1(%arg0: i32) -> (i32, i32) {
    %c0_i32 = arith.constant 0 : i32
    %c0_i32_0 = arith.constant 0 : i32
    %c0_i32_1 = arith.constant 0 : i32
    return %c0_i32, %c0_i32_0 : i32, i32
  }
  func.func @transform_2(%arg0: i32) -> (i32, i32) {
    %c0_i32 = arith.constant 0 : i32
    %c0_i32_0 = arith.constant 0 : i32
    %c0_i32_1 = arith.constant 0 : i32
    return %c0_i32, %c0_i32_0 : i32, i32
  }
  func.func @transform_3(%arg0: i32) -> (i32, i32) {
    %c0_i32 = arith.constant 0 : i32
    %c0_i32_0 = arith.constant 0 : i32
    %c0_i32_1 = arith.constant 0 : i32
    return %c0_i32, %c0_i32_0 : i32, i32
  }
  func.func @transform_4(%arg0: i32) -> (i32, i32) {
    %c0_i32 = arith.constant 0 : i32
    %c0_i32_0 = arith.constant 0 : i32
    return %arg0, %c0_i32 : i32, i32
  }
  func.func @transform_5(%arg0: i32) -> (i32, i32, i32) {
    %c0_i32 = arith.constant 0 : i32
    %c0_i32_0 = arith.constant 0 : i32
    %c0_i32_1 = arith.constant 0 : i32
    return %arg0, %c0_i32, %c0_i32_0 : i32, i32, i32
  }
  func.func @transform_6(%arg0: i32) -> (i32, i32, i32) {
    %c0_i32 = arith.constant 0 : i32
    %c0_i32_0 = arith.constant 0 : i32
    %c0_i32_1 = arith.constant 0 : i32
    return %arg0, %c0_i32, %c0_i32_0 : i32, i32, i32
  }
}

module attributes {stable_mosaic.version = 11 : i64} {
  func.func @_apply_kernel(%arg0: i32, %arg1: memref<128x128xbf16, #tpu.memory_space<vmem>>, %arg2: memref<1x128xf32, #tpu.memory_space<vmem>>, %arg3: memref<1x128xf32, #tpu.memory_space<vmem>>, %arg4: memref<128x128xbf16, #tpu.memory_space<vmem>>, %arg5: memref<1x128xf32, #tpu.memory_space<vmem>>, %arg6: memref<1x128xf32, #tpu.memory_space<vmem>>, %arg7: memref<128x128xbf16, #tpu.memory_space<vmem>>) attributes {dimension_semantics = [#tpu.dimension_semantics<parallel>], iteration_bounds = array<i64: 4>, scalar_prefetch = 0 : i64, scratch_operands = 0 : i64, tpu.core_type = #tpu.core_type<tc>, window_params = [{transform_indices = @transform_0, window_bounds = array<i64: 128, 128>}, {pipeline_mode = #tpu.pipeline_mode<synchronous>, transform_indices = @transform_1, window_bounds = array<i64: 1, 128>}, {pipeline_mode = #tpu.pipeline_mode<synchronous>, transform_indices = @transform_2, window_bounds = array<i64: 1, 128>}, {transform_indices = @transform_3, window_bounds = array<i64: 128, 128>}, {pipeline_mode = #tpu.pipeline_mode<synchronous>, transform_indices = @transform_4, window_bounds = array<i64: 1, 128>}, {pipeline_mode = #tpu.pipeline_mode<synchronous>, transform_indices = @transform_5, window_bounds = array<i64: 1, 128>}, {transform_indices = @transform_6, window_bounds = array<i64: 128, 128>}]} {
    %c0 = arith.constant 0 : index
    %c0_0 = arith.constant 0 : index
    %0 = vector.load %arg1[%c0, %c0_0] : memref<128x128xbf16, #tpu.memory_space<vmem>>, vector<128x128xbf16>
    %1 = arith.extf %0 : vector<128x128xbf16> to vector<128x128xf32>
    %c0_1 = arith.constant 0 : index
    %c0_2 = arith.constant 0 : index
    %2 = vector.load %arg2[%c0_1, %c0_2] : memref<1x128xf32, #tpu.memory_space<vmem>>, vector<1x128xf32>
    %3 = vector.broadcast %2 : vector<1x128xf32> to vector<128x128xf32>
    %4 = arith.mulf %1, %3 : vector<128x128xf32>
    %c0_3 = arith.constant 0 : index
    %c0_4 = arith.constant 0 : index
    %5 = vector.load %arg3[%c0_3, %c0_4] : memref<1x128xf32, #tpu.memory_space<vmem>>, vector<1x128xf32>
    %6 = vector.broadcast %5 : vector<1x128xf32> to vector<128x128xf32>
    %7 = arith.addf %4, %6 : vector<128x128xf32>
    %c0_5 = arith.constant 0 : index
    %c0_6 = arith.constant 0 : index
    %8 = vector.load %arg4[%c0_5, %c0_6] : memref<128x128xbf16, #tpu.memory_space<vmem>>, vector<128x128xbf16>
    %9 = arith.extf %8 : vector<128x128xbf16> to vector<128x128xf32>
    %c0_7 = arith.constant 0 : index
    %c0_8 = arith.constant 0 : index
    %10 = vector.load %arg5[%c0_7, %c0_8] : memref<1x128xf32, #tpu.memory_space<vmem>>, vector<1x128xf32>
    %11 = vector.broadcast %10 : vector<1x128xf32> to vector<128x128xf32>
    %12 = arith.mulf %9, %11 : vector<128x128xf32>
    %c0_9 = arith.constant 0 : index
    %c0_10 = arith.constant 0 : index
    %13 = vector.load %arg6[%c0_9, %c0_10] : memref<1x128xf32, #tpu.memory_space<vmem>>, vector<1x128xf32>
    %14 = vector.broadcast %13 : vector<1x128xf32> to vector<128x128xf32>
    %15 = arith.addf %12, %14 : vector<128x128xf32>
    %16 = arith.addf %7, %15 : vector<128x128xf32>
    %cst = arith.constant 0.000000e+00 : f32
    %17 = vector.broadcast %cst : f32 to vector<128x128xf32>
    %18 = arith.maximumf %16, %17 : vector<128x128xf32>
    %19 = arith.truncf %18 : vector<128x128xf32> to vector<128x128xbf16>
    %c0_11 = arith.constant 0 : index
    %c0_12 = arith.constant 0 : index
    %20 = vector.load %arg7[%c0_11, %c0_12] : memref<128x128xbf16, #tpu.memory_space<vmem>>, vector<128x128xbf16>
    tpu.vector_store %arg7[%c0_11, %c0_12], %19 {strides = array<i32>} : memref<128x128xbf16, #tpu.memory_space<vmem>>, vector<128x128xbf16>,
    return
  }
  func.func @transform_0(%arg0: i32) -> (i32, i32) {
    %c0_i32 = arith.constant 0 : i32
    %c0_i32_0 = arith.constant 0 : i32
    return %arg0, %c0_i32 : i32, i32
  }
  func.func @transform_1(%arg0: i32) -> (i32, i32) {
    %c0_i32 = arith.constant 0 : i32
    %c0_i32_0 = arith.constant 0 : i32
    %c0_i32_1 = arith.constant 0 : i32
    return %c0_i32, %c0_i32_0 : i32, i32
  }
  func.func @transform_2(%arg0: i32) -> (i32, i32) {
    %c0_i32 = arith.constant 0 : i32
    %c0_i32_0 = arith.constant 0 : i32
    %c0_i32_1 = arith.constant 0 : i32
    return %c0_i32, %c0_i32_0 : i32, i32
  }
  func.func @transform_3(%arg0: i32) -> (i32, i32) {
    %c0_i32 = arith.constant 0 : i32
    %c0_i32_0 = arith.constant 0 : i32
    return %arg0, %c0_i32 : i32, i32
  }
  func.func @transform_4(%arg0: i32) -> (i32, i32) {
    %c0_i32 = arith.constant 0 : i32
    %c0_i32_0 = arith.constant 0 : i32
    %c0_i32_1 = arith.constant 0 : i32
    return %c0_i32, %c0_i32_0 : i32, i32
  }
  func.func @transform_5(%arg0: i32) -> (i32, i32) {
    %c0_i32 = arith.constant 0 : i32
    %c0_i32_0 = arith.constant 0 : i32
    %c0_i32_1 = arith.constant 0 : i32
    return %c0_i32, %c0_i32_0 : i32, i32
  }
  func.func @transform_6(%arg0: i32) -> (i32, i32) {
    %c0_i32 = arith.constant 0 : i32
    %c0_i32_0 = arith.constant 0 : i32
    return %arg0, %c0_i32 : i32, i32
  }
}

module attributes {stable_mosaic.version = 11 : i64} {
  func.func @_mm_stats_kernel(%arg0: i32, %arg1: memref<128x128xbf16, #tpu.memory_space<vmem>>, %arg2: memref<128x128xbf16, #tpu.memory_space<vmem>>, %arg3: memref<1x128xf32, #tpu.memory_space<vmem>>, %arg4: memref<1x128xf32, #tpu.memory_space<vmem>>, %arg5: memref<128x128xbf16, #tpu.memory_space<vmem>>, %arg6: memref<1x1x128xf32, #tpu.memory_space<vmem>>, %arg7: memref<1x1x128xf32, #tpu.memory_space<vmem>>) attributes {dimension_semantics = [#tpu.dimension_semantics<parallel>], iteration_bounds = array<i64: 1>, scalar_prefetch = 0 : i64, scratch_operands = 0 : i64, tpu.core_type = #tpu.core_type<tc>, window_params = [{transform_indices = @transform_0, window_bounds = array<i64: 128, 128>}, {pipeline_mode = #tpu.pipeline_mode<synchronous>, transform_indices = @transform_1, window_bounds = array<i64: 128, 128>}, {pipeline_mode = #tpu.pipeline_mode<synchronous>, transform_indices = @transform_2, window_bounds = array<i64: 1, 128>}, {pipeline_mode = #tpu.pipeline_mode<synchronous>, transform_indices = @transform_3, window_bounds = array<i64: 1, 128>}, {transform_indices = @transform_4, window_bounds = array<i64: 128, 128>}, {transform_indices = @transform_5, window_bounds = array<i64: 1, 1, 128>}, {transform_indices = @transform_6, window_bounds = array<i64: 1, 1, 128>}]} {
    %c0 = arith.constant 0 : index
    %c0_0 = arith.constant 0 : index
    %0 = vector.load %arg1[%c0, %c0_0] : memref<128x128xbf16, #tpu.memory_space<vmem>>, vector<128x128xbf16>
    %c0_1 = arith.constant 0 : index
    %c0_2 = arith.constant 0 : index
    %1 = vector.load %arg2[%c0_1, %c0_2] : memref<128x128xbf16, #tpu.memory_space<vmem>>, vector<128x128xbf16>
    %cst = arith.constant dense<0.000000e+00> : vector<128x128xf32>
    %2 = tpu.matmul %0, %1, %cst {dimension_numbers = #tpu.dot_dimension_numbers<[1], [0], [0], [1], [0, 0, 1, 1], [], []>} : vector<128x128xbf16>, vector<128x128xbf16>, vector<128x128xf32> -> vector<128x128xf32>
    %3 = arith.truncf %2 : vector<128x128xf32> to vector<128x128xbf16>
    %c0_3 = arith.constant 0 : index
    %c0_4 = arith.constant 0 : index
    %4 = vector.load %arg5[%c0_3, %c0_4] : memref<128x128xbf16, #tpu.memory_space<vmem>>, vector<128x128xbf16>
    tpu.vector_store %arg5[%c0_3, %c0_4], %3 {strides = array<i32>} : memref<128x128xbf16, #tpu.memory_space<vmem>>, vector<128x128xbf16>,
    %cst_5 = arith.constant dense<0.000000e+00> : vector<128xf32>
    %5 = vector.multi_reduction <add>, %2, %cst_5 [0] : vector<128x128xf32> to vector<128xf32>
    %6 = vector.shape_cast %5 : vector<128xf32> to vector<1x128xf32>
    %c0_6 = arith.constant 0 : index
    %c0_7 = arith.constant 0 : index
    %c0_8 = arith.constant 0 : index
    %7 = vector.load %arg6[%c0_6, %c0_7, %c0_8] : memref<1x1x128xf32, #tpu.memory_space<vmem>>, vector<1x1x128xf32>
    %8 = vector.shape_cast %7 : vector<1x1x128xf32> to vector<1x128xf32>
    %9 = vector.shape_cast %6 : vector<1x128xf32> to vector<1x1x128xf32>
    tpu.vector_store %arg6[%c0_6, %c0_7, %c0_8], %9 {strides = array<i32>} : memref<1x1x128xf32, #tpu.memory_space<vmem>>, vector<1x1x128xf32>,
    %10 = arith.mulf %2, %2 : vector<128x128xf32>
    %cst_9 = arith.constant dense<0.000000e+00> : vector<128xf32>
    %11 = vector.multi_reduction <add>, %10, %cst_9 [0] : vector<128x128xf32> to vector<128xf32>
    %12 = vector.shape_cast %11 : vector<128xf32> to vector<1x128xf32>
    %c0_10 = arith.constant 0 : index
    %c0_11 = arith.constant 0 : index
    %c0_12 = arith.constant 0 : index
    %13 = vector.load %arg7[%c0_10, %c0_11, %c0_12] : memref<1x1x128xf32, #tpu.memory_space<vmem>>, vector<1x1x128xf32>
    %14 = vector.shape_cast %13 : vector<1x1x128xf32> to vector<1x128xf32>
    %15 = vector.shape_cast %12 : vector<1x128xf32> to vector<1x1x128xf32>
    tpu.vector_store %arg7[%c0_10, %c0_11, %c0_12], %15 {strides = array<i32>} : memref<1x1x128xf32, #tpu.memory_space<vmem>>, vector<1x1x128xf32>,
    return
  }
  func.func @transform_0(%arg0: i32) -> (i32, i32) {
    %c0_i32 = arith.constant 0 : i32
    %c0_i32_0 = arith.constant 0 : i32
    return %arg0, %c0_i32 : i32, i32
  }
  func.func @transform_1(%arg0: i32) -> (i32, i32) {
    %c0_i32 = arith.constant 0 : i32
    %c0_i32_0 = arith.constant 0 : i32
    %c0_i32_1 = arith.constant 0 : i32
    return %c0_i32, %c0_i32_0 : i32, i32
  }
  func.func @transform_2(%arg0: i32) -> (i32, i32) {
    %c0_i32 = arith.constant 0 : i32
    %c0_i32_0 = arith.constant 0 : i32
    %c0_i32_1 = arith.constant 0 : i32
    return %c0_i32, %c0_i32_0 : i32, i32
  }
  func.func @transform_3(%arg0: i32) -> (i32, i32) {
    %c0_i32 = arith.constant 0 : i32
    %c0_i32_0 = arith.constant 0 : i32
    %c0_i32_1 = arith.constant 0 : i32
    return %c0_i32, %c0_i32_0 : i32, i32
  }
  func.func @transform_4(%arg0: i32) -> (i32, i32) {
    %c0_i32 = arith.constant 0 : i32
    %c0_i32_0 = arith.constant 0 : i32
    return %arg0, %c0_i32 : i32, i32
  }
  func.func @transform_5(%arg0: i32) -> (i32, i32, i32) {
    %c0_i32 = arith.constant 0 : i32
    %c0_i32_0 = arith.constant 0 : i32
    %c0_i32_1 = arith.constant 0 : i32
    return %arg0, %c0_i32, %c0_i32_0 : i32, i32, i32
  }
  func.func @transform_6(%arg0: i32) -> (i32, i32, i32) {
    %c0_i32 = arith.constant 0 : i32
    %c0_i32_0 = arith.constant 0 : i32
    %c0_i32_1 = arith.constant 0 : i32
    return %arg0, %c0_i32, %c0_i32_0 : i32, i32, i32
  }
}

module attributes {stable_mosaic.version = 11 : i64} {
  func.func @_conv3x3_kernel(%arg0: i32, %arg1: i32, %arg2: memref<1x4x9x9x128xbf16, #tpu.memory_space<vmem>>, %arg3: memref<9x128x128xbf16, #tpu.memory_space<vmem>>, %arg4: memref<32x128xbf16, #tpu.memory_space<vmem>>, %arg5: memref<1x1x128xf32, #tpu.memory_space<vmem>>, %arg6: memref<1x1x128xf32, #tpu.memory_space<vmem>>) attributes {dimension_semantics = [#tpu.dimension_semantics<parallel>, #tpu.dimension_semantics<arbitrary>], iteration_bounds = array<i64: 2, 2>, scalar_prefetch = 0 : i64, scratch_operands = 0 : i64, tpu.core_type = #tpu.core_type<tc>, window_params = [{transform_indices = @transform_0, window_bounds = array<i64: 1, 4, 9, 9, 128>}, {pipeline_mode = #tpu.pipeline_mode<synchronous>, transform_indices = @transform_1, window_bounds = array<i64: 9, 128, 128>}, {transform_indices = @transform_2, window_bounds = array<i64: 32, 128>}, {transform_indices = @transform_3, window_bounds = array<i64: 1, 1, 128>}, {transform_indices = @transform_4, window_bounds = array<i64: 1, 1, 128>}]} {
    %c4_i32 = arith.constant 4 : i32
    %0 = arith.muli %arg1, %c4_i32 : i32
    %cst = arith.constant 0.000000e+00 : f32
    %1 = vector.broadcast %cst : f32 to vector<32x128xf32>
    %c0 = arith.constant 0 : index
    %c0_0 = arith.constant 0 : index
    %2 = arith.index_cast %0 : i32 to index
    %c0_1 = arith.constant 0 : index
    %c0_2 = arith.constant 0 : index
    %3 = vector.load %arg2[%c0, %c0_0, %2, %c0_1, %c0_2] : memref<1x4x9x9x128xbf16, #tpu.memory_space<vmem>>, vector<1x4x5x9x128xbf16>
    %4 = vector.shape_cast %3 : vector<1x4x5x9x128xbf16> to vector<4x5x9x128xbf16>
    %5 = arith.extf %4 : vector<4x5x9x128xbf16> to vector<4x5x9x128xf32>
    %6 = vector.extract_strided_slice %5 {offsets = [0, 0, 0, 0], sizes = [1, 4, 8, 128], strides = [1, 1, 1, 1]} : vector<4x5x9x128xf32> to vector<1x4x8x128xf32>
    %7 = vector.shape_cast %6 : vector<1x4x8x128xf32> to vector<4x8x128xf32>
    %8 = vector.shape_cast %7 : vector<4x8x128xf32> to vector<32x128xf32>
    %9 = arith.truncf %8 : vector<32x128xf32> to vector<32x128xbf16>
    %c0_3 = arith.constant 0 : index
    %c0_4 = arith.constant 0 : index
    %c0_5 = arith.constant 0 : index
    %10 = vector.load %arg3[%c0_3, %c0_4, %c0_5] : memref<9x128x128xbf16, #tpu.memory_space<vmem>>, vector<1x128x128xbf16>
    %11 = vector.shape_cast %10 : vector<1x128x128xbf16> to vector<128x128xbf16>
    %cst_6 = arith.constant dense<0.000000e+00> : vector<32x128xf32>
    %12 = tpu.matmul %9, %11, %cst_6 {dimension_numbers = #tpu.dot_dimension_numbers<[1], [0], [0], [1], [0, 0, 1, 1], [], []>} : vector<32x128xbf16>, vector<128x128xbf16>, vector<32x128xf32> -> vector<32x128xf32>
    %13 = arith.addf %1, %12 : vector<32x128xf32>
    %14 = vector.extract_strided_slice %5 {offsets = [1, 0, 0, 0], sizes = [1, 4, 8, 128], strides = [1, 1, 1, 1]} : vector<4x5x9x128xf32> to vector<1x4x8x128xf32>
    %15 = vector.shape_cast %14 : vector<1x4x8x128xf32> to vector<4x8x128xf32>
    %16 = vector.shape_cast %15 : vector<4x8x128xf32> to vector<32x128xf32>
    %17 = arith.truncf %16 : vector<32x128xf32> to vector<32x128xbf16>
    %c1 = arith.constant 1 : index
    %c0_7 = arith.constant 0 : index
    %c0_8 = arith.constant 0 : index
    %18 = vector.load %arg3[%c1, %c0_7, %c0_8] : memref<9x128x128xbf16, #tpu.memory_space<vmem>>, vector<1x128x128xbf16>
    %19 = vector.shape_cast %18 : vector<1x128x128xbf16> to vector<128x128xbf16>
    %cst_9 = arith.constant dense<0.000000e+00> : vector<32x128xf32>
    %20 = tpu.matmul %17, %19, %cst_9 {dimension_numbers = #tpu.dot_dimension_numbers<[1], [0], [0], [1], [0, 0, 1, 1], [], []>} : vector<32x128xbf16>, vector<128x128xbf16>, vector<32x128xf32> -> vector<32x128xf32>
    %21 = arith.addf %13, %20 : vector<32x128xf32>
    %22 = vector.extract_strided_slice %5 {offsets = [0, 0, 1, 0], sizes = [1, 4, 8, 128], strides = [1, 1, 1, 1]} : vector<4x5x9x128xf32> to vector<1x4x8x128xf32>
    %23 = vector.shape_cast %22 : vector<1x4x8x128xf32> to vector<4x8x128xf32>
    %24 = vector.shape_cast %23 : vector<4x8x128xf32> to vector<32x128xf32>
    %25 = arith.truncf %24 : vector<32x128xf32> to vector<32x128xbf16>
    %c2 = arith.constant 2 : index
    %c0_10 = arith.constant 0 : index
    %c0_11 = arith.constant 0 : index
    %26 = vector.load %arg3[%c2, %c0_10, %c0_11] : memref<9x128x128xbf16, #tpu.memory_space<vmem>>, vector<1x128x128xbf16>
    %27 = vector.shape_cast %26 : vector<1x128x128xbf16> to vector<128x128xbf16>
    %cst_12 = arith.constant dense<0.000000e+00> : vector<32x128xf32>
    %28 = tpu.matmul %25, %27, %cst_12 {dimension_numbers = #tpu.dot_dimension_numbers<[1], [0], [0], [1], [0, 0, 1, 1], [], []>} : vector<32x128xbf16>, vector<128x128xbf16>, vector<32x128xf32> -> vector<32x128xf32>
    %29 = arith.addf %21, %28 : vector<32x128xf32>
    %30 = vector.extract_strided_slice %5 {offsets = [2, 0, 0, 0], sizes = [1, 4, 8, 128], strides = [1, 1, 1, 1]} : vector<4x5x9x128xf32> to vector<1x4x8x128xf32>
    %31 = vector.shape_cast %30 : vector<1x4x8x128xf32> to vector<4x8x128xf32>
    %32 = vector.shape_cast %31 : vector<4x8x128xf32> to vector<32x128xf32>
    %33 = arith.truncf %32 : vector<32x128xf32> to vector<32x128xbf16>
    %c3 = arith.constant 3 : index
    %c0_13 = arith.constant 0 : index
    %c0_14 = arith.constant 0 : index
    %34 = vector.load %arg3[%c3, %c0_13, %c0_14] : memref<9x128x128xbf16, #tpu.memory_space<vmem>>, vector<1x128x128xbf16>
    %35 = vector.shape_cast %34 : vector<1x128x128xbf16> to vector<128x128xbf16>
    %cst_15 = arith.constant dense<0.000000e+00> : vector<32x128xf32>
    %36 = tpu.matmul %33, %35, %cst_15 {dimension_numbers = #tpu.dot_dimension_numbers<[1], [0], [0], [1], [0, 0, 1, 1], [], []>} : vector<32x128xbf16>, vector<128x128xbf16>, vector<32x128xf32> -> vector<32x128xf32>
    %37 = arith.addf %29, %36 : vector<32x128xf32>
    %38 = vector.extract_strided_slice %5 {offsets = [3, 0, 0, 0], sizes = [1, 4, 8, 128], strides = [1, 1, 1, 1]} : vector<4x5x9x128xf32> to vector<1x4x8x128xf32>
    %39 = vector.shape_cast %38 : vector<1x4x8x128xf32> to vector<4x8x128xf32>
    %40 = vector.shape_cast %39 : vector<4x8x128xf32> to vector<32x128xf32>
    %41 = arith.truncf %40 : vector<32x128xf32> to vector<32x128xbf16>
    %c4 = arith.constant 4 : index
    %c0_16 = arith.constant 0 : index
    %c0_17 = arith.constant 0 : index
    %42 = vector.load %arg3[%c4, %c0_16, %c0_17] : memref<9x128x128xbf16, #tpu.memory_space<vmem>>, vector<1x128x128xbf16>
    %43 = vector.shape_cast %42 : vector<1x128x128xbf16> to vector<128x128xbf16>
    %cst_18 = arith.constant dense<0.000000e+00> : vector<32x128xf32>
    %44 = tpu.matmul %41, %43, %cst_18 {dimension_numbers = #tpu.dot_dimension_numbers<[1], [0], [0], [1], [0, 0, 1, 1], [], []>} : vector<32x128xbf16>, vector<128x128xbf16>, vector<32x128xf32> -> vector<32x128xf32>
    %45 = arith.addf %37, %44 : vector<32x128xf32>
    %46 = vector.extract_strided_slice %5 {offsets = [2, 0, 1, 0], sizes = [1, 4, 8, 128], strides = [1, 1, 1, 1]} : vector<4x5x9x128xf32> to vector<1x4x8x128xf32>
    %47 = vector.shape_cast %46 : vector<1x4x8x128xf32> to vector<4x8x128xf32>
    %48 = vector.shape_cast %47 : vector<4x8x128xf32> to vector<32x128xf32>
    %49 = arith.truncf %48 : vector<32x128xf32> to vector<32x128xbf16>
    %c5 = arith.constant 5 : index
    %c0_19 = arith.constant 0 : index
    %c0_20 = arith.constant 0 : index
    %50 = vector.load %arg3[%c5, %c0_19, %c0_20] : memref<9x128x128xbf16, #tpu.memory_space<vmem>>, vector<1x128x128xbf16>
    %51 = vector.shape_cast %50 : vector<1x128x128xbf16> to vector<128x128xbf16>
    %cst_21 = arith.constant dense<0.000000e+00> : vector<32x128xf32>
    %52 = tpu.matmul %49, %51, %cst_21 {dimension_numbers = #tpu.dot_dimension_numbers<[1], [0], [0], [1], [0, 0, 1, 1], [], []>} : vector<32x128xbf16>, vector<128x128xbf16>, vector<32x128xf32> -> vector<32x128xf32>
    %53 = arith.addf %45, %52 : vector<32x128xf32>
    %54 = vector.extract_strided_slice %5 {offsets = [0, 1, 0, 0], sizes = [1, 4, 8, 128], strides = [1, 1, 1, 1]} : vector<4x5x9x128xf32> to vector<1x4x8x128xf32>
    %55 = vector.shape_cast %54 : vector<1x4x8x128xf32> to vector<4x8x128xf32>
    %56 = vector.shape_cast %55 : vector<4x8x128xf32> to vector<32x128xf32>
    %57 = arith.truncf %56 : vector<32x128xf32> to vector<32x128xbf16>
    %c6 = arith.constant 6 : index
    %c0_22 = arith.constant 0 : index
    %c0_23 = arith.constant 0 : index
    %58 = vector.load %arg3[%c6, %c0_22, %c0_23] : memref<9x128x128xbf16, #tpu.memory_space<vmem>>, vector<1x128x128xbf16>
    %59 = vector.shape_cast %58 : vector<1x128x128xbf16> to vector<128x128xbf16>
    %cst_24 = arith.constant dense<0.000000e+00> : vector<32x128xf32>
    %60 = tpu.matmul %57, %59, %cst_24 {dimension_numbers = #tpu.dot_dimension_numbers<[1], [0], [0], [1], [0, 0, 1, 1], [], []>} : vector<32x128xbf16>, vector<128x128xbf16>, vector<32x128xf32> -> vector<32x128xf32>
    %61 = arith.addf %53, %60 : vector<32x128xf32>
    %62 = vector.extract_strided_slice %5 {offsets = [1, 1, 0, 0], sizes = [1, 4, 8, 128], strides = [1, 1, 1, 1]} : vector<4x5x9x128xf32> to vector<1x4x8x128xf32>
    %63 = vector.shape_cast %62 : vector<1x4x8x128xf32> to vector<4x8x128xf32>
    %64 = vector.shape_cast %63 : vector<4x8x128xf32> to vector<32x128xf32>
    %65 = arith.truncf %64 : vector<32x128xf32> to vector<32x128xbf16>
    %c7 = arith.constant 7 : index
    %c0_25 = arith.constant 0 : index
    %c0_26 = arith.constant 0 : index
    %66 = vector.load %arg3[%c7, %c0_25, %c0_26] : memref<9x128x128xbf16, #tpu.memory_space<vmem>>, vector<1x128x128xbf16>
    %67 = vector.shape_cast %66 : vector<1x128x128xbf16> to vector<128x128xbf16>
    %cst_27 = arith.constant dense<0.000000e+00> : vector<32x128xf32>
    %68 = tpu.matmul %65, %67, %cst_27 {dimension_numbers = #tpu.dot_dimension_numbers<[1], [0], [0], [1], [0, 0, 1, 1], [], []>} : vector<32x128xbf16>, vector<128x128xbf16>, vector<32x128xf32> -> vector<32x128xf32>
    %69 = arith.addf %61, %68 : vector<32x128xf32>
    %70 = vector.extract_strided_slice %5 {offsets = [0, 1, 1, 0], sizes = [1, 4, 8, 128], strides = [1, 1, 1, 1]} : vector<4x5x9x128xf32> to vector<1x4x8x128xf32>
    %71 = vector.shape_cast %70 : vector<1x4x8x128xf32> to vector<4x8x128xf32>
    %72 = vector.shape_cast %71 : vector<4x8x128xf32> to vector<32x128xf32>
    %73 = arith.truncf %72 : vector<32x128xf32> to vector<32x128xbf16>
    %c8 = arith.constant 8 : index
    %c0_28 = arith.constant 0 : index
    %c0_29 = arith.constant 0 : index
    %74 = vector.load %arg3[%c8, %c0_28, %c0_29] : memref<9x128x128xbf16, #tpu.memory_space<vmem>>, vector<1x128x128xbf16>
    %75 = vector.shape_cast %74 : vector<1x128x128xbf16> to vector<128x128xbf16>
    %cst_30 = arith.constant dense<0.000000e+00> : vector<32x128xf32>
    %76 = tpu.matmul %73, %75, %cst_30 {dimension_numbers = #tpu.dot_dimension_numbers<[1], [0], [0], [1], [0, 0, 1, 1], [], []>} : vector<32x128xbf16>, vector<128x128xbf16>, vector<32x128xf32> -> vector<32x128xf32>
    %77 = arith.addf %69, %76 : vector<32x128xf32>
    %78 = arith.truncf %77 : vector<32x128xf32> to vector<32x128xbf16>
    %c0_31 = arith.constant 0 : index
    %c0_32 = arith.constant 0 : index
    %79 = vector.load %arg4[%c0_31, %c0_32] : memref<32x128xbf16, #tpu.memory_space<vmem>>, vector<32x128xbf16>
    tpu.vector_store %arg4[%c0_31, %c0_32], %78 {strides = array<i32>} : memref<32x128xbf16, #tpu.memory_space<vmem>>, vector<32x128xbf16>,
    %cst_33 = arith.constant dense<0.000000e+00> : vector<128xf32>
    %80 = vector.multi_reduction <add>, %77, %cst_33 [0] : vector<32x128xf32> to vector<128xf32>
    %81 = vector.shape_cast %80 : vector<128xf32> to vector<1x128xf32>
    %c0_34 = arith.constant 0 : index
    %c0_35 = arith.constant 0 : index
    %c0_36 = arith.constant 0 : index
    %82 = vector.load %arg5[%c0_34, %c0_35, %c0_36] : memref<1x1x128xf32, #tpu.memory_space<vmem>>, vector<1x1x128xf32>
    %83 = vector.shape_cast %82 : vector<1x1x128xf32> to vector<1x128xf32>
    %84 = vector.shape_cast %81 : vector<1x128xf32> to vector<1x1x128xf32>
    tpu.vector_store %arg5[%c0_34, %c0_35, %c0_36], %84 {strides = array<i32>} : memref<1x1x128xf32, #tpu.memory_space<vmem>>, vector<1x1x128xf32>,
    %85 = arith.mulf %77, %77 : vector<32x128xf32>
    %cst_37 = arith.constant dense<0.000000e+00> : vector<128xf32>
    %86 = vector.multi_reduction <add>, %85, %cst_37 [0] : vector<32x128xf32> to vector<128xf32>
    %87 = vector.shape_cast %86 : vector<128xf32> to vector<1x128xf32>
    %c0_38 = arith.constant 0 : index
    %c0_39 = arith.constant 0 : index
    %c0_40 = arith.constant 0 : index
    %88 = vector.load %arg6[%c0_38, %c0_39, %c0_40] : memref<1x1x128xf32, #tpu.memory_space<vmem>>, vector<1x1x128xf32>
    %89 = vector.shape_cast %88 : vector<1x1x128xf32> to vector<1x128xf32>
    %90 = vector.shape_cast %87 : vector<1x128xf32> to vector<1x1x128xf32>
    tpu.vector_store %arg6[%c0_38, %c0_39, %c0_40], %90 {strides = array<i32>} : memref<1x1x128xf32, #tpu.memory_space<vmem>>, vector<1x1x128xf32>,
    return
  }
  func.func @transform_0(%arg0: i32, %arg1: i32) -> (i32, i32, i32, i32, i32) {
    %c0_i32 = arith.constant 0 : i32
    %c0_i32_0 = arith.constant 0 : i32
    %c0_i32_1 = arith.constant 0 : i32
    %c0_i32_2 = arith.constant 0 : i32
    %c0_i32_3 = arith.constant 0 : i32
    return %arg0, %c0_i32, %c0_i32_0, %c0_i32_1, %c0_i32_2 : i32, i32, i32, i32, i32
  }
  func.func @transform_1(%arg0: i32, %arg1: i32) -> (i32, i32, i32) {
    %c0_i32 = arith.constant 0 : i32
    %c0_i32_0 = arith.constant 0 : i32
    %c0_i32_1 = arith.constant 0 : i32
    %c0_i32_2 = arith.constant 0 : i32
    return %c0_i32, %c0_i32_0, %c0_i32_1 : i32, i32, i32
  }
  func.func @transform_2(%arg0: i32, %arg1: i32) -> (i32, i32) {
    %c2_i32 = arith.constant 2 : i32
    %0 = arith.muli %arg0, %c2_i32 : i32
    %1 = arith.addi %0, %arg1 : i32
    %c0_i32 = arith.constant 0 : i32
    %c0_i32_0 = arith.constant 0 : i32
    return %1, %c0_i32 : i32, i32
  }
  func.func @transform_3(%arg0: i32, %arg1: i32) -> (i32, i32, i32) {
    %c2_i32 = arith.constant 2 : i32
    %0 = arith.muli %arg0, %c2_i32 : i32
    %1 = arith.addi %0, %arg1 : i32
    %c0_i32 = arith.constant 0 : i32
    %c0_i32_0 = arith.constant 0 : i32
    %c0_i32_1 = arith.constant 0 : i32
    return %1, %c0_i32, %c0_i32_0 : i32, i32, i32
  }
  func.func @transform_4(%arg0: i32, %arg1: i32) -> (i32, i32, i32) {
    %c2_i32 = arith.constant 2 : i32
    %0 = arith.muli %arg0, %c2_i32 : i32
    %1 = arith.addi %0, %arg1 : i32
    %c0_i32 = arith.constant 0 : i32
    %c0_i32_0 = arith.constant 0 : i32
    %c0_i32_1 = arith.constant 0 : i32
    return %1, %c0_i32, %c0_i32_0 : i32, i32, i32
  }
}

module attributes {stable_mosaic.version = 11 : i64} {
  func.func @_mm_stats_kernel(%arg0: i32, %arg1: memref<128x128xbf16, #tpu.memory_space<vmem>>, %arg2: memref<128x128xbf16, #tpu.memory_space<vmem>>, %arg3: memref<1x128xf32, #tpu.memory_space<vmem>>, %arg4: memref<1x128xf32, #tpu.memory_space<vmem>>, %arg5: memref<128x128xbf16, #tpu.memory_space<vmem>>, %arg6: memref<1x1x128xf32, #tpu.memory_space<vmem>>, %arg7: memref<1x1x128xf32, #tpu.memory_space<vmem>>) attributes {dimension_semantics = [#tpu.dimension_semantics<parallel>], iteration_bounds = array<i64: 1>, scalar_prefetch = 0 : i64, scratch_operands = 0 : i64, tpu.core_type = #tpu.core_type<tc>, window_params = [{transform_indices = @transform_0, window_bounds = array<i64: 128, 128>}, {pipeline_mode = #tpu.pipeline_mode<synchronous>, transform_indices = @transform_1, window_bounds = array<i64: 128, 128>}, {pipeline_mode = #tpu.pipeline_mode<synchronous>, transform_indices = @transform_2, window_bounds = array<i64: 1, 128>}, {pipeline_mode = #tpu.pipeline_mode<synchronous>, transform_indices = @transform_3, window_bounds = array<i64: 1, 128>}, {transform_indices = @transform_4, window_bounds = array<i64: 128, 128>}, {transform_indices = @transform_5, window_bounds = array<i64: 1, 1, 128>}, {transform_indices = @transform_6, window_bounds = array<i64: 1, 1, 128>}]} {
    %c0 = arith.constant 0 : index
    %c0_0 = arith.constant 0 : index
    %0 = vector.load %arg1[%c0, %c0_0] : memref<128x128xbf16, #tpu.memory_space<vmem>>, vector<128x128xbf16>
    %1 = arith.extf %0 : vector<128x128xbf16> to vector<128x128xf32>
    %c0_1 = arith.constant 0 : index
    %c0_2 = arith.constant 0 : index
    %2 = vector.load %arg3[%c0_1, %c0_2] : memref<1x128xf32, #tpu.memory_space<vmem>>, vector<1x128xf32>
    %3 = vector.broadcast %2 : vector<1x128xf32> to vector<128x128xf32>
    %4 = arith.mulf %1, %3 : vector<128x128xf32>
    %c0_3 = arith.constant 0 : index
    %c0_4 = arith.constant 0 : index
    %5 = vector.load %arg4[%c0_3, %c0_4] : memref<1x128xf32, #tpu.memory_space<vmem>>, vector<1x128xf32>
    %6 = vector.broadcast %5 : vector<1x128xf32> to vector<128x128xf32>
    %7 = arith.addf %4, %6 : vector<128x128xf32>
    %cst = arith.constant 0.000000e+00 : f32
    %8 = vector.broadcast %cst : f32 to vector<128x128xf32>
    %9 = arith.maximumf %7, %8 : vector<128x128xf32>
    %10 = arith.truncf %9 : vector<128x128xf32> to vector<128x128xbf16>
    %c0_5 = arith.constant 0 : index
    %c0_6 = arith.constant 0 : index
    %11 = vector.load %arg2[%c0_5, %c0_6] : memref<128x128xbf16, #tpu.memory_space<vmem>>, vector<128x128xbf16>
    %cst_7 = arith.constant dense<0.000000e+00> : vector<128x128xf32>
    %12 = tpu.matmul %10, %11, %cst_7 {dimension_numbers = #tpu.dot_dimension_numbers<[1], [0], [0], [1], [0, 0, 1, 1], [], []>} : vector<128x128xbf16>, vector<128x128xbf16>, vector<128x128xf32> -> vector<128x128xf32>
    %13 = arith.truncf %12 : vector<128x128xf32> to vector<128x128xbf16>
    %c0_8 = arith.constant 0 : index
    %c0_9 = arith.constant 0 : index
    %14 = vector.load %arg5[%c0_8, %c0_9] : memref<128x128xbf16, #tpu.memory_space<vmem>>, vector<128x128xbf16>
    tpu.vector_store %arg5[%c0_8, %c0_9], %13 {strides = array<i32>} : memref<128x128xbf16, #tpu.memory_space<vmem>>, vector<128x128xbf16>,
    %cst_10 = arith.constant dense<0.000000e+00> : vector<128xf32>
    %15 = vector.multi_reduction <add>, %12, %cst_10 [0] : vector<128x128xf32> to vector<128xf32>
    %16 = vector.shape_cast %15 : vector<128xf32> to vector<1x128xf32>
    %c0_11 = arith.constant 0 : index
    %c0_12 = arith.constant 0 : index
    %c0_13 = arith.constant 0 : index
    %17 = vector.load %arg6[%c0_11, %c0_12, %c0_13] : memref<1x1x128xf32, #tpu.memory_space<vmem>>, vector<1x1x128xf32>
    %18 = vector.shape_cast %17 : vector<1x1x128xf32> to vector<1x128xf32>
    %19 = vector.shape_cast %16 : vector<1x128xf32> to vector<1x1x128xf32>
    tpu.vector_store %arg6[%c0_11, %c0_12, %c0_13], %19 {strides = array<i32>} : memref<1x1x128xf32, #tpu.memory_space<vmem>>, vector<1x1x128xf32>,
    %20 = arith.mulf %12, %12 : vector<128x128xf32>
    %cst_14 = arith.constant dense<0.000000e+00> : vector<128xf32>
    %21 = vector.multi_reduction <add>, %20, %cst_14 [0] : vector<128x128xf32> to vector<128xf32>
    %22 = vector.shape_cast %21 : vector<128xf32> to vector<1x128xf32>
    %c0_15 = arith.constant 0 : index
    %c0_16 = arith.constant 0 : index
    %c0_17 = arith.constant 0 : index
    %23 = vector.load %arg7[%c0_15, %c0_16, %c0_17] : memref<1x1x128xf32, #tpu.memory_space<vmem>>, vector<1x1x128xf32>
    %24 = vector.shape_cast %23 : vector<1x1x128xf32> to vector<1x128xf32>
    %25 = vector.shape_cast %22 : vector<1x128xf32> to vector<1x1x128xf32>
    tpu.vector_store %arg7[%c0_15, %c0_16, %c0_17], %25 {strides = array<i32>} : memref<1x1x128xf32, #tpu.memory_space<vmem>>, vector<1x1x128xf32>,
    return
  }
  func.func @transform_0(%arg0: i32) -> (i32, i32) {
    %c0_i32 = arith.constant 0 : i32
    %c0_i32_0 = arith.constant 0 : i32
    return %arg0, %c0_i32 : i32, i32
  }
  func.func @transform_1(%arg0: i32) -> (i32, i32) {
    %c0_i32 = arith.constant 0 : i32
    %c0_i32_0 = arith.constant 0 : i32
    %c0_i32_1 = arith.constant 0 : i32
    return %c0_i32, %c0_i32_0 : i32, i32
  }
  func.func @transform_2(%arg0: i32) -> (i32, i32) {
    %c0_i32 = arith.constant 0 : i32
    %c0_i32_0 = arith.constant 0 : i32
    %c0_i32_1 = arith.constant 0 : i32
    return %c0_i32, %c0_i32_0 : i32, i32
  }
  func.func @transform_3(%arg0: i32) -> (i32, i32) {
    %c0_i32 = arith.constant 0 : i32
    %c0_i32_0 = arith.constant 0 : i32
    %c0_i32_1 = arith.constant 0 : i32
    return %c0_i32, %c0_i32_0 : i32, i32
  }
  func.func @transform_4(%arg0: i32) -> (i32, i32) {
    %c0_i32 = arith.constant 0 : i32
    %c0_i32_0 = arith.constant 0 : i32
    return %arg0, %c0_i32 : i32, i32
  }
  func.func @transform_5(%arg0: i32) -> (i32, i32, i32) {
    %c0_i32 = arith.constant 0 : i32
    %c0_i32_0 = arith.constant 0 : i32
    %c0_i32_1 = arith.constant 0 : i32
    return %arg0, %c0_i32, %c0_i32_0 : i32, i32, i32
  }
  func.func @transform_6(%arg0: i32) -> (i32, i32, i32) {
    %c0_i32 = arith.constant 0 : i32
    %c0_i32_0 = arith.constant 0 : i32
    %c0_i32_1 = arith.constant 0 : i32
    return %arg0, %c0_i32, %c0_i32_0 : i32, i32, i32
  }
}

module attributes {stable_mosaic.version = 11 : i64} {
  func.func @_apply_kernel(%arg0: i32, %arg1: memref<128x128xbf16, #tpu.memory_space<vmem>>, %arg2: memref<1x128xf32, #tpu.memory_space<vmem>>, %arg3: memref<1x128xf32, #tpu.memory_space<vmem>>, %arg4: memref<128x128xbf16, #tpu.memory_space<vmem>>, %arg5: memref<1x128xf32, #tpu.memory_space<vmem>>, %arg6: memref<1x128xf32, #tpu.memory_space<vmem>>, %arg7: memref<128x128xbf16, #tpu.memory_space<vmem>>) attributes {dimension_semantics = [#tpu.dimension_semantics<parallel>], iteration_bounds = array<i64: 1>, scalar_prefetch = 0 : i64, scratch_operands = 0 : i64, tpu.core_type = #tpu.core_type<tc>, window_params = [{transform_indices = @transform_0, window_bounds = array<i64: 128, 128>}, {pipeline_mode = #tpu.pipeline_mode<synchronous>, transform_indices = @transform_1, window_bounds = array<i64: 1, 128>}, {pipeline_mode = #tpu.pipeline_mode<synchronous>, transform_indices = @transform_2, window_bounds = array<i64: 1, 128>}, {transform_indices = @transform_3, window_bounds = array<i64: 128, 128>}, {pipeline_mode = #tpu.pipeline_mode<synchronous>, transform_indices = @transform_4, window_bounds = array<i64: 1, 128>}, {pipeline_mode = #tpu.pipeline_mode<synchronous>, transform_indices = @transform_5, window_bounds = array<i64: 1, 128>}, {transform_indices = @transform_6, window_bounds = array<i64: 128, 128>}]} {
    %c0 = arith.constant 0 : index
    %c0_0 = arith.constant 0 : index
    %0 = vector.load %arg1[%c0, %c0_0] : memref<128x128xbf16, #tpu.memory_space<vmem>>, vector<128x128xbf16>
    %1 = arith.extf %0 : vector<128x128xbf16> to vector<128x128xf32>
    %c0_1 = arith.constant 0 : index
    %c0_2 = arith.constant 0 : index
    %2 = vector.load %arg2[%c0_1, %c0_2] : memref<1x128xf32, #tpu.memory_space<vmem>>, vector<1x128xf32>
    %3 = vector.broadcast %2 : vector<1x128xf32> to vector<128x128xf32>
    %4 = arith.mulf %1, %3 : vector<128x128xf32>
    %c0_3 = arith.constant 0 : index
    %c0_4 = arith.constant 0 : index
    %5 = vector.load %arg3[%c0_3, %c0_4] : memref<1x128xf32, #tpu.memory_space<vmem>>, vector<1x128xf32>
    %6 = vector.broadcast %5 : vector<1x128xf32> to vector<128x128xf32>
    %7 = arith.addf %4, %6 : vector<128x128xf32>
    %c0_5 = arith.constant 0 : index
    %c0_6 = arith.constant 0 : index
    %8 = vector.load %arg4[%c0_5, %c0_6] : memref<128x128xbf16, #tpu.memory_space<vmem>>, vector<128x128xbf16>
    %9 = arith.extf %8 : vector<128x128xbf16> to vector<128x128xf32>
    %c0_7 = arith.constant 0 : index
    %c0_8 = arith.constant 0 : index
    %10 = vector.load %arg5[%c0_7, %c0_8] : memref<1x128xf32, #tpu.memory_space<vmem>>, vector<1x128xf32>
    %11 = vector.broadcast %10 : vector<1x128xf32> to vector<128x128xf32>
    %12 = arith.mulf %9, %11 : vector<128x128xf32>
    %c0_9 = arith.constant 0 : index
    %c0_10 = arith.constant 0 : index
    %13 = vector.load %arg6[%c0_9, %c0_10] : memref<1x128xf32, #tpu.memory_space<vmem>>, vector<1x128xf32>
    %14 = vector.broadcast %13 : vector<1x128xf32> to vector<128x128xf32>
    %15 = arith.addf %12, %14 : vector<128x128xf32>
    %16 = arith.addf %7, %15 : vector<128x128xf32>
    %cst = arith.constant 0.000000e+00 : f32
    %17 = vector.broadcast %cst : f32 to vector<128x128xf32>
    %18 = arith.maximumf %16, %17 : vector<128x128xf32>
    %19 = arith.truncf %18 : vector<128x128xf32> to vector<128x128xbf16>
    %c0_11 = arith.constant 0 : index
    %c0_12 = arith.constant 0 : index
    %20 = vector.load %arg7[%c0_11, %c0_12] : memref<128x128xbf16, #tpu.memory_space<vmem>>, vector<128x128xbf16>
    tpu.vector_store %arg7[%c0_11, %c0_12], %19 {strides = array<i32>} : memref<128x128xbf16, #tpu.memory_space<vmem>>, vector<128x128xbf16>,
    return
  }
  func.func @transform_0(%arg0: i32) -> (i32, i32) {
    %c0_i32 = arith.constant 0 : i32
    %c0_i32_0 = arith.constant 0 : i32
    return %arg0, %c0_i32 : i32, i32
  }
  func.func @transform_1(%arg0: i32) -> (i32, i32) {
    %c0_i32 = arith.constant 0 : i32
    %c0_i32_0 = arith.constant 0 : i32
    %c0_i32_1 = arith.constant 0 : i32
    return %c0_i32, %c0_i32_0 : i32, i32
  }
  func.func @transform_2(%arg0: i32) -> (i32, i32) {
    %c0_i32 = arith.constant 0 : i32
    %c0_i32_0 = arith.constant 0 : i32
    %c0_i32_1 = arith.constant 0 : i32
    return %c0_i32, %c0_i32_0 : i32, i32
  }
  func.func @transform_3(%arg0: i32) -> (i32, i32) {
    %c0_i32 = arith.constant 0 : i32
    %c0_i32_0 = arith.constant 0 : i32
    return %arg0, %c0_i32 : i32, i32
  }
  func.func @transform_4(%arg0: i32) -> (i32, i32) {
    %c0_i32 = arith.constant 0 : i32
    %c0_i32_0 = arith.constant 0 : i32
    %c0_i32_1 = arith.constant 0 : i32
    return %c0_i32, %c0_i32_0 : i32, i32
  }
  func.func @transform_5(%arg0: i32) -> (i32, i32) {
    %c0_i32 = arith.constant 0 : i32
    %c0_i32_0 = arith.constant 0 : i32
    %c0_i32_1 = arith.constant 0 : i32
    return %c0_i32, %c0_i32_0 : i32, i32
  }
  func.func @transform_6(%arg0: i32) -> (i32, i32) {
    %c0_i32 = arith.constant 0 : i32
    %c0_i32_0 = arith.constant 0 : i32
    return %arg0, %c0_i32 : i32, i32
  }
}

module attributes {stable_mosaic.version = 11 : i64} {
  func.func @_pool_linear_kernel(%arg0: i32, %arg1: memref<128x128xbf16, #tpu.memory_space<vmem>>, %arg2: memref<128x128xbf16, #tpu.memory_space<vmem>>, %arg3: memref<1x128xf32, #tpu.memory_space<vmem>>, %arg4: memref<2x128xf32, #tpu.memory_space<vmem>>) attributes {dimension_semantics = [#tpu.dimension_semantics<arbitrary>], iteration_bounds = array<i64: 1>, scalar_prefetch = 0 : i64, scratch_operands = 0 : i64, tpu.core_type = #tpu.core_type<tc>, window_params = [{pipeline_mode = #tpu.pipeline_mode<synchronous>, transform_indices = @transform_0, window_bounds = array<i64: 128, 128>}, {pipeline_mode = #tpu.pipeline_mode<synchronous>, transform_indices = @transform_1, window_bounds = array<i64: 128, 128>}, {pipeline_mode = #tpu.pipeline_mode<synchronous>, transform_indices = @transform_2, window_bounds = array<i64: 1, 128>}, {pipeline_mode = #tpu.pipeline_mode<synchronous>, transform_indices = @transform_3, window_bounds = array<i64: 2, 128>}]} {
    %c0 = arith.constant 0 : index
    %c0_0 = arith.constant 0 : index
    %0 = vector.load %arg1[%c0, %c0_0] : memref<128x128xbf16, #tpu.memory_space<vmem>>, vector<128x128xbf16>
    %1 = arith.extf %0 : vector<128x128xbf16> to vector<128x128xf32>
    %2 = vector.shape_cast %1 : vector<128x128xf32> to vector<2x64x128xf32>
    %cst = arith.constant dense<0.000000e+00> : vector<2x128xf32>
    %3 = vector.multi_reduction <add>, %2, %cst [1] : vector<2x64x128xf32> to vector<2x128xf32>
    %cst_1 = arith.constant 6.400000e+01 : f32
    %4 = vector.broadcast %cst_1 : f32 to vector<2x128xf32>
    %5 = arith.divf %3, %4 : vector<2x128xf32>
    %6 = arith.truncf %5 : vector<2x128xf32> to vector<2x128xbf16>
    %c0_2 = arith.constant 0 : index
    %c0_3 = arith.constant 0 : index
    %7 = vector.load %arg2[%c0_2, %c0_3] : memref<128x128xbf16, #tpu.memory_space<vmem>>, vector<128x128xbf16>
    %cst_4 = arith.constant dense<0.000000e+00> : vector<2x128xf32>
    %8 = tpu.matmul %6, %7, %cst_4 {dimension_numbers = #tpu.dot_dimension_numbers<[1], [0], [0], [1], [0, 0, 1, 1], [], []>} : vector<2x128xbf16>, vector<128x128xbf16>, vector<2x128xf32> -> vector<2x128xf32>
    %c0_5 = arith.constant 0 : index
    %c0_6 = arith.constant 0 : index
    %9 = vector.load %arg3[%c0_5, %c0_6] : memref<1x128xf32, #tpu.memory_space<vmem>>, vector<1x128xf32>
    %10 = vector.broadcast %9 : vector<1x128xf32> to vector<2x128xf32>
    %11 = arith.addf %8, %10 : vector<2x128xf32>
    %c0_7 = arith.constant 0 : index
    %c0_8 = arith.constant 0 : index
    %12 = vector.load %arg4[%c0_7, %c0_8] : memref<2x128xf32, #tpu.memory_space<vmem>>, vector<2x128xf32>
    tpu.vector_store %arg4[%c0_7, %c0_8], %11 {strides = array<i32>} : memref<2x128xf32, #tpu.memory_space<vmem>>, vector<2x128xf32>,
    return
  }
  func.func @transform_0(%arg0: i32) -> (i32, i32) {
    %c0_i32 = arith.constant 0 : i32
    %c0_i32_0 = arith.constant 0 : i32
    %c0_i32_1 = arith.constant 0 : i32
    return %c0_i32, %c0_i32_0 : i32, i32
  }
  func.func @transform_1(%arg0: i32) -> (i32, i32) {
    %c0_i32 = arith.constant 0 : i32
    %c0_i32_0 = arith.constant 0 : i32
    %c0_i32_1 = arith.constant 0 : i32
    return %c0_i32, %c0_i32_0 : i32, i32
  }
  func.func @transform_2(%arg0: i32) -> (i32, i32) {
    %c0_i32 = arith.constant 0 : i32
    %c0_i32_0 = arith.constant 0 : i32
    %c0_i32_1 = arith.constant 0 : i32
    return %c0_i32, %c0_i32_0 : i32, i32
  }
  func.func @transform_3(%arg0: i32) -> (i32, i32) {
    %c0_i32 = arith.constant 0 : i32
    %c0_i32_0 = arith.constant 0 : i32
    %c0_i32_1 = arith.constant 0 : i32
    return %c0_i32, %c0_i32_0 : i32, i32
  }
}

</mosaic_0001>

<bundles_post_ra>
// kernel: _lambda_.19
= control target key start
LH: loop header
LB: loop body
LE: loop exit
PB: predicated region body
PF: predicated region fallthrough
CT: control target
= control target key end

     0   :  { %s1507_s21 = smov 0   ;;  %s1737_s0 = inlined_call_operand.vmem [shape: bf16[2048,128], index: 0, kind: input, shape index: {}]   ;;  %s1738_s1 = inlined_call_operand.vmem [shape: f32[1,128], index: 1, kind: input, shape index: {}]   ;;  %s1739_s2 = inlined_call_operand.vmem [shape: f32[1,128], index: 2, kind: input, shape index: {}]   ;;  %s1740_s3 = inlined_call_operand.vmem [shape: bf16[1,128], index: 3, kind: input, shape index: {}]   ;;  %s1741_s4 = inlined_call_operand.vmem [shape: f32[1,128], index: 4, kind: input, shape index: {}]   ;;  %s1742_s5 = inlined_call_operand.vmem [shape: f32[1,128], index: 5, kind: input, shape index: {}]   ;;  %s1743_s6 = inlined_call_operand.vmem [shape: bf16[2048,128], index: 6, kind: output, shape index: {}]  }
   0x1 LB: > { %s965_s3 = sadd.s32 4294967295, %s1470_s21   ;;  %p969_p0 = scmp.ge.s32.totalorder %s1470_s21, 1  ;;  %s1470_s21 = sphi %s1507_s21, %s16_s21  }
   0x2   : > { %p213_p1 = scmp.lt.s32.totalorder %s1470_s21, 5 }
   0x4   : > { %p214_p2 = pnand %p969_p0, %p213_p1 }
   0x5   : > { %s970_s4 = sshll.u32 (!%p214_p2), %s965_s3, 6  ;;  %v1528_v0 = vld [vmem:[%s1738_s1] ss:$0 sm:$0xff] (!%p214_p2) }
   0x6   : > { %217 = sbr.rel (%p214_p2) target bundleno = 95 (0x5f), region = 44  ;;  %p244_p3 = scmp.lt.s32.totalorder (!%p214_p2), %s970_s4, 255  ;;  %v1537_v9 = vld [vmem:[%s1739_s2] ss:$0 sm:$0xff] (!%p214_p2) }
   0xd   : > { %s1745_s4 = smov (!%p244_p3, %s970_s4), 255 }
   0xe   : > { %s971_s5 = sshll.u32 %s1745_s4, 2 }
   0xf   : > { %s1523_s24 = scalar_lea.vmem %s1737_s0, %s971_s5  ;;  %s1562_s7 = scalar_lea.vmem %s1743_s6, %s971_s5 }
  0x10   : > { %v1107_v1 = vld [vmem:[%s1523_s24] sm:$0xff]   ;;  %v1394_v2 = vld [vmem:[%s1523_s24 + $0x8] sm:$0xff]   ;;  %v1395_v3 = vld [vmem:[%s1523_s24 + $0x10] sm:$0xff]  }
  0x11   : > { %v1108_v4 = vunpack.c.l.bf16 %v1107_v1  ;;  %v1109_v5 = vunpack.c.h.bf16 %v1107_v1  ;;  %v1112_v6 = vunpack.c.l.bf16 %v1394_v2  ;;  %v1113_v7 = vunpack.c.h.bf16 %v1394_v2  ;;  %v1396_v8 = vld [vmem:[%s1523_s24 + $0x18] sm:$0xff]   ;;  %v1397_v30 = vld [vmem:[%s1523_s24 + $0x20] sm:$0xff]   ;;  %v1398_v35 = vld [vmem:[%s1523_s24 + $0x28] sm:$0xff]  }
  0x12   : > { %v1116_v10 = vunpack.c.l.bf16 %v1395_v3  ;;  %v1117_v11 = vunpack.c.h.bf16 %v1395_v3  ;;  %v1120_v12 = vunpack.c.l.bf16 %v1396_v8  ;;  %v1121_v13 = vunpack.c.h.bf16 %v1396_v8  ;;  %v1399_v40 = vld [vmem:[%s1523_s24 + $0x30] sm:$0xff]   ;;  %v1400_v45 = vld [vmem:[%s1523_s24 + $0x38] sm:$0xff]   ;;  %v1401_v3 = vld [vmem:[%s1523_s24 + $0x40] sm:$0xff]  }
  0x13   : > { %v390_v14 = vmul.f32 %v1108_v4, %v1528_v0  ;;  %v391_v15 = vmul.f32 %v1109_v5, %v1528_v0  ;;  %v392_v16 = vmul.f32 %v1112_v6, %v1528_v0  ;;  %v393_v17 = vmul.f32 %v1113_v7, %v1528_v0 }
  0x14   : > { %v394_v18 = vmul.f32 %v1116_v10, %v1528_v0  ;;  %v395_v19 = vmul.f32 %v1117_v11, %v1528_v0  ;;  %v396_v20 = vmul.f32 %v1120_v12, %v1528_v0  ;;  %v397_v21 = vmul.f32 %v1121_v13, %v1528_v0  ;;  %v1402_v13 = vld [vmem:[%s1523_s24 + $0x48] sm:$0xff]  }
  0x15   : > { %v461_v22 = vadd.f32 %v1537_v9, %v390_v14  ;;  %v462_v23 = vadd.f32 %v1537_v9, %v391_v15  ;;  %v463_v24 = vadd.f32 %v1537_v9, %v392_v16  ;;  %v464_v25 = vadd.f32 %v1537_v9, %v393_v17 }
  0x16   : > { %v465_v26 = vadd.f32 %v1537_v9, %v394_v18  ;;  %v466_v27 = vadd.f32 %v1537_v9, %v395_v19  ;;  %v467_v28 = vadd.f32 %v1537_v9, %v396_v20  ;;  %v468_v29 = vadd.f32 %v1537_v9, %v397_v21  ;;  %v1403_v18 = vld [vmem:[%s1523_s24 + $0x50] sm:$0xff]  }
  0x17   : > { %v525_v31 = vmax.f32 %v461_v22, 0.0  ;;  %v526_v32 = vmax.f32 %v462_v23, 0.0  ;;  %v527_v33 = vmax.f32 %v463_v24, 0.0  ;;  %v528_v34 = vmax.f32 %v464_v25, 0.0  ;;  %v1404_v23 = vld [vmem:[%s1523_s24 + $0x58] sm:$0xff]  }
  0x18   : > { %v529_v36 = vmax.f32 %v465_v26, 0.0  ;;  %v530_v37 = vmax.f32 %v466_v27, 0.0  ;;  %v531_v38 = vmax.f32 %v467_v28, 0.0  ;;  %v532_v39 = vmax.f32 %v468_v29, 0.0 }
  0x19   : > { %v1237_v41 = vpack.c.bf16 %v526_v32, %v525_v31  ;;  %v1242_v42 = vpack.c.bf16 %v528_v34, %v527_v33  ;;  %v1124_v43 = vunpack.c.l.bf16 %v1397_v30  ;;  %v1125_v44 = vunpack.c.h.bf16 %v1397_v30 }
  0x1a   : > { %v1247_v46 = vpack.c.bf16 %v530_v37, %v529_v36  ;;  %v1252_v47 = vpack.c.bf16 %v532_v39, %v531_v38  ;;  %v1128_v48 = vunpack.c.l.bf16 %v1398_v35  ;;  %v1129_v49 = vunpack.c.h.bf16 %v1398_v35 }
  0x1b   : > { %1238 = vst [vmem:[%s1562_s7] sm:$0xff] %v1237_v41   ;;  %1425 = vst [vmem:[%s1562_s7 + $0x8] sm:$0xff] %v1242_v42   ;;  %v398_v50 = vmul.f32 %v1124_v43, %v1528_v0  ;;  %v399_v51 = vmul.f32 %v1125_v44, %v1528_v0  ;;  %v1132_v52 = vunpack.c.l.bf16 %v1399_v40  ;;  %v1133_v53 = vunpack.c.h.bf16 %v1399_v40  ;;  %v1405_v40 = vld [vmem:[%s1523_s24 + $0x60] sm:$0xff]  }
  0x1c   : > { %1426 = vst [vmem:[%s1562_s7 + $0x10] sm:$0xff] %v1247_v46   ;;  %1427 = vst [vmem:[%s1562_s7 + $0x18] sm:$0xff] %v1252_v47   ;;  %v400_v54 = vmul.f32 %v1128_v48, %v1528_v0  ;;  %v401_v55 = vmul.f32 %v1129_v49, %v1528_v0  ;;  %v1136_v56 = vunpack.c.l.bf16 %v1400_v45  ;;  %v1137_v57 = vunpack.c.h.bf16 %v1400_v45 }
  0x1d   : > { %v469_v58 = vadd.f32 %v1537_v9, %v398_v50  ;;  %v470_v59 = vadd.f32 %v1537_v9, %v399_v51  ;;  %v402_v60 = vmul.f32 %v1132_v52, %v1528_v0  ;;  %v403_v61 = vmul.f32 %v1133_v53, %v1528_v0  ;;  %v1406_v53 = vld [vmem:[%s1523_s24 + $0x68] sm:$0xff]  }
  0x1e   : > { %v471_v62 = vadd.f32 %v1537_v9, %v400_v54  ;;  %v472_v63 = vadd.f32 %v1537_v9, %v401_v55  ;;  %v404_v1 = vmul.f32 %v1136_v56, %v1528_v0  ;;  %v405_v2 = vmul.f32 %v1137_v57, %v1528_v0 }
  0x1f   : > { %v533_v4 = vmax.f32 %v469_v58, 0.0  ;;  %v534_v5 = vmax.f32 %v470_v59, 0.0  ;;  %v473_v6 = vadd.f32 %v1537_v9, %v402_v60  ;;  %v474_v7 = vadd.f32 %v1537_v9, %v403_v61  ;;  %v1407_v58 = vld [vmem:[%s1523_s24 + $0x70] sm:$0xff]  }
  0x20   : > { %v535_v8 = vmax.f32 %v471_v62, 0.0  ;;  %v536_v10 = vmax.f32 %v472_v63, 0.0  ;;  %v475_v11 = vadd.f32 %v1537_v9, %v404_v1  ;;  %v476_v12 = vadd.f32 %v1537_v9, %v405_v2  ;;  %v1408_v63 = vld [vmem:[%s1523_s24 + $0x78] sm:$0xff]  }
  0x21   : > { %v1257_v14 = vpack.c.bf16 %v534_v5, %v533_v4  ;;  %v537_v15 = vmax.f32 %v473_v6, 0.0  ;;  %v538_v16 = vmax.f32 %v474_v7, 0.0  ;;  %v1140_v17 = vunpack.c.l.bf16 %v1401_v3 }
  0x22   : > { %v1262_v19 = vpack.c.bf16 %v536_v10, %v535_v8  ;;  %v539_v20 = vmax.f32 %v475_v11, 0.0  ;;  %v540_v21 = vmax.f32 %v476_v12, 0.0  ;;  %v1141_v22 = vunpack.c.h.bf16 %v1401_v3 }
  0x23   : > { %1428 = vst [vmem:[%s1562_s7 + $0x20] sm:$0xff] %v1257_v14   ;;  %v1267_v24 = vpack.c.bf16 %v538_v16, %v537_v15  ;;  %v406_v25 = vmul.f32 %v1140_v17, %v1528_v0  ;;  %v1144_v26 = vunpack.c.l.bf16 %v1402_v13  ;;  %v1145_v27 = vunpack.c.h.bf16 %v1402_v13  ;;  %v1409_v14 = vld [vmem:[%s1523_s24 + $0x80] sm:$0xff]  }
  0x24   : > { %1429 = vst [vmem:[%s1562_s7 + $0x28] sm:$0xff] %v1262_v19   ;;  %v1272_v28 = vpack.c.bf16 %v540_v21, %v539_v20  ;;  %v407_v29 = vmul.f32 %v1141_v22, %v1528_v0  ;;  %v1148_v30 = vunpack.c.l.bf16 %v1403_v18  ;;  %v1149_v31 = vunpack.c.h.bf16 %v1403_v18 }
  0x25   : > { %1430 = vst [vmem:[%s1562_s7 + $0x30] sm:$0xff] %v1267_v24   ;;  %v477_v32 = vadd.f32 %v1537_v9, %v406_v25  ;;  %v408_v33 = vmul.f32 %v1144_v26, %v1528_v0  ;;  %v409_v34 = vmul.f32 %v1145_v27, %v1528_v0  ;;  %v1152_v35 = vunpack.c.l.bf16 %v1404_v23 }
  0x26   : > { %1431 = vst [vmem:[%s1562_s7 + $0x38] sm:$0xff] %v1272_v28   ;;  %v478_v36 = vadd.f32 %v1537_v9, %v407_v29  ;;  %v410_v37 = vmul.f32 %v1148_v30, %v1528_v0  ;;  %v411_v38 = vmul.f32 %v1149_v31, %v1528_v0  ;;  %v1153_v39 = vunpack.c.h.bf16 %v1404_v23  ;;  %v1410_v31 = vld [vmem:[%s1523_s24 + $0x88] sm:$0xff]  }
  0x27   : > { %v541_v41 = vmax.f32 %v477_v32, 0.0  ;;  %v479_v42 = vadd.f32 %v1537_v9, %v408_v33  ;;  %v480_v43 = vadd.f32 %v1537_v9, %v409_v34  ;;  %v412_v44 = vmul.f32 %v1152_v35, %v1528_v0 }
  0x28   : > { %v542_v45 = vmax.f32 %v478_v36, 0.0  ;;  %v481_v46 = vadd.f32 %v1537_v9, %v410_v37  ;;  %v482_v47 = vadd.f32 %v1537_v9, %v411_v38  ;;  %v413_v48 = vmul.f32 %v1153_v39, %v1528_v0  ;;  %v1411_v36 = vld [vmem:[%s1523_s24 + $0x90] sm:$0xff]  }
  0x29   : > { %v543_v49 = vmax.f32 %v479_v42, 0.0  ;;  %v544_v50 = vmax.f32 %v480_v43, 0.0  ;;  %v483_v51 = vadd.f32 %v1537_v9, %v412_v44  ;;  %v1156_v52 = vunpack.c.l.bf16 %v1405_v40 }
  0x2a   : > { %v1277_v54 = vpack.c.bf16 %v542_v45, %v541_v41  ;;  %v545_v55 = vmax.f32 %v481_v46, 0.0  ;;  %v546_v56 = vmax.f32 %v482_v47, 0.0  ;;  %v484_v57 = vadd.f32 %v1537_v9, %v413_v48  ;;  %v1412_v41 = vld [vmem:[%s1523_s24 + $0x98] sm:$0xff]  }
  0x2b   : > { %v1282_v59 = vpack.c.bf16 %v544_v50, %v543_v49  ;;  %v547_v60 = vmax.f32 %v483_v51, 0.0  ;;  %v1157_v61 = vunpack.c.h.bf16 %v1405_v40  ;;  %v414_v62 = vmul.f32 %v1156_v52, %v1528_v0 }
  0x2c   : > { %1432 = vst [vmem:[%s1562_s7 + $0x40] sm:$0xff] %v1277_v54   ;;  %v1287_v1 = vpack.c.bf16 %v546_v56, %v545_v55  ;;  %v548_v2 = vmax.f32 %v484_v57, 0.0  ;;  %v1160_v3 = vunpack.c.l.bf16 %v1406_v53  ;;  %v1161_v4 = vunpack.c.h.bf16 %v1406_v53  ;;  %v1413_v54 = vld [vmem:[%s1523_s24 + $0xa0] sm:$0xff]  }
  0x2d   : > { %1433 = vst [vmem:[%s1562_s7 + $0x48] sm:$0xff] %v1282_v59   ;;  %v415_v5 = vmul.f32 %v1157_v61, %v1528_v0  ;;  %v485_v6 = vadd.f32 %v1537_v9, %v414_v62  ;;  %v1164_v7 = vunpack.c.l.bf16 %v1407_v58  ;;  %v1165_v8 = vunpack.c.h.bf16 %v1407_v58 }
  0x2e   : > { %1434 = vst [vmem:[%s1562_s7 + $0x50] sm:$0xff] %v1287_v1   ;;  %v1292_v10 = vpack.c.bf16 %v548_v2, %v547_v60  ;;  %v416_v11 = vmul.f32 %v1160_v3, %v1528_v0  ;;  %v417_v12 = vmul.f32 %v1161_v4, %v1528_v0  ;;  %v1168_v13 = vunpack.c.l.bf16 %v1408_v63  ;;  %v1414_v4 = vld [vmem:[%s1523_s24 + $0xa8] sm:$0xff]  }
  0x2f   : > { %v486_v15 = vadd.f32 %v1537_v9, %v415_v5  ;;  %v549_v16 = vmax.f32 %v485_v6, 0.0  ;;  %v418_v17 = vmul.f32 %v1164_v7, %v1528_v0  ;;  %v419_v18 = vmul.f32 %v1165_v8, %v1528_v0 }
  0x30   : > { %1435 = vst [vmem:[%s1562_s7 + $0x58] sm:$0xff] %v1292_v10   ;;  %v487_v19 = vadd.f32 %v1537_v9, %v416_v11  ;;  %v488_v20 = vadd.f32 %v1537_v9, %v417_v12  ;;  %v1169_v21 = vunpack.c.h.bf16 %v1408_v63  ;;  %v420_v22 = vmul.f32 %v1168_v13, %v1528_v0 }
  0x31   : > { %v550_v23 = vmax.f32 %v486_v15, 0.0  ;;  %v489_v24 = vadd.f32 %v1537_v9, %v418_v17  ;;  %v490_v25 = vadd.f32 %v1537_v9, %v419_v18  ;;  %v1172_v26 = vunpack.c.l.bf16 %v1409_v14 }
  0x32   : > { %v551_v27 = vmax.f32 %v487_v19, 0.0  ;;  %v552_v28 = vmax.f32 %v488_v20, 0.0  ;;  %v421_v29 = vmul.f32 %v1169_v21, %v1528_v0  ;;  %v491_v30 = vadd.f32 %v1537_v9, %v420_v22  ;;  %v1416_v19 = vld [vmem:[%s1523_s24 + $0xb8] sm:$0xff]  }
  0x33   : > { %v1297_v32 = vpack.c.bf16 %v550_v23, %v549_v16  ;;  %v553_v33 = vmax.f32 %v489_v24, 0.0  ;;  %v554_v34 = vmax.f32 %v490_v25, 0.0  ;;  %v1173_v35 = vunpack.c.h.bf16 %v1409_v14  ;;  %v1415_v14 = vld [vmem:[%s1523_s24 + $0xb0] sm:$0xff]  }
  0x34   : > { %v1302_v37 = vpack.c.bf16 %v552_v28, %v551_v27  ;;  %v492_v38 = vadd.f32 %v1537_v9, %v421_v29  ;;  %v555_v39 = vmax.f32 %v491_v30, 0.0  ;;  %v422_v40 = vmul.f32 %v1172_v26, %v1528_v0 }
  0x35   : > { %1436 = vst [vmem:[%s1562_s7 + $0x60] sm:$0xff] %v1297_v32   ;;  %v1307_v42 = vpack.c.bf16 %v554_v34, %v553_v33  ;;  %v423_v43 = vmul.f32 %v1173_v35, %v1528_v0  ;;  %v1176_v44 = vunpack.c.l.bf16 %v1410_v31  ;;  %v1177_v45 = vunpack.c.h.bf16 %v1410_v31  ;;  %v1417_v32 = vld [vmem:[%s1523_s24 + $0xc0] sm:$0xff]  }
  0x36   : > { %1437 = vst [vmem:[%s1562_s7 + $0x68] sm:$0xff] %v1302_v37   ;;  %v556_v46 = vmax.f32 %v492_v38, 0.0  ;;  %v493_v47 = vadd.f32 %v1537_v9, %v422_v40  ;;  %v1180_v48 = vunpack.c.l.bf16 %v1411_v36  ;;  %v1181_v49 = vunpack.c.h.bf16 %v1411_v36 }
  0x37   : > { %1438 = vst [vmem:[%s1562_s7 + $0x70] sm:$0xff] %v1307_v42   ;;  %v494_v50 = vadd.f32 %v1537_v9, %v423_v43  ;;  %v424_v51 = vmul.f32 %v1176_v44, %v1528_v0  ;;  %v425_v52 = vmul.f32 %v1177_v45, %v1528_v0  ;;  %v1184_v53 = vunpack.c.l.bf16 %v1412_v41  ;;  %v1418_v45 = vld [vmem:[%s1523_s24 + $0xc8] sm:$0xff]  }
  0x38   : > { %v1312_v55 = vpack.c.bf16 %v556_v46, %v555_v39  ;;  %v557_v56 = vmax.f32 %v493_v47, 0.0  ;;  %v426_v57 = vmul.f32 %v1180_v48, %v1528_v0  ;;  %v427_v58 = vmul.f32 %v1181_v49, %v1528_v0 }
  0x39   : > { %v558_v59 = vmax.f32 %v494_v50, 0.0  ;;  %v495_v60 = vadd.f32 %v1537_v9, %v424_v51  ;;  %v496_v61 = vadd.f32 %v1537_v9, %v425_v52  ;;  %v1185_v62 = vunpack.c.h.bf16 %v1412_v41 }
  0x3a   : > { %1439 = vst [vmem:[%s1562_s7 + $0x78] sm:$0xff] %v1312_v55   ;;  %v497_v63 = vadd.f32 %v1537_v9, %v426_v57  ;;  %v498_v1 = vadd.f32 %v1537_v9, %v427_v58  ;;  %v428_v2 = vmul.f32 %v1184_v53, %v1528_v0  ;;  %v1188_v3 = vunpack.c.l.bf16 %v1413_v54 }
  0x3b   : > { %v1317_v5 = vpack.c.bf16 %v558_v59, %v557_v56  ;;  %v559_v6 = vmax.f32 %v495_v60, 0.0  ;;  %v560_v7 = vmax.f32 %v496_v61, 0.0  ;;  %v429_v8 = vmul.f32 %v1185_v62, %v1528_v0 }
  0x3c   : > { %v561_v10 = vmax.f32 %v497_v63, 0.0  ;;  %v562_v11 = vmax.f32 %v498_v1, 0.0  ;;  %v499_v12 = vadd.f32 %v1537_v9, %v428_v2  ;;  %v1189_v13 = vunpack.c.h.bf16 %v1413_v54  ;;  %v1419_v54 = vld [vmem:[%s1523_s24 + $0xd0] sm:$0xff]   ;;  %v1420_v63 = vld [vmem:[%s1523_s24 + $0xd8] sm:$0xff]  }
  0x3d   : > { %1440 = vst [vmem:[%s1562_s7 + $0x80] sm:$0xff] %v1317_v5   ;;  %v1322_v15 = vpack.c.bf16 %v560_v7, %v559_v6  ;;  %v500_v16 = vadd.f32 %v1537_v9, %v429_v8  ;;  %v430_v17 = vmul.f32 %v1188_v3, %v1528_v0  ;;  %v1192_v18 = vunpack.c.l.bf16 %v1414_v4 }
  0x3e   : > { %v1327_v20 = vpack.c.bf16 %v562_v11, %v561_v10  ;;  %v563_v21 = vmax.f32 %v499_v12, 0.0  ;;  %v431_v22 = vmul.f32 %v1189_v13, %v1528_v0  ;;  %v1193_v23 = vunpack.c.h.bf16 %v1414_v4  ;;  %v1421_v10 = vld [vmem:[%s1523_s24 + $0xe0] sm:$0xff]  }
  0x3f   : > { %1441 = vst [vmem:[%s1562_s7 + $0x88] sm:$0xff] %v1322_v15   ;;  %v564_v24 = vmax.f32 %v500_v16, 0.0  ;;  %v501_v25 = vadd.f32 %v1537_v9, %v430_v17  ;;  %v432_v26 = vmul.f32 %v1192_v18, %v1528_v0  ;;  %v1196_v27 = vunpack.c.l.bf16 %v1415_v14 }
  0x40   : > { %1442 = vst [vmem:[%s1562_s7 + $0x90] sm:$0xff] %v1327_v20   ;;  %v502_v28 = vadd.f32 %v1537_v9, %v431_v22  ;;  %v433_v29 = vmul.f32 %v1193_v23, %v1528_v0  ;;  %v1197_v30 = vunpack.c.h.bf16 %v1415_v14  ;;  %v1200_v31 = vunpack.c.l.bf16 %v1416_v19  ;;  %v1422_v23 = vld [vmem:[%s1523_s24 + $0xe8] sm:$0xff]  }
  0x41   : > { %v1332_v33 = vpack.c.bf16 %v564_v24, %v563_v21  ;;  %v565_v34 = vmax.f32 %v501_v25, 0.0  ;;  %v503_v35 = vadd.f32 %v1537_v9, %v432_v26  ;;  %v434_v36 = vmul.f32 %v1196_v27, %v1528_v0 }
  0x42   : > { %v566_v37 = vmax.f32 %v502_v28, 0.0  ;;  %v504_v38 = vadd.f32 %v1537_v9, %v433_v29  ;;  %v435_v39 = vmul.f32 %v1197_v30, %v1528_v0  ;;  %v1201_v40 = vunpack.c.h.bf16 %v1416_v19 }
  0x43   : > { %1443 = vst [vmem:[%s1562_s7 + $0x98] sm:$0xff] %v1332_v33   ;;  %v567_v41 = vmax.f32 %v503_v35, 0.0  ;;  %v505_v42 = vadd.f32 %v1537_v9, %v434_v36  ;;  %v436_v43 = vmul.f32 %v1200_v31, %v1528_v0  ;;  %v1204_v44 = vunpack.c.l.bf16 %v1417_v32 }
  0x44   : > { %v1337_v46 = vpack.c.bf16 %v566_v37, %v565_v34  ;;  %v568_v47 = vmax.f32 %v504_v38, 0.0  ;;  %v506_v48 = vadd.f32 %v1537_v9, %v435_v39  ;;  %v437_v49 = vmul.f32 %v1201_v40, %v1528_v0 }
  0x45   : > { %v569_v50 = vmax.f32 %v505_v42, 0.0  ;;  %v507_v51 = vadd.f32 %v1537_v9, %v436_v43  ;;  %v1205_v52 = vunpack.c.h.bf16 %v1417_v32  ;;  %v438_v53 = vmul.f32 %v1204_v44, %v1528_v0  ;;  %v1423_v32 = vld [vmem:[%s1523_s24 + $0xf0] sm:$0xff]  }
  0x46   : > { %1444 = vst [vmem:[%s1562_s7 + $0xa0] sm:$0xff] %v1337_v46   ;;  %v1342_v55 = vpack.c.bf16 %v568_v47, %v567_v41  ;;  %v570_v56 = vmax.f32 %v506_v48, 0.0  ;;  %v508_v57 = vadd.f32 %v1537_v9, %v437_v49  ;;  %v1208_v58 = vunpack.c.l.bf16 %v1418_v45  ;;  %v1424_v41 = vld [vmem:[%s1523_s24 + $0xf8] sm:$0xff]  }
  0x47   : > { %v571_v59 = vmax.f32 %v507_v51, 0.0  ;;  %v439_v60 = vmul.f32 %v1205_v52, %v1528_v0  ;;  %v509_v61 = vadd.f32 %v1537_v9, %v438_v53  ;;  %v1209_v62 = vunpack.c.h.bf16 %v1418_v45 }
  0x48   : > { %1445 = vst [vmem:[%s1562_s7 + $0xa8] sm:$0xff] %v1342_v55   ;;  %v1347_v1 = vpack.c.bf16 %v570_v56, %v569_v50  ;;  %v572_v2 = vmax.f32 %v508_v57, 0.0  ;;  %v440_v3 = vmul.f32 %v1208_v58, %v1528_v0  ;;  %v1212_v4 = vunpack.c.l.bf16 %v1419_v54 }
  0x49   : > { %v510_v5 = vadd.f32 %v1537_v9, %v439_v60  ;;  %v573_v6 = vmax.f32 %v509_v61, 0.0  ;;  %v441_v7 = vmul.f32 %v1209_v62, %v1528_v0  ;;  %v1213_v8 = vunpack.c.h.bf16 %v1419_v54 }
  0x4a   : > { %1446 = vst [vmem:[%s1562_s7 + $0xb0] sm:$0xff] %v1347_v1   ;;  %v1352_v11 = vpack.c.bf16 %v572_v2, %v571_v59  ;;  %v511_v12 = vadd.f32 %v1537_v9, %v440_v3  ;;  %v442_v13 = vmul.f32 %v1212_v4, %v1528_v0  ;;  %v1216_v14 = vunpack.c.l.bf16 %v1420_v63 }
  0x4b   : > { %v574_v15 = vmax.f32 %v510_v5, 0.0  ;;  %v512_v16 = vadd.f32 %v1537_v9, %v441_v7  ;;  %v443_v17 = vmul.f32 %v1213_v8, %v1528_v0  ;;  %v1217_v18 = vunpack.c.h.bf16 %v1420_v63 }
  0x4c   : > { %1447 = vst [vmem:[%s1562_s7 + $0xb8] sm:$0xff] %v1352_v11   ;;  %v575_v19 = vmax.f32 %v511_v12, 0.0  ;;  %v513_v20 = vadd.f32 %v1537_v9, %v442_v13  ;;  %v444_v21 = vmul.f32 %v1216_v14, %v1528_v0  ;;  %v1220_v22 = vunpack.c.l.bf16 %v1421_v10 }
  0x4d   : > { %v1357_v24 = vpack.c.bf16 %v574_v15, %v573_v6  ;;  %v576_v25 = vmax.f32 %v512_v16, 0.0  ;;  %v514_v26 = vadd.f32 %v1537_v9, %v443_v17  ;;  %v445_v27 = vmul.f32 %v1217_v18, %v1528_v0 }
  0x4e   : > { %v577_v28 = vmax.f32 %v513_v20, 0.0  ;;  %v515_v29 = vadd.f32 %v1537_v9, %v444_v21  ;;  %v1221_v30 = vunpack.c.h.bf16 %v1421_v10  ;;  %v446_v31 = vmul.f32 %v1220_v22, %v1528_v0 }
  0x4f   : > { %1448 = vst [vmem:[%s1562_s7 + $0xc0] sm:$0xff] %v1357_v24   ;;  %v1362_v33 = vpack.c.bf16 %v576_v25, %v575_v19  ;;  %v578_v34 = vmax.f32 %v514_v26, 0.0  ;;  %v516_v35 = vadd.f32 %v1537_v9, %v445_v27  ;;  %v1224_v36 = vunpack.c.l.bf16 %v1422_v23 }
  0x50   : > { %v579_v37 = vmax.f32 %v515_v29, 0.0  ;;  %v447_v38 = vmul.f32 %v1221_v30, %v1528_v0  ;;  %v517_v39 = vadd.f32 %v1537_v9, %v446_v31  ;;  %v1225_v40 = vunpack.c.h.bf16 %v1422_v23 }
  0x51   : > { %1449 = vst [vmem:[%s1562_s7 + $0xc8] sm:$0xff] %v1362_v33   ;;  %v1367_v42 = vpack.c.bf16 %v578_v34, %v577_v28  ;;  %v580_v43 = vmax.f32 %v516_v35, 0.0  ;;  %v448_v44 = vmul.f32 %v1224_v36, %v1528_v0  ;;  %v1228_v45 = vunpack.c.l.bf16 %v1423_v32 }
  0x52   : > { %v518_v46 = vadd.f32 %v1537_v9, %v447_v38  ;;  %v581_v47 = vmax.f32 %v517_v39, 0.0  ;;  %v449_v48 = vmul.f32 %v1225_v40, %v1528_v0  ;;  %v1229_v49 = vunpack.c.h.bf16 %v1423_v32 }
  0x53   : > { %1450 = vst [vmem:[%s1562_s7 + $0xd0] sm:$0xff] %v1367_v42   ;;  %v1372_v50 = vpack.c.bf16 %v580_v43, %v579_v37  ;;  %v519_v51 = vadd.f32 %v1537_v9, %v448_v44  ;;  %v450_v52 = vmul.f32 %v1228_v45, %v1528_v0  ;;  %v1232_v53 = vunpack.c.l.bf16 %v1424_v41 }
  0x54   : > { %v582_v54 = vmax.f32 %v518_v46, 0.0  ;;  %v520_v55 = vadd.f32 %v1537_v9, %v449_v48  ;;  %v451_v56 = vmul.f32 %v1229_v49, %v1528_v0  ;;  %v1233_v57 = vunpack.c.h.bf16 %v1424_v41 }
  0x55   : > { %1451 = vst [vmem:[%s1562_s7 + $0xd8] sm:$0xff] %v1372_v50   ;;  %v583_v58 = vmax.f32 %v519_v51, 0.0  ;;  %v521_v59 = vadd.f32 %v1537_v9, %v450_v52  ;;  %v452_v60 = vmul.f32 %v1232_v53, %v1528_v0 }
  0x56   : > { %v1377_v61 = vpack.c.bf16 %v582_v54, %v581_v47  ;;  %v584_v62 = vmax.f32 %v520_v55, 0.0  ;;  %v522_v63 = vadd.f32 %v1537_v9, %v451_v56  ;;  %v453_v1 = vmul.f32 %v1233_v57, %v1528_v0 }
  0x57   : > { %v585_v2 = vmax.f32 %v521_v59, 0.0  ;;  %v523_v3 = vadd.f32 %v1537_v9, %v452_v60 }
  0x58   : > { %1452 = vst [vmem:[%s1562_s7 + $0xe0] sm:$0xff] %v1377_v61   ;;  %v1382_v4 = vpack.c.bf16 %v584_v62, %v583_v58  ;;  %v586_v5 = vmax.f32 %v522_v63, 0.0  ;;  %v524_v6 = vadd.f32 %v1537_v9, %v453_v1 }
  0x59   : > { %v587_v7 = vmax.f32 %v523_v3, 0.0 }
  0x5a   : > { %1453 = vst [vmem:[%s1562_s7 + $0xe8] sm:$0xff] %v1382_v4   ;;  %v1387_v8 = vpack.c.bf16 %v586_v5, %v585_v2  ;;  %v588_v10 = vmax.f32 %v524_v6, 0.0 }
  0x5c   : > { %1454 = vst [vmem:[%s1562_s7 + $0xf0] sm:$0xff] %v1387_v8   ;;  %v1392_v11 = vpack.c.bf16 %v588_v10, %v587_v7 }
  0x5e   : > { %1455 = vst [vmem:[%s1562_s7 + $0xf8] sm:$0xff] %v1392_v11  }
  0x5f PF: > { %s16_s21 = sadd.s32 1, %s1470_s21  }
  0x60   : > { %p13_p4 = scmp.ge.s32.totalorder %s16_s21, 6  }
  0x62   :  { %15 = sbr.rel (!%p13_p4) target bundleno = 1 (0x1), region = 74 }

// kernel: _lambda_.18
= control target key start
LH: loop header
LB: loop body
LE: loop exit
PB: predicated region body
PF: predicated region fallthrough
CT: control target
= control target key end

     0   :  { %s2109_s21 = smov 0   ;;  %s2428_s0 = inlined_call_operand.vmem [shape: bf16[2048,128], index: 0, kind: input, shape index: {}]   ;;  %s2429_s1 = inlined_call_operand.vmem [shape: bf16[128,128], index: 1, kind: input, shape index: {}]   ;;  %s2430_s2 = inlined_call_operand.vmem [shape: f32[1,128], index: 2, kind: input, shape index: {}]   ;;  %s2431_s3 = inlined_call_operand.vmem [shape: f32[1,128], index: 3, kind: input, shape index: {}]   ;;  %s2432_s4 = inlined_call_operand.vmem [shape: bf16[2048,128], index: 4, kind: output, shape index: {0}]   ;;  %s2433_s5 = inlined_call_operand.vmem [shape: f32[4,1,128], index: 5, kind: output, shape index: {1}]   ;;  %s2434_s6 = inlined_call_operand.vmem [shape: f32[4,1,128], index: 6, kind: output, shape index: {2}]  }
   0x1 LB: > { %s2115_s2 = sadd.s32 4294967295, %s2072_s21   ;;  %p1516_p0 = scmp.ge.s32.totalorder %s2072_s21, 1  ;;  %s2072_s21 = sphi %s2109_s21, %s17_s21  }
   0x2   : > { %p218_p1 = scmp.lt.s32.totalorder %s2072_s21, 5 }
   0x4   : > { %p219_p2 = pnand %p1516_p0, %p218_p1 }
   0x5   : > { %v2026_v0 = vld [vmem:[%s2429_s1] sm:$0xff] (!%p219_p2)   ;;  %s1517_s23 = sshll.u32 (!%p219_p2), %s2115_s2, 6  ;;  %v2027_v1 = vld [vmem:[%s2429_s1 + $0x8] sm:$0xff] (!%p219_p2)   ;;  %v2028_v2 = vld [vmem:[%s2429_s1 + $0x10] sm:$0xff] (!%p219_p2)   ;;  %p266_p4 = scmp.lt.s32.totalorder (!%p219_p2), %s2115_s2, 3 }
   0x6   : > { %222 = sbr.rel (%p219_p2) target bundleno = 394 (0x18a), region = 36  ;;  %p255_p3 = scmp.lt.s32.totalorder (!%p219_p2), %s1517_s23, 255  ;;  %1922 = vmatprep.subr.bf16.mxu0 (!%p219_p2), %v2026_v0  ;;  %2002 = vmatprep.subr.bf16.mxu1 (!%p219_p2), %v2026_v0  ;;  %v2029_v3 = vld [vmem:[%s2429_s1 + $0x18] sm:$0xff] (!%p219_p2)   ;;  %v2030_v5 = vld [vmem:[%s2429_s1 + $0x20] sm:$0xff] (!%p219_p2)   ;;  %v2031_v6 = vld [vmem:[%s2429_s1 + $0x28] sm:$0xff] (!%p219_p2)  }
   0x7   : > { %1923 = vmatpush3.bf16.msra.mxu0 (!%p219_p2), %v2026_v0  ;;  %2010 = vmatpush3.bf16.msra.mxu1 (!%p219_p2), %v2026_v0  ;;  %v2032_v7 = vld [vmem:[%s2429_s1 + $0x30] sm:$0xff] (!%p219_p2)   ;;  %v2033_v8 = vld [vmem:[%s2429_s1 + $0x38] sm:$0xff] (!%p219_p2)  }
   0x8   : > { %1924 = vmatprep.subr.bf16.mxu0 (!%p219_p2), %v2027_v1  ;;  %2003 = vmatprep.subr.bf16.mxu1 (!%p219_p2), %v2027_v1 }
   0xb   : > { %1925 = vmatpush3.bf16.msra.mxu0 (!%p219_p2), %v2027_v1  ;;  %2011 = vmatpush3.bf16.msra.mxu1 (!%p219_p2), %v2027_v1 }
   0xc   : > { %1926 = vmatprep.subr.bf16.mxu0 (!%p219_p2), %v2028_v2  ;;  %2004 = vmatprep.subr.bf16.mxu1 (!%p219_p2), %v2028_v2 }
   0xd   : > { %s2436_s23 = smov (!%p255_p3, %s1517_s23), 255  ;;  %s2438_s2 = smov (!%p266_p4, %s2115_s2), 3 }
   0xe   : > { %s1518_s28 = sshll.u32 %s2436_s23, 2  ;;  %s268_s23 = scalar_lea.vmem %s2433_s5, %s2438_s2 }
   0xf   : > { %s2137_s7 = scalar_lea.vmem %s2428_s0, %s1518_s28  ;;  %1927 = vmatpush3.bf16.msra.mxu0 %v2028_v2  ;;  %2012 = vmatpush3.bf16.msra.mxu1 %v2028_v2  ;;  %s2195_s20 = scalar_lea.vmem %s2432_s4, %s1518_s28 }
  0x10   : > { %v2034_v4 = vld [vmem:[%s2137_s7] sm:$0xff]   ;;  %1928 = vmatprep.subr.bf16.mxu0 %v2029_v3  ;;  %2005 = vmatprep.subr.bf16.mxu1 %v2029_v3  ;;  %v2035_v10 = vld [vmem:[%s2137_s7 + $0x8] sm:$0xff]   ;;  %v2036_v11 = vld [vmem:[%s2137_s7 + $0x10] sm:$0xff]   ;;  %s271_s26 = scalar_lea.vmem %s2434_s6, %s2438_s2 }
  0x11   : > { %1938 = vmatprep.mubr.bf16.mxu0 %v2034_v4  ;;  %v2050_v9 = vld [vmem:[%s2137_s7 + $0x80] sm:$0xff]   ;;  %v2051_v12 = vld [vmem:[%s2137_s7 + $0x88] sm:$0xff]   ;;  %v2052_v13 = vld [vmem:[%s2137_s7 + $0x90] sm:$0xff]  }
  0x12   : > { %1970 = vmatprep.mubr.bf16.mxu1 %v2050_v9  ;;  %v2037_v14 = vld [vmem:[%s2137_s7 + $0x18] sm:$0xff]   ;;  %v2038_v15 = vld [vmem:[%s2137_s7 + $0x20] sm:$0xff]   ;;  %v2039_v18 = vld [vmem:[%s2137_s7 + $0x28] sm:$0xff]  }
  0x13   : > { %1929 = vmatpush3.bf16.msra.mxu0 %v2029_v3  ;;  %2013 = vmatpush3.bf16.msra.mxu1 %v2029_v3  ;;  %v2053_v16 = vld [vmem:[%s2137_s7 + $0x98] sm:$0xff]   ;;  %v2054_v17 = vld [vmem:[%s2137_s7 + $0xa0] sm:$0xff]   ;;  %v2055_v19 = vld [vmem:[%s2137_s7 + $0xa8] sm:$0xff]  }
  0x14   : > { %1930 = vmatprep.subr.bf16.mxu0 %v2030_v5  ;;  %2006 = vmatprep.subr.bf16.mxu1 %v2030_v5  ;;  %v2040_v20 = vld [vmem:[%s2137_s7 + $0x30] sm:$0xff]   ;;  %v2041_v22 = vld [vmem:[%s2137_s7 + $0x38] sm:$0xff]   ;;  %v2042_v24 = vld [vmem:[%s2137_s7 + $0x40] sm:$0xff]  }
  0x15   : > { %v2056_v21 = vld [vmem:[%s2137_s7 + $0xb0] sm:$0xff]   ;;  %v2057_v23 = vld [vmem:[%s2137_s7 + $0xb8] sm:$0xff]   ;;  %v2058_v25 = vld [vmem:[%s2137_s7 + $0xc0] sm:$0xff]  }
  0x16   : > { %v2043_v26 = vld [vmem:[%s2137_s7 + $0x48] sm:$0xff]   ;;  %v2044_v28 = vld [vmem:[%s2137_s7 + $0x50] sm:$0xff]   ;;  %v2045_v30 = vld [vmem:[%s2137_s7 + $0x58] sm:$0xff]  }
  0x17   : > { %1931 = vmatpush3.bf16.msra.mxu0 %v2030_v5  ;;  %2014 = vmatpush3.bf16.msra.mxu1 %v2030_v5  ;;  %v2059_v27 = vld [vmem:[%s2137_s7 + $0xc8] sm:$0xff]   ;;  %v2060_v29 = vld [vmem:[%s2137_s7 + $0xd0] sm:$0xff]   ;;  %v2061_v31 = vld [vmem:[%s2137_s7 + $0xd8] sm:$0xff]  }
  0x18   : > { %1932 = vmatprep.subr.bf16.mxu0 %v2031_v6  ;;  %2007 = vmatprep.subr.bf16.mxu1 %v2031_v6  ;;  %v2046_v32 = vld [vmem:[%s2137_s7 + $0x60] sm:$0xff]   ;;  %v2047_v34 = vld [vmem:[%s2137_s7 + $0x68] sm:$0xff]   ;;  %v2048_v36 = vld [vmem:[%s2137_s7 + $0x70] sm:$0xff]  }
  0x19   : > { %v2062_v33 = vld [vmem:[%s2137_s7 + $0xe0] sm:$0xff]   ;;  %v2063_v35 = vld [vmem:[%s2137_s7 + $0xe8] sm:$0xff]   ;;  %v2064_v37 = vld [vmem:[%s2137_s7 + $0xf0] sm:$0xff]  }
  0x1a   : > { %v2049_v38 = vld [vmem:[%s2137_s7 + $0x78] sm:$0xff]  }
  0x1b   : > { %1933 = vmatpush3.bf16.msra.mxu0 %v2031_v6  ;;  %2015 = vmatpush3.bf16.msra.mxu1 %v2031_v6  ;;  %v2065_v39 = vld [vmem:[%s2137_s7 + $0xf8] sm:$0xff]  }
  0x1c   : > { %1934 = vmatprep.subr.bf16.mxu0 %v2032_v7  ;;  %2008 = vmatprep.subr.bf16.mxu1 %v2032_v7 }
  0x1f   : > { %1935 = vmatpush3.bf16.msra.mxu0 %v2032_v7  ;;  %2016 = vmatpush3.bf16.msra.mxu1 %v2032_v7 }
  0x20   : > { %1936 = vmatprep.subr.bf16.mxu0 %v2033_v8  ;;  %2009 = vmatprep.subr.bf16.mxu1 %v2033_v8 }
  0x23   : > { %1937 = vmatpush3.bf16.msra.mxu0 %v2033_v8  ;;  %2017 = vmatpush3.bf16.msra.mxu1 %v2033_v8 }
  0x26   : > { %1939 = vmatmul.mubr.bf16.vlgmr.msra.gmra.mrb[0].mxu0 %v2035_v10  ;;  %1971 = vmatmul.mubr.bf16.vlgmr.msra.gmra.mrb[0].mxu1 %v2051_v12 }
  0x27   : > { %1942 = vmatprep.mubr.bf16.mxu0 %v2036_v11  ;;  %1974 = vmatprep.mubr.bf16.mxu1 %v2052_v13 }
  0x2e   : > { %1943 = vmatmul.mubr.bf16.gmra.mrb[4].mxu0 %v2037_v14  ;;  %1975 = vmatmul.mubr.bf16.gmra.mrb[4].mxu1 %v2053_v16 }
  0x2f   : > { %1946 = vmatprep.mubr.bf16.mxu0 %v2038_v15  ;;  %1978 = vmatprep.mubr.bf16.mxu1 %v2054_v17 }
  0x36   : > { %1947 = vmatmul.mubr.bf16.gmra.mrb[8].mxu0 %v2039_v18  ;;  %1979 = vmatmul.mubr.bf16.gmra.mrb[8].mxu1 %v2055_v19 }
  0x37   : > { %1950 = vmatprep.mubr.bf16.mxu0 %v2040_v20  ;;  %1982 = vmatprep.mubr.bf16.mxu1 %v2056_v21 }
  0x3e   : > { %1951 = vmatmul.mubr.bf16.gmra.mrb[12].mxu0 %v2041_v22  ;;  %1983 = vmatmul.mubr.bf16.gmra.mrb[12].mxu1 %v2057_v23 }
  0x3f   : > { %1954 = vmatprep.mubr.bf16.mxu0 %v2042_v24  ;;  %1986 = vmatprep.mubr.bf16.mxu1 %v2058_v25 }
  0x46   : > { %1955 = vmatmul.mubr.bf16.gmra.mrb[16].mxu0 %v2043_v26  ;;  %1987 = vmatmul.mubr.bf16.gmra.mrb[16].mxu1 %v2059_v27 }
  0x47   : > { %1958 = vmatprep.mubr.bf16.mxu0 %v2044_v28  ;;  %1990 = vmatprep.mubr.bf16.mxu1 %v2060_v29 }
  0x4e   : > { %1959 = vmatmul.mubr.bf16.gmra.mrb[20].mxu0 %v2045_v30  ;;  %1991 = vmatmul.mubr.bf16.gmra.mrb[20].mxu1 %v2061_v31 }
  0x4f   : > { %1962 = vmatprep.mubr.bf16.mxu0 %v2046_v32  ;;  %1994 = vmatprep.mubr.bf16.mxu1 %v2062_v33 }
  0x56   : > { %1963 = vmatmul.mubr.bf16.gmra.mrb[24].mxu0 %v2047_v34  ;;  %1995 = vmatmul.mubr.bf16.gmra.mrb[24].mxu1 %v2063_v35 }
  0x57   : > { %1966 = vmatprep.mubr.bf16.mxu0 %v2048_v36  ;;  %1998 = vmatprep.mubr.bf16.mxu1 %v2064_v37 }
  0x5e   : > { %1967 = vmatmul.mubr.bf16.gmra.mrb[28].mxu0 %v2049_v38  ;;  %1999 = vmatmul.mubr.bf16.gmra.mrb[28].mxu1 %v2065_v39 }
  0xf9   : > { %v1940_v40 = vpop.f32.mrb[0].mxu0  ;;  %v2186_v41 = vpop.f32.mrb[0].mxu1 }
  0xfa   : > { %v627_v42 = vpop.f32.mrb[1].mxu0  ;;  %v2188_v43 = vpop.f32.mrb[1].mxu1  ;;  %v1274_v55 = vmul.f32 %v1940_v40, %v1940_v40 }
  0xfb   : > { %v1941_v44 = vpop.f32.mrb[2].mxu0  ;;  %v2197_v45 = vpop.f32.mrb[2].mxu1  ;;  %v1272_v46 = vmul.f32 %v627_v42, %v627_v42 }
  0xfc   : > { %v1699_v47 = vpack.c.bf16 %v1941_v44, %v1940_v40  ;;  %v630_v48 = vpop.f32.mrb[3].mxu0  ;;  %v1779_v49 = vpack.c.bf16 %v2197_v45, %v2186_v41  ;;  %v2201_v50 = vpop.f32.mrb[3].mxu1  ;;  %v1275_v58 = vmul.f32 %v1941_v44, %v1941_v44 }
  0xfd   : > { %v1694_v51 = vpack.c.bf16 %v630_v48, %v627_v42  ;;  %v1202_v52 = vadd.f32 %v630_v48, %v627_v42  ;;  %v1273_v53 = vmul.f32 %v630_v48, %v630_v48  ;;  %v1774_v54 = vpack.c.bf16 %v2201_v50, %v2188_v43 }
  0xfe   : > { %1851 = vst [vmem:[%s2195_s20 + $0x8] sm:$0xff] %v1699_v47   ;;  %1867 = vst [vmem:[%s2195_s20 + $0x88] sm:$0xff] %v1779_v49  }
  0xff   : > { %1695 = vst [vmem:[%s2195_s20] sm:$0xff] %v1694_v51   ;;  %v1203_v56 = vadd.f32 %v1940_v40, %v1202_v52  ;;  %v1336_v57 = vadd.f32 %v1273_v53, %v1272_v46  ;;  %1866 = vst [vmem:[%s2195_s20 + $0x80] sm:$0xff] %v1774_v54  }
 0x101   : > { %v1337_v59 = vadd.f32 %v1336_v57, %v1274_v55  ;;  %v1944_v60 = vpop.f32.mrb[4].mxu0  ;;  %v1204_v61 = vadd.f32 %v1941_v44, %v1203_v56  ;;  %v2209_v62 = vpop.f32.mrb[4].mxu1 }
 0x102   : > { %v643_v63 = vpop.f32.mrb[5].mxu0  ;;  %v2211_v0 = vpop.f32.mrb[5].mxu1  ;;  %v1278_v15 = vmul.f32 %v1944_v60, %v1944_v60 }
 0x103   : > { %v1205_v1 = vadd.f32 %v1204_v61, %v643_v63  ;;  %v1276_v2 = vmul.f32 %v643_v63, %v643_v63  ;;  %v1338_v3 = vadd.f32 %v1337_v59, %v1275_v58  ;;  %v1945_v4 = vpop.f32.mrb[6].mxu0  ;;  %v2213_v5 = vpop.f32.mrb[6].mxu1 }
 0x104   : > { %v1709_v6 = vpack.c.bf16 %v1945_v4, %v1944_v60  ;;  %v646_v7 = vpop.f32.mrb[7].mxu0  ;;  %v1789_v8 = vpack.c.bf16 %v2213_v5, %v2209_v62  ;;  %v2217_v9 = vpop.f32.mrb[7].mxu1  ;;  %v1279_v18 = vmul.f32 %v1945_v4, %v1945_v4 }
 0x105   : > { %v1339_v10 = vadd.f32 %v1338_v3, %v1276_v2  ;;  %v1704_v11 = vpack.c.bf16 %v646_v7, %v643_v63  ;;  %v1206_v12 = vadd.f32 %v1205_v1, %v646_v7  ;;  %v1277_v13 = vmul.f32 %v646_v7, %v646_v7 }
 0x106   : > { %1853 = vst [vmem:[%s2195_s20 + $0x18] sm:$0xff] %v1709_v6   ;;  %1869 = vst [vmem:[%s2195_s20 + $0x98] sm:$0xff] %v1789_v8   ;;  %v1784_v14 = vpack.c.bf16 %v2217_v9, %v2211_v0 }
 0x107   : > { %1852 = vst [vmem:[%s2195_s20 + $0x10] sm:$0xff] %v1704_v11   ;;  %v1207_v16 = vadd.f32 %v1944_v60, %v1206_v12  ;;  %v1340_v17 = vadd.f32 %v1339_v10, %v1277_v13 }
 0x108   : > { %1868 = vst [vmem:[%s2195_s20 + $0x90] sm:$0xff] %v1784_v14  }
 0x109   : > { %v1341_v19 = vadd.f32 %v1340_v17, %v1278_v15  ;;  %v1948_v20 = vpop.f32.mrb[8].mxu0  ;;  %v1208_v21 = vadd.f32 %v1945_v4, %v1207_v16  ;;  %v2225_v22 = vpop.f32.mrb[8].mxu1 }
 0x10a   : > { %v659_v23 = vpop.f32.mrb[9].mxu0  ;;  %v2227_v24 = vpop.f32.mrb[9].mxu1  ;;  %v1282_v39 = vmul.f32 %v1948_v20, %v1948_v20 }
 0x10b   : > { %v1209_v25 = vadd.f32 %v1208_v21, %v659_v23  ;;  %v1280_v26 = vmul.f32 %v659_v23, %v659_v23  ;;  %v1342_v27 = vadd.f32 %v1341_v19, %v1279_v18  ;;  %v1949_v28 = vpop.f32.mrb[10].mxu0  ;;  %v2229_v29 = vpop.f32.mrb[10].mxu1 }
 0x10c   : > { %v1719_v30 = vpack.c.bf16 %v1949_v28, %v1948_v20  ;;  %v662_v31 = vpop.f32.mrb[11].mxu0  ;;  %v1799_v32 = vpack.c.bf16 %v2229_v29, %v2225_v22  ;;  %v2233_v33 = vpop.f32.mrb[11].mxu1  ;;  %v1283_v44 = vmul.f32 %v1949_v28, %v1949_v28 }
 0x10d   : > { %v1343_v34 = vadd.f32 %v1342_v27, %v1280_v26  ;;  %v1714_v35 = vpack.c.bf16 %v662_v31, %v659_v23  ;;  %v1210_v36 = vadd.f32 %v1209_v25, %v662_v31  ;;  %v1281_v37 = vmul.f32 %v662_v31, %v662_v31 }
 0x10e   : > { %1855 = vst [vmem:[%s2195_s20 + $0x28] sm:$0xff] %v1719_v30   ;;  %1871 = vst [vmem:[%s2195_s20 + $0xa8] sm:$0xff] %v1799_v32   ;;  %v1794_v38 = vpack.c.bf16 %v2233_v33, %v2227_v24 }
 0x10f   : > { %1854 = vst [vmem:[%s2195_s20 + $0x20] sm:$0xff] %v1714_v35   ;;  %v1211_v40 = vadd.f32 %v1948_v20, %v1210_v36  ;;  %v1344_v42 = vadd.f32 %v1343_v34, %v1281_v37 }
 0x110   : > { %1870 = vst [vmem:[%s2195_s20 + $0xa0] sm:$0xff] %v1794_v38  }
 0x111   : > { %v1345_v46 = vadd.f32 %v1344_v42, %v1282_v39  ;;  %v1952_v47 = vpop.f32.mrb[12].mxu0  ;;  %v1212_v48 = vadd.f32 %v1949_v28, %v1211_v40  ;;  %v2241_v49 = vpop.f32.mrb[12].mxu1 }
 0x112   : > { %v675_v51 = vpop.f32.mrb[13].mxu0  ;;  %v2243_v52 = vpop.f32.mrb[13].mxu1  ;;  %v1286_v6 = vmul.f32 %v1952_v47, %v1952_v47 }
 0x113   : > { %v1213_v53 = vadd.f32 %v1212_v48, %v675_v51  ;;  %v1284_v54 = vmul.f32 %v675_v51, %v675_v51  ;;  %v1346_v55 = vadd.f32 %v1345_v46, %v1283_v44  ;;  %v1953_v56 = vpop.f32.mrb[14].mxu0  ;;  %v2245_v57 = vpop.f32.mrb[14].mxu1 }
 0x114   : > { %v1729_v58 = vpack.c.bf16 %v1953_v56, %v1952_v47  ;;  %v678_v59 = vpop.f32.mrb[15].mxu0  ;;  %v1809_v60 = vpack.c.bf16 %v2245_v57, %v2241_v49  ;;  %v2249_v61 = vpop.f32.mrb[15].mxu1  ;;  %v1287_v10 = vmul.f32 %v1953_v56, %v1953_v56 }
 0x115   : > { %v1347_v63 = vadd.f32 %v1346_v55, %v1284_v54  ;;  %v1724_v1 = vpack.c.bf16 %v678_v59, %v675_v51  ;;  %v1214_v2 = vadd.f32 %v1213_v53, %v678_v59  ;;  %v1285_v3 = vmul.f32 %v678_v59, %v678_v59 }
 0x116   : > { %1857 = vst [vmem:[%s2195_s20 + $0x38] sm:$0xff] %v1729_v58   ;;  %1873 = vst [vmem:[%s2195_s20 + $0xb8] sm:$0xff] %v1809_v60   ;;  %v1804_v4 = vpack.c.bf16 %v2249_v61, %v2243_v52 }
 0x117   : > { %1856 = vst [vmem:[%s2195_s20 + $0x30] sm:$0xff] %v1724_v1   ;;  %v1215_v7 = vadd.f32 %v1952_v47, %v1214_v2  ;;  %v1348_v8 = vadd.f32 %v1347_v63, %v1285_v3 }
 0x118   : > { %1872 = vst [vmem:[%s2195_s20 + $0xb0] sm:$0xff] %v1804_v4  }
 0x119   : > { %v1349_v11 = vadd.f32 %v1348_v8, %v1286_v6  ;;  %v1956_v12 = vpop.f32.mrb[16].mxu0  ;;  %v1216_v13 = vadd.f32 %v1953_v56, %v1215_v7  ;;  %v2257_v14 = vpop.f32.mrb[16].mxu1 }
 0x11a   : > { %v691_v15 = vpop.f32.mrb[17].mxu0  ;;  %v2259_v16 = vpop.f32.mrb[17].mxu1  ;;  %v1290_v35 = vmul.f32 %v1956_v12, %v1956_v12 }
 0x11b   : > { %v1217_v17 = vadd.f32 %v1216_v13, %v691_v15  ;;  %v1288_v18 = vmul.f32 %v691_v15, %v691_v15  ;;  %v1350_v19 = vadd.f32 %v1349_v11, %v1287_v10  ;;  %v1957_v20 = vpop.f32.mrb[18].mxu0  ;;  %v2261_v21 = vpop.f32.mrb[18].mxu1 }
 0x11c   : > { %v1739_v23 = vpack.c.bf16 %v1957_v20, %v1956_v12  ;;  %v694_v25 = vpop.f32.mrb[19].mxu0  ;;  %v1819_v26 = vpack.c.bf16 %v2261_v21, %v2257_v14  ;;  %v2265_v27 = vpop.f32.mrb[19].mxu1  ;;  %v1291_v38 = vmul.f32 %v1957_v20, %v1957_v20 }
 0x11d   : > { %v1351_v28 = vadd.f32 %v1350_v19, %v1288_v18  ;;  %v1734_v30 = vpack.c.bf16 %v694_v25, %v691_v15  ;;  %v1218_v31 = vadd.f32 %v1217_v17, %v694_v25  ;;  %v1289_v32 = vmul.f32 %v694_v25, %v694_v25 }
 0x11e   : > { %1859 = vst [vmem:[%s2195_s20 + $0x48] sm:$0xff] %v1739_v23   ;;  %1875 = vst [vmem:[%s2195_s20 + $0xc8] sm:$0xff] %v1819_v26   ;;  %v1814_v34 = vpack.c.bf16 %v2265_v27, %v2259_v16 }
 0x11f   : > { %1858 = vst [vmem:[%s2195_s20 + $0x40] sm:$0xff] %v1734_v30   ;;  %v1219_v36 = vadd.f32 %v1956_v12, %v1218_v31  ;;  %v1352_v37 = vadd.f32 %v1351_v28, %v1289_v32 }
 0x120   : > { %1874 = vst [vmem:[%s2195_s20 + $0xc0] sm:$0xff] %v1814_v34  }
 0x121   : > { %v1353_v39 = vadd.f32 %v1352_v37, %v1290_v35  ;;  %v1960_v40 = vpop.f32.mrb[20].mxu0  ;;  %v1220_v42 = vadd.f32 %v1957_v20, %v1219_v36  ;;  %v2273_v44 = vpop.f32.mrb[20].mxu1 }
 0x122   : > { %v707_v46 = vpop.f32.mrb[21].mxu0  ;;  %v2275_v47 = vpop.f32.mrb[21].mxu1  ;;  %v1294_v6 = vmul.f32 %v1960_v40, %v1960_v40 }
 0x123   : > { %v1221_v48 = vadd.f32 %v1220_v42, %v707_v46  ;;  %v1292_v51 = vmul.f32 %v707_v46, %v707_v46  ;;  %v1354_v53 = vadd.f32 %v1353_v39, %v1291_v38  ;;  %v1961_v54 = vpop.f32.mrb[22].mxu0  ;;  %v2277_v55 = vpop.f32.mrb[22].mxu1 }
 0x124   : > { %v1749_v56 = vpack.c.bf16 %v1961_v54, %v1960_v40  ;;  %v710_v58 = vpop.f32.mrb[23].mxu0  ;;  %v1829_v59 = vpack.c.bf16 %v2277_v55, %v2273_v44  ;;  %v2281_v60 = vpop.f32.mrb[23].mxu1  ;;  %v1295_v10 = vmul.f32 %v1961_v54, %v1961_v54 }
 0x125   : > { %v1355_v63 = vadd.f32 %v1354_v53, %v1292_v51  ;;  %v1744_v1 = vpack.c.bf16 %v710_v58, %v707_v46  ;;  %v1222_v2 = vadd.f32 %v1221_v48, %v710_v58  ;;  %v1293_v3 = vmul.f32 %v710_v58, %v710_v58 }
 0x126   : > { %1861 = vst [vmem:[%s2195_s20 + $0x58] sm:$0xff] %v1749_v56   ;;  %1877 = vst [vmem:[%s2195_s20 + $0xd8] sm:$0xff] %v1829_v59   ;;  %v1824_v4 = vpack.c.bf16 %v2281_v60, %v2275_v47 }
 0x127   : > { %1860 = vst [vmem:[%s2195_s20 + $0x50] sm:$0xff] %v1744_v1   ;;  %v1223_v7 = vadd.f32 %v1960_v40, %v1222_v2  ;;  %v1356_v8 = vadd.f32 %v1355_v63, %v1293_v3 }
 0x128   : > { %1876 = vst [vmem:[%s2195_s20 + $0xd0] sm:$0xff] %v1824_v4  }
 0x129   : > { %v1357_v11 = vadd.f32 %v1356_v8, %v1294_v6  ;;  %v1964_v12 = vpop.f32.mrb[24].mxu0  ;;  %v1224_v13 = vadd.f32 %v1961_v54, %v1223_v7  ;;  %v2289_v15 = vpop.f32.mrb[24].mxu1 }
 0x12a   : > { %v723_v17 = vpop.f32.mrb[25].mxu0  ;;  %v2291_v18 = vpop.f32.mrb[25].mxu1  ;;  %v1298_v39 = vmul.f32 %v1964_v12, %v1964_v12 }
 0x12b   : > { %v1225_v19 = vadd.f32 %v1224_v13, %v723_v17  ;;  %v1296_v20 = vmul.f32 %v723_v17, %v723_v17  ;;  %v1358_v23 = vadd.f32 %v1357_v11, %v1295_v10  ;;  %v1965_v25 = vpop.f32.mrb[26].mxu0  ;;  %v2293_v26 = vpop.f32.mrb[26].mxu1 }
 0x12c   : > { %v1759_v28 = vpack.c.bf16 %v1965_v25, %v1964_v12  ;;  %v726_v30 = vpop.f32.mrb[27].mxu0  ;;  %v1839_v31 = vpack.c.bf16 %v2293_v26, %v2289_v15  ;;  %v2297_v32 = vpop.f32.mrb[27].mxu1  ;;  %v1299_v46 = vmul.f32 %v1965_v25, %v1965_v25 }
 0x12d   : > { %v1359_v34 = vadd.f32 %v1358_v23, %v1296_v20  ;;  %v1754_v35 = vpack.c.bf16 %v726_v30, %v723_v17  ;;  %v1226_v36 = vadd.f32 %v1225_v19, %v726_v30  ;;  %v1297_v37 = vmul.f32 %v726_v30, %v726_v30 }
 0x12e   : > { %1863 = vst [vmem:[%s2195_s20 + $0x68] sm:$0xff] %v1759_v28   ;;  %1879 = vst [vmem:[%s2195_s20 + $0xe8] sm:$0xff] %v1839_v31   ;;  %v1834_v38 = vpack.c.bf16 %v2297_v32, %v2291_v18  ;;  %v1304_v31 = vmul.f32 %v2188_v43, %v2188_v43 }
 0x12f   : > { %1862 = vst [vmem:[%s2195_s20 + $0x60] sm:$0xff] %v1754_v35   ;;  %v1227_v40 = vadd.f32 %v1964_v12, %v1226_v36  ;;  %v1360_v42 = vadd.f32 %v1359_v34, %v1297_v37 }
 0x130   : > { %1878 = vst [vmem:[%s2195_s20 + $0xe0] sm:$0xff] %v1834_v38   ;;  %v1305_v38 = vmul.f32 %v2201_v50, %v2201_v50 }
 0x131   : > { %v1361_v48 = vadd.f32 %v1360_v42, %v1298_v39  ;;  %v1968_v51 = vpop.f32.mrb[28].mxu0  ;;  %v1228_v53 = vadd.f32 %v1965_v25, %v1227_v40  ;;  %v2305_v54 = vpop.f32.mrb[28].mxu1  ;;  %v1306_v39 = vmul.f32 %v2186_v41, %v2186_v41 }
 0x132   : > { %v739_v56 = vpop.f32.mrb[29].mxu0  ;;  %v2307_v58 = vpop.f32.mrb[29].mxu1  ;;  %v1302_v19 = vmul.f32 %v1968_v51, %v1968_v51 }
 0x133   : > { %v1229_v59 = vadd.f32 %v1228_v53, %v739_v56  ;;  %v1300_v63 = vmul.f32 %v739_v56, %v739_v56  ;;  %v1362_v1 = vadd.f32 %v1361_v48, %v1299_v46  ;;  %v1969_v2 = vpop.f32.mrb[30].mxu0  ;;  %v2309_v3 = vpop.f32.mrb[30].mxu1  ;;  %v1307_v46 = vmul.f32 %v2197_v45, %v2197_v45 }
 0x134   : > { %v1769_v4 = vpack.c.bf16 %v1969_v2, %v1968_v51  ;;  %v742_v6 = vpop.f32.mrb[31].mxu0  ;;  %v1849_v7 = vpack.c.bf16 %v2309_v3, %v2305_v54  ;;  %v2313_v8 = vpop.f32.mrb[31].mxu1  ;;  %v1303_v25 = vmul.f32 %v1969_v2, %v1969_v2 }
 0x135   : > { %v1363_v10 = vadd.f32 %v1362_v1, %v1300_v63  ;;  %v1764_v11 = vpack.c.bf16 %v742_v6, %v739_v56  ;;  %v1230_v12 = vadd.f32 %v1229_v59, %v742_v6  ;;  %v1301_v13 = vmul.f32 %v742_v6, %v742_v6 }
 0x136   : > { %1865 = vst [vmem:[%s2195_s20 + $0x78] sm:$0xff] %v1769_v4   ;;  %1881 = vst [vmem:[%s2195_s20 + $0xf8] sm:$0xff] %v1849_v7   ;;  %v1844_v17 = vpack.c.bf16 %v2313_v8, %v2307_v58  ;;  %v1309_v63 = vmul.f32 %v2217_v9, %v2217_v9 }
 0x137   : > { %1864 = vst [vmem:[%s2195_s20 + $0x70] sm:$0xff] %v1764_v11   ;;  %v1231_v20 = vadd.f32 %v1968_v51, %v1230_v12  ;;  %v1364_v23 = vadd.f32 %v1363_v10, %v1301_v13  ;;  %v1313_v12 = vmul.f32 %v2233_v33, %v2233_v33 }
 0x138   : > { %1880 = vst [vmem:[%s2195_s20 + $0xf0] sm:$0xff] %v1844_v17  }
 0x139   : > { %v1365_v28 = vadd.f32 %v1364_v23, %v1302_v19  ;;  %v1232_v30 = vadd.f32 %v1969_v2, %v1231_v20 }
 0x13b   : > { %v1233_v34 = vadd.f32 %v1232_v30, %v2188_v43  ;;  %v1366_v35 = vadd.f32 %v1365_v28, %v1303_v25  ;;  %v1308_v43 = vmul.f32 %v2211_v0, %v2211_v0  ;;  %v1317_v30 = vmul.f32 %v2249_v61, %v2249_v61 }
 0x13d   : > { %v1367_v36 = vadd.f32 %v1366_v35, %v1304_v31  ;;  %v1234_v37 = vadd.f32 %v1233_v34, %v2201_v50 }
 0x13f   : > { %v1235_v40 = vadd.f32 %v2186_v41, %v1234_v37  ;;  %v1368_v42 = vadd.f32 %v1367_v36, %v1305_v38  ;;  %v1310_v41 = vmul.f32 %v2209_v62, %v2209_v62 }
 0x141   : > { %v1369_v48 = vadd.f32 %v1368_v42, %v1306_v39  ;;  %v1236_v51 = vadd.f32 %v2197_v45, %v1235_v40  ;;  %v1311_v45 = vmul.f32 %v2213_v5, %v2213_v5  ;;  %v1321_v40 = vmul.f32 %v2265_v27, %v2265_v27 }
 0x143   : > { %v1237_v53 = vadd.f32 %v1236_v51, %v2211_v0  ;;  %v1370_v56 = vadd.f32 %v1369_v48, %v1307_v46  ;;  %v1312_v0 = vmul.f32 %v2227_v24, %v2227_v24 }
 0x145   : > { %v1371_v59 = vadd.f32 %v1370_v56, %v1308_v43  ;;  %v1238_v50 = vadd.f32 %v1237_v53, %v2217_v9 }
 0x147   : > { %v1239_v1 = vadd.f32 %v2209_v62, %v1238_v50  ;;  %v1372_v2 = vadd.f32 %v1371_v59, %v1309_v63  ;;  %v1314_v62 = vmul.f32 %v2225_v22, %v2225_v22  ;;  %v1325_v59 = vmul.f32 %v2281_v60, %v2281_v60 }
 0x149   : > { %v1373_v4 = vadd.f32 %v1372_v2, %v1310_v41  ;;  %v1240_v6 = vadd.f32 %v2213_v5, %v1239_v1  ;;  %v1315_v5 = vmul.f32 %v2229_v29, %v2229_v29 }
 0x14b   : > { %v1241_v7 = vadd.f32 %v1240_v6, %v2227_v24  ;;  %v1374_v10 = vadd.f32 %v1373_v4, %v1311_v45  ;;  %v1316_v24 = vmul.f32 %v2243_v52, %v2243_v52  ;;  %v1329_v6 = vmul.f32 %v2297_v32, %v2297_v32 }
 0x14d   : > { %v1375_v11 = vadd.f32 %v1374_v10, %v1312_v0  ;;  %v1242_v9 = vadd.f32 %v1241_v7, %v2233_v33 }
 0x14f   : > { %v1243_v13 = vadd.f32 %v2225_v22, %v1242_v9  ;;  %v1376_v17 = vadd.f32 %v1375_v11, %v1313_v12  ;;  %v1318_v22 = vmul.f32 %v2241_v49, %v2241_v49  ;;  %v1332_v11 = vmul.f32 %v2307_v58, %v2307_v58 }
 0x151   : > { %v1377_v19 = vadd.f32 %v1376_v17, %v1314_v62  ;;  %v1244_v20 = vadd.f32 %v2229_v29, %v1243_v13  ;;  %v1319_v29 = vmul.f32 %v2245_v57, %v2245_v57  ;;  %v1334_v13 = vmul.f32 %v2305_v54, %v2305_v54 }
 0x153   : > { %v1245_v23 = vadd.f32 %v1244_v20, %v2243_v52  ;;  %v1378_v25 = vadd.f32 %v1377_v19, %v1315_v5  ;;  %v1320_v52 = vmul.f32 %v2259_v16, %v2259_v16 }
 0x155   : > { %v1379_v28 = vadd.f32 %v1378_v25, %v1316_v24  ;;  %v1246_v33 = vadd.f32 %v1245_v23, %v2249_v61 }
 0x157   : > { %v1247_v31 = vadd.f32 %v2241_v49, %v1246_v33  ;;  %v1380_v34 = vadd.f32 %v1379_v28, %v1317_v30  ;;  %v1322_v49 = vmul.f32 %v2257_v14, %v2257_v14 }
 0x159   : > { %v1381_v35 = vadd.f32 %v1380_v34, %v1318_v22  ;;  %v1248_v36 = vadd.f32 %v2245_v57, %v1247_v31  ;;  %v1323_v57 = vmul.f32 %v2261_v21, %v2261_v21 }
 0x15b   : > { %v1249_v37 = vadd.f32 %v1248_v36, %v2259_v16  ;;  %v1382_v38 = vadd.f32 %v1381_v35, %v1319_v29  ;;  %v1324_v16 = vmul.f32 %v2275_v47, %v2275_v47 }
 0x15d   : > { %v1383_v39 = vadd.f32 %v1382_v38, %v1320_v52  ;;  %v1250_v61 = vadd.f32 %v1249_v37, %v2265_v27 }
 0x15f   : > { %v1251_v42 = vadd.f32 %v2257_v14, %v1250_v61  ;;  %v1384_v46 = vadd.f32 %v1383_v39, %v1321_v40  ;;  %v1326_v14 = vmul.f32 %v2273_v44, %v2273_v44 }
 0x161   : > { %v1385_v48 = vadd.f32 %v1384_v46, %v1322_v49  ;;  %v1252_v51 = vadd.f32 %v2261_v21, %v1251_v42  ;;  %v1327_v21 = vmul.f32 %v2277_v55, %v2277_v55 }
 0x163   : > { %v1253_v43 = vadd.f32 %v1252_v51, %v2275_v47  ;;  %v1386_v53 = vadd.f32 %v1385_v48, %v1323_v57  ;;  %v1328_v47 = vmul.f32 %v2291_v18, %v2291_v18 }
 0x165   : > { %v1387_v56 = vadd.f32 %v1386_v53, %v1324_v16  ;;  %v1254_v27 = vadd.f32 %v1253_v43, %v2281_v60 }
 0x167   : > { %v1255_v50 = vadd.f32 %v2273_v44, %v1254_v27  ;;  %v1388_v63 = vadd.f32 %v1387_v56, %v1325_v59  ;;  %v1330_v44 = vmul.f32 %v2289_v15, %v2289_v15 }
 0x169   : > { %v1389_v41 = vadd.f32 %v1388_v63, %v1326_v14  ;;  %v1256_v1 = vadd.f32 %v2277_v55, %v1255_v50  ;;  %v1331_v55 = vmul.f32 %v2293_v26, %v2293_v26 }
 0x16b   : > { %v1257_v2 = vadd.f32 %v1256_v1, %v2291_v18  ;;  %v1390_v45 = vadd.f32 %v1389_v41, %v1327_v21 }
 0x16d   : > { %v1391_v4 = vadd.f32 %v1390_v45, %v1328_v47  ;;  %v1258_v60 = vadd.f32 %v1257_v2, %v2297_v32 }
 0x16f   : > { %v1259_v0 = vadd.f32 %v2289_v15, %v1258_v60  ;;  %v1392_v7 = vadd.f32 %v1391_v4, %v1329_v6  ;;  %v1333_v15 = vmul.f32 %v2313_v8, %v2313_v8 }
 0x171   : > { %v1393_v10 = vadd.f32 %v1392_v7, %v1330_v44  ;;  %v1260_v18 = vadd.f32 %v2293_v26, %v1259_v0  ;;  %v1335_v26 = vmul.f32 %v2309_v3, %v2309_v3 }
 0x173   : > { %v1261_v9 = vadd.f32 %v1260_v18, %v2307_v58  ;;  %v1394_v12 = vadd.f32 %v1393_v10, %v1331_v55 }
 0x175   : > { %v1395_v32 = vadd.f32 %v1394_v12, %v1332_v11  ;;  %v1262_v62 = vadd.f32 %v1261_v9, %v2313_v8 }
 0x177   : > { %v1263_v17 = vadd.f32 %v2305_v54, %v1262_v62  ;;  %v1396_v5 = vadd.f32 %v1395_v32, %v1333_v15 }
 0x179   : > { %v1264_v19 = vadd.f32 %v2309_v3, %v1263_v17  ;;  %v1397_v58 = vadd.f32 %v1396_v5, %v1334_v13 }
 0x17b   : > { %v1265_v20 = vrot.slane %v1264_v19, 4  ;;  %v1398_v24 = vadd.f32 %v1397_v58, %v1335_v26 }
 0x17d   : > { %v1266_v23 = vadd.f32 %v1265_v20, %v1264_v19  ;;  %v1399_v25 = vrot.slane %v1398_v24, 4 }
 0x17f   : > { %v1267_v28 = vrot.slane %v1266_v23, 2  ;;  %v1400_v33 = vadd.f32 %v1399_v25, %v1398_v24 }
 0x181   : > { %v1268_v8 = vadd.f32 %v1267_v28, %v1266_v23  ;;  %v1401_v30 = vrot.slane %v1400_v33, 2 }
 0x183   : > { %v1269_v22 = vrot.slane %v1268_v8, 1  ;;  %v1402_v31 = vadd.f32 %v1401_v30, %v1400_v33 }
 0x185   : > { %v1270_v54 = vadd.f32 %v1269_v22, %v1268_v8  ;;  %v1403_v34 = vrot.slane %v1402_v31, 1 }
 0x187   : > { %1271 = vst [vmem:[%s268_s23] sm:$0x1] %v1270_v54  ;;  %v1404_v3 = vadd.f32 %v1403_v34, %v1402_v31 }
 0x189   : > { %1405 = vst [vmem:[%s271_s26] sm:$0x1] %v1404_v3 }
 0x18a PF: > { %s17_s21 = sadd.s32 1, %s2072_s21  }
 0x18b   : > { %p14_p5 = scmp.ge.s32.totalorder %s17_s21, 6  }
 0x18d   :  { %16 = sbr.rel (!%p14_p5) target bundleno = 1 (0x1), region = 90 }

// kernel: _lambda_.22
= control target key start
LH: loop header
LB: loop body
LE: loop exit
PB: predicated region body
PF: predicated region fallthrough
CT: control target
= control target key end

     0   :  { %s2316_s21 = smov 0   ;;  %s2807_s0 = inlined_call_operand.vmem [shape: bf16[2048,128], index: 0, kind: input, shape index: {}]   ;;  %s2808_s1 = inlined_call_operand.vmem [shape: bf16[128,128], index: 1, kind: input, shape index: {}]   ;;  %s2809_s2 = inlined_call_operand.vmem [shape: f32[1,128], index: 2, kind: input, shape index: {}]   ;;  %s2810_s3 = inlined_call_operand.vmem [shape: f32[1,128], index: 3, kind: input, shape index: {}]   ;;  %s2811_s4 = inlined_call_operand.vmem [shape: bf16[2048,128], index: 4, kind: output, shape index: {0}]   ;;  %s2812_s5 = inlined_call_operand.vmem [shape: f32[4,1,128], index: 5, kind: output, shape index: {1}]   ;;  %s2813_s6 = inlined_call_operand.vmem [shape: f32[4,1,128], index: 6, kind: output, shape index: {2}]  }
   0x1 LB: > { %s2322_s22 = sadd.s32 4294967295, %s2279_s21   ;;  %p1626_p0 = scmp.ge.s32.totalorder %s2279_s21, 1  ;;  %s2279_s21 = sphi %s2316_s21, %s17_s21  }
   0x2   : > { %p218_p1 = scmp.lt.s32.totalorder %s2279_s21, 5 }
   0x4   : > { %p219_p2 = pnand %p1626_p0, %p218_p1 }
   0x5   : > { %v2265_v0 = vld [vmem:[%s2808_s1] sm:$0xff] (!%p219_p2)   ;;  %s1627_s25 = sshll.u32 (!%p219_p2), %s2322_s22, 6  ;;  %v2266_v1 = vld [vmem:[%s2808_s1 + $0x8] sm:$0xff] (!%p219_p2)   ;;  %v2267_v2 = vld [vmem:[%s2808_s1 + $0x10] sm:$0xff] (!%p219_p2)   ;;  %p266_p4 = scmp.lt.s32.totalorder (!%p219_p2), %s2322_s22, 3 }
   0x6   : > { %222 = sbr.rel (%p219_p2) target bundleno = 394 (0x18a), region = 36  ;;  %p255_p3 = scmp.lt.s32.totalorder (!%p219_p2), %s1627_s25, 255  ;;  %2161 = vmatprep.subr.bf16.mxu0 (!%p219_p2), %v2265_v0  ;;  %2241 = vmatprep.subr.bf16.mxu1 (!%p219_p2), %v2265_v0  ;;  %v2268_v3 = vld [vmem:[%s2808_s1 + $0x18] sm:$0xff] (!%p219_p2)   ;;  %v2353_v5 = vld [vmem:[%s2809_s2] ss:$0 sm:$0xff] (!%p219_p2)  ;;  %v2270_v22 = vld [vmem:[%s2808_s1 + $0x28] sm:$0xff] (!%p219_p2)  }
   0x7   : > { %2162 = vmatpush3.bf16.msra.mxu0 (!%p219_p2), %v2265_v0  ;;  %2249 = vmatpush3.bf16.msra.mxu1 (!%p219_p2), %v2265_v0  ;;  %v2360_v10 = vld [vmem:[%s2810_s3] ss:$0 sm:$0xff] (!%p219_p2)  ;;  %v2271_v31 = vld [vmem:[%s2808_s1 + $0x30] sm:$0xff] (!%p219_p2)   ;;  %v2272_v43 = vld [vmem:[%s2808_s1 + $0x38] sm:$0xff] (!%p219_p2)  }
   0x8   : > { %2163 = vmatprep.subr.bf16.mxu0 (!%p219_p2), %v2266_v1  ;;  %2242 = vmatprep.subr.bf16.mxu1 (!%p219_p2), %v2266_v1  ;;  %v2269_v13 = vld [vmem:[%s2808_s1 + $0x20] sm:$0xff] (!%p219_p2)  }
   0xb   : > { %2164 = vmatpush3.bf16.msra.mxu0 (!%p219_p2), %v2266_v1  ;;  %2250 = vmatpush3.bf16.msra.mxu1 (!%p219_p2), %v2266_v1 }
   0xc   : > { %2165 = vmatprep.subr.bf16.mxu0 (!%p219_p2), %v2267_v2  ;;  %2243 = vmatprep.subr.bf16.mxu1 (!%p219_p2), %v2267_v2 }
   0xd   : > { %s2815_s25 = smov (!%p255_p3, %s1627_s25), 255  ;;  %s2817_s22 = smov (!%p266_p4, %s2322_s22), 3 }
   0xe   : > { %s1628_s30 = sshll.u32 %s2815_s25, 2  ;;  %s268_s7 = scalar_lea.vmem %s2812_s5, %s2817_s22 }
   0xf   : > { %s2344_s9 = scalar_lea.vmem %s2807_s0, %s1628_s30  ;;  %2166 = vmatpush3.bf16.msra.mxu0 %v2267_v2  ;;  %2251 = vmatpush3.bf16.msra.mxu1 %v2267_v2  ;;  %s2570_s29 = scalar_lea.vmem %s2811_s4, %s1628_s30 }
  0x10   : > { %v1772_v4 = vld [vmem:[%s2344_s9] sm:$0xff]   ;;  %v2059_v8 = vld [vmem:[%s2344_s9 + $0x8] sm:$0xff]   ;;  %v2060_v9 = vld [vmem:[%s2344_s9 + $0x10] sm:$0xff]   ;;  %2167 = vmatprep.subr.bf16.mxu0 %v2268_v3  ;;  %2244 = vmatprep.subr.bf16.mxu1 %v2268_v3  ;;  %s271_s10 = scalar_lea.vmem %s2813_s6, %s2817_s22 }
  0x11   : > { %v1773_v6 = vunpack.c.l.bf16 %v1772_v4  ;;  %v1774_v7 = vunpack.c.h.bf16 %v1772_v4  ;;  %v1777_v14 = vunpack.c.l.bf16 %v2059_v8  ;;  %v1778_v15 = vunpack.c.h.bf16 %v2059_v8  ;;  %v2061_v26 = vld [vmem:[%s2344_s9 + $0x18] sm:$0xff]   ;;  %v2062_v29 = vld [vmem:[%s2344_s9 + $0x20] sm:$0xff]   ;;  %v2063_v38 = vld [vmem:[%s2344_s9 + $0x28] sm:$0xff]  }
  0x12   : > { %v1781_v16 = vunpack.c.l.bf16 %v2060_v9  ;;  %v1782_v19 = vunpack.c.h.bf16 %v2060_v9  ;;  %v1785_v30 = vunpack.c.l.bf16 %v2061_v26  ;;  %v1786_v35 = vunpack.c.h.bf16 %v2061_v26  ;;  %v2064_v41 = vld [vmem:[%s2344_s9 + $0x30] sm:$0xff]   ;;  %v2065_v42 = vld [vmem:[%s2344_s9 + $0x38] sm:$0xff]   ;;  %v2066_v48 = vld [vmem:[%s2344_s9 + $0x40] sm:$0xff]  }
  0x13   : > { %v408_v11 = vmul.f32 %v1773_v6, %v2353_v5  ;;  %v409_v12 = vmul.f32 %v1774_v7, %v2353_v5  ;;  %2168 = vmatpush3.bf16.msra.mxu0 %v2268_v3  ;;  %2252 = vmatpush3.bf16.msra.mxu1 %v2268_v3  ;;  %v410_v23 = vmul.f32 %v1777_v14, %v2353_v5  ;;  %v1789_v37 = vunpack.c.l.bf16 %v2062_v29  ;;  %v2067_v63 = vld [vmem:[%s2344_s9 + $0x48] sm:$0xff]   ;;  %v2068_v4 = vld [vmem:[%s2344_s9 + $0x50] sm:$0xff]  }
  0x14   : > { %2169 = vmatprep.subr.bf16.mxu0 %v2269_v13  ;;  %v411_v24 = vmul.f32 %v1778_v15, %v2353_v5  ;;  %v412_v25 = vmul.f32 %v1781_v16, %v2353_v5  ;;  %2245 = vmatprep.subr.bf16.mxu1 %v2269_v13  ;;  %v413_v28 = vmul.f32 %v1782_v19, %v2353_v5  ;;  %v1790_v40 = vunpack.c.h.bf16 %v2062_v29 }
  0x15   : > { %v479_v17 = vadd.f32 %v2360_v10, %v408_v11  ;;  %v480_v18 = vadd.f32 %v2360_v10, %v409_v12  ;;  %v481_v32 = vadd.f32 %v2360_v10, %v410_v23  ;;  %v414_v39 = vmul.f32 %v1785_v30, %v2353_v5  ;;  %v2069_v23 = vld [vmem:[%s2344_s9 + $0x58] sm:$0xff]  }
  0x16   : > { %v482_v33 = vadd.f32 %v2360_v10, %v411_v24  ;;  %v483_v34 = vadd.f32 %v2360_v10, %v412_v25  ;;  %v484_v36 = vadd.f32 %v2360_v10, %v413_v28  ;;  %v415_v47 = vmul.f32 %v1786_v35, %v2353_v5 }
  0x17   : > { %v543_v20 = vmax.f32 %v479_v17, 0.0  ;;  %v544_v21 = vmax.f32 %v480_v18, 0.0  ;;  %2170 = vmatpush3.bf16.msra.mxu0 %v2269_v13  ;;  %2253 = vmatpush3.bf16.msra.mxu1 %v2269_v13  ;;  %v545_v44 = vmax.f32 %v481_v32, 0.0  ;;  %v416_v50 = vmul.f32 %v1789_v37, %v2353_v5 }
  0x18   : > { %2171 = vmatprep.subr.bf16.mxu0 %v2270_v22  ;;  %2246 = vmatprep.subr.bf16.mxu1 %v2270_v22  ;;  %v546_v45 = vmax.f32 %v482_v33, 0.0  ;;  %v547_v46 = vmax.f32 %v483_v34, 0.0  ;;  %v548_v49 = vmax.f32 %v484_v36, 0.0  ;;  %v1793_v51 = vunpack.c.l.bf16 %v2063_v38 }
  0x19   : > { %v607_v27 = vpack.c.bf16 %v544_v21, %v543_v20  ;;  %v1794_v52 = vunpack.c.h.bf16 %v2063_v38  ;;  %v1797_v53 = vunpack.c.l.bf16 %v2064_v41  ;;  %v1798_v54 = vunpack.c.h.bf16 %v2064_v41 }
  0x1a   : > { %v1801_v55 = vunpack.c.l.bf16 %v2065_v42  ;;  %v1802_v56 = vunpack.c.h.bf16 %v2065_v42  ;;  %v417_v57 = vmul.f32 %v1790_v40, %v2353_v5  ;;  %v1805_v58 = vunpack.c.l.bf16 %v2066_v48 }
  0x1b   : > { %2177 = vmatprep.mubr.bf16.mxu0 %v607_v27  ;;  %2172 = vmatpush3.bf16.msra.mxu0 %v2270_v22  ;;  %v1806_v59 = vunpack.c.h.bf16 %v2066_v48  ;;  %v608_v60 = vpack.c.bf16 %v546_v45, %v545_v44  ;;  %v485_v61 = vadd.f32 %v2360_v10, %v414_v39  ;;  %v486_v62 = vadd.f32 %v2360_v10, %v415_v47  ;;  %v2074_v44 = vld [vmem:[%s2344_s9 + $0x80] sm:$0xff]  }
  0x1c   : > { %2173 = vmatprep.subr.bf16.mxu0 %v2271_v31  ;;  %2254 = vmatpush3.bf16.msra.mxu1 %v2270_v22  ;;  %v609_v0 = vpack.c.bf16 %v548_v49, %v547_v46  ;;  %v487_v1 = vadd.f32 %v2360_v10, %v416_v50  ;;  %v418_v2 = vmul.f32 %v1793_v51, %v2353_v5  ;;  %v1809_v14 = vunpack.c.l.bf16 %v2067_v63 }
  0x1d   : > { %2247 = vmatprep.subr.bf16.mxu1 %v2271_v31  ;;  %v419_v3 = vmul.f32 %v1794_v52, %v2353_v5  ;;  %v420_v6 = vmul.f32 %v1797_v53, %v2353_v5  ;;  %v421_v7 = vmul.f32 %v1798_v54, %v2353_v5  ;;  %v422_v8 = vmul.f32 %v1801_v55, %v2353_v5  ;;  %v2431_v52 = vld [vmem:[%s2344_s9 + $0x60] sm:$0xff]  }
  0x1e   : > { %v423_v9 = vmul.f32 %v1802_v56, %v2353_v5  ;;  %v488_v11 = vadd.f32 %v2360_v10, %v417_v57  ;;  %v424_v12 = vmul.f32 %v1805_v58, %v2353_v5  ;;  %v425_v13 = vmul.f32 %v1806_v59, %v2353_v5  ;;  %v2075_v59 = vld [vmem:[%s2344_s9 + $0x88] sm:$0xff]  }
  0x1f   : > { %2174 = vmatpush3.bf16.msra.mxu0 %v2271_v31  ;;  %v549_v15 = vmax.f32 %v485_v61, 0.0  ;;  %v550_v16 = vmax.f32 %v486_v62, 0.0  ;;  %v1810_v17 = vunpack.c.h.bf16 %v2067_v63  ;;  %v1813_v18 = vunpack.c.l.bf16 %v2068_v4 }
  0x20   : > { %2175 = vmatprep.subr.bf16.mxu0 %v2272_v43  ;;  %2255 = vmatpush3.bf16.msra.mxu1 %v2271_v31  ;;  %v551_v19 = vmax.f32 %v487_v1, 0.0  ;;  %v489_v20 = vadd.f32 %v2360_v10, %v418_v2  ;;  %v490_v21 = vadd.f32 %v2360_v10, %v419_v3  ;;  %v1814_v22 = vunpack.c.h.bf16 %v2068_v4 }
  0x21   : > { %2248 = vmatprep.subr.bf16.mxu1 %v2272_v43  ;;  %v491_v24 = vadd.f32 %v2360_v10, %v420_v6  ;;  %v492_v25 = vadd.f32 %v2360_v10, %v421_v7  ;;  %v493_v26 = vadd.f32 %v2360_v10, %v422_v8  ;;  %v494_v27 = vadd.f32 %v2360_v10, %v423_v9 }
  0x22   : > { %v552_v28 = vmax.f32 %v488_v11, 0.0  ;;  %v495_v29 = vadd.f32 %v2360_v10, %v424_v12  ;;  %v496_v30 = vadd.f32 %v2360_v10, %v425_v13  ;;  %v426_v31 = vmul.f32 %v1809_v14, %v2353_v5  ;;  %v2077_v11 = vld [vmem:[%s2344_s9 + $0x98] sm:$0xff]  }
  0x23   : > { %2176 = vmatpush3.bf16.msra.mxu0 %v2272_v43  ;;  %v610_v32 = vpack.c.bf16 %v550_v16, %v549_v15  ;;  %v427_v33 = vmul.f32 %v1810_v17, %v2353_v5  ;;  %v428_v34 = vmul.f32 %v1813_v18, %v2353_v5  ;;  %v1817_v35 = vunpack.c.l.bf16 %v2069_v23 }
  0x24   : > { %2256 = vmatpush3.bf16.msra.mxu1 %v2272_v43  ;;  %v553_v36 = vmax.f32 %v489_v20, 0.0  ;;  %v554_v37 = vmax.f32 %v490_v21, 0.0  ;;  %v429_v38 = vmul.f32 %v1814_v22, %v2353_v5  ;;  %v1818_v39 = vunpack.c.h.bf16 %v2069_v23 }
  0x25   : > { %v555_v40 = vmax.f32 %v491_v24, 0.0  ;;  %v556_v41 = vmax.f32 %v492_v25, 0.0  ;;  %v557_v42 = vmax.f32 %v493_v26, 0.0  ;;  %v558_v43 = vmax.f32 %v494_v27, 0.0  ;;  %v2078_v24 = vld [vmem:[%s2344_s9 + $0xa0] sm:$0xff]  }
  0x26   : > { %2178 = vmatmul.mubr.bf16.vlgmr.msra.gmra.mrb[0].mxu0 %v608_v60  ;;  %v611_v45 = vpack.c.bf16 %v552_v28, %v551_v19  ;;  %v559_v46 = vmax.f32 %v495_v29, 0.0  ;;  %v560_v47 = vmax.f32 %v496_v30, 0.0  ;;  %v497_v48 = vadd.f32 %v2360_v10, %v426_v31 }
  0x27   : > { %2181 = vmatprep.mubr.bf16.mxu0 %v609_v0  ;;  %v498_v49 = vadd.f32 %v2360_v10, %v427_v33  ;;  %v2427_v50 = vadd.f32 %v2360_v10, %v428_v34  ;;  %v430_v51 = vmul.f32 %v1817_v35, %v2353_v5  ;;  %v2434_v53 = vadd.f32 %v2360_v10, %v429_v38  ;;  %v2076_v0 = vld [vmem:[%s2344_s9 + $0x90] sm:$0xff]   ;;  %v2079_v33 = vld [vmem:[%s2344_s9 + $0xa8] sm:$0xff]  }
  0x28   : > { %v431_v54 = vmul.f32 %v1818_v39, %v2353_v5  ;;  %v1837_v55 = vunpack.c.l.bf16 %v2074_v44  ;;  %v612_v56 = vpack.c.bf16 %v554_v37, %v553_v36  ;;  %v613_v57 = vpack.c.bf16 %v556_v41, %v555_v40 }
  0x29   : > { %v2437_v58 = vpack.c.bf16 %v558_v43, %v557_v42  ;;  %v2440_v60 = vpack.c.bf16 %v560_v47, %v559_v46  ;;  %v561_v61 = vmax.f32 %v497_v48, 0.0  ;;  %v1821_v62 = vunpack.c.l.bf16 %v2431_v52  ;;  %v2080_v46 = vld [vmem:[%s2344_s9 + $0xb0] sm:$0xff]   ;;  %v2071_v47 = vld [vmem:[%s2344_s9 + $0x68] sm:$0xff]  }
  0x2a   : > { %v1838_v63 = vunpack.c.h.bf16 %v2074_v44  ;;  %v562_v1 = vmax.f32 %v498_v49, 0.0  ;;  %v563_v2 = vmax.f32 %v2427_v50, 0.0  ;;  %v2446_v3 = vadd.f32 %v2360_v10, %v430_v51 }
  0x2b   : > { %v440_v4 = vmul.f32 %v1837_v55, %v2353_v5  ;;  %v564_v6 = vmax.f32 %v2434_v53, 0.0  ;;  %v2451_v7 = vadd.f32 %v2360_v10, %v431_v54  ;;  %v1841_v9 = vunpack.c.l.bf16 %v2075_v59 }
  0x2c   : > { %v441_v8 = vmul.f32 %v1838_v63, %v2353_v5  ;;  %v1822_v12 = vunpack.c.h.bf16 %v2431_v52  ;;  %v1842_v14 = vunpack.c.h.bf16 %v2075_v59  ;;  %v1845_v15 = vunpack.c.l.bf16 %v2076_v0 }
  0x2d   : > { %v511_v13 = vadd.f32 %v2360_v10, %v440_v4  ;;  %v2458_v16 = vmul.f32 %v1821_v62, %v2353_v5  ;;  %v442_v18 = vmul.f32 %v1841_v9, %v2353_v5  ;;  %v1846_v19 = vunpack.c.h.bf16 %v2076_v0 }
  0x2e   : > { %2182 = vmatmul.mubr.bf16.gmra.mrb[4].mxu0 %v610_v32  ;;  %v512_v17 = vadd.f32 %v2360_v10, %v441_v8  ;;  %v443_v21 = vmul.f32 %v1842_v14, %v2353_v5  ;;  %v444_v22 = vmul.f32 %v1845_v15, %v2353_v5  ;;  %v1849_v23 = vunpack.c.l.bf16 %v2077_v11 }
  0x2f   : > { %2185 = vmatprep.mubr.bf16.mxu0 %v611_v45  ;;  %v575_v20 = vmax.f32 %v511_v13, 0.0  ;;  %v2465_v25 = vpack.c.bf16 %v562_v1, %v561_v61  ;;  %v513_v27 = vadd.f32 %v2360_v10, %v442_v18  ;;  %v445_v28 = vmul.f32 %v1846_v19, %v2353_v5  ;;  %v2081_v1 = vld [vmem:[%s2344_s9 + $0xb8] sm:$0xff]   ;;  %v2082_v18 = vld [vmem:[%s2344_s9 + $0xc0] sm:$0xff]   ;;  %v2072_v19 = vld [vmem:[%s2344_s9 + $0x70] sm:$0xff]  }
  0x30   : > { %v576_v26 = vmax.f32 %v512_v17, 0.0  ;;  %v514_v29 = vadd.f32 %v2360_v10, %v443_v21  ;;  %v515_v30 = vadd.f32 %v2360_v10, %v444_v22  ;;  %v1850_v31 = vunpack.c.h.bf16 %v2077_v11 }
  0x31   : > { %v446_v32 = vmul.f32 %v1849_v23, %v2353_v5  ;;  %v577_v35 = vmax.f32 %v513_v27, 0.0  ;;  %v516_v36 = vadd.f32 %v2360_v10, %v445_v28  ;;  %v1853_v37 = vunpack.c.l.bf16 %v2078_v24 }
  0x32   : > { %v623_v34 = vpack.c.bf16 %v576_v26, %v575_v20  ;;  %v578_v38 = vmax.f32 %v514_v29, 0.0  ;;  %v579_v39 = vmax.f32 %v515_v30, 0.0  ;;  %v447_v40 = vmul.f32 %v1850_v31, %v2353_v5 }
  0x33   : > { %v517_v41 = vadd.f32 %v2360_v10, %v446_v32  ;;  %v580_v42 = vmax.f32 %v516_v36, 0.0  ;;  %v1854_v43 = vunpack.c.h.bf16 %v2078_v24  ;;  %v448_v44 = vmul.f32 %v1853_v37, %v2353_v5 }
  0x34   : > { %2209 = vmatprep.mubr.bf16.mxu1 %v623_v34  ;;  %v1857_v45 = vunpack.c.l.bf16 %v2079_v33  ;;  %v624_v48 = vpack.c.bf16 %v578_v38, %v577_v35  ;;  %v518_v49 = vadd.f32 %v2360_v10, %v447_v40  ;;  %v1858_v54 = vunpack.c.h.bf16 %v2079_v33  ;;  %v2073_v33 = vld [vmem:[%s2344_s9 + $0x78] sm:$0xff]   ;;  %v2084_v40 = vld [vmem:[%s2344_s9 + $0xd0] sm:$0xff]  }
  0x35   : > { %v581_v51 = vmax.f32 %v517_v41, 0.0  ;;  %v625_v55 = vpack.c.bf16 %v580_v42, %v579_v39  ;;  %v1861_v63 = vunpack.c.l.bf16 %v2080_v46  ;;  %v1862_v0 = vunpack.c.h.bf16 %v2080_v46 }
  0x36   : > { %2186 = vmatmul.mubr.bf16.gmra.mrb[8].mxu0 %v612_v56  ;;  %v449_v56 = vmul.f32 %v1854_v43, %v2353_v5  ;;  %v450_v59 = vmul.f32 %v1857_v45, %v2353_v5  ;;  %2210 = vmatmul.mubr.bf16.vlgmr.msra.gmra.mrb[0].mxu1 %v624_v48  ;;  %v582_v61 = vmax.f32 %v518_v49, 0.0  ;;  %v451_v62 = vmul.f32 %v1858_v54, %v2353_v5 }
  0x37   : > { %2189 = vmatprep.mubr.bf16.mxu0 %v613_v57  ;;  %v519_v57 = vadd.f32 %v2360_v10, %v448_v44  ;;  %v565_v4 = vmax.f32 %v2446_v3, 0.0  ;;  %v1825_v8 = vunpack.c.l.bf16 %v2071_v47  ;;  %2213 = vmatprep.mubr.bf16.mxu1 %v625_v55  ;;  %v566_v13 = vmax.f32 %v2451_v7, 0.0 }
  0x38   : > { %v520_v9 = vadd.f32 %v2360_v10, %v449_v56  ;;  %v1826_v14 = vunpack.c.h.bf16 %v2071_v47  ;;  %v452_v15 = vmul.f32 %v1861_v63, %v2353_v5  ;;  %v453_v17 = vmul.f32 %v1862_v0, %v2353_v5 }
  0x39   : > { %v583_v11 = vmax.f32 %v519_v57, 0.0  ;;  %v433_v3 = vmul.f32 %v1822_v12, %v2353_v5  ;;  %v1865_v21 = vunpack.c.l.bf16 %v2081_v1  ;;  %v1866_v22 = vunpack.c.h.bf16 %v2081_v1 }
  0x3a   : > { %v584_v20 = vmax.f32 %v520_v9, 0.0  ;;  %v521_v7 = vadd.f32 %v2360_v10, %v450_v59  ;;  %v522_v23 = vadd.f32 %v2360_v10, %v451_v62  ;;  %v523_v24 = vadd.f32 %v2360_v10, %v452_v15  ;;  %v2085_v15 = vld [vmem:[%s2344_s9 + $0xd8] sm:$0xff]  }
  0x3b   : > { %v524_v27 = vadd.f32 %v2360_v10, %v453_v17  ;;  %v1870_v28 = vunpack.c.h.bf16 %v2082_v18  ;;  %v617_v52 = vpack.c.bf16 %v564_v6, %v563_v2  ;;  %v503_v12 = vadd.f32 %v2360_v10, %v2458_v16  ;;  %v2083_v6 = vld [vmem:[%s2344_s9 + $0xc8] sm:$0xff]  }
  0x3c   : > { %v627_v26 = vpack.c.bf16 %v584_v20, %v583_v11  ;;  %v1829_v29 = vunpack.c.l.bf16 %v2072_v19  ;;  %v1830_v30 = vunpack.c.h.bf16 %v2072_v19  ;;  %v504_v31 = vadd.f32 %v2360_v10, %v433_v3 }
  0x3d   : > { %v434_v32 = vmul.f32 %v1825_v8, %v2353_v5  ;;  %v454_v34 = vmul.f32 %v1865_v21, %v2353_v5  ;;  %v455_v35 = vmul.f32 %v1866_v22, %v2353_v5  ;;  %v618_v36 = vpack.c.bf16 %v566_v13, %v565_v4 }
  0x3e   : > { %2190 = vmatmul.mubr.bf16.gmra.mrb[12].mxu0 %v2437_v58  ;;  %v626_v58 = vpack.c.bf16 %v582_v61, %v581_v51  ;;  %v435_v50 = vmul.f32 %v1826_v14, %v2353_v5  ;;  %v585_v53 = vmax.f32 %v521_v7, 0.0  ;;  %v586_v2 = vmax.f32 %v522_v23, 0.0 }
  0x3f   : > { %2193 = vmatprep.mubr.bf16.mxu0 %v2440_v60  ;;  %v1869_v60 = vunpack.c.l.bf16 %v2082_v18  ;;  %v587_v16 = vmax.f32 %v523_v24, 0.0  ;;  %v588_v37 = vmax.f32 %v524_v27, 0.0  ;;  %v457_v39 = vmul.f32 %v1870_v28, %v2353_v5 }
  0x40   : > { %2214 = vmatmul.mubr.bf16.gmra.mrb[4].mxu1 %v626_v58  ;;  %v567_v41 = vmax.f32 %v503_v12, 0.0  ;;  %v436_v42 = vmul.f32 %v1829_v29, %v2353_v5  ;;  %v437_v43 = vmul.f32 %v1830_v30, %v2353_v5  ;;  %v1833_v44 = vunpack.c.l.bf16 %v2073_v33  ;;  %v2086_v58 = vld [vmem:[%s2344_s9 + $0xe0] sm:$0xff]  }
  0x41   : > { %2217 = vmatprep.mubr.bf16.mxu1 %v627_v26  ;;  %v456_v38 = vmul.f32 %v1869_v60, %v2353_v5  ;;  %v568_v45 = vmax.f32 %v504_v31, 0.0  ;;  %v525_v46 = vadd.f32 %v2360_v10, %v454_v34  ;;  %v526_v47 = vadd.f32 %v2360_v10, %v455_v35 }
  0x42   : > { %v1873_v48 = vunpack.c.l.bf16 %v2083_v6  ;;  %v628_v49 = vpack.c.bf16 %v586_v2, %v585_v53  ;;  %v1874_v51 = vunpack.c.h.bf16 %v2083_v6  ;;  %v1877_v54 = vunpack.c.l.bf16 %v2084_v40 }
  0x43   : > { %v1878_v55 = vunpack.c.h.bf16 %v2084_v40  ;;  %v505_v56 = vadd.f32 %v2360_v10, %v434_v32  ;;  %v527_v57 = vadd.f32 %v2360_v10, %v456_v38  ;;  %v528_v59 = vadd.f32 %v2360_v10, %v457_v39 }
  0x44   : > { %v506_v61 = vadd.f32 %v2360_v10, %v435_v50  ;;  %v507_v62 = vadd.f32 %v2360_v10, %v436_v42  ;;  %v508_v63 = vadd.f32 %v2360_v10, %v437_v43  ;;  %v1834_v0 = vunpack.c.h.bf16 %v2073_v33 }
  0x45   : > { %v619_v1 = vpack.c.bf16 %v568_v45, %v567_v41  ;;  %v589_v4 = vmax.f32 %v525_v46, 0.0  ;;  %v590_v8 = vmax.f32 %v526_v47, 0.0  ;;  %v458_v9 = vmul.f32 %v1873_v48, %v2353_v5  ;;  %v2088_v41 = vld [vmem:[%s2344_s9 + $0xf0] sm:$0xff]  }
  0x46   : > { %2194 = vmatmul.mubr.bf16.gmra.mrb[16].mxu0 %v2465_v25  ;;  %v629_v25 = vpack.c.bf16 %v588_v37, %v587_v16  ;;  %v459_v11 = vmul.f32 %v1874_v51, %v2353_v5  ;;  %v460_v13 = vmul.f32 %v1877_v54, %v2353_v5  ;;  %v461_v14 = vmul.f32 %v1878_v55, %v2353_v5  ;;  %v2087_v16 = vld [vmem:[%s2344_s9 + $0xe8] sm:$0xff]  }
  0x47   : > { %2197 = vmatprep.mubr.bf16.mxu0 %v617_v52  ;;  %v438_v17 = vmul.f32 %v1833_v44, %v2353_v5  ;;  %v591_v18 = vmax.f32 %v527_v57, 0.0  ;;  %v592_v3 = vmax.f32 %v528_v59, 0.0  ;;  %v569_v19 = vmax.f32 %v505_v56, 0.0 }
  0x48   : > { %2218 = vmatmul.mubr.bf16.gmra.mrb[8].mxu1 %v628_v49  ;;  %v570_v20 = vmax.f32 %v506_v61, 0.0  ;;  %v571_v21 = vmax.f32 %v507_v62, 0.0  ;;  %v439_v22 = vmul.f32 %v1834_v0, %v2353_v5  ;;  %v572_v7 = vmax.f32 %v508_v63, 0.0 }
  0x49   : > { %2221 = vmatprep.mubr.bf16.mxu1 %v629_v25  ;;  %v630_v23 = vpack.c.bf16 %v590_v8, %v589_v4  ;;  %v529_v24 = vadd.f32 %v2360_v10, %v458_v9  ;;  %v1881_v26 = vunpack.c.l.bf16 %v2085_v15  ;;  %v530_v27 = vadd.f32 %v2360_v10, %v459_v11 }
  0x4a   : > { %v531_v60 = vadd.f32 %v2360_v10, %v460_v13  ;;  %v532_v28 = vadd.f32 %v2360_v10, %v461_v14  ;;  %v1882_v52 = vunpack.c.h.bf16 %v2085_v15  ;;  %v631_v12 = vpack.c.bf16 %v592_v3, %v591_v18 }
  0x4b   : > { %v1885_v29 = vunpack.c.l.bf16 %v2086_v58  ;;  %v1886_v30 = vunpack.c.h.bf16 %v2086_v58  ;;  %v620_v31 = vpack.c.bf16 %v570_v20, %v569_v19  ;;  %v509_v32 = vadd.f32 %v2360_v10, %v438_v17 }
  0x4c   : > { %v510_v33 = vadd.f32 %v2360_v10, %v439_v22  ;;  %v621_v34 = vpack.c.bf16 %v572_v7, %v571_v21  ;;  %v593_v35 = vmax.f32 %v529_v24, 0.0  ;;  %v594_v50 = vmax.f32 %v530_v27, 0.0 }
  0x4d   : > { %v595_v53 = vmax.f32 %v531_v60, 0.0  ;;  %v596_v2 = vmax.f32 %v532_v28, 0.0  ;;  %v463_v6 = vmul.f32 %v1882_v52, %v2353_v5  ;;  %v464_v37 = vmul.f32 %v1885_v29, %v2353_v5 }
  0x4e   : > { %2198 = vmatmul.mubr.bf16.gmra.mrb[20].mxu0 %v618_v36  ;;  %v462_v36 = vmul.f32 %v1881_v26, %v2353_v5  ;;  %v465_v38 = vmul.f32 %v1886_v30, %v2353_v5  ;;  %v573_v39 = vmax.f32 %v509_v32, 0.0  ;;  %v574_v40 = vmax.f32 %v510_v33, 0.0 }
  0x4f   : > { %2201 = vmatprep.mubr.bf16.mxu0 %v619_v1  ;;  %v1889_v43 = vunpack.c.l.bf16 %v2087_v16  ;;  %v632_v44 = vpack.c.bf16 %v594_v50, %v593_v35  ;;  %v633_v45 = vpack.c.bf16 %v596_v2, %v595_v53  ;;  %v534_v46 = vadd.f32 %v2360_v10, %v463_v6  ;;  %v2089_v1 = vld [vmem:[%s2344_s9 + $0xf8] sm:$0xff]  }
  0x50   : > { %2222 = vmatmul.mubr.bf16.gmra.mrb[12].mxu1 %v630_v23  ;;  %v533_v42 = vadd.f32 %v2360_v10, %v462_v36  ;;  %v1890_v47 = vunpack.c.h.bf16 %v2087_v16  ;;  %v535_v48 = vadd.f32 %v2360_v10, %v464_v37  ;;  %v536_v49 = vadd.f32 %v2360_v10, %v465_v38 }
  0x51   : > { %2225 = vmatprep.mubr.bf16.mxu1 %v631_v12  ;;  %v1893_v51 = vunpack.c.l.bf16 %v2088_v41  ;;  %v1894_v54 = vunpack.c.h.bf16 %v2088_v41  ;;  %v622_v55 = vpack.c.bf16 %v574_v40, %v573_v39  ;;  %v466_v56 = vmul.f32 %v1889_v43, %v2353_v5 }
  0x52   : > { %v597_v25 = vmax.f32 %v533_v42, 0.0  ;;  %v598_v57 = vmax.f32 %v534_v46, 0.0  ;;  %v467_v59 = vmul.f32 %v1890_v47, %v2353_v5  ;;  %v599_v61 = vmax.f32 %v535_v48, 0.0 }
  0x53   : > { %v600_v62 = vmax.f32 %v536_v49, 0.0  ;;  %v468_v63 = vmul.f32 %v1893_v51, %v2353_v5  ;;  %v469_v0 = vmul.f32 %v1894_v54, %v2353_v5  ;;  %v537_v4 = vadd.f32 %v2360_v10, %v466_v56 }
  0x54   : > { %v634_v8 = vpack.c.bf16 %v598_v57, %v597_v25  ;;  %v538_v9 = vadd.f32 %v2360_v10, %v467_v59  ;;  %v1897_v11 = vunpack.c.l.bf16 %v2089_v1  ;;  %v1898_v13 = vunpack.c.h.bf16 %v2089_v1 }
  0x55   : > { %v635_v14 = vpack.c.bf16 %v600_v62, %v599_v61  ;;  %v539_v15 = vadd.f32 %v2360_v10, %v468_v63  ;;  %v540_v17 = vadd.f32 %v2360_v10, %v469_v0  ;;  %v601_v18 = vmax.f32 %v537_v4, 0.0 }
  0x56   : > { %2202 = vmatmul.mubr.bf16.gmra.mrb[24].mxu0 %v620_v31  ;;  %v602_v3 = vmax.f32 %v538_v9, 0.0  ;;  %v470_v19 = vmul.f32 %v1897_v11, %v2353_v5  ;;  %v471_v20 = vmul.f32 %v1898_v13, %v2353_v5 }
  0x57   : > { %2205 = vmatprep.mubr.bf16.mxu0 %v621_v34  ;;  %v603_v21 = vmax.f32 %v539_v15, 0.0  ;;  %v604_v22 = vmax.f32 %v540_v17, 0.0 }
  0x58   : > { %2226 = vmatmul.mubr.bf16.gmra.mrb[16].mxu1 %v632_v44  ;;  %v636_v58 = vpack.c.bf16 %v602_v3, %v601_v18  ;;  %v541_v7 = vadd.f32 %v2360_v10, %v470_v19  ;;  %v542_v23 = vadd.f32 %v2360_v10, %v471_v20 }
  0x59   : > { %2229 = vmatprep.mubr.bf16.mxu1 %v633_v45  ;;  %v637_v24 = vpack.c.bf16 %v604_v22, %v603_v21 }
  0x5a   : > { %v605_v26 = vmax.f32 %v541_v7, 0.0  ;;  %v606_v27 = vmax.f32 %v542_v23, 0.0 }
  0x5c   : > { %v638_v60 = vpack.c.bf16 %v606_v27, %v605_v26 }
  0x5e   : > { %2206 = vmatmul.mubr.bf16.gmra.mrb[28].mxu0 %v622_v55 }
  0x60   : > { %2230 = vmatmul.mubr.bf16.gmra.mrb[20].mxu1 %v634_v8 }
  0x61   : > { %2233 = vmatprep.mubr.bf16.mxu1 %v635_v14 }
  0x68   : > { %2234 = vmatmul.mubr.bf16.gmra.mrb[24].mxu1 %v636_v58 }
  0x69   : > { %2237 = vmatprep.mubr.bf16.mxu1 %v637_v24 }
  0x70   : > { %2238 = vmatmul.mubr.bf16.gmra.mrb[28].mxu1 %v638_v60 }
  0xf9   : > { %v2179_v28 = vpop.f32.mrb[0].mxu0 }
  0xfa   : > { %v737_v52 = vpop.f32.mrb[1].mxu0  ;;  %v1384_v33 = vmul.f32 %v2179_v28, %v2179_v28 }
  0xfb   : > { %v2180_v5 = vpop.f32.mrb[2].mxu0  ;;  %v1382_v29 = vmul.f32 %v737_v52, %v737_v52 }
  0xfc   : > { %v1907_v12 = vpack.c.bf16 %v2180_v5, %v2179_v28  ;;  %v740_v10 = vpop.f32.mrb[3].mxu0  ;;  %v1385_v36 = vmul.f32 %v2180_v5, %v2180_v5 }
  0xfd   : > { %v1902_v30 = vpack.c.bf16 %v740_v10, %v737_v52  ;;  %v1312_v31 = vadd.f32 %v740_v10, %v737_v52  ;;  %v1383_v32 = vmul.f32 %v740_v10, %v740_v10 }
  0xfe   : > { %2090 = vst [vmem:[%s2570_s29 + $0x8] sm:$0xff] %v1907_v12  }
  0xff   : > { %1903 = vst [vmem:[%s2570_s29] sm:$0xff] %v1902_v30   ;;  %v1313_v34 = vadd.f32 %v2179_v28, %v1312_v31  ;;  %v1446_v35 = vadd.f32 %v1383_v32, %v1382_v29 }
 0x101   : > { %v1447_v50 = vadd.f32 %v1446_v35, %v1384_v33  ;;  %v2183_v53 = vpop.f32.mrb[4].mxu0  ;;  %v1314_v2 = vadd.f32 %v2180_v5, %v1313_v34 }
 0x102   : > { %v753_v6 = vpop.f32.mrb[5].mxu0  ;;  %v1388_v46 = vmul.f32 %v2183_v53, %v2183_v53 }
 0x103   : > { %v1315_v16 = vadd.f32 %v1314_v2, %v753_v6  ;;  %v1386_v37 = vmul.f32 %v753_v6, %v753_v6  ;;  %v1448_v38 = vadd.f32 %v1447_v50, %v1385_v36  ;;  %v2184_v39 = vpop.f32.mrb[6].mxu0 }
 0x104   : > { %v1917_v40 = vpack.c.bf16 %v2184_v39, %v2183_v53  ;;  %v756_v41 = vpop.f32.mrb[7].mxu0  ;;  %v1389_v49 = vmul.f32 %v2184_v39, %v2184_v39 }
 0x105   : > { %v1449_v42 = vadd.f32 %v1448_v38, %v1386_v37  ;;  %v1912_v43 = vpack.c.bf16 %v756_v41, %v753_v6  ;;  %v1316_v44 = vadd.f32 %v1315_v16, %v756_v41  ;;  %v1387_v45 = vmul.f32 %v756_v41, %v756_v41 }
 0x106   : > { %2092 = vst [vmem:[%s2570_s29 + $0x18] sm:$0xff] %v1917_v40  }
 0x107   : > { %2091 = vst [vmem:[%s2570_s29 + $0x10] sm:$0xff] %v1912_v43   ;;  %v1317_v47 = vadd.f32 %v2183_v53, %v1316_v44  ;;  %v1450_v48 = vadd.f32 %v1449_v42, %v1387_v45 }
 0x109   : > { %v1451_v51 = vadd.f32 %v1450_v48, %v1388_v46  ;;  %v2187_v54 = vpop.f32.mrb[8].mxu0  ;;  %v1318_v55 = vadd.f32 %v2184_v39, %v1317_v47  ;;  %v2578_v14 = vpop.f32.mrb[0].mxu1 }
 0x10a   : > { %v769_v56 = vpop.f32.mrb[9].mxu0  ;;  %v1392_v9 = vmul.f32 %v2187_v54, %v2187_v54  ;;  %v2580_v15 = vpop.f32.mrb[1].mxu1 }
 0x10b   : > { %v1319_v25 = vadd.f32 %v1318_v55, %v769_v56  ;;  %v1390_v57 = vmul.f32 %v769_v56, %v769_v56  ;;  %v1452_v59 = vadd.f32 %v1451_v51, %v1389_v49  ;;  %v2188_v61 = vpop.f32.mrb[10].mxu0  ;;  %v2582_v20 = vpop.f32.mrb[2].mxu1 }
 0x10c   : > { %v1927_v62 = vpack.c.bf16 %v2188_v61, %v2187_v54  ;;  %v772_v63 = vpop.f32.mrb[11].mxu0  ;;  %v1393_v17 = vmul.f32 %v2188_v61, %v2188_v61  ;;  %v1987_v22 = vpack.c.bf16 %v2582_v20, %v2578_v14  ;;  %v2586_v58 = vpop.f32.mrb[3].mxu1 }
 0x10d   : > { %v1453_v0 = vadd.f32 %v1452_v59, %v1390_v57  ;;  %v1922_v1 = vpack.c.bf16 %v772_v63, %v769_v56  ;;  %v1320_v4 = vadd.f32 %v1319_v25, %v772_v63  ;;  %v1391_v8 = vmul.f32 %v772_v63, %v772_v63 }
 0x10e   : > { %2094 = vst [vmem:[%s2570_s29 + $0x28] sm:$0xff] %v1927_v62   ;;  %v1982_v27 = vpack.c.bf16 %v2586_v58, %v2580_v15  ;;  %2106 = vst [vmem:[%s2570_s29 + $0x88] sm:$0xff] %v1987_v22  }
 0x10f   : > { %2093 = vst [vmem:[%s2570_s29 + $0x20] sm:$0xff] %v1922_v1   ;;  %v1321_v11 = vadd.f32 %v2187_v54, %v1320_v4  ;;  %v1454_v13 = vadd.f32 %v1453_v0, %v1391_v8 }
 0x110   : > { %2105 = vst [vmem:[%s2570_s29 + $0x80] sm:$0xff] %v1982_v27  }
 0x111   : > { %v1455_v18 = vadd.f32 %v1454_v13, %v1392_v9  ;;  %v2191_v3 = vpop.f32.mrb[12].mxu0  ;;  %v1322_v19 = vadd.f32 %v2188_v61, %v1321_v11 }
 0x112   : > { %v785_v21 = vpop.f32.mrb[13].mxu0  ;;  %v1396_v29 = vmul.f32 %v2191_v3, %v2191_v3 }
 0x113   : > { %v1323_v7 = vadd.f32 %v1322_v19, %v785_v21  ;;  %v1394_v23 = vmul.f32 %v785_v21, %v785_v21  ;;  %v1456_v24 = vadd.f32 %v1455_v18, %v1393_v17  ;;  %v2192_v26 = vpop.f32.mrb[14].mxu0  ;;  %v2594_v32 = vpop.f32.mrb[4].mxu1 }
 0x114   : > { %v1937_v60 = vpack.c.bf16 %v2192_v26, %v2191_v3  ;;  %v788_v28 = vpop.f32.mrb[15].mxu0  ;;  %v2596_v33 = vpop.f32.mrb[5].mxu1  ;;  %v1397_v34 = vmul.f32 %v2192_v26, %v2192_v26 }
 0x115   : > { %v1457_v52 = vadd.f32 %v1456_v24, %v1394_v23  ;;  %v1932_v5 = vpack.c.bf16 %v788_v28, %v785_v21  ;;  %v1324_v12 = vadd.f32 %v1323_v7, %v788_v28  ;;  %v1395_v10 = vmul.f32 %v788_v28, %v788_v28  ;;  %v2598_v53 = vpop.f32.mrb[6].mxu1 }
 0x116   : > { %2096 = vst [vmem:[%s2570_s29 + $0x38] sm:$0xff] %v1937_v60   ;;  %v1997_v6 = vpack.c.bf16 %v2598_v53, %v2594_v32  ;;  %v2602_v16 = vpop.f32.mrb[7].mxu1 }
 0x117   : > { %2095 = vst [vmem:[%s2570_s29 + $0x30] sm:$0xff] %v1932_v5   ;;  %v1325_v30 = vadd.f32 %v2191_v3, %v1324_v12  ;;  %v1458_v31 = vadd.f32 %v1457_v52, %v1395_v10  ;;  %v1992_v41 = vpack.c.bf16 %v2602_v16, %v2596_v33 }
 0x118   : > { %2108 = vst [vmem:[%s2570_s29 + $0x98] sm:$0xff] %v1997_v6  }
 0x119   : > { %v1459_v35 = vadd.f32 %v1458_v31, %v1396_v29  ;;  %v2195_v36 = vpop.f32.mrb[16].mxu0  ;;  %v1326_v50 = vadd.f32 %v2192_v26, %v1325_v30  ;;  %2107 = vst [vmem:[%s2570_s29 + $0x90] sm:$0xff] %v1992_v41  }
 0x11a   : > { %v801_v2 = vpop.f32.mrb[17].mxu0  ;;  %v1400_v48 = vmul.f32 %v2195_v36, %v2195_v36 }
 0x11b   : > { %v1327_v37 = vadd.f32 %v1326_v50, %v801_v2  ;;  %v1398_v38 = vmul.f32 %v801_v2, %v801_v2  ;;  %v1460_v39 = vadd.f32 %v1459_v35, %v1397_v34  ;;  %v2196_v40 = vpop.f32.mrb[18].mxu0  ;;  %v2610_v54 = vpop.f32.mrb[8].mxu1 }
 0x11c   : > { %v1947_v42 = vpack.c.bf16 %v2196_v40, %v2195_v36  ;;  %v804_v43 = vpop.f32.mrb[19].mxu0  ;;  %v2612_v55 = vpop.f32.mrb[9].mxu1  ;;  %v1401_v56 = vmul.f32 %v2196_v40, %v2196_v40 }
 0x11d   : > { %v1461_v44 = vadd.f32 %v1460_v39, %v1398_v38  ;;  %v1942_v45 = vpack.c.bf16 %v804_v43, %v801_v2  ;;  %v1328_v46 = vadd.f32 %v1327_v37, %v804_v43  ;;  %v1399_v47 = vmul.f32 %v804_v43, %v804_v43  ;;  %v2614_v61 = vpop.f32.mrb[10].mxu1 }
 0x11e   : > { %2098 = vst [vmem:[%s2570_s29 + $0x48] sm:$0xff] %v1947_v42   ;;  %v2007_v63 = vpack.c.bf16 %v2614_v61, %v2610_v54  ;;  %v2618_v0 = vpop.f32.mrb[11].mxu1 }
 0x11f   : > { %2097 = vst [vmem:[%s2570_s29 + $0x40] sm:$0xff] %v1942_v45   ;;  %v1329_v49 = vadd.f32 %v2195_v36, %v1328_v46  ;;  %v1462_v51 = vadd.f32 %v1461_v44, %v1399_v47  ;;  %v2002_v11 = vpack.c.bf16 %v2618_v0, %v2612_v55 }
 0x120   : > { %2110 = vst [vmem:[%s2570_s29 + $0xa8] sm:$0xff] %v2007_v63  }
 0x121   : > { %v1463_v25 = vadd.f32 %v1462_v51, %v1400_v48  ;;  %v2199_v57 = vpop.f32.mrb[20].mxu0  ;;  %v1330_v59 = vadd.f32 %v2196_v40, %v1329_v49  ;;  %2109 = vst [vmem:[%s2570_s29 + $0xa0] sm:$0xff] %v2002_v11  }
 0x122   : > { %v817_v62 = vpop.f32.mrb[21].mxu0  ;;  %v1404_v22 = vmul.f32 %v2199_v57, %v2199_v57 }
 0x123   : > { %v1331_v1 = vadd.f32 %v1330_v59, %v817_v62  ;;  %v1402_v4 = vmul.f32 %v817_v62, %v817_v62  ;;  %v1464_v8 = vadd.f32 %v1463_v25, %v1401_v56  ;;  %v2200_v9 = vpop.f32.mrb[22].mxu0  ;;  %v2626_v24 = vpop.f32.mrb[12].mxu1 }
 0x124   : > { %v1957_v13 = vpack.c.bf16 %v2200_v9, %v2199_v57  ;;  %v820_v17 = vpop.f32.mrb[23].mxu0  ;;  %v2628_v26 = vpop.f32.mrb[13].mxu1  ;;  %v1405_v27 = vmul.f32 %v2200_v9, %v2200_v9 }
 0x125   : > { %v1465_v18 = vadd.f32 %v1464_v8, %v1402_v4  ;;  %v1952_v3 = vpack.c.bf16 %v820_v17, %v817_v62  ;;  %v1332_v19 = vadd.f32 %v1331_v1, %v820_v17  ;;  %v1403_v21 = vmul.f32 %v820_v17, %v820_v17  ;;  %v2630_v5 = vpop.f32.mrb[14].mxu1 }
 0x126   : > { %2100 = vst [vmem:[%s2570_s29 + $0x58] sm:$0xff] %v1957_v13   ;;  %v2017_v10 = vpack.c.bf16 %v2630_v5, %v2626_v24  ;;  %v2634_v29 = vpop.f32.mrb[15].mxu1 }
 0x127   : > { %2099 = vst [vmem:[%s2570_s29 + $0x50] sm:$0xff] %v1952_v3   ;;  %v1333_v7 = vadd.f32 %v2199_v57, %v1332_v19  ;;  %v1466_v23 = vadd.f32 %v1465_v18, %v1403_v21  ;;  %v2012_v36 = vpack.c.bf16 %v2634_v29, %v2628_v26 }
 0x128   : > { %2112 = vst [vmem:[%s2570_s29 + $0xb8] sm:$0xff] %v2017_v10  }
 0x129   : > { %v1467_v60 = vadd.f32 %v1466_v23, %v1404_v22  ;;  %v2203_v28 = vpop.f32.mrb[24].mxu0  ;;  %v1334_v52 = vadd.f32 %v2200_v9, %v1333_v7  ;;  %2111 = vst [vmem:[%s2570_s29 + $0xb0] sm:$0xff] %v2012_v36   ;;  %v1415_v36 = vmul.f32 %v2586_v58, %v2586_v58 }
 0x12a   : > { %v833_v12 = vpop.f32.mrb[25].mxu0  ;;  %v1408_v40 = vmul.f32 %v2203_v28, %v2203_v28 }
 0x12b   : > { %v1335_v30 = vadd.f32 %v1334_v52, %v833_v12  ;;  %v1406_v31 = vmul.f32 %v833_v12, %v833_v12  ;;  %v1468_v34 = vadd.f32 %v1467_v60, %v1405_v27  ;;  %v2204_v35 = vpop.f32.mrb[26].mxu0  ;;  %v2642_v43 = vpop.f32.mrb[16].mxu1  ;;  %v1414_v60 = vmul.f32 %v2580_v15, %v2580_v15 }
 0x12c   : > { %v1967_v50 = vpack.c.bf16 %v2204_v35, %v2203_v28  ;;  %v836_v2 = vpop.f32.mrb[27].mxu0  ;;  %v2644_v44 = vpop.f32.mrb[17].mxu1  ;;  %v1409_v45 = vmul.f32 %v2204_v35, %v2204_v35 }
 0x12d   : > { %v1469_v6 = vadd.f32 %v1468_v34, %v1406_v31  ;;  %v1962_v37 = vpack.c.bf16 %v836_v2, %v833_v12  ;;  %v1336_v38 = vadd.f32 %v1335_v30, %v836_v2  ;;  %v1407_v39 = vmul.f32 %v836_v2, %v836_v2  ;;  %v2646_v49 = vpop.f32.mrb[18].mxu1 }
 0x12e   : > { %2102 = vst [vmem:[%s2570_s29 + $0x68] sm:$0xff] %v1967_v50   ;;  %v2027_v56 = vpack.c.bf16 %v2646_v49, %v2642_v43  ;;  %v2650_v25 = vpop.f32.mrb[19].mxu1  ;;  %v1416_v50 = vmul.f32 %v2578_v14, %v2578_v14 }
 0x12f   : > { %2101 = vst [vmem:[%s2570_s29 + $0x60] sm:$0xff] %v1962_v37   ;;  %v1337_v41 = vadd.f32 %v2203_v28, %v1336_v38  ;;  %v1470_v42 = vadd.f32 %v1469_v6, %v1407_v39  ;;  %v2022_v1 = vpack.c.bf16 %v2650_v25, %v2644_v44  ;;  %v1417_v38 = vmul.f32 %v2582_v20, %v2582_v20 }
 0x130   : > { %2114 = vst [vmem:[%s2570_s29 + $0xc8] sm:$0xff] %v2027_v56   ;;  %v1420_v56 = vmul.f32 %v2594_v32, %v2594_v32 }
 0x131   : > { %v1471_v46 = vadd.f32 %v1470_v42, %v1408_v40  ;;  %v2207_v47 = vpop.f32.mrb[28].mxu0  ;;  %v1338_v48 = vadd.f32 %v2204_v35, %v1337_v41  ;;  %2113 = vst [vmem:[%s2570_s29 + $0xc0] sm:$0xff] %v2022_v1  }
 0x132   : > { %v849_v51 = vpop.f32.mrb[29].mxu0  ;;  %v1412_v18 = vmul.f32 %v2207_v47, %v2207_v47 }
 0x133   : > { %v1339_v57 = vadd.f32 %v1338_v48, %v849_v51  ;;  %v1410_v59 = vmul.f32 %v849_v51, %v849_v51  ;;  %v1472_v62 = vadd.f32 %v1471_v46, %v1409_v45  ;;  %v2208_v63 = vpop.f32.mrb[30].mxu0  ;;  %v2658_v21 = vpop.f32.mrb[20].mxu1 }
 0x134   : > { %v1977_v4 = vpack.c.bf16 %v2208_v63, %v2207_v47  ;;  %v852_v8 = vpop.f32.mrb[31].mxu0  ;;  %v2660_v22 = vpop.f32.mrb[21].mxu1  ;;  %v1413_v7 = vmul.f32 %v2208_v63, %v2208_v63 }
 0x135   : > { %v1473_v9 = vadd.f32 %v1472_v62, %v1410_v59  ;;  %v1972_v11 = vpack.c.bf16 %v852_v8, %v849_v51  ;;  %v1340_v13 = vadd.f32 %v1339_v57, %v852_v8  ;;  %v1411_v17 = vmul.f32 %v852_v8, %v852_v8  ;;  %v2664_v28 = vpop.f32.mrb[22].mxu1 }
 0x136   : > { %2104 = vst [vmem:[%s2570_s29 + $0x78] sm:$0xff] %v1977_v4   ;;  %v2037_v52 = vpack.c.bf16 %v2664_v28, %v2658_v21  ;;  %v2668_v12 = vpop.f32.mrb[23].mxu1  ;;  %v1419_v51 = vmul.f32 %v2602_v16, %v2602_v16 }
 0x137   : > { %2103 = vst [vmem:[%s2570_s29 + $0x70] sm:$0xff] %v1972_v11   ;;  %v1341_v3 = vadd.f32 %v2207_v47, %v1340_v13  ;;  %v1474_v19 = vadd.f32 %v1473_v9, %v1411_v17  ;;  %v2032_v31 = vpack.c.bf16 %v2668_v12, %v2660_v22 }
 0x138   : > { %2116 = vst [vmem:[%s2570_s29 + $0xd8] sm:$0xff] %v2037_v52   ;;  %v1426_v52 = vmul.f32 %v2628_v26, %v2628_v26 }
 0x139   : > { %v1475_v23 = vadd.f32 %v1474_v19, %v1412_v18  ;;  %v1342_v27 = vadd.f32 %v2208_v63, %v1341_v3  ;;  %2115 = vst [vmem:[%s2570_s29 + $0xd0] sm:$0xff] %v2032_v31   ;;  %v1421_v63 = vmul.f32 %v2598_v53, %v2598_v53  ;;  %v1423_v3 = vmul.f32 %v2618_v0, %v2618_v0 }
 0x13a   : > { %v1424_v19 = vmul.f32 %v2610_v54, %v2610_v54 }
 0x13b   : > { %v1343_v10 = vadd.f32 %v1342_v27, %v2580_v15  ;;  %v1476_v30 = vadd.f32 %v1475_v23, %v1413_v7  ;;  %v2681_v15 = vpop.f32.mrb[24].mxu1 }
 0x13c   : > { %v2683_v37 = vpop.f32.mrb[25].mxu1 }
 0x13d   : > { %v1477_v34 = vadd.f32 %v1476_v30, %v1414_v60  ;;  %v1344_v35 = vadd.f32 %v1343_v10, %v2586_v58  ;;  %v1418_v58 = vmul.f32 %v2596_v33, %v2596_v33  ;;  %v2690_v41 = vpop.f32.mrb[26].mxu1 }
 0x13e   : > { %v2694_v42 = vpop.f32.mrb[27].mxu1 }
 0x13f   : > { %v1345_v2 = vadd.f32 %v2578_v14, %v1344_v35  ;;  %v1478_v6 = vadd.f32 %v1477_v34, %v1415_v36  ;;  %v2047_v14 = vpack.c.bf16 %v2690_v41, %v2681_v15  ;;  %v2042_v47 = vpack.c.bf16 %v2694_v42, %v2683_v37 }
 0x140   : > { %v1427_v34 = vmul.f32 %v2634_v29, %v2634_v29 }
 0x141   : > { %v1479_v39 = vadd.f32 %v1478_v6, %v1416_v50  ;;  %v1346_v40 = vadd.f32 %v2582_v20, %v1345_v2  ;;  %2118 = vst [vmem:[%s2570_s29 + $0xe8] sm:$0xff] %v2047_v14   ;;  %2117 = vst [vmem:[%s2570_s29 + $0xe0] sm:$0xff] %v2042_v47  }
 0x143   : > { %v1347_v45 = vadd.f32 %v1346_v40, %v2596_v33  ;;  %v1480_v46 = vadd.f32 %v1479_v39, %v1417_v38  ;;  %v2707_v33 = vpop.f32.mrb[28].mxu1  ;;  %v1431_v40 = vmul.f32 %v2650_v25, %v2650_v25 }
 0x144   : > { %v2709_v62 = vpop.f32.mrb[29].mxu1 }
 0x145   : > { %v1481_v48 = vadd.f32 %v1480_v46, %v1418_v58  ;;  %v1348_v20 = vadd.f32 %v1347_v45, %v2602_v16  ;;  %v1422_v16 = vmul.f32 %v2612_v55, %v2612_v55  ;;  %v2716_v8 = vpop.f32.mrb[30].mxu1 }
 0x146   : > { %v2720_v9 = vpop.f32.mrb[31].mxu1 }
 0x147   : > { %v1349_v57 = vadd.f32 %v2594_v32, %v1348_v20  ;;  %v1482_v59 = vadd.f32 %v1481_v48, %v1419_v51  ;;  %v2057_v32 = vpack.c.bf16 %v2716_v8, %v2707_v33  ;;  %v2052_v17 = vpack.c.bf16 %v2720_v9, %v2709_v62 }
 0x148   : > { %v1435_v51 = vmul.f32 %v2668_v12, %v2668_v12 }
 0x149   : > { %v1483_v1 = vadd.f32 %v1482_v59, %v1420_v56  ;;  %v1350_v4 = vadd.f32 %v2598_v53, %v1349_v57  ;;  %2120 = vst [vmem:[%s2570_s29 + $0xf8] sm:$0xff] %v2057_v32   ;;  %2119 = vst [vmem:[%s2570_s29 + $0xf0] sm:$0xff] %v2052_v17   ;;  %v1439_v32 = vmul.f32 %v2694_v42, %v2694_v42 }
 0x14b   : > { %v1351_v11 = vadd.f32 %v1350_v4, %v2612_v55  ;;  %v1484_v13 = vadd.f32 %v1483_v1, %v1421_v63  ;;  %v1425_v55 = vmul.f32 %v2614_v61, %v2614_v61 }
 0x14d   : > { %v1485_v18 = vadd.f32 %v1484_v13, %v1422_v16  ;;  %v1352_v53 = vadd.f32 %v1351_v11, %v2618_v0 }
 0x14f   : > { %v1353_v7 = vadd.f32 %v2610_v54, %v1352_v53  ;;  %v1486_v23 = vadd.f32 %v1485_v18, %v1423_v3  ;;  %v1428_v54 = vmul.f32 %v2626_v24, %v2626_v24  ;;  %v1442_v18 = vmul.f32 %v2709_v62, %v2709_v62 }
 0x151   : > { %v1487_v27 = vadd.f32 %v1486_v23, %v1424_v19  ;;  %v1354_v60 = vadd.f32 %v2614_v61, %v1353_v7  ;;  %v1429_v61 = vmul.f32 %v2630_v5, %v2630_v5  ;;  %v1444_v7 = vmul.f32 %v2707_v33, %v2707_v33 }
 0x153   : > { %v1355_v10 = vadd.f32 %v1354_v60, %v2628_v26  ;;  %v1488_v30 = vadd.f32 %v1487_v27, %v1425_v55  ;;  %v1430_v26 = vmul.f32 %v2644_v44, %v2644_v44 }
 0x155   : > { %v1489_v0 = vadd.f32 %v1488_v30, %v1426_v52  ;;  %v1356_v31 = vadd.f32 %v1355_v10, %v2634_v29 }
 0x157   : > { %v1357_v35 = vadd.f32 %v2626_v24, %v1356_v31  ;;  %v1490_v36 = vadd.f32 %v1489_v0, %v1427_v34  ;;  %v1432_v24 = vmul.f32 %v2642_v43, %v2642_v43 }
 0x159   : > { %v1491_v50 = vadd.f32 %v1490_v36, %v1428_v54  ;;  %v1358_v2 = vadd.f32 %v2630_v5, %v1357_v35  ;;  %v1433_v5 = vmul.f32 %v2646_v49, %v2646_v49 }
 0x15b   : > { %v1359_v6 = vadd.f32 %v1358_v2, %v2644_v44  ;;  %v1492_v38 = vadd.f32 %v1491_v50, %v1429_v61  ;;  %v1434_v44 = vmul.f32 %v2660_v22, %v2660_v22 }
 0x15d   : > { %v1493_v39 = vadd.f32 %v1492_v38, %v1430_v26  ;;  %v1360_v29 = vadd.f32 %v1359_v6, %v2650_v25 }
 0x15f   : > { %v1361_v58 = vadd.f32 %v2642_v43, %v1360_v29  ;;  %v1494_v14 = vadd.f32 %v1493_v39, %v1431_v40  ;;  %v1436_v43 = vmul.f32 %v2658_v21, %v2658_v21 }
 0x161   : > { %v1495_v45 = vadd.f32 %v1494_v14, %v1432_v24  ;;  %v1362_v46 = vadd.f32 %v2646_v49, %v1361_v58  ;;  %v1437_v49 = vmul.f32 %v2664_v28, %v2664_v28 }
 0x163   : > { %v1363_v47 = vadd.f32 %v1362_v46, %v2660_v22  ;;  %v1496_v48 = vadd.f32 %v1495_v45, %v1433_v5  ;;  %v1438_v22 = vmul.f32 %v2683_v37, %v2683_v37 }
 0x165   : > { %v1497_v20 = vadd.f32 %v1496_v48, %v1434_v44  ;;  %v1364_v25 = vadd.f32 %v1363_v47, %v2668_v12 }
 0x167   : > { %v1365_v56 = vadd.f32 %v2658_v21, %v1364_v25  ;;  %v1498_v57 = vadd.f32 %v1497_v20, %v1435_v51  ;;  %v1440_v21 = vmul.f32 %v2681_v15, %v2681_v15 }
 0x169   : > { %v1499_v59 = vadd.f32 %v1498_v57, %v1436_v43  ;;  %v1366_v63 = vadd.f32 %v2664_v28, %v1365_v56  ;;  %v1441_v28 = vmul.f32 %v2690_v41, %v2690_v41 }
 0x16b   : > { %v1367_v1 = vadd.f32 %v1366_v63, %v2683_v37  ;;  %v1500_v4 = vadd.f32 %v1499_v59, %v1437_v49 }
 0x16d   : > { %v1501_v16 = vadd.f32 %v1500_v4, %v1438_v22  ;;  %v1368_v12 = vadd.f32 %v1367_v1, %v2694_v42 }
 0x16f   : > { %v1369_v11 = vadd.f32 %v2681_v15, %v1368_v12  ;;  %v1502_v13 = vadd.f32 %v1501_v16, %v1439_v32  ;;  %v1443_v15 = vmul.f32 %v2720_v9, %v2720_v9 }
 0x171   : > { %v1503_v17 = vadd.f32 %v1502_v13, %v1440_v21  ;;  %v1370_v37 = vadd.f32 %v2690_v41, %v1369_v11  ;;  %v1445_v41 = vmul.f32 %v2716_v8, %v2716_v8 }
 0x173   : > { %v1371_v53 = vadd.f32 %v1370_v37, %v2709_v62  ;;  %v1504_v3 = vadd.f32 %v1503_v17, %v1441_v28 }
 0x175   : > { %v1505_v42 = vadd.f32 %v1504_v3, %v1442_v18  ;;  %v1372_v19 = vadd.f32 %v1371_v53, %v2720_v9 }
 0x177   : > { %v1373_v23 = vadd.f32 %v2707_v33, %v1372_v19  ;;  %v1506_v55 = vadd.f32 %v1505_v42, %v1443_v15 }
 0x179   : > { %v1374_v27 = vadd.f32 %v2716_v8, %v1373_v23  ;;  %v1507_v62 = vadd.f32 %v1506_v55, %v1444_v7 }
 0x17b   : > { %v1375_v60 = vrot.slane %v1374_v27, 4  ;;  %v1508_v52 = vadd.f32 %v1507_v62, %v1445_v41 }
 0x17d   : > { %v1376_v10 = vadd.f32 %v1375_v60, %v1374_v27  ;;  %v1509_v30 = vrot.slane %v1508_v52, 4 }
 0x17f   : > { %v1377_v0 = vrot.slane %v1376_v10, 2  ;;  %v1510_v31 = vadd.f32 %v1509_v30, %v1508_v52 }
 0x181   : > { %v1378_v9 = vadd.f32 %v1377_v0, %v1376_v10  ;;  %v1511_v34 = vrot.slane %v1510_v31, 2 }
 0x183   : > { %v1379_v54 = vrot.slane %v1378_v9, 1  ;;  %v1512_v35 = vadd.f32 %v1511_v34, %v1510_v31 }
 0x185   : > { %v1380_v33 = vadd.f32 %v1379_v54, %v1378_v9  ;;  %v1513_v36 = vrot.slane %v1512_v35, 1 }
 0x187   : > { %1381 = vst [vmem:[%s268_s7] sm:$0x1] %v1380_v33  ;;  %v1514_v8 = vadd.f32 %v1513_v36, %v1512_v35 }
 0x189   : > { %1515 = vst [vmem:[%s271_s10] sm:$0x1] %v1514_v8 }
 0x18a PF: > { %s17_s21 = sadd.s32 1, %s2279_s21  }
 0x18b   : > { %p14_p5 = scmp.ge.s32.totalorder %s17_s21, 6  }
 0x18d   :  { %16 = sbr.rel (!%p14_p5) target bundleno = 1 (0x1), region = 90 }

// kernel: _lambda_.24
= control target key start
LH: loop header
LB: loop body
LE: loop exit
PB: predicated region body
PF: predicated region fallthrough
CT: control target
= control target key end

     0   :  { %s2042_s21 = smov 0   ;;  %s2465_s0 = inlined_call_operand.vmem [shape: bf16[2048,128], index: 0, kind: input, shape index: {}]   ;;  %s2466_s1 = inlined_call_operand.vmem [shape: f32[1,128], index: 1, kind: input, shape index: {}]   ;;  %s2467_s2 = inlined_call_operand.vmem [shape: f32[1,128], index: 2, kind: input, shape index: {}]   ;;  %s2468_s3 = inlined_call_operand.vmem [shape: bf16[2048,128], index: 3, kind: input, shape index: {}]   ;;  %s2469_s4 = inlined_call_operand.vmem [shape: f32[1,128], index: 4, kind: input, shape index: {}]   ;;  %s2470_s5 = inlined_call_operand.vmem [shape: f32[1,128], index: 5, kind: input, shape index: {}]   ;;  %s2471_s6 = inlined_call_operand.vmem [shape: bf16[2048,128], index: 6, kind: output, shape index: {}]  }
   0x1 LB: > { %s1333_s22 = sadd.s32 4294967295, %s2005_s21   ;;  %p1337_p0 = scmp.ge.s32.totalorder %s2005_s21, 1  ;;  %s2005_s21 = sphi %s2042_s21, %s16_s21  }
   0x2   : > { %p224_p1 = scmp.lt.s32.totalorder %s2005_s21, 5 }
   0x4   : > { %p225_p2 = pnand %p1337_p0, %p224_p1 }
   0x5   : > { %s1338_s23 = sshll.u32 (!%p225_p2), %s1333_s22, 6  ;;  %v2067_v0 = vld [vmem:[%s2466_s1] ss:$0 sm:$0xff] (!%p225_p2) }
   0x6   : > { %228 = sbr.rel (%p225_p2) target bundleno = 161 (0xa1), region = 44  ;;  %p260_p3 = scmp.lt.s32.totalorder (!%p225_p2), %s1338_s23, 255  ;;  %v2072_v1 = vld [vmem:[%s2469_s4] ss:$0 sm:$0xff] (!%p225_p2) }
   0x7   : > { %v2081_v10 = vld [vmem:[%s2467_s2] ss:$0 sm:$0xff] (!%p225_p2) }
   0x8   : > { %v2086_v11 = vld [vmem:[%s2470_s5] ss:$0 sm:$0xff] (!%p225_p2) }
   0xd   : > { %s2473_s23 = smov (!%p260_p3, %s1338_s23), 255 }
   0xe   : > { %s2050_s24 = sshll.u32 %s2473_s23, 2 }
   0xf   : > { %s2056_s27 = scalar_lea.vmem %s2465_s0, %s2050_s24  ;;  %s2062_s30 = scalar_lea.vmem %s2468_s3, %s2050_s24 }
  0x10   : > { %v1479_v2 = vld [vmem:[%s2056_s27] sm:$0xff]   ;;  %v1894_v4 = vld [vmem:[%s2056_s27 + $0x8] sm:$0xff]   ;;  %v1895_v24 = vld [vmem:[%s2056_s27 + $0x10] sm:$0xff]   ;;  %s2113_s17 = scalar_lea.vmem %s2471_s6, %s2050_s24 }
  0x11   : > { %v1607_v3 = vld [vmem:[%s2062_s30] sm:$0xff]   ;;  %v1480_v5 = vunpack.c.l.bf16 %v1479_v2  ;;  %v1481_v6 = vunpack.c.h.bf16 %v1479_v2  ;;  %v1925_v9 = vld [vmem:[%s2062_s30 + $0x8] sm:$0xff]   ;;  %v1484_v12 = vunpack.c.l.bf16 %v1894_v4  ;;  %v1485_v13 = vunpack.c.h.bf16 %v1894_v4  ;;  %v1926_v29 = vld [vmem:[%s2062_s30 + $0x10] sm:$0xff]  }
  0x12   : > { %v1608_v7 = vunpack.c.l.bf16 %v1607_v3  ;;  %v1609_v8 = vunpack.c.h.bf16 %v1607_v3  ;;  %v1612_v14 = vunpack.c.l.bf16 %v1925_v9  ;;  %v1613_v15 = vunpack.c.h.bf16 %v1925_v9  ;;  %v1896_v42 = vld [vmem:[%s2056_s27 + $0x18] sm:$0xff]   ;;  %v1897_v52 = vld [vmem:[%s2056_s27 + $0x20] sm:$0xff]  }
  0x13   : > { %v412_v16 = vmul.f32 %v1480_v5, %v2067_v0  ;;  %v413_v17 = vmul.f32 %v1481_v6, %v2067_v0  ;;  %v414_v20 = vmul.f32 %v1484_v12, %v2067_v0  ;;  %v415_v21 = vmul.f32 %v1485_v13, %v2067_v0  ;;  %v1927_v51 = vld [vmem:[%s2062_s30 + $0x18] sm:$0xff]  }
  0x14   : > { %v682_v18 = vmul.f32 %v1608_v7, %v2072_v1  ;;  %v683_v19 = vmul.f32 %v1609_v8, %v2072_v1  ;;  %v684_v22 = vmul.f32 %v1612_v14, %v2072_v1  ;;  %v685_v23 = vmul.f32 %v1613_v15, %v2072_v1  ;;  %v1928_v7 = vld [vmem:[%s2062_s30 + $0x20] sm:$0xff]   ;;  %v1898_v14 = vld [vmem:[%s2056_s27 + $0x28] sm:$0xff]  }
  0x15   : > { %v483_v25 = vadd.f32 %v2081_v10, %v412_v16  ;;  %v484_v26 = vadd.f32 %v2081_v10, %v413_v17  ;;  %v485_v30 = vadd.f32 %v2081_v10, %v414_v20  ;;  %v486_v31 = vadd.f32 %v2081_v10, %v415_v21 }
  0x16   : > { %v753_v27 = vadd.f32 %v2086_v11, %v682_v18  ;;  %v754_v28 = vadd.f32 %v2086_v11, %v683_v19  ;;  %v755_v32 = vadd.f32 %v2086_v11, %v684_v22  ;;  %v756_v33 = vadd.f32 %v2086_v11, %v685_v23  ;;  %v1929_v23 = vld [vmem:[%s2062_s30 + $0x28] sm:$0xff]  }
  0x17   : > { %v1488_v36 = vunpack.c.l.bf16 %v1895_v24  ;;  %v1489_v37 = vunpack.c.h.bf16 %v1895_v24  ;;  %v1616_v40 = vunpack.c.l.bf16 %v1926_v29  ;;  %v1617_v41 = vunpack.c.h.bf16 %v1926_v29 }
  0x18   : > { %v817_v34 = vadd.f32 %v753_v27, %v483_v25  ;;  %v818_v35 = vadd.f32 %v754_v28, %v484_v26  ;;  %v819_v38 = vadd.f32 %v755_v32, %v485_v30  ;;  %v820_v39 = vadd.f32 %v756_v33, %v486_v31 }
  0x19   : > { %v416_v45 = vmul.f32 %v1488_v36, %v2067_v0  ;;  %v417_v46 = vmul.f32 %v1489_v37, %v2067_v0  ;;  %v686_v49 = vmul.f32 %v1616_v40, %v2072_v1  ;;  %v687_v50 = vmul.f32 %v1617_v41, %v2072_v1  ;;  %v1899_v36 = vld [vmem:[%s2056_s27 + $0x30] sm:$0xff]  }
  0x1a   : > { %v881_v43 = vmax.f32 %v817_v34, 0.0  ;;  %v882_v44 = vmax.f32 %v818_v35, 0.0  ;;  %v883_v47 = vmax.f32 %v819_v38, 0.0  ;;  %v884_v48 = vmax.f32 %v820_v39, 0.0 }
  0x1b   : > { %v487_v54 = vadd.f32 %v2081_v10, %v416_v45  ;;  %v488_v55 = vadd.f32 %v2081_v10, %v417_v46  ;;  %v1492_v56 = vunpack.c.l.bf16 %v1896_v42  ;;  %v757_v58 = vadd.f32 %v2086_v11, %v686_v49  ;;  %v1930_v45 = vld [vmem:[%s2062_s30 + $0x30] sm:$0xff]  }
  0x1c   : > { %v1737_v53 = vpack.c.bf16 %v882_v44, %v881_v43  ;;  %v1742_v57 = vpack.c.bf16 %v884_v48, %v883_v47  ;;  %v758_v59 = vadd.f32 %v2086_v11, %v687_v50  ;;  %v1493_v60 = vunpack.c.h.bf16 %v1896_v42 }
  0x1d   : > { %v418_v61 = vmul.f32 %v1492_v56, %v2067_v0  ;;  %v1620_v62 = vunpack.c.l.bf16 %v1927_v51  ;;  %v1621_v63 = vunpack.c.h.bf16 %v1927_v51  ;;  %v1496_v2 = vunpack.c.l.bf16 %v1897_v52 }
  0x1e   : > { %1738 = vst [vmem:[%s2113_s17] sm:$0xff] %v1737_v53   ;;  %1956 = vst [vmem:[%s2113_s17 + $0x8] sm:$0xff] %v1742_v57   ;;  %v821_v3 = vadd.f32 %v757_v58, %v487_v54  ;;  %v822_v4 = vadd.f32 %v758_v59, %v488_v55  ;;  %v419_v5 = vmul.f32 %v1493_v60, %v2067_v0  ;;  %v1497_v6 = vunpack.c.h.bf16 %v1897_v52  ;;  %v1900_v54 = vld [vmem:[%s2056_s27 + $0x38] sm:$0xff]  }
  0x1f   : > { %v489_v8 = vadd.f32 %v2081_v10, %v418_v61  ;;  %v688_v9 = vmul.f32 %v1620_v62, %v2072_v1  ;;  %v689_v12 = vmul.f32 %v1621_v63, %v2072_v1  ;;  %v420_v13 = vmul.f32 %v1496_v2, %v2067_v0 }
  0x20   : > { %v885_v15 = vmax.f32 %v821_v3, 0.0  ;;  %v886_v16 = vmax.f32 %v822_v4, 0.0  ;;  %v490_v17 = vadd.f32 %v2081_v10, %v419_v5  ;;  %v421_v18 = vmul.f32 %v1497_v6, %v2067_v0  ;;  %v1931_v5 = vld [vmem:[%s2062_s30 + $0x38] sm:$0xff]   ;;  %v1901_v6 = vld [vmem:[%s2056_s27 + $0x40] sm:$0xff]  }
  0x21   : > { %v759_v19 = vadd.f32 %v2086_v11, %v688_v9  ;;  %v760_v20 = vadd.f32 %v2086_v11, %v689_v12  ;;  %v491_v21 = vadd.f32 %v2081_v10, %v420_v13  ;;  %v1624_v22 = vunpack.c.l.bf16 %v1928_v7 }
  0x22   : > { %v1747_v24 = vpack.c.bf16 %v886_v16, %v885_v15  ;;  %v492_v25 = vadd.f32 %v2081_v10, %v421_v18  ;;  %v1625_v26 = vunpack.c.h.bf16 %v1928_v7  ;;  %v1500_v27 = vunpack.c.l.bf16 %v1898_v14 }
  0x23   : > { %v823_v28 = vadd.f32 %v759_v19, %v489_v8  ;;  %v824_v29 = vadd.f32 %v760_v20, %v490_v17  ;;  %v690_v30 = vmul.f32 %v1624_v22, %v2072_v1  ;;  %v1501_v31 = vunpack.c.h.bf16 %v1898_v14 }
  0x24   : > { %1957 = vst [vmem:[%s2113_s17 + $0x10] sm:$0xff] %v1747_v24   ;;  %v691_v32 = vmul.f32 %v1625_v26, %v2072_v1  ;;  %v422_v33 = vmul.f32 %v1500_v27, %v2067_v0  ;;  %v1628_v34 = vunpack.c.l.bf16 %v1929_v23  ;;  %v1629_v35 = vunpack.c.h.bf16 %v1929_v23 }
  0x25   : > { %v887_v37 = vmax.f32 %v823_v28, 0.0  ;;  %v888_v38 = vmax.f32 %v824_v29, 0.0  ;;  %v761_v39 = vadd.f32 %v2086_v11, %v690_v30  ;;  %v423_v40 = vmul.f32 %v1501_v31, %v2067_v0  ;;  %v1902_v30 = vld [vmem:[%s2056_s27 + $0x48] sm:$0xff]  }
  0x26   : > { %v762_v41 = vadd.f32 %v2086_v11, %v691_v32  ;;  %v493_v42 = vadd.f32 %v2081_v10, %v422_v33  ;;  %v692_v43 = vmul.f32 %v1628_v34, %v2072_v1  ;;  %v693_v44 = vmul.f32 %v1629_v35, %v2072_v1 }
  0x27   : > { %v1752_v46 = vpack.c.bf16 %v888_v38, %v887_v37  ;;  %v825_v47 = vadd.f32 %v761_v39, %v491_v21  ;;  %v494_v48 = vadd.f32 %v2081_v10, %v423_v40  ;;  %v1504_v49 = vunpack.c.l.bf16 %v1899_v36  ;;  %v1932_v21 = vld [vmem:[%s2062_s30 + $0x40] sm:$0xff]   ;;  %v1933_v39 = vld [vmem:[%s2062_s30 + $0x48] sm:$0xff]  }
  0x28   : > { %v826_v50 = vadd.f32 %v762_v41, %v492_v25  ;;  %v763_v51 = vadd.f32 %v2086_v11, %v692_v43  ;;  %v764_v52 = vadd.f32 %v2086_v11, %v693_v44  ;;  %v1505_v53 = vunpack.c.h.bf16 %v1899_v36 }
  0x29   : > { %1958 = vst [vmem:[%s2113_s17 + $0x18] sm:$0xff] %v1752_v46   ;;  %v889_v55 = vmax.f32 %v825_v47, 0.0  ;;  %v424_v56 = vmul.f32 %v1504_v49, %v2067_v0  ;;  %v1632_v57 = vunpack.c.l.bf16 %v1930_v45  ;;  %v1633_v58 = vunpack.c.h.bf16 %v1930_v45 }
  0x2a   : > { %v890_v59 = vmax.f32 %v826_v50, 0.0  ;;  %v827_v60 = vadd.f32 %v763_v51, %v493_v42  ;;  %v828_v61 = vadd.f32 %v764_v52, %v494_v48  ;;  %v425_v62 = vmul.f32 %v1505_v53, %v2067_v0  ;;  %v1903_v52 = vld [vmem:[%s2056_s27 + $0x50] sm:$0xff]  }
  0x2b   : > { %v495_v63 = vadd.f32 %v2081_v10, %v424_v56  ;;  %v694_v2 = vmul.f32 %v1632_v57, %v2072_v1  ;;  %v695_v3 = vmul.f32 %v1633_v58, %v2072_v1  ;;  %v1508_v4 = vunpack.c.l.bf16 %v1900_v54 }
  0x2c   : > { %v1757_v7 = vpack.c.bf16 %v890_v59, %v889_v55  ;;  %v891_v8 = vmax.f32 %v827_v60, 0.0  ;;  %v892_v9 = vmax.f32 %v828_v61, 0.0  ;;  %v496_v12 = vadd.f32 %v2081_v10, %v425_v62  ;;  %v1934_v61 = vld [vmem:[%s2062_s30 + $0x50] sm:$0xff]  }
  0x2d   : > { %v765_v13 = vadd.f32 %v2086_v11, %v694_v2  ;;  %v766_v14 = vadd.f32 %v2086_v11, %v695_v3  ;;  %v1509_v15 = vunpack.c.h.bf16 %v1900_v54  ;;  %v426_v16 = vmul.f32 %v1508_v4, %v2067_v0  ;;  %v1904_v4 = vld [vmem:[%s2056_s27 + $0x58] sm:$0xff]  }
  0x2e   : > { %1959 = vst [vmem:[%s2113_s17 + $0x20] sm:$0xff] %v1757_v7   ;;  %v1762_v17 = vpack.c.bf16 %v892_v9, %v891_v8  ;;  %v1636_v18 = vunpack.c.l.bf16 %v1931_v5  ;;  %v1637_v19 = vunpack.c.h.bf16 %v1931_v5  ;;  %v1512_v20 = vunpack.c.l.bf16 %v1901_v6 }
  0x2f   : > { %v829_v22 = vadd.f32 %v765_v13, %v495_v63  ;;  %v830_v23 = vadd.f32 %v766_v14, %v496_v12  ;;  %v427_v24 = vmul.f32 %v1509_v15, %v2067_v0  ;;  %v497_v25 = vadd.f32 %v2081_v10, %v426_v16 }
  0x30   : > { %1960 = vst [vmem:[%s2113_s17 + $0x28] sm:$0xff] %v1762_v17   ;;  %v696_v26 = vmul.f32 %v1636_v18, %v2072_v1  ;;  %v697_v27 = vmul.f32 %v1637_v19, %v2072_v1  ;;  %v1513_v28 = vunpack.c.h.bf16 %v1901_v6  ;;  %v428_v29 = vmul.f32 %v1512_v20, %v2067_v0 }
  0x31   : > { %v893_v31 = vmax.f32 %v829_v22, 0.0  ;;  %v894_v32 = vmax.f32 %v830_v23, 0.0  ;;  %v498_v33 = vadd.f32 %v2081_v10, %v427_v24  ;;  %v1640_v34 = vunpack.c.l.bf16 %v1932_v21  ;;  %v1935_v23 = vld [vmem:[%s2062_s30 + $0x58] sm:$0xff]   ;;  %v1905_v24 = vld [vmem:[%s2056_s27 + $0x60] sm:$0xff]  }
  0x32   : > { %v767_v35 = vadd.f32 %v2086_v11, %v696_v26  ;;  %v768_v36 = vadd.f32 %v2086_v11, %v697_v27  ;;  %v429_v37 = vmul.f32 %v1513_v28, %v2067_v0  ;;  %v499_v38 = vadd.f32 %v2081_v10, %v428_v29 }
  0x33   : > { %v1767_v40 = vpack.c.bf16 %v894_v32, %v893_v31  ;;  %v1641_v41 = vunpack.c.h.bf16 %v1932_v21  ;;  %v698_v42 = vmul.f32 %v1640_v34, %v2072_v1  ;;  %v1516_v43 = vunpack.c.l.bf16 %v1902_v30 }
  0x34   : > { %v831_v44 = vadd.f32 %v767_v35, %v497_v25  ;;  %v832_v45 = vadd.f32 %v768_v36, %v498_v33  ;;  %v500_v46 = vadd.f32 %v2081_v10, %v429_v37  ;;  %v1517_v47 = vunpack.c.h.bf16 %v1902_v30  ;;  %v1936_v37 = vld [vmem:[%s2062_s30 + $0x60] sm:$0xff]  }
  0x35   : > { %1961 = vst [vmem:[%s2113_s17 + $0x30] sm:$0xff] %v1767_v40   ;;  %v699_v48 = vmul.f32 %v1641_v41, %v2072_v1  ;;  %v769_v49 = vadd.f32 %v2086_v11, %v698_v42  ;;  %v430_v50 = vmul.f32 %v1516_v43, %v2067_v0  ;;  %v1644_v51 = vunpack.c.l.bf16 %v1933_v39 }
  0x36   : > { %v895_v53 = vmax.f32 %v831_v44, 0.0  ;;  %v896_v54 = vmax.f32 %v832_v45, 0.0  ;;  %v431_v55 = vmul.f32 %v1517_v47, %v2067_v0  ;;  %v1645_v56 = vunpack.c.h.bf16 %v1933_v39 }
  0x37   : > { %v770_v57 = vadd.f32 %v2086_v11, %v699_v48  ;;  %v833_v58 = vadd.f32 %v769_v49, %v499_v38  ;;  %v501_v59 = vadd.f32 %v2081_v10, %v430_v50  ;;  %v700_v60 = vmul.f32 %v1644_v51, %v2072_v1 }
  0x38   : > { %v1772_v62 = vpack.c.bf16 %v896_v54, %v895_v53  ;;  %v502_v63 = vadd.f32 %v2081_v10, %v431_v55  ;;  %v701_v2 = vmul.f32 %v1645_v56, %v2072_v1  ;;  %v1520_v3 = vunpack.c.l.bf16 %v1903_v52  ;;  %v1937_v55 = vld [vmem:[%s2062_s30 + $0x68] sm:$0xff]  }
  0x39   : > { %v834_v5 = vadd.f32 %v770_v57, %v500_v46  ;;  %v897_v6 = vmax.f32 %v833_v58, 0.0  ;;  %v771_v7 = vadd.f32 %v2086_v11, %v700_v60  ;;  %v1521_v8 = vunpack.c.h.bf16 %v1903_v52  ;;  %v1906_v46 = vld [vmem:[%s2056_s27 + $0x68] sm:$0xff]  }
  0x3a   : > { %1962 = vst [vmem:[%s2113_s17 + $0x38] sm:$0xff] %v1772_v62   ;;  %v772_v9 = vadd.f32 %v2086_v11, %v701_v2  ;;  %v432_v12 = vmul.f32 %v1520_v3, %v2067_v0  ;;  %v1648_v13 = vunpack.c.l.bf16 %v1934_v61  ;;  %v1649_v14 = vunpack.c.h.bf16 %v1934_v61 }
  0x3b   : > { %v898_v15 = vmax.f32 %v834_v5, 0.0  ;;  %v835_v16 = vadd.f32 %v771_v7, %v501_v59  ;;  %v433_v17 = vmul.f32 %v1521_v8, %v2067_v0  ;;  %v1524_v18 = vunpack.c.l.bf16 %v1904_v4 }
  0x3c   : > { %v836_v19 = vadd.f32 %v772_v9, %v502_v63  ;;  %v503_v20 = vadd.f32 %v2081_v10, %v432_v12  ;;  %v702_v21 = vmul.f32 %v1648_v13, %v2072_v1  ;;  %v703_v22 = vmul.f32 %v1649_v14, %v2072_v1 }
  0x3d   : > { %v1777_v25 = vpack.c.bf16 %v898_v15, %v897_v6  ;;  %v899_v26 = vmax.f32 %v835_v16, 0.0  ;;  %v504_v27 = vadd.f32 %v2081_v10, %v433_v17  ;;  %v1525_v28 = vunpack.c.h.bf16 %v1904_v4  ;;  %v1907_v6 = vld [vmem:[%s2056_s27 + $0x70] sm:$0xff]  }
  0x3e   : > { %v900_v29 = vmax.f32 %v836_v19, 0.0  ;;  %v773_v30 = vadd.f32 %v2086_v11, %v702_v21  ;;  %v774_v31 = vadd.f32 %v2086_v11, %v703_v22  ;;  %v434_v32 = vmul.f32 %v1524_v18, %v2067_v0  ;;  %v1938_v17 = vld [vmem:[%s2062_s30 + $0x70] sm:$0xff]   ;;  %v1908_v22 = vld [vmem:[%s2056_s27 + $0x78] sm:$0xff]  }
  0x3f   : > { %1963 = vst [vmem:[%s2113_s17 + $0x40] sm:$0xff] %v1777_v25   ;;  %v435_v33 = vmul.f32 %v1525_v28, %v2067_v0  ;;  %v1652_v34 = vunpack.c.l.bf16 %v1935_v23  ;;  %v1653_v35 = vunpack.c.h.bf16 %v1935_v23  ;;  %v1528_v36 = vunpack.c.l.bf16 %v1905_v24 }
  0x40   : > { %v1782_v38 = vpack.c.bf16 %v900_v29, %v899_v26  ;;  %v837_v39 = vadd.f32 %v773_v30, %v503_v20  ;;  %v838_v40 = vadd.f32 %v774_v31, %v504_v27  ;;  %v505_v41 = vadd.f32 %v2081_v10, %v434_v32 }
  0x41   : > { %v506_v42 = vadd.f32 %v2081_v10, %v435_v33  ;;  %v704_v43 = vmul.f32 %v1652_v34, %v2072_v1  ;;  %v705_v44 = vmul.f32 %v1653_v35, %v2072_v1  ;;  %v1529_v45 = vunpack.c.h.bf16 %v1905_v24  ;;  %v1939_v35 = vld [vmem:[%s2062_s30 + $0x78] sm:$0xff]  }
  0x42   : > { %1964 = vst [vmem:[%s2113_s17 + $0x48] sm:$0xff] %v1782_v38   ;;  %v901_v47 = vmax.f32 %v837_v39, 0.0  ;;  %v902_v48 = vmax.f32 %v838_v40, 0.0  ;;  %v436_v49 = vmul.f32 %v1528_v36, %v2067_v0  ;;  %v1656_v50 = vunpack.c.l.bf16 %v1936_v37  ;;  %v1909_v40 = vld [vmem:[%s2056_s27 + $0x80] sm:$0xff]  }
  0x43   : > { %v775_v51 = vadd.f32 %v2086_v11, %v704_v43  ;;  %v776_v52 = vadd.f32 %v2086_v11, %v705_v44  ;;  %v437_v53 = vmul.f32 %v1529_v45, %v2067_v0  ;;  %v1657_v54 = vunpack.c.h.bf16 %v1936_v37 }
  0x44   : > { %v1787_v56 = vpack.c.bf16 %v902_v48, %v901_v47  ;;  %v507_v57 = vadd.f32 %v2081_v10, %v436_v49  ;;  %v706_v58 = vmul.f32 %v1656_v50, %v2072_v1  ;;  %v1532_v59 = vunpack.c.l.bf16 %v1906_v46 }
  0x45   : > { %v839_v60 = vadd.f32 %v775_v51, %v505_v41  ;;  %v840_v61 = vadd.f32 %v776_v52, %v506_v42  ;;  %v508_v62 = vadd.f32 %v2081_v10, %v437_v53  ;;  %v707_v63 = vmul.f32 %v1657_v54, %v2072_v1  ;;  %v1940_v53 = vld [vmem:[%s2062_s30 + $0x80] sm:$0xff]  }
  0x46   : > { %1965 = vst [vmem:[%s2113_s17 + $0x50] sm:$0xff] %v1787_v56   ;;  %v777_v2 = vadd.f32 %v2086_v11, %v706_v58  ;;  %v1533_v3 = vunpack.c.h.bf16 %v1906_v46  ;;  %v438_v4 = vmul.f32 %v1532_v59, %v2067_v0  ;;  %v1660_v5 = vunpack.c.l.bf16 %v1937_v55 }
  0x47   : > { %v903_v7 = vmax.f32 %v839_v60, 0.0  ;;  %v904_v8 = vmax.f32 %v840_v61, 0.0  ;;  %v778_v9 = vadd.f32 %v2086_v11, %v707_v63  ;;  %v1661_v12 = vunpack.c.h.bf16 %v1937_v55 }
  0x48   : > { %v841_v13 = vadd.f32 %v777_v2, %v507_v57  ;;  %v439_v14 = vmul.f32 %v1533_v3, %v2067_v0  ;;  %v509_v15 = vadd.f32 %v2081_v10, %v438_v4  ;;  %v708_v16 = vmul.f32 %v1660_v5, %v2072_v1 }
  0x49   : > { %v1792_v18 = vpack.c.bf16 %v904_v8, %v903_v7  ;;  %v842_v19 = vadd.f32 %v778_v9, %v508_v62  ;;  %v709_v20 = vmul.f32 %v1661_v12, %v2072_v1  ;;  %v1536_v21 = vunpack.c.l.bf16 %v1907_v6  ;;  %v1910_v62 = vld [vmem:[%s2056_s27 + $0x88] sm:$0xff]  }
  0x4a   : > { %v905_v23 = vmax.f32 %v841_v13, 0.0  ;;  %v510_v24 = vadd.f32 %v2081_v10, %v439_v14  ;;  %v779_v25 = vadd.f32 %v2086_v11, %v708_v16  ;;  %v1537_v26 = vunpack.c.h.bf16 %v1907_v6 }
  0x4b   : > { %1966 = vst [vmem:[%s2113_s17 + $0x58] sm:$0xff] %v1792_v18   ;;  %v906_v27 = vmax.f32 %v842_v19, 0.0  ;;  %v780_v28 = vadd.f32 %v2086_v11, %v709_v20  ;;  %v440_v29 = vmul.f32 %v1536_v21, %v2067_v0  ;;  %v1664_v30 = vunpack.c.l.bf16 %v1938_v17  ;;  %v1911_v20 = vld [vmem:[%s2056_s27 + $0x90] sm:$0xff]  }
  0x4c   : > { %v843_v31 = vadd.f32 %v779_v25, %v509_v15  ;;  %v441_v32 = vmul.f32 %v1537_v26, %v2067_v0  ;;  %v1665_v33 = vunpack.c.h.bf16 %v1938_v17  ;;  %v1540_v34 = vunpack.c.l.bf16 %v1908_v22  ;;  %v1941_v15 = vld [vmem:[%s2062_s30 + $0x88] sm:$0xff]  }
  0x4d   : > { %v1797_v36 = vpack.c.bf16 %v906_v27, %v905_v23  ;;  %v844_v37 = vadd.f32 %v780_v28, %v510_v24  ;;  %v511_v38 = vadd.f32 %v2081_v10, %v440_v29  ;;  %v710_v39 = vmul.f32 %v1664_v30, %v2072_v1 }
  0x4e   : > { %v907_v41 = vmax.f32 %v843_v31, 0.0  ;;  %v512_v42 = vadd.f32 %v2081_v10, %v441_v32  ;;  %v711_v43 = vmul.f32 %v1665_v33, %v2072_v1  ;;  %v1541_v44 = vunpack.c.h.bf16 %v1908_v22  ;;  %v1942_v33 = vld [vmem:[%s2062_s30 + $0x90] sm:$0xff]  }
  0x4f   : > { %1967 = vst [vmem:[%s2113_s17 + $0x60] sm:$0xff] %v1797_v36   ;;  %v908_v45 = vmax.f32 %v844_v37, 0.0  ;;  %v781_v46 = vadd.f32 %v2086_v11, %v710_v39  ;;  %v442_v47 = vmul.f32 %v1540_v34, %v2067_v0  ;;  %v1668_v48 = vunpack.c.l.bf16 %v1939_v35 }
  0x50   : > { %v782_v49 = vadd.f32 %v2086_v11, %v711_v43  ;;  %v443_v50 = vmul.f32 %v1541_v44, %v2067_v0  ;;  %v1669_v51 = vunpack.c.h.bf16 %v1939_v35  ;;  %v1544_v52 = vunpack.c.l.bf16 %v1909_v40 }
  0x51   : > { %v1802_v54 = vpack.c.bf16 %v908_v45, %v907_v41  ;;  %v845_v55 = vadd.f32 %v781_v46, %v511_v38  ;;  %v513_v56 = vadd.f32 %v2081_v10, %v442_v47  ;;  %v712_v57 = vmul.f32 %v1668_v48, %v2072_v1  ;;  %v1912_v38 = vld [vmem:[%s2056_s27 + $0x98] sm:$0xff]  }
  0x52   : > { %v846_v58 = vadd.f32 %v782_v49, %v512_v42  ;;  %v514_v59 = vadd.f32 %v2081_v10, %v443_v50  ;;  %v713_v60 = vmul.f32 %v1669_v51, %v2072_v1  ;;  %v1545_v61 = vunpack.c.h.bf16 %v1909_v40  ;;  %v1943_v51 = vld [vmem:[%s2062_s30 + $0x98] sm:$0xff]  }
  0x53   : > { %1968 = vst [vmem:[%s2113_s17 + $0x68] sm:$0xff] %v1802_v54   ;;  %v909_v63 = vmax.f32 %v845_v55, 0.0  ;;  %v783_v2 = vadd.f32 %v2086_v11, %v712_v57  ;;  %v444_v3 = vmul.f32 %v1544_v52, %v2067_v0  ;;  %v1672_v4 = vunpack.c.l.bf16 %v1940_v53 }
  0x54   : > { %v910_v5 = vmax.f32 %v846_v58, 0.0  ;;  %v784_v6 = vadd.f32 %v2086_v11, %v713_v60  ;;  %v445_v7 = vmul.f32 %v1545_v61, %v2067_v0  ;;  %v1673_v8 = vunpack.c.h.bf16 %v1940_v53  ;;  %v1913_v60 = vld [vmem:[%s2056_s27 + $0xa0] sm:$0xff]  }
  0x55   : > { %v847_v9 = vadd.f32 %v783_v2, %v513_v56  ;;  %v515_v12 = vadd.f32 %v2081_v10, %v444_v3  ;;  %v714_v13 = vmul.f32 %v1672_v4, %v2072_v1  ;;  %v1548_v14 = vunpack.c.l.bf16 %v1910_v62 }
  0x56   : > { %v1807_v16 = vpack.c.bf16 %v910_v5, %v909_v63  ;;  %v848_v17 = vadd.f32 %v784_v6, %v514_v59  ;;  %v516_v18 = vadd.f32 %v2081_v10, %v445_v7  ;;  %v715_v19 = vmul.f32 %v1673_v8, %v2072_v1  ;;  %v1944_v7 = vld [vmem:[%s2062_s30 + $0xa0] sm:$0xff]  }
  0x57   : > { %v911_v21 = vmax.f32 %v847_v9, 0.0  ;;  %v785_v22 = vadd.f32 %v2086_v11, %v714_v13  ;;  %v1549_v23 = vunpack.c.h.bf16 %v1910_v62  ;;  %v446_v24 = vmul.f32 %v1548_v14, %v2067_v0 }
  0x58   : > { %1969 = vst [vmem:[%s2113_s17 + $0x70] sm:$0xff] %v1807_v16   ;;  %v912_v25 = vmax.f32 %v848_v17, 0.0  ;;  %v786_v26 = vadd.f32 %v2086_v11, %v715_v19  ;;  %v1676_v27 = vunpack.c.l.bf16 %v1941_v15  ;;  %v1677_v28 = vunpack.c.h.bf16 %v1941_v15 }
  0x59   : > { %v849_v29 = vadd.f32 %v785_v22, %v515_v12  ;;  %v447_v30 = vmul.f32 %v1549_v23, %v2067_v0  ;;  %v517_v31 = vadd.f32 %v2081_v10, %v446_v24  ;;  %v1552_v32 = vunpack.c.l.bf16 %v1911_v20 }
  0x5a   : > { %v1812_v34 = vpack.c.bf16 %v912_v25, %v911_v21  ;;  %v850_v35 = vadd.f32 %v786_v26, %v516_v18  ;;  %v716_v36 = vmul.f32 %v1676_v27, %v2072_v1  ;;  %v717_v37 = vmul.f32 %v1677_v28, %v2072_v1  ;;  %v1914_v18 = vld [vmem:[%s2056_s27 + $0xa8] sm:$0xff]  }
  0x5b   : > { %v913_v39 = vmax.f32 %v849_v29, 0.0  ;;  %v518_v40 = vadd.f32 %v2081_v10, %v447_v30  ;;  %v1553_v41 = vunpack.c.h.bf16 %v1911_v20  ;;  %v448_v42 = vmul.f32 %v1552_v32, %v2067_v0 }
  0x5c   : > { %1970 = vst [vmem:[%s2113_s17 + $0x78] sm:$0xff] %v1812_v34   ;;  %v914_v43 = vmax.f32 %v850_v35, 0.0  ;;  %v787_v44 = vadd.f32 %v2086_v11, %v716_v36  ;;  %v788_v45 = vadd.f32 %v2086_v11, %v717_v37  ;;  %v1680_v46 = vunpack.c.l.bf16 %v1942_v33  ;;  %v1915_v36 = vld [vmem:[%s2056_s27 + $0xb0] sm:$0xff]  }
  0x5d   : > { %v449_v47 = vmul.f32 %v1553_v41, %v2067_v0  ;;  %v519_v48 = vadd.f32 %v2081_v10, %v448_v42  ;;  %v1681_v49 = vunpack.c.h.bf16 %v1942_v33  ;;  %v1556_v50 = vunpack.c.l.bf16 %v1912_v38 }
  0x5e   : > { %v1817_v52 = vpack.c.bf16 %v914_v43, %v913_v39  ;;  %v851_v53 = vadd.f32 %v787_v44, %v517_v31  ;;  %v852_v54 = vadd.f32 %v788_v45, %v518_v40  ;;  %v718_v55 = vmul.f32 %v1680_v46, %v2072_v1  ;;  %v1945_v31 = vld [vmem:[%s2062_s30 + $0xa8] sm:$0xff]  }
  0x5f   : > { %v520_v56 = vadd.f32 %v2081_v10, %v449_v47  ;;  %v719_v57 = vmul.f32 %v1681_v49, %v2072_v1  ;;  %v1557_v58 = vunpack.c.h.bf16 %v1912_v38  ;;  %v450_v59 = vmul.f32 %v1556_v50, %v2067_v0  ;;  %v1946_v49 = vld [vmem:[%s2062_s30 + $0xb0] sm:$0xff]  }
  0x60   : > { %1971 = vst [vmem:[%s2113_s17 + $0x80] sm:$0xff] %v1817_v52   ;;  %v915_v61 = vmax.f32 %v851_v53, 0.0  ;;  %v916_v62 = vmax.f32 %v852_v54, 0.0  ;;  %v789_v63 = vadd.f32 %v2086_v11, %v718_v55  ;;  %v1684_v2 = vunpack.c.l.bf16 %v1943_v51  ;;  %v1916_v54 = vld [vmem:[%s2056_s27 + $0xb8] sm:$0xff]  }
  0x61   : > { %v790_v3 = vadd.f32 %v2086_v11, %v719_v57  ;;  %v451_v4 = vmul.f32 %v1557_v58, %v2067_v0  ;;  %v521_v5 = vadd.f32 %v2081_v10, %v450_v59  ;;  %v1685_v6 = vunpack.c.h.bf16 %v1943_v51 }
  0x62   : > { %v1822_v8 = vpack.c.bf16 %v916_v62, %v915_v61  ;;  %v853_v9 = vadd.f32 %v789_v63, %v519_v48  ;;  %v720_v12 = vmul.f32 %v1684_v2, %v2072_v1  ;;  %v1560_v13 = vunpack.c.l.bf16 %v1913_v60 }
  0x63   : > { %v854_v14 = vadd.f32 %v790_v3, %v520_v56  ;;  %v522_v15 = vadd.f32 %v2081_v10, %v451_v4  ;;  %v721_v16 = vmul.f32 %v1685_v6, %v2072_v1  ;;  %v1561_v17 = vunpack.c.h.bf16 %v1913_v60 }
  0x64   : > { %1972 = vst [vmem:[%s2113_s17 + $0x88] sm:$0xff] %v1822_v8   ;;  %v917_v19 = vmax.f32 %v853_v9, 0.0  ;;  %v791_v20 = vadd.f32 %v2086_v11, %v720_v12  ;;  %v452_v21 = vmul.f32 %v1560_v13, %v2067_v0  ;;  %v1688_v22 = vunpack.c.l.bf16 %v1944_v7 }
  0x65   : > { %v918_v23 = vmax.f32 %v854_v14, 0.0  ;;  %v792_v24 = vadd.f32 %v2086_v11, %v721_v16  ;;  %v453_v25 = vmul.f32 %v1561_v17, %v2067_v0  ;;  %v1689_v26 = vunpack.c.h.bf16 %v1944_v7  ;;  %v1917_v16 = vld [vmem:[%s2056_s27 + $0xc0] sm:$0xff]  }
  0x66   : > { %v855_v27 = vadd.f32 %v791_v20, %v521_v5  ;;  %v523_v28 = vadd.f32 %v2081_v10, %v452_v21  ;;  %v722_v29 = vmul.f32 %v1688_v22, %v2072_v1  ;;  %v1564_v30 = vunpack.c.l.bf16 %v1914_v18  ;;  %v1947_v5 = vld [vmem:[%s2062_s30 + $0xb8] sm:$0xff]  }
  0x67   : > { %v1827_v32 = vpack.c.bf16 %v918_v23, %v917_v19  ;;  %v856_v33 = vadd.f32 %v792_v24, %v522_v15  ;;  %v524_v34 = vadd.f32 %v2081_v10, %v453_v25  ;;  %v723_v35 = vmul.f32 %v1689_v26, %v2072_v1  ;;  %v1948_v25 = vld [vmem:[%s2062_s30 + $0xc0] sm:$0xff]  }
  0x68   : > { %v919_v37 = vmax.f32 %v855_v27, 0.0  ;;  %v793_v38 = vadd.f32 %v2086_v11, %v722_v29  ;;  %v1565_v39 = vunpack.c.h.bf16 %v1914_v18  ;;  %v454_v40 = vmul.f32 %v1564_v30, %v2067_v0 }
  0x69   : > { %1973 = vst [vmem:[%s2113_s17 + $0x90] sm:$0xff] %v1827_v32   ;;  %v920_v41 = vmax.f32 %v856_v33, 0.0  ;;  %v794_v42 = vadd.f32 %v2086_v11, %v723_v35  ;;  %v1692_v43 = vunpack.c.l.bf16 %v1945_v31  ;;  %v1693_v44 = vunpack.c.h.bf16 %v1945_v31 }
  0x6a   : > { %v857_v45 = vadd.f32 %v793_v38, %v523_v28  ;;  %v455_v46 = vmul.f32 %v1565_v39, %v2067_v0  ;;  %v525_v47 = vadd.f32 %v2081_v10, %v454_v40  ;;  %v1568_v48 = vunpack.c.l.bf16 %v1915_v36 }
  0x6b   : > { %v1832_v50 = vpack.c.bf16 %v920_v41, %v919_v37  ;;  %v858_v51 = vadd.f32 %v794_v42, %v524_v34  ;;  %v724_v52 = vmul.f32 %v1692_v43, %v2072_v1  ;;  %v725_v53 = vmul.f32 %v1693_v44, %v2072_v1  ;;  %v1918_v34 = vld [vmem:[%s2056_s27 + $0xc8] sm:$0xff]  }
  0x6c   : > { %v921_v55 = vmax.f32 %v857_v45, 0.0  ;;  %v526_v56 = vadd.f32 %v2081_v10, %v455_v46  ;;  %v1569_v57 = vunpack.c.h.bf16 %v1915_v36  ;;  %v456_v58 = vmul.f32 %v1568_v48, %v2067_v0 }
  0x6d   : > { %1974 = vst [vmem:[%s2113_s17 + $0x98] sm:$0xff] %v1832_v50   ;;  %v922_v59 = vmax.f32 %v858_v51, 0.0  ;;  %v795_v60 = vadd.f32 %v2086_v11, %v724_v52  ;;  %v796_v61 = vadd.f32 %v2086_v11, %v725_v53  ;;  %v1696_v62 = vunpack.c.l.bf16 %v1946_v49  ;;  %v1919_v52 = vld [vmem:[%s2056_s27 + $0xd0] sm:$0xff]  }
  0x6e   : > { %v457_v63 = vmul.f32 %v1569_v57, %v2067_v0  ;;  %v527_v2 = vadd.f32 %v2081_v10, %v456_v58  ;;  %v1697_v3 = vunpack.c.h.bf16 %v1946_v49  ;;  %v1572_v4 = vunpack.c.l.bf16 %v1916_v54 }
  0x6f   : > { %v1837_v6 = vpack.c.bf16 %v922_v59, %v921_v55  ;;  %v859_v7 = vadd.f32 %v795_v60, %v525_v47  ;;  %v860_v8 = vadd.f32 %v796_v61, %v526_v56  ;;  %v726_v9 = vmul.f32 %v1696_v62, %v2072_v1  ;;  %v1949_v47 = vld [vmem:[%s2062_s30 + $0xc8] sm:$0xff]  }
  0x70   : > { %v528_v12 = vadd.f32 %v2081_v10, %v457_v63  ;;  %v727_v13 = vmul.f32 %v1697_v3, %v2072_v1  ;;  %v1573_v14 = vunpack.c.h.bf16 %v1916_v54  ;;  %v458_v15 = vmul.f32 %v1572_v4, %v2067_v0  ;;  %v1950_v3 = vld [vmem:[%s2062_s30 + $0xd0] sm:$0xff]  }
  0x71   : > { %1975 = vst [vmem:[%s2113_s17 + $0xa0] sm:$0xff] %v1837_v6   ;;  %v923_v17 = vmax.f32 %v859_v7, 0.0  ;;  %v924_v18 = vmax.f32 %v860_v8, 0.0  ;;  %v797_v19 = vadd.f32 %v2086_v11, %v726_v9  ;;  %v1700_v20 = vunpack.c.l.bf16 %v1947_v5  ;;  %v2374_v7 = vld [vmem:[%s2469_s4] ss:$0 sm:$0xff]  ;;  %v1920_v9 = vld [vmem:[%s2056_s27 + $0xd8] sm:$0xff]  }
  0x72   : > { %v798_v21 = vadd.f32 %v2086_v11, %v727_v13  ;;  %v459_v22 = vmul.f32 %v1573_v14, %v2067_v0  ;;  %v529_v23 = vadd.f32 %v2081_v10, %v458_v15  ;;  %v1701_v24 = vunpack.c.h.bf16 %v1947_v5  ;;  %v2382_v14 = vld [vmem:[%s2466_s1] ss:$0 sm:$0xff] }
  0x73   : > { %v1842_v26 = vpack.c.bf16 %v924_v18, %v923_v17  ;;  %v861_v27 = vadd.f32 %v797_v19, %v527_v2  ;;  %v728_v28 = vmul.f32 %v1700_v20, %v2072_v1  ;;  %v1576_v29 = vunpack.c.l.bf16 %v1917_v16 }
  0x74   : > { %v862_v30 = vadd.f32 %v798_v21, %v528_v12  ;;  %v530_v31 = vadd.f32 %v2081_v10, %v459_v22  ;;  %v729_v32 = vmul.f32 %v1701_v24, %v2072_v1  ;;  %v1577_v33 = vunpack.c.h.bf16 %v1917_v16 }
  0x75   : > { %1976 = vst [vmem:[%s2113_s17 + $0xa8] sm:$0xff] %v1842_v26   ;;  %v925_v35 = vmax.f32 %v861_v27, 0.0  ;;  %v799_v36 = vadd.f32 %v2086_v11, %v728_v28  ;;  %v460_v37 = vmul.f32 %v1576_v29, %v2067_v0  ;;  %v1704_v38 = vunpack.c.l.bf16 %v1948_v25 }
  0x76   : > { %v926_v39 = vmax.f32 %v862_v30, 0.0  ;;  %v800_v40 = vadd.f32 %v2086_v11, %v729_v32  ;;  %v461_v41 = vmul.f32 %v1577_v33, %v2067_v0  ;;  %v1705_v42 = vunpack.c.h.bf16 %v1948_v25 }
  0x77   : > { %v863_v43 = vadd.f32 %v799_v36, %v529_v23  ;;  %v531_v44 = vadd.f32 %v2081_v10, %v460_v37  ;;  %v730_v45 = vmul.f32 %v1704_v38, %v2072_v1  ;;  %v1580_v46 = vunpack.c.l.bf16 %v1918_v34  ;;  %v1951_v23 = vld [vmem:[%s2062_s30 + $0xd8] sm:$0xff]  }
  0x78   : > { %v1847_v48 = vpack.c.bf16 %v926_v39, %v925_v35  ;;  %v864_v49 = vadd.f32 %v800_v40, %v530_v31  ;;  %v532_v50 = vadd.f32 %v2081_v10, %v461_v41  ;;  %v731_v51 = vmul.f32 %v1705_v42, %v2072_v1  ;;  %v1921_v31 = vld [vmem:[%s2056_s27 + $0xe0] sm:$0xff]  }
  0x79   : > { %v927_v53 = vmax.f32 %v863_v43, 0.0  ;;  %v801_v54 = vadd.f32 %v2086_v11, %v730_v45  ;;  %v1581_v55 = vunpack.c.h.bf16 %v1918_v34  ;;  %v462_v56 = vmul.f32 %v1580_v46, %v2067_v0  ;;  %v2405_v34 = vld [vmem:[%s2470_s5] ss:$0 sm:$0xff] }
  0x7a   : > { %1977 = vst [vmem:[%s2113_s17 + $0xb0] sm:$0xff] %v1847_v48   ;;  %v928_v57 = vmax.f32 %v864_v49, 0.0  ;;  %v802_v58 = vadd.f32 %v2086_v11, %v731_v51  ;;  %v1708_v59 = vunpack.c.l.bf16 %v1949_v47  ;;  %v1709_v60 = vunpack.c.h.bf16 %v1949_v47  ;;  %v1952_v41 = vld [vmem:[%s2062_s30 + $0xe0] sm:$0xff]  }
  0x7b   : > { %v865_v61 = vadd.f32 %v801_v54, %v531_v44  ;;  %v463_v62 = vmul.f32 %v1581_v55, %v2067_v0  ;;  %v533_v63 = vadd.f32 %v2081_v10, %v462_v56  ;;  %v1584_v2 = vunpack.c.l.bf16 %v1919_v52 }
  0x7c   : > { %v1852_v4 = vpack.c.bf16 %v928_v57, %v927_v53  ;;  %v866_v5 = vadd.f32 %v802_v58, %v532_v50  ;;  %v732_v6 = vmul.f32 %v1708_v59, %v2072_v1  ;;  %v733_v8 = vmul.f32 %v2374_v7, %v1709_v60  ;;  %v1922_v50 = vld [vmem:[%s2056_s27 + $0xe8] sm:$0xff]  }
  0x7d   : > { %v929_v12 = vmax.f32 %v865_v61, 0.0  ;;  %v534_v0 = vadd.f32 %v2081_v10, %v463_v62  ;;  %v1585_v13 = vunpack.c.h.bf16 %v1919_v52  ;;  %v464_v1 = vmul.f32 %v2382_v14, %v1584_v2  ;;  %v2392_v10 = vld [vmem:[%s2467_s2] ss:$0 sm:$0xff] }
  0x7e   : > { %1978 = vst [vmem:[%s2113_s17 + $0xb8] sm:$0xff] %v1852_v4   ;;  %v930_v15 = vmax.f32 %v866_v5, 0.0  ;;  %v803_v16 = vadd.f32 %v2086_v11, %v732_v6  ;;  %v804_v17 = vadd.f32 %v2086_v11, %v733_v8  ;;  %v1712_v18 = vunpack.c.l.bf16 %v1950_v3  ;;  %v1923_v6 = vld [vmem:[%s2056_s27 + $0xf0] sm:$0xff]  }
  0x7f   : > { %v465_v19 = vmul.f32 %v2382_v14, %v1585_v13  ;;  %v535_v20 = vadd.f32 %v2392_v10, %v464_v1  ;;  %v1713_v21 = vunpack.c.h.bf16 %v1950_v3  ;;  %v1588_v22 = vunpack.c.l.bf16 %v1920_v9 }
  0x80   : > { %v1857_v24 = vpack.c.bf16 %v930_v15, %v929_v12  ;;  %v867_v25 = vadd.f32 %v803_v16, %v533_v63  ;;  %v868_v26 = vadd.f32 %v804_v17, %v534_v0  ;;  %v734_v11 = vmul.f32 %v2374_v7, %v1712_v18  ;;  %v1953_v63 = vld [vmem:[%s2062_s30 + $0xe8] sm:$0xff]  }
  0x81   : > { %v536_v27 = vadd.f32 %v2392_v10, %v465_v19  ;;  %v735_v28 = vmul.f32 %v2374_v7, %v1713_v21  ;;  %v1589_v29 = vunpack.c.h.bf16 %v1920_v9  ;;  %v466_v30 = vmul.f32 %v2382_v14, %v1588_v22  ;;  %v1954_v21 = vld [vmem:[%s2062_s30 + $0xf0] sm:$0xff]  }
  0x82   : > { %1979 = vst [vmem:[%s2113_s17 + $0xc0] sm:$0xff] %v1857_v24   ;;  %v931_v32 = vmax.f32 %v867_v25, 0.0  ;;  %v932_v33 = vmax.f32 %v868_v26, 0.0  ;;  %v805_v35 = vadd.f32 %v2405_v34, %v734_v11  ;;  %v1716_v36 = vunpack.c.l.bf16 %v1951_v23  ;;  %v1924_v26 = vld [vmem:[%s2056_s27 + $0xf8] sm:$0xff]  }
  0x83   : > { %v806_v37 = vadd.f32 %v2405_v34, %v735_v28  ;;  %v467_v38 = vmul.f32 %v2382_v14, %v1589_v29  ;;  %v537_v39 = vadd.f32 %v2392_v10, %v466_v30  ;;  %v1717_v40 = vunpack.c.h.bf16 %v1951_v23 }
  0x84   : > { %v1862_v42 = vpack.c.bf16 %v932_v33, %v931_v32  ;;  %v869_v43 = vadd.f32 %v805_v35, %v535_v20  ;;  %v736_v44 = vmul.f32 %v2374_v7, %v1716_v36  ;;  %v1592_v45 = vunpack.c.l.bf16 %v1921_v31 }
  0x85   : > { %v870_v46 = vadd.f32 %v806_v37, %v536_v27  ;;  %v538_v47 = vadd.f32 %v2392_v10, %v467_v38  ;;  %v737_v48 = vmul.f32 %v2374_v7, %v1717_v40  ;;  %v1593_v49 = vunpack.c.h.bf16 %v1921_v31 }
  0x86   : > { %1980 = vst [vmem:[%s2113_s17 + $0xc8] sm:$0xff] %v1862_v42   ;;  %v933_v51 = vmax.f32 %v869_v43, 0.0  ;;  %v807_v52 = vadd.f32 %v2405_v34, %v736_v44  ;;  %v468_v53 = vmul.f32 %v2382_v14, %v1592_v45  ;;  %v1720_v54 = vunpack.c.l.bf16 %v1952_v41 }
  0x87   : > { %v934_v55 = vmax.f32 %v870_v46, 0.0  ;;  %v808_v56 = vadd.f32 %v2405_v34, %v737_v48  ;;  %v469_v57 = vmul.f32 %v2382_v14, %v1593_v49  ;;  %v1721_v58 = vunpack.c.h.bf16 %v1952_v41 }
  0x88   : > { %v871_v59 = vadd.f32 %v807_v52, %v537_v39  ;;  %v539_v60 = vadd.f32 %v2392_v10, %v468_v53  ;;  %v738_v61 = vmul.f32 %v2374_v7, %v1720_v54  ;;  %v1596_v62 = vunpack.c.l.bf16 %v1922_v50  ;;  %v1955_v39 = vld [vmem:[%s2062_s30 + $0xf8] sm:$0xff]  }
  0x89   : > { %v1867_v2 = vpack.c.bf16 %v934_v55, %v933_v51  ;;  %v872_v3 = vadd.f32 %v808_v56, %v538_v47  ;;  %v540_v4 = vadd.f32 %v2392_v10, %v469_v57  ;;  %v739_v5 = vmul.f32 %v2374_v7, %v1721_v58 }
  0x8a   : > { %v935_v8 = vmax.f32 %v871_v59, 0.0  ;;  %v809_v9 = vadd.f32 %v2405_v34, %v738_v61  ;;  %v1597_v12 = vunpack.c.h.bf16 %v1922_v50  ;;  %v470_v0 = vmul.f32 %v2382_v14, %v1596_v62 }
  0x8b   : > { %1981 = vst [vmem:[%s2113_s17 + $0xd0] sm:$0xff] %v1867_v2   ;;  %v936_v13 = vmax.f32 %v872_v3, 0.0  ;;  %v810_v1 = vadd.f32 %v2405_v34, %v739_v5  ;;  %v1724_v15 = vunpack.c.l.bf16 %v1953_v63  ;;  %v1725_v16 = vunpack.c.h.bf16 %v1953_v63 }
  0x8c   : > { %v873_v17 = vadd.f32 %v809_v9, %v539_v60  ;;  %v471_v18 = vmul.f32 %v2382_v14, %v1597_v12  ;;  %v541_v19 = vadd.f32 %v2392_v10, %v470_v0  ;;  %v1600_v20 = vunpack.c.l.bf16 %v1923_v6 }
  0x8d   : > { %v1872_v22 = vpack.c.bf16 %v936_v13, %v935_v8  ;;  %v874_v23 = vadd.f32 %v810_v1, %v540_v4  ;;  %v740_v24 = vmul.f32 %v2374_v7, %v1724_v15  ;;  %v741_v25 = vmul.f32 %v2374_v7, %v1725_v16 }
  0x8e   : > { %v937_v11 = vmax.f32 %v873_v17, 0.0  ;;  %v542_v27 = vadd.f32 %v2392_v10, %v471_v18  ;;  %v1601_v28 = vunpack.c.h.bf16 %v1923_v6  ;;  %v472_v29 = vmul.f32 %v2382_v14, %v1600_v20 }
  0x8f   : > { %1982 = vst [vmem:[%s2113_s17 + $0xd8] sm:$0xff] %v1872_v22   ;;  %v938_v30 = vmax.f32 %v874_v23, 0.0  ;;  %v811_v31 = vadd.f32 %v2405_v34, %v740_v24  ;;  %v812_v32 = vadd.f32 %v2405_v34, %v741_v25  ;;  %v1728_v33 = vunpack.c.l.bf16 %v1954_v21 }
  0x90   : > { %v473_v35 = vmul.f32 %v2382_v14, %v1601_v28  ;;  %v543_v36 = vadd.f32 %v2392_v10, %v472_v29  ;;  %v1729_v37 = vunpack.c.h.bf16 %v1954_v21  ;;  %v1604_v38 = vunpack.c.l.bf16 %v1924_v26 }
  0x91   : > { %v1877_v40 = vpack.c.bf16 %v938_v30, %v937_v11  ;;  %v875_v41 = vadd.f32 %v811_v31, %v541_v19  ;;  %v876_v42 = vadd.f32 %v812_v32, %v542_v27  ;;  %v742_v43 = vmul.f32 %v2374_v7, %v1728_v33 }
  0x92   : > { %v544_v44 = vadd.f32 %v2392_v10, %v473_v35  ;;  %v743_v45 = vmul.f32 %v2374_v7, %v1729_v37  ;;  %v1605_v46 = vunpack.c.h.bf16 %v1924_v26  ;;  %v474_v47 = vmul.f32 %v2382_v14, %v1604_v38 }
  0x93   : > { %1983 = vst [vmem:[%s2113_s17 + $0xe0] sm:$0xff] %v1877_v40   ;;  %v939_v48 = vmax.f32 %v875_v41, 0.0  ;;  %v940_v49 = vmax.f32 %v876_v42, 0.0  ;;  %v813_v50 = vadd.f32 %v2405_v34, %v742_v43  ;;  %v1732_v51 = vunpack.c.l.bf16 %v1955_v39 }
  0x94   : > { %v814_v52 = vadd.f32 %v2405_v34, %v743_v45  ;;  %v475_v53 = vmul.f32 %v2382_v14, %v1605_v46  ;;  %v1733_v54 = vunpack.c.h.bf16 %v1955_v39  ;;  %v545_v57 = vadd.f32 %v2392_v10, %v474_v47 }
  0x95   : > { %v1882_v55 = vpack.c.bf16 %v940_v49, %v939_v48  ;;  %v877_v56 = vadd.f32 %v813_v50, %v543_v36  ;;  %v744_v58 = vmul.f32 %v2374_v7, %v1732_v51 }
  0x96   : > { %v878_v59 = vadd.f32 %v814_v52, %v544_v44  ;;  %v546_v60 = vadd.f32 %v2392_v10, %v475_v53  ;;  %v745_v61 = vmul.f32 %v2374_v7, %v1733_v54 }
  0x97   : > { %1984 = vst [vmem:[%s2113_s17 + $0xe8] sm:$0xff] %v1882_v55   ;;  %v941_v62 = vmax.f32 %v877_v56, 0.0  ;;  %v815_v63 = vadd.f32 %v2405_v34, %v744_v58 }
  0x98   : > { %v942_v2 = vmax.f32 %v878_v59, 0.0  ;;  %v816_v14 = vadd.f32 %v2405_v34, %v745_v61 }
  0x99   : > { %v879_v3 = vadd.f32 %v815_v63, %v545_v57 }
  0x9a   : > { %v1887_v4 = vpack.c.bf16 %v942_v2, %v941_v62  ;;  %v880_v5 = vadd.f32 %v816_v14, %v546_v60 }
  0x9b   : > { %v943_v6 = vmax.f32 %v879_v3, 0.0 }
  0x9c   : > { %1985 = vst [vmem:[%s2113_s17 + $0xf0] sm:$0xff] %v1887_v4   ;;  %v944_v8 = vmax.f32 %v880_v5, 0.0 }
  0x9e   : > { %v1892_v9 = vpack.c.bf16 %v944_v8, %v943_v6 }
  0xa0   : > { %1986 = vst [vmem:[%s2113_s17 + $0xf8] sm:$0xff] %v1892_v9  }
  0xa1 PF: > { %s16_s21 = sadd.s32 1, %s2005_s21  }
  0xa2   : > { %p13_p4 = scmp.ge.s32.totalorder %s16_s21, 6  }
  0xa4   :  { %15 = sbr.rel (!%p13_p4) target bundleno = 1 (0x1), region = 77 }

// kernel: _lambda_.28
= control target key start
LH: loop header
LB: loop body
LE: loop exit
PB: predicated region body
PF: predicated region fallthrough
CT: control target
= control target key end

     0   :  { %s981_s21 = smov 0   ;;  %s1060_s0 = inlined_call_operand.vmem [shape: bf16[512,128], index: 0, kind: input, shape index: {}]   ;;  %s1061_s1 = inlined_call_operand.vmem [shape: bf16[128,128], index: 1, kind: input, shape index: {}]   ;;  %s1062_s2 = inlined_call_operand.vmem [shape: f32[1,128], index: 2, kind: input, shape index: {}]   ;;  %s1063_s3 = inlined_call_operand.vmem [shape: f32[1,128], index: 3, kind: input, shape index: {}]   ;;  %s1064_s4 = inlined_call_operand.vmem [shape: bf16[512,128], index: 4, kind: output, shape index: {0}]   ;;  %s1065_s5 = inlined_call_operand.vmem [shape: f32[4,1,128], index: 5, kind: output, shape index: {1}]   ;;  %s1066_s6 = inlined_call_operand.vmem [shape: f32[4,1,128], index: 6, kind: output, shape index: {2}]  }
   0x1 LB: > { %s987_s2 = sadd.s32 4294967295, %s944_s21   ;;  %p748_p0 = scmp.ge.s32.totalorder %s944_s21, 1  ;;  %s944_s21 = sphi %s981_s21, %s17_s21  }
   0x2   : > { %p218_p1 = scmp.lt.s32.totalorder %s944_s21, 5 }
   0x4   : > { %p219_p2 = pnand %p748_p0, %p218_p1 }
   0x5   : > { %v922_v0 = vld [vmem:[%s1061_s1] sm:$0xff] (!%p219_p2)   ;;  %s749_s23 = sshll.u32 (!%p219_p2), %s987_s2, 4  ;;  %v923_v1 = vld [vmem:[%s1061_s1 + $0x8] sm:$0xff] (!%p219_p2)   ;;  %v924_v2 = vld [vmem:[%s1061_s1 + $0x10] sm:$0xff] (!%p219_p2)   ;;  %p266_p4 = scmp.lt.s32.totalorder (!%p219_p2), %s987_s2, 3 }
   0x6   : > { %222 = sbr.rel (%p219_p2) target bundleno = 298 (0x12a), region = 36  ;;  %p255_p3 = scmp.lt.s32.totalorder (!%p219_p2), %s749_s23, 63  ;;  %866 = vmatprep.subr.bf16.mxu0 (!%p219_p2), %v922_v0  ;;  %898 = vmatprep.subr.bf16.mxu1 (!%p219_p2), %v922_v0  ;;  %v925_v3 = vld [vmem:[%s1061_s1 + $0x18] sm:$0xff] (!%p219_p2)   ;;  %v926_v5 = vld [vmem:[%s1061_s1 + $0x20] sm:$0xff] (!%p219_p2)   ;;  %v927_v7 = vld [vmem:[%s1061_s1 + $0x28] sm:$0xff] (!%p219_p2)  }
   0x7   : > { %867 = vmatpush3.bf16.msra.mxu0 (!%p219_p2), %v922_v0  ;;  %906 = vmatpush3.bf16.msra.mxu1 (!%p219_p2), %v922_v0  ;;  %v928_v8 = vld [vmem:[%s1061_s1 + $0x30] sm:$0xff] (!%p219_p2)   ;;  %v929_v9 = vld [vmem:[%s1061_s1 + $0x38] sm:$0xff] (!%p219_p2)  }
   0x8   : > { %868 = vmatprep.subr.bf16.mxu0 (!%p219_p2), %v923_v1  ;;  %899 = vmatprep.subr.bf16.mxu1 (!%p219_p2), %v923_v1 }
   0xb   : > { %869 = vmatpush3.bf16.msra.mxu0 (!%p219_p2), %v923_v1  ;;  %907 = vmatpush3.bf16.msra.mxu1 (!%p219_p2), %v923_v1 }
   0xc   : > { %870 = vmatprep.subr.bf16.mxu0 (!%p219_p2), %v924_v2  ;;  %900 = vmatprep.subr.bf16.mxu1 (!%p219_p2), %v924_v2 }
   0xd   : > { %s1068_s23 = smov (!%p255_p3, %s749_s23), 63  ;;  %s1070_s2 = smov (!%p266_p4, %s987_s2), 3 }
   0xe   : > { %s750_s28 = sshll.u32 %s1068_s23, 2  ;;  %s268_s23 = scalar_lea.vmem %s1065_s5, %s1070_s2 }
   0xf   : > { %s1009_s7 = scalar_lea.vmem %s1060_s0, %s750_s28  ;;  %871 = vmatpush3.bf16.msra.mxu0 %v924_v2  ;;  %908 = vmatpush3.bf16.msra.mxu1 %v924_v2  ;;  %s1039_s20 = scalar_lea.vmem %s1064_s4, %s750_s28 }
  0x10   : > { %v930_v4 = vld [vmem:[%s1009_s7] sm:$0xff]   ;;  %872 = vmatprep.subr.bf16.mxu0 %v925_v3  ;;  %901 = vmatprep.subr.bf16.mxu1 %v925_v3  ;;  %v931_v10 = vld [vmem:[%s1009_s7 + $0x8] sm:$0xff]   ;;  %v932_v12 = vld [vmem:[%s1009_s7 + $0x10] sm:$0xff]   ;;  %s271_s26 = scalar_lea.vmem %s1066_s6, %s1070_s2 }
  0x11   : > { %882 = vmatprep.mubr.bf16.mxu0 %v930_v4  ;;  %v934_v6 = vld [vmem:[%s1009_s7 + $0x20] sm:$0xff]   ;;  %v935_v11 = vld [vmem:[%s1009_s7 + $0x28] sm:$0xff]   ;;  %v936_v13 = vld [vmem:[%s1009_s7 + $0x30] sm:$0xff]  }
  0x12   : > { %890 = vmatprep.mubr.bf16.mxu1 %v934_v6  ;;  %v933_v14 = vld [vmem:[%s1009_s7 + $0x18] sm:$0xff]  }
  0x13   : > { %873 = vmatpush3.bf16.msra.mxu0 %v925_v3  ;;  %909 = vmatpush3.bf16.msra.mxu1 %v925_v3  ;;  %v937_v15 = vld [vmem:[%s1009_s7 + $0x38] sm:$0xff]  }
  0x14   : > { %874 = vmatprep.subr.bf16.mxu0 %v926_v5  ;;  %902 = vmatprep.subr.bf16.mxu1 %v926_v5 }
  0x17   : > { %875 = vmatpush3.bf16.msra.mxu0 %v926_v5  ;;  %910 = vmatpush3.bf16.msra.mxu1 %v926_v5 }
  0x18   : > { %876 = vmatprep.subr.bf16.mxu0 %v927_v7  ;;  %903 = vmatprep.subr.bf16.mxu1 %v927_v7 }
  0x1b   : > { %877 = vmatpush3.bf16.msra.mxu0 %v927_v7  ;;  %911 = vmatpush3.bf16.msra.mxu1 %v927_v7 }
  0x1c   : > { %878 = vmatprep.subr.bf16.mxu0 %v928_v8  ;;  %904 = vmatprep.subr.bf16.mxu1 %v928_v8 }
  0x1f   : > { %879 = vmatpush3.bf16.msra.mxu0 %v928_v8  ;;  %912 = vmatpush3.bf16.msra.mxu1 %v928_v8 }
  0x20   : > { %880 = vmatprep.subr.bf16.mxu0 %v929_v9  ;;  %905 = vmatprep.subr.bf16.mxu1 %v929_v9 }
  0x23   : > { %881 = vmatpush3.bf16.msra.mxu0 %v929_v9  ;;  %913 = vmatpush3.bf16.msra.mxu1 %v929_v9 }
  0x26   : > { %883 = vmatmul.mubr.bf16.vlgmr.msra.gmra.mrb[0].mxu0 %v931_v10  ;;  %891 = vmatmul.mubr.bf16.vlgmr.msra.gmra.mrb[0].mxu1 %v935_v11 }
  0x27   : > { %886 = vmatprep.mubr.bf16.mxu0 %v932_v12  ;;  %894 = vmatprep.mubr.bf16.mxu1 %v936_v13 }
  0x2e   : > { %887 = vmatmul.mubr.bf16.gmra.mrb[4].mxu0 %v933_v14  ;;  %895 = vmatmul.mubr.bf16.gmra.mrb[4].mxu1 %v937_v15 }
  0xf9   : > { %v884_v16 = vpop.f32.mrb[0].mxu0  ;;  %v892_v17 = vpop.f32.mrb[0].mxu1 }
  0xfa   : > { %v435_v18 = vpop.f32.mrb[1].mxu0  ;;  %v467_v19 = vpop.f32.mrb[1].mxu1  ;;  %v602_v31 = vmul.f32 %v884_v16, %v884_v16  ;;  %v610_v3 = vmul.f32 %v892_v17, %v892_v17 }
  0xfb   : > { %v885_v20 = vpop.f32.mrb[2].mxu0  ;;  %v893_v21 = vpop.f32.mrb[2].mxu1  ;;  %v600_v22 = vmul.f32 %v435_v18, %v435_v18  ;;  %v608_v61 = vmul.f32 %v467_v19, %v467_v19 }
  0xfc   : > { %v811_v23 = vpack.c.bf16 %v885_v20, %v884_v16  ;;  %v438_v24 = vpop.f32.mrb[3].mxu0  ;;  %v831_v25 = vpack.c.bf16 %v893_v21, %v892_v17  ;;  %v470_v26 = vpop.f32.mrb[3].mxu1  ;;  %v603_v34 = vmul.f32 %v885_v20, %v885_v20  ;;  %v611_v6 = vmul.f32 %v893_v21, %v893_v21 }
  0xfd   : > { %v806_v27 = vpack.c.bf16 %v438_v24, %v435_v18  ;;  %v578_v28 = vadd.f32 %v438_v24, %v435_v18  ;;  %v601_v29 = vmul.f32 %v438_v24, %v438_v24  ;;  %v826_v30 = vpack.c.bf16 %v470_v26, %v467_v19 }
  0xfe   : > { %843 = vst [vmem:[%s1039_s20 + $0x8] sm:$0xff] %v811_v23   ;;  %847 = vst [vmem:[%s1039_s20 + $0x28] sm:$0xff] %v831_v25   ;;  %v609_v2 = vmul.f32 %v470_v26, %v470_v26 }
  0xff   : > { %807 = vst [vmem:[%s1039_s20] sm:$0xff] %v806_v27   ;;  %v579_v32 = vadd.f32 %v884_v16, %v578_v28  ;;  %v616_v33 = vadd.f32 %v601_v29, %v600_v22  ;;  %846 = vst [vmem:[%s1039_s20 + $0x20] sm:$0xff] %v826_v30  }
 0x101   : > { %v617_v35 = vadd.f32 %v616_v33, %v602_v31  ;;  %v888_v36 = vpop.f32.mrb[4].mxu0  ;;  %v580_v37 = vadd.f32 %v885_v20, %v579_v32  ;;  %v896_v38 = vpop.f32.mrb[4].mxu1 }
 0x102   : > { %v451_v39 = vpop.f32.mrb[5].mxu0  ;;  %v483_v40 = vpop.f32.mrb[5].mxu1  ;;  %v606_v55 = vmul.f32 %v888_v36, %v888_v36  ;;  %v614_v15 = vmul.f32 %v896_v38, %v896_v38 }
 0x103   : > { %v581_v41 = vadd.f32 %v580_v37, %v451_v39  ;;  %v604_v42 = vmul.f32 %v451_v39, %v451_v39  ;;  %v618_v43 = vadd.f32 %v617_v35, %v603_v34  ;;  %v889_v44 = vpop.f32.mrb[6].mxu0  ;;  %v897_v45 = vpop.f32.mrb[6].mxu1  ;;  %v612_v9 = vmul.f32 %v483_v40, %v483_v40 }
 0x104   : > { %v821_v46 = vpack.c.bf16 %v889_v44, %v888_v36  ;;  %v454_v47 = vpop.f32.mrb[7].mxu0  ;;  %v841_v48 = vpack.c.bf16 %v897_v45, %v896_v38  ;;  %v486_v49 = vpop.f32.mrb[7].mxu1  ;;  %v607_v58 = vmul.f32 %v889_v44, %v889_v44 }
 0x105   : > { %v619_v50 = vadd.f32 %v618_v43, %v604_v42  ;;  %v816_v51 = vpack.c.bf16 %v454_v47, %v451_v39  ;;  %v582_v52 = vadd.f32 %v581_v41, %v454_v47  ;;  %v605_v53 = vmul.f32 %v454_v47, %v454_v47 }
 0x106   : > { %845 = vst [vmem:[%s1039_s20 + $0x18] sm:$0xff] %v821_v46   ;;  %849 = vst [vmem:[%s1039_s20 + $0x38] sm:$0xff] %v841_v48   ;;  %v836_v54 = vpack.c.bf16 %v486_v49, %v483_v40  ;;  %v613_v14 = vmul.f32 %v486_v49, %v486_v49 }
 0x107   : > { %844 = vst [vmem:[%s1039_s20 + $0x10] sm:$0xff] %v816_v51   ;;  %v583_v56 = vadd.f32 %v888_v36, %v582_v52  ;;  %v620_v57 = vadd.f32 %v619_v50, %v605_v53 }
 0x108   : > { %848 = vst [vmem:[%s1039_s20 + $0x30] sm:$0xff] %v836_v54  }
 0x109   : > { %v621_v59 = vadd.f32 %v620_v57, %v606_v55  ;;  %v584_v60 = vadd.f32 %v889_v44, %v583_v56 }
 0x10b   : > { %v585_v62 = vadd.f32 %v584_v60, %v467_v19  ;;  %v622_v63 = vadd.f32 %v621_v59, %v607_v58  ;;  %v615_v19 = vmul.f32 %v897_v45, %v897_v45 }
 0x10d   : > { %v623_v0 = vadd.f32 %v622_v63, %v608_v61  ;;  %v586_v1 = vadd.f32 %v585_v62, %v470_v26 }
 0x10f   : > { %v587_v4 = vadd.f32 %v892_v17, %v586_v1  ;;  %v624_v5 = vadd.f32 %v623_v0, %v609_v2 }
 0x111   : > { %v625_v7 = vadd.f32 %v624_v5, %v610_v3  ;;  %v588_v8 = vadd.f32 %v893_v21, %v587_v4 }
 0x113   : > { %v589_v10 = vadd.f32 %v588_v8, %v483_v40  ;;  %v626_v11 = vadd.f32 %v625_v7, %v611_v6 }
 0x115   : > { %v627_v12 = vadd.f32 %v626_v11, %v612_v9  ;;  %v590_v13 = vadd.f32 %v589_v10, %v486_v49 }
 0x117   : > { %v591_v16 = vadd.f32 %v896_v38, %v590_v13  ;;  %v628_v18 = vadd.f32 %v627_v12, %v613_v14 }
 0x119   : > { %v592_v20 = vadd.f32 %v897_v45, %v591_v16  ;;  %v629_v22 = vadd.f32 %v628_v18, %v614_v15 }
 0x11b   : > { %v593_v23 = vrot.slane %v592_v20, 4  ;;  %v630_v17 = vadd.f32 %v629_v22, %v615_v19 }
 0x11d   : > { %v594_v24 = vadd.f32 %v593_v23, %v592_v20  ;;  %v631_v25 = vrot.slane %v630_v17, 4 }
 0x11f   : > { %v595_v26 = vrot.slane %v594_v24, 2  ;;  %v632_v21 = vadd.f32 %v631_v25, %v630_v17 }
 0x121   : > { %v596_v27 = vadd.f32 %v595_v26, %v594_v24  ;;  %v633_v28 = vrot.slane %v632_v21, 2 }
 0x123   : > { %v597_v29 = vrot.slane %v596_v27, 1  ;;  %v634_v30 = vadd.f32 %v633_v28, %v632_v21 }
 0x125   : > { %v598_v31 = vadd.f32 %v597_v29, %v596_v27  ;;  %v635_v32 = vrot.slane %v634_v30, 1 }
 0x127   : > { %599 = vst [vmem:[%s268_s23] sm:$0x1] %v598_v31  ;;  %v636_v33 = vadd.f32 %v635_v32, %v634_v30 }
 0x129   : > { %637 = vst [vmem:[%s271_s26] sm:$0x1] %v636_v33 }
 0x12a PF: > { %s17_s21 = sadd.s32 1, %s944_s21  }
 0x12b   : > { %p14_p5 = scmp.ge.s32.totalorder %s17_s21, 6  }
 0x12d   :  { %16 = sbr.rel (!%p14_p5) target bundleno = 1 (0x1), region = 90 }

// kernel: _lambda_.21
= control target key start
LH: loop header
LB: loop body
LE: loop exit
PB: predicated region body
PF: predicated region fallthrough
CT: control target
= control target key end

     0   :  { %s4946_s15 = smov 0   ;;  %s4948_s16 = smov 0   ;;  %s5929_s0 = inlined_call_operand.vmem [shape: bf16[2,1,34,34,128], index: 0, kind: input, shape index: {}]   ;;  %s5930_s1 = inlined_call_operand.vmem [shape: bf16[9,128,128], index: 1, kind: input, shape index: {}]   ;;  %s5931_s2 = inlined_call_operand.vmem [shape: bf16[2048,128], index: 2, kind: output, shape index: {0}]   ;;  %s5932_s3 = inlined_call_operand.vmem [shape: f32[8,1,128], index: 3, kind: output, shape index: {1}]   ;;  %s5933_s4 = inlined_call_operand.vmem [shape: f32[8,1,128], index: 4, kind: output, shape index: {2}]  }
   0x1   :  { %s4950_s17 = smov 0   ;;  %s4952_s18 = smov 0  }
   0x2   :  { %s4954_s19 = smov 0  }
   0x3 LB: > { %s24_s20 = sadd.s32 1, %s4911_s17  ;;  %s27_s21 = sadd.s32 1, %s4915_s18  ;;  %s4919_s19 = sphi %s4954_s19, %s15_s19   ;;  %s4915_s18 = sphi %s4952_s18, %s5994_s18   ;;  %s4911_s17 = sphi %s4950_s17, %s5993_s17   ;;  %s4907_s16 = sphi %s4948_s16, %s5992_s16   ;;  %s4903_s15 = sphi %s4946_s15, %s5991_s15  }
   0x4   : > { %p25_p0 = scmp.ge.s32.totalorder %s24_s20, 4  ;;  %p3408_p1 = scmp.ge.s32.totalorder %s4919_s19, 1 }
   0x5   : > { %p191_p2 = scmp.lt.s32.totalorder %s4919_s19, 9 }
   0x6   : > { %s5996_s20 = smov (%p25_p0, %s24_s20), 0  ;;  %s5998_s21 = smov (!%p25_p0, %s27_s21), %s4915_s18 }
   0x7   : > { %p192_p3 = pnand %p3408_p1, %p191_p2  ;;  %p29_p4 = scmp.ge.s32.totalorder %s5998_s21, 2 }
   0x9   : > { %s6000_s21 = smov (%p29_p4, %s5998_s21), 0  ;;  %195 = sbr.rel (%p192_p3) target bundleno = 568 (0x238), region = 28 }
  0x10   : > { %v4761_v0 = vld [vmem:[%s5930_s1 + $0x40] sm:$0xff]   ;;  %p229_p5 = scmp.lt.s32.totalorder %s4907_s16, 1  ;;  %v4763_v2 = vld [vmem:[%s5930_s1 + $0x48] sm:$0xff]   ;;  %v4765_v4 = vld [vmem:[%s5930_s1 + $0x50] sm:$0xff]   ;;  %s3672_s14 = smul.u32 160, %s4903_s15  ;;  %vm435_vm0 = vcmask 1046528  }
  0x11   : > { %v4762_v1 = vld [vmem:[%s5930_s1 + $0x100] sm:$0xff]   ;;  %4016 = vmatprep.subr.bf16.mxu1 %v4761_v0  ;;  %v4764_v3 = vld [vmem:[%s5930_s1 + $0x108] sm:$0xff]   ;;  %v4766_v5 = vld [vmem:[%s5930_s1 + $0x110] sm:$0xff]   ;;  %vm991_vm1 = vcmask 1045504   ;;  %s3410_s23 = sshll.u32 %s4907_s16, 2 }
  0x12   : > { %s230_s28 = scalar_select %p229_p5, %s4907_s16, 1  ;;  %4208 = vmatprep.subr.bf16.mxu0 %v4762_v1  ;;  %4017 = vmatpush3.bf16.msra.mxu1 %v4761_v0  ;;  %v4767_v6 = vld [vmem:[%s5930_s1 + $0x58] sm:$0xff]   ;;  %v4769_v8 = vld [vmem:[%s5930_s1 + $0x60] sm:$0xff]   ;;  %v4771_v10 = vld [vmem:[%s5930_s1 + $0x68] sm:$0xff]  }
  0x13   : > { %4209 = vmatpush3.bf16.msra.mxu0 %v4762_v1  ;;  %4018 = vmatprep.subr.bf16.mxu1 %v4763_v2  ;;  %v4768_v7 = vld [vmem:[%s5930_s1 + $0x118] sm:$0xff]   ;;  %v4770_v9 = vld [vmem:[%s5930_s1 + $0x120] sm:$0xff]   ;;  %v4772_v11 = vld [vmem:[%s5930_s1 + $0x128] sm:$0xff]  }
  0x14   : > { %4210 = vmatprep.subr.bf16.mxu0 %v4764_v3  ;;  %s4720_s9 = smul.u32 680, %s230_s28  ;;  %v4773_v24 = vld [vmem:[%s5930_s1 + $0x70] sm:$0xff]   ;;  %v4775_v42 = vld [vmem:[%s5930_s1 + $0x78] sm:$0xff]   ;;  %v4778_v63 = vld [vmem:[%s5930_s1] sm:$0xff]  }
  0x15   : > { %v4774_v29 = vld [vmem:[%s5930_s1 + $0x130] sm:$0xff]   ;;  %v4776_v50 = vld [vmem:[%s5930_s1 + $0x138] sm:$0xff]  }
  0x16   : > { %4019 = vmatpush3.bf16.msra.mxu1 %v4763_v2  ;;  %s233_s24 = scalar_lea.vmem %s5929_s0, %s4720_s9 }
  0x17   : > { %4211 = vmatpush3.bf16.msra.mxu0 %v4764_v3  ;;  %4020 = vmatprep.subr.bf16.mxu1 %v4765_v4  ;;  %s5016_s29 = scalar_lea.vmem %s233_s24, %s3672_s14  ;;  %s5869_s24 = sadd.s32 %s4903_s15, %s3410_s23 }
  0x18   : > { %4212 = vmatprep.subr.bf16.mxu0 %v4766_v5  ;;  %v5025_v12 = vld [vmem:[%s5016_s29] sm:$0xff]   ;;  %v5028_v13 = vld [vmem:[%s5016_s29 + $0x8] sm:$0xff]   ;;  %v5031_v14 = vld [vmem:[%s5016_s29 + $0x14] sm:$0xff]   ;;  %s3411_s25 = sshll.u32 %s5869_s24, 5  ;;  %p246_p7 = scmp.lt.s32.totalorder %s5869_s24, 7 }
  0x19   : > { %v5939_v15 = vunpack.c.l.bf16 %v5025_v12  ;;  %v5938_v16 = vunpack.c.h.bf16 %v5025_v12  ;;  %v5934_v17 = vunpack.c.l.bf16 %v5028_v13  ;;  %v5037_v18 = vld [vmem:[%s5016_s29 + $0x1c] sm:$0xff]   ;;  %v5040_v19 = vld [vmem:[%s5016_s29 + $0x10] sm:$0x1]  ;;  %v318_v20 = vunpack.c.l.bf16 %v5031_v14  ;;  %v5068_v35 = vld [vmem:[%s5016_s29 + $0x24] sm:$0x1]  ;;  %p237_p6 = scmp.lt.s32.totalorder %s3411_s25, 255 }
  0x1a   : > { %4021 = vmatpush3.bf16.msra.mxu1 %v4765_v4  ;;  %5961 = vst [vmem:[#allocation2_spill] sm:$0xff] %v5037_v18  ;;  %v319_v21 = vunpack.c.h.bf16 %v5031_v14  ;;  %v320_v22 = vunpack.c.l.bf16 %v5037_v18  ;;  %v316_v23 = vunpack.c.h.bf16 %v5028_v13  ;;  %v317_v28 = vunpack.c.l.bf16 %v5040_v19  ;;  %v5075_v40 = vld [vmem:[%s5016_s29 + $0x28] sm:$0xff]   ;;  %v5078_v41 = vld [vmem:[%s5016_s29 + $0x30] sm:$0xff]   ;;  %v5090_v49 = vld [vmem:[%s5016_s29 + $0x38] sm:$0x1]  ;;  %s6004_s24 = smov (!%p246_p7, %s5869_s24), 7 }
  0x1b   : > { %4213 = vmatpush3.bf16.msra.mxu0 %v4766_v5  ;;  %4022 = vmatprep.subr.bf16.mxu1 %v4767_v6  ;;  %v436_v25 = vrot.slane %v5939_v15, 1  ;;  %v437_v26 = vrot.slane %v5938_v16, 1  ;;  %v439_v27 = vrot.slane %v5934_v17, 1  ;;  %v445_v30 = vrot.slane %v318_v20, 1  ;;  %v5111_v61 = vld [vmem:[%s5016_s29 + $0x3c] sm:$0xff]   ;;  %v5114_v62 = vld [vmem:[%s5016_s29 + $0x44] sm:$0xff]   ;;  %s248_s30 = scalar_lea.vmem %s5932_s3, %s6004_s24  ;;  %s255_s7 = scalar_lea.vmem %s5933_s4, %s6004_s24 }
  0x1c   : > { %4214 = vmatprep.subr.bf16.mxu0 %v4768_v7  ;;  %v446_v31 = vrot.slane %v319_v21, 1  ;;  %v448_v32 = vrot.slane %v320_v22, 1  ;;  %v441_v39 = vrot.slane %v316_v23, 1  ;;  %v443_v44 = vrot.slane %v317_v28, 1  ;;  %v4779_v4 = vld [vmem:[%s5930_s1 + $0x140] sm:$0xff]   ;;  %s6002_s25 = smov (!%p237_p6, %s3411_s25), 255 }
  0x1d   : > { %v438_v33 = vsel %vm435_vm0, %v436_v25, %v437_v26  ;;  %v440_v34 = vsel %vm435_vm0, %v437_v26, %v439_v27  ;;  %v321_v45 = vunpack.c.h.bf16 %v5037_v18  ;;  %v322_v46 = vunpack.c.l.bf16 %v5068_v35  ;;  %v4781_v25 = vld [vmem:[%s5930_s1 + $0x8] sm:$0xff]   ;;  %s3412_s16 = sshll.u32 %s6002_s25, 2 }
  0x1e   : > { %4023 = vmatpush3.bf16.msra.mxu1 %v4767_v6  ;;  %v540_v36 = vpack.c.bf16 %v440_v34, %v438_v33  ;;  %v447_v37 = vsel %vm435_vm0, %v445_v30, %v446_v31  ;;  %v449_v38 = vsel %vm435_vm0, %v446_v31, %v448_v32  ;;  %v323_v47 = vunpack.c.l.bf16 %v5075_v40  ;;  %v5148_v31 = vld [vmem:[%s5016_s29 + $0x4c] sm:$0x1]  ;;  %v5154_v33 = vld [vmem:[%s5016_s29 + $0x58] sm:$0xff]  }
  0x1f   : > { %4215 = vmatpush3.bf16.msra.mxu0 %v4768_v7  ;;  %4024 = vmatprep.subr.bf16.mxu1 %v4769_v8  ;;  %v542_v43 = vpack.c.bf16 %v449_v38, %v447_v37  ;;  %v324_v48 = vunpack.c.h.bf16 %v5075_v40  ;;  %v450_v51 = vrot.slane %v321_v45, 1  ;;  %v325_v52 = vunpack.c.l.bf16 %v5078_v41  ;;  %v4784_v38 = vld [vmem:[%s5930_s1 + $0x10] sm:$0xff]  }
  0x20   : > { %4216 = vmatprep.subr.bf16.mxu0 %v4770_v9  ;;  %4032 = vmatprep.mubr.bf16.mxu1 %v540_v36  ;;  %v442_v53 = vsel %vm435_vm0, %v439_v27, %v441_v39  ;;  %v452_v54 = vrot.slane %v322_v46, 1  ;;  %v454_v55 = vrot.slane %v323_v47, 1  ;;  %v444_v57 = vsel %vm435_vm0, %v441_v39, %v443_v44  ;;  %v4782_v44 = vld [vmem:[%s5930_s1 + $0x150] sm:$0xff]  }
  0x21   : > { %4224 = vmatprep.mubr.bf16.mxu0 %v542_v43  ;;  %v455_v56 = vrot.slane %v324_v48, 1  ;;  %v457_v58 = vrot.slane %v325_v52, 1  ;;  %v326_v59 = vunpack.c.h.bf16 %v5078_v41  ;;  %v327_v60 = vunpack.c.l.bf16 %v5090_v49  ;;  %v4793_v49 = vld [vmem:[%s5930_s1 + $0x188] sm:$0xff]  }
  0x22   : > { %4025 = vmatpush3.bf16.msra.mxu1 %v4769_v8  ;;  %v451_v0 = vsel %vm435_vm0, %v448_v32, %v450_v51  ;;  %v453_v1 = vsel %vm435_vm0, %v450_v51, %v452_v54  ;;  %v328_v2 = vunpack.c.l.bf16 %v5111_v61  ;;  %v329_v3 = vunpack.c.h.bf16 %v5111_v61  ;;  %v5151_v32 = vld [vmem:[%s5016_s29 + $0x50] sm:$0xff]  }
  0x23   : > { %4217 = vmatpush3.bf16.msra.mxu0 %v4770_v9  ;;  %4026 = vmatprep.subr.bf16.mxu1 %v4771_v10  ;;  %v541_v5 = vpack.c.bf16 %v444_v57, %v442_v53  ;;  %v456_v6 = vsel %vm435_vm0, %v454_v55, %v455_v56  ;;  %v458_v7 = vsel %vm435_vm0, %v455_v56, %v457_v58  ;;  %v330_v8 = vunpack.c.l.bf16 %v5114_v62 }
  0x24   : > { %4218 = vmatprep.subr.bf16.mxu0 %v4772_v11  ;;  %v543_v9 = vpack.c.bf16 %v453_v1, %v451_v0  ;;  %v463_v26 = vrot.slane %v328_v2, 1  ;;  %v464_v27 = vrot.slane %v329_v3, 1  ;;  %v331_v39 = vunpack.c.h.bf16 %v5114_v62 }
  0x25   : > { %v466_v30 = vrot.slane %v330_v8, 1  ;;  %v334_v51 = vunpack.c.h.bf16 %v5151_v32  ;;  %v335_v53 = vunpack.c.l.bf16 %v5154_v33 }
  0x26   : > { %4027 = vmatpush3.bf16.msra.mxu1 %v4771_v10  ;;  %v4780_v10 = vld [vmem:[%s5930_s1 + $0x148] sm:$0xff]   ;;  %v465_v37 = vsel %vm435_vm0, %v463_v26, %v464_v27  ;;  %v468_v56 = vrot.slane %v331_v39, 1  ;;  %v4790_v26 = vld [vmem:[%s5930_s1 + $0x20] sm:$0xff]  }
  0x27   : > { %4219 = vmatpush3.bf16.msra.mxu0 %v4772_v11  ;;  %4028 = vmatprep.subr.bf16.mxu1 %v4773_v24  ;;  %v459_v11 = vrot.slane %v326_v59, 1  ;;  %v473_v0 = vrot.slane %v334_v51, 1  ;;  %v475_v1 = vrot.slane %v335_v53, 1 }
  0x28   : > { %4220 = vmatprep.subr.bf16.mxu0 %v4774_v29 }
  0x29   : > { %v460_v34 = vsel %vm435_vm0, %v457_v58, %v459_v11  ;;  %v4783_v58 = vld [vmem:[%s5930_s1 + $0x158] sm:$0xff]  }
  0x2a   : > { %4029 = vmatpush3.bf16.msra.mxu1 %v4773_v24  ;;  %v461_v24 = vrot.slane %v327_v60, 1 }
  0x2b   : > { %4221 = vmatpush3.bf16.msra.mxu0 %v4774_v29  ;;  %4030 = vmatprep.subr.bf16.mxu1 %v4775_v42  ;;  %v5143_v29 = vpack.c.bf16 %v458_v7, %v456_v6  ;;  %v469_v6 = vsel %vm435_vm0, %v466_v30, %v468_v56 }
  0x2c   : > { %4222 = vmatprep.subr.bf16.mxu0 %v4776_v50  ;;  %v462_v36 = vsel %vm435_vm0, %v459_v11, %v461_v24 }
  0x2d   : > { %v5172_v54 = vpack.c.bf16 %v462_v36, %v460_v34  ;;  %v1001_v34 = vrot.slane %v318_v20, 2  ;;  %v5231_v20 = vld [vmem:[%s5016_s29 + $0x6c] sm:$0xff]  }
  0x2e   : > { %4031 = vmatpush3.bf16.msra.mxu1 %v4775_v42  ;;  %v332_v42 = vunpack.c.l.bf16 %v5148_v31 }
  0x2f   : > { %4223 = vmatpush3.bf16.msra.mxu0 %v4776_v50  ;;  %4064 = vmatprep.subr.bf16.mxu1 %v4778_v63  ;;  %v333_v50 = vunpack.c.l.bf16 %v5151_v32 }
  0x30   : > { %4256 = vmatprep.subr.bf16.mxu0 %v4779_v4  ;;  %v470_v57 = vrot.slane %v332_v42, 1 }
  0x31   : > { %4033 = vmatmul.mubr.bf16.vlgmr.msra.gmra.mrb[0].mxu1 %v541_v5  ;;  %v4787_v5 = vld [vmem:[%s5930_s1 + $0x18] sm:$0xff]  }
  0x32   : > { %4225 = vmatmul.mubr.bf16.vlgmr.msra.gmra.mrb[0].mxu0 %v543_v9  ;;  %4065 = vmatpush3.bf16.msra.mxu1 %v4778_v63  ;;  %v472_v63 = vrot.slane %v333_v50, 1  ;;  %v471_v7 = vsel %vm435_vm0, %v468_v56, %v470_v57  ;;  %v1004_v56 = vrot.slane %v320_v22, 2  ;;  %v4792_v57 = vld [vmem:[%s5930_s1 + $0x28] sm:$0xff]  }
  0x33   : > { %4257 = vmatpush3.bf16.msra.mxu0 %v4779_v4  ;;  %4036 = vmatprep.mubr.bf16.mxu1 %v542_v43  ;;  %v467_v43 = vsel %vm435_vm0, %v464_v27, %v466_v30  ;;  %v5190_v4 = vld [vmem:[%s5016_s29 + $0x60] sm:$0x1]  ;;  %v5210_v27 = vpack.c.bf16 %v471_v7, %v469_v6  ;;  %v4786_v30 = vld [vmem:[%s5930_s1 + $0x168] sm:$0xff]  }
  0x34   : > { %4258 = vmatprep.subr.bf16.mxu0 %v4780_v10  ;;  %4228 = vmatprep.mubr.bf16.mxu0 %v5143_v29  ;;  %v5174_v55 = vpack.c.bf16 %v467_v43, %v465_v37  ;;  %v5940_v11 = vunpack.c.l.bf16 %v5190_v4  ;;  %v474_v24 = vsel %vm435_vm0, %v472_v63, %v473_v0  ;;  %v5226_v43 = vld [vmem:[%s5016_s29 + $0x64] sm:$0xff]   ;;  %v4788_v63 = vld [vmem:[%s5930_s1 + $0x170] sm:$0xff]  }
  0x35   : > { %4066 = vmatprep.subr.bf16.mxu1 %v4781_v25 }
  0x36   : > { %4067 = vmatpush3.bf16.msra.mxu1 %v4781_v25  ;;  %v476_v25 = vsel %vm435_vm0, %v473_v0, %v475_v1  ;;  %v5936_v0 = vunpack.c.h.bf16 %v5226_v43 }
  0x37   : > { %4259 = vmatpush3.bf16.msra.mxu0 %v4780_v10  ;;  %4068 = vmatprep.subr.bf16.mxu1 %v4784_v38  ;;  %v336_v10 = vunpack.c.h.bf16 %v5154_v33  ;;  %v5217_v36 = vpack.c.bf16 %v476_v25, %v474_v24  ;;  %v4794_v24 = vld [vmem:[%s5930_s1 + $0x30] sm:$0xff]   ;;  %v1008_v25 = vrot.slane %v322_v46, 2  ;;  %v4789_v46 = vld [vmem:[%s5930_s1 + $0x178] sm:$0xff]  }
  0x38   : > { %4260 = vmatprep.subr.bf16.mxu0 %v4782_v44  ;;  %v482_v17 = vrot.slane %v5936_v0, 1  ;;  %v4791_v0 = vld [vmem:[%s5930_s1 + $0x180] sm:$0xff]  }
  0x39   : > { %4037 = vmatmul.mubr.bf16.gmra.mrb[4].mxu1 %v543_v9  ;;  %v4785_v9 = vld [vmem:[%s5930_s1 + $0x160] sm:$0xff]   ;;  %v477_v37 = vrot.slane %v336_v10, 1 }
  0x3a   : > { %4229 = vmatmul.mubr.bf16.gmra.mrb[4].mxu0 %v5172_v54  ;;  %4040 = vmatprep.mubr.bf16.mxu1 %v5143_v29 }
  0x3b   : > { %4261 = vmatpush3.bf16.msra.mxu0 %v4782_v44  ;;  %4232 = vmatprep.mubr.bf16.mxu0 %v5174_v55  ;;  %v1002_v44 = vrot.slane %v319_v21, 2  ;;  %v5937_v21 = vunpack.c.l.bf16 %v5226_v43  ;;  %v478_v22 = vsel %vm435_vm0, %v475_v1, %v477_v37  ;;  %v1006_v1 = vrot.slane %v321_v45, 2 }
  0x3c   : > { %4262 = vmatprep.subr.bf16.mxu0 %v4783_v58  ;;  %4069 = vmatpush3.bf16.msra.mxu1 %v4784_v38  ;;  %v479_v38 = vrot.slane %v5940_v11, 1 }
  0x3d   : > { %4070 = vmatprep.subr.bf16.mxu1 %v4787_v5  ;;  %v1003_v6 = vsel %vm991_vm1, %v1001_v34, %v1002_v44  ;;  %v1005_v7 = vsel %vm991_vm1, %v1002_v44, %v1004_v56  ;;  %v481_v34 = vrot.slane %v5937_v21, 1  ;;  %v5270_v44 = vld [vmem:[%s5016_s29 + $0x80] sm:$0xff]  }
  0x3e   : > { %v5272_v45 = vpack.c.bf16 %v1005_v7, %v1003_v6  ;;  %v4796_v7 = vld [vmem:[%s5930_s1 + $0x38] sm:$0xff]  }
  0x3f   : > { %4263 = vmatpush3.bf16.msra.mxu0 %v4783_v58  ;;  %v480_v58 = vsel %vm435_vm0, %v477_v37, %v479_v38  ;;  %v5267_v38 = vld [vmem:[%s5016_s29 + $0x78] sm:$0xff]   ;;  %v483_v21 = vsel %vm435_vm0, %v481_v34, %v482_v17  ;;  %v5320_v34 = vld [vmem:[%s5016_s29 + $0x8c] sm:$0xff]  }
  0x40   : > { %4264 = vmatprep.subr.bf16.mxu0 %v4785_v9  ;;  %4071 = vmatpush3.bf16.msra.mxu1 %v4787_v5  ;;  %v5935_v5 = vunpack.c.l.bf16 %v5231_v20  ;;  %v5260_v37 = vpack.c.bf16 %v480_v58, %v478_v22  ;;  %v1013_v22 = vrot.slane %v325_v52, 2  ;;  %v5942_v6 = vunpack.c.l.bf16 %v5267_v38 }
  0x41   : > { %4041 = vmatmul.mubr.bf16.gmra.mrb[8].mxu1 %v5172_v54  ;;  %4072 = vmatprep.subr.bf16.mxu1 %v4790_v26  ;;  %v5944_v52 = vunpack.c.h.bf16 %v5267_v38 }
  0x42   : > { %4233 = vmatmul.mubr.bf16.gmra.mrb[8].mxu0 %v5210_v27  ;;  %4044 = vmatprep.mubr.bf16.mxu1 %v5174_v55  ;;  %v484_v35 = vrot.slane %v5935_v5, 1  ;;  %v1007_v5 = vsel %vm991_vm1, %v1004_v56, %v1006_v1 }
  0x43   : > { %4265 = vmatpush3.bf16.msra.mxu0 %v4785_v9  ;;  %4236 = vmatprep.mubr.bf16.mxu0 %v5217_v36  ;;  %v5251_v9 = vld [vmem:[%s5016_s29 + $0x74] sm:$0x1] }
  0x44   : > { %4266 = vmatprep.subr.bf16.mxu0 %v4786_v30  ;;  %4073 = vmatpush3.bf16.msra.mxu1 %v4790_v26  ;;  %v1010_v26 = vrot.slane %v323_v47, 2  ;;  %v1011_v47 = vrot.slane %v324_v48, 2  ;;  %v5941_v58 = vunpack.c.l.bf16 %v5251_v9  ;;  %v1009_v48 = vsel %vm991_vm1, %v1006_v1, %v1008_v25  ;;  %v5313_v1 = vld [vmem:[%s5016_s29 + $0x88] sm:$0x1] }
  0x45   : > { %4074 = vmatprep.subr.bf16.mxu1 %v4792_v57  ;;  %v485_v16 = vsel %vm435_vm0, %v482_v17, %v484_v35  ;;  %v1015_v25 = vrot.slane %v326_v59, 2  ;;  %v1017_v17 = vrot.slane %v327_v60, 2  ;;  %v490_v59 = vrot.slane %v5942_v6, 1 }
  0x46   : > { %v1012_v15 = vsel %vm991_vm1, %v1010_v26, %v1011_v47  ;;  %v488_v56 = vrot.slane %v5941_v58, 1  ;;  %v5325_v26 = vld [vmem:[%s5930_s1 + $0x80] sm:$0xff]   ;;  %v5329_v58 = vpack.c.bf16 %v485_v16, %v483_v21  ;;  %v491_v60 = vrot.slane %v5944_v52, 1  ;;  %v5349_v52 = vld [vmem:[%s5016_s29 + $0x94] sm:$0xff]  }
  0x47   : > { %4267 = vmatpush3.bf16.msra.mxu0 %v4786_v30  ;;  %v5943_v30 = vunpack.c.h.bf16 %v5231_v20  ;;  %v1019_v16 = vrot.slane %v328_v2, 2  ;;  %v1020_v21 = vrot.slane %v329_v3, 2 }
  0x48   : > { %4268 = vmatprep.subr.bf16.mxu0 %v4788_v63  ;;  %4075 = vmatpush3.bf16.msra.mxu1 %v4792_v57  ;;  %v5945_v57 = vunpack.c.l.bf16 %v5270_v44  ;;  %v492_v2 = vsel %vm435_vm0, %v490_v59, %v491_v60 }
  0x49   : > { %4045 = vmatmul.mubr.bf16.gmra.mrb[12].mxu1 %v5210_v27  ;;  %4076 = vmatprep.subr.bf16.mxu1 %v4794_v24  ;;  %v486_v11 = vrot.slane %v5943_v30, 1  ;;  %v1016_v30 = vsel %vm991_vm1, %v1013_v22, %v1015_v25 }
  0x4a   : > { %4237 = vmatmul.mubr.bf16.gmra.mrb[12].mxu0 %v5260_v37  ;;  %4048 = vmatprep.mubr.bf16.mxu1 %v5217_v36 }
  0x4b   : > { %4269 = vmatpush3.bf16.msra.mxu0 %v4788_v63  ;;  %4272 = vmatprep.mubr.bf16.mxu0 %v5272_v45  ;;  %v1014_v63 = vsel %vm991_vm1, %v1011_v47, %v1013_v22  ;;  %v5327_v47 = vpack.c.bf16 %v1009_v48, %v1007_v5  ;;  %v487_v5 = vsel %vm435_vm0, %v484_v35, %v486_v11  ;;  %v1022_v48 = vrot.slane %v330_v8, 2 }
  0x4c   : > { %4270 = vmatprep.subr.bf16.mxu0 %v4789_v46  ;;  %4077 = vmatpush3.bf16.msra.mxu1 %v4794_v24  ;;  %v493_v24 = vrot.slane %v5945_v57, 1  ;;  %v5338_v6 = vpack.c.bf16 %v1014_v63, %v1012_v15  ;;  %v489_v15 = vsel %vm435_vm0, %v486_v11, %v488_v56  ;;  %v346_v35 = vunpack.c.h.bf16 %v5270_v44  ;;  %v4795_v56 = vld [vmem:[%s5930_s1 + $0x190] sm:$0xff]  }
  0x4d   : > { %4078 = vmatprep.subr.bf16.mxu1 %v4796_v7  ;;  %v5949_v22 = vunpack.c.l.bf16 %v5313_v1  ;;  %v5948_v8 = vunpack.c.l.bf16 %v5320_v34  ;;  %v5946_v11 = vunpack.c.h.bf16 %v5320_v34  ;;  %v1026_v63 = vrot.slane %v332_v42, 2  ;;  %v5387_v42 = vld [vmem:[%s5016_s29 + $0x9c] sm:$0x1] }
  0x4e   : > { %v494_v3 = vsel %vm435_vm0, %v491_v60, %v493_v24  ;;  %v5374_v59 = vpack.c.bf16 %v489_v15, %v487_v5  ;;  %v495_v31 = vrot.slane %v346_v35, 1  ;;  %v999_v15 = vrot.slane %v317_v28, 2 }
  0x4f   : > { %4271 = vmatpush3.bf16.msra.mxu0 %v4789_v46  ;;  %v1018_v46 = vsel %vm991_vm1, %v1015_v25, %v1017_v17  ;;  %v1024_v25 = vrot.slane %v331_v39, 2  ;;  %v5947_v17 = vunpack.c.l.bf16 %v5349_v52  ;;  %v5380_v57 = vpack.c.bf16 %v494_v3, %v492_v2 }
  0x50   : > { %4304 = vmatprep.subr.bf16.mxu0 %v4791_v0  ;;  %4079 = vmatpush3.bf16.msra.mxu1 %v4796_v7  ;;  %v997_v7 = vrot.slane %v316_v23, 2  ;;  %v1021_v23 = vsel %vm991_vm1, %v1019_v16, %v1020_v21  ;;  %v5378_v60 = vpack.c.bf16 %v1018_v46, %v1016_v30  ;;  %v497_v39 = vrot.slane %v5949_v22, 1 }
  0x51   : > { %4049 = vmatmul.mubr.bf16.gmra.mrb[16].mxu1 %v5260_v37  ;;  %4112 = vmatprep.subr.bf16.mxu1 %v5325_v26  ;;  %5962 = vst [vmem:[#allocation3_spill] sm:$0xff] %v5380_v57  ;;  %v499_v5 = vrot.slane %v5948_v8, 1  ;;  %v500_v16 = vrot.slane %v5946_v11, 1  ;;  %v1028_v30 = vrot.slane %v333_v50, 2  ;;  %v502_v2 = vrot.slane %v5947_v17, 1  ;;  %v4797_v50 = vld [vmem:[%s5930_s1 + $0x198] sm:$0xff]  }
  0x52   : > { %4273 = vmatmul.mubr.bf16.vlgmr.msra.gmra.mrb[0].mxu0 %v5327_v47  ;;  %4052 = vmatprep.mubr.bf16.mxu1 %v5329_v58  ;;  %v1031_v3 = vrot.slane %v335_v53, 2  ;;  %v5950_v11 = vunpack.c.h.bf16 %v5349_v52  ;;  %v496_v19 = vsel %vm435_vm0, %v493_v24, %v495_v31  ;;  %v498_v28 = vsel %vm435_vm0, %v495_v31, %v497_v39 }
  0x53   : > { %4305 = vmatpush3.bf16.msra.mxu0 %v4791_v0  ;;  %4276 = vmatprep.mubr.bf16.mxu0 %v5338_v6  ;;  %v1023_v0 = vsel %vm991_vm1, %v1020_v21, %v1022_v48  ;;  %v1029_v21 = vrot.slane %v334_v51, 2  ;;  %v1025_v51 = vsel %vm991_vm1, %v1022_v48, %v1024_v25  ;;  %v501_v53 = vsel %vm435_vm0, %v499_v5, %v500_v16 }
  0x54   : > { %4306 = vmatprep.subr.bf16.mxu0 %v4793_v49  ;;  %v5399_v46 = vpack.c.bf16 %v1023_v0, %v1021_v23  ;;  %v5951_v0 = vunpack.c.l.bf16 %v5387_v42  ;;  %v1033_v17 = vrot.slane %v336_v10, 2  ;;  %v503_v24 = vsel %vm435_vm0, %v500_v16, %v502_v2 }
  0x55   : > { %v1030_v23 = vsel %vm991_vm1, %v1028_v30, %v1029_v21  ;;  %v5963_v48 = vunpack.c.l.bf16 %v5190_v4  ;;  %v5964_v31 = vunpack.c.l.bf16 %v5025_v12  ;;  %v5965_v5 = vunpack.c.h.bf16 %v5025_v12 }
  0x56   : > { %v1032_v10 = vsel %vm991_vm1, %v1029_v21, %v1031_v3  ;;  %v5966_v16 = vunpack.c.l.bf16 %v5028_v13  ;;  %v5440_v8 = vpack.c.bf16 %v498_v28, %v496_v19  ;;  %v506_v21 = vrot.slane %v5951_v0, 1 }
  0x57   : > { %4307 = vmatpush3.bf16.msra.mxu0 %v4793_v49  ;;  %v1027_v49 = vsel %vm991_vm1, %v1024_v25, %v1026_v63  ;;  %v1035_v25 = vrot.slane %v5963_v48, 2  ;;  %v4800_v63 = vld [vmem:[%s5930_s1 + $0x1a0] sm:$0xff]   ;;  %v992_v39 = vrot.slane %v5964_v31, 2  ;;  %v993_v30 = vrot.slane %v5965_v5, 2 }
  0x58   : > { %4308 = vmatprep.subr.bf16.mxu0 %v4795_v56  ;;  %v995_v4 = vrot.slane %v5966_v16, 2  ;;  %v5438_v48 = vsel %vm991_vm1, %v997_v7, %v999_v15  ;;  %5967 = vst [vmem:[#allocation4_spill] sm:$0xff] %v5440_v8  ;;  %v5442_v22 = vpack.c.bf16 %v1027_v49, %v1025_v51  ;;  %v5447_v5 = vpack.c.bf16 %v503_v24, %v501_v53  ;;  %v4804_v51 = vld [vmem:[%s5930_s1 + $0x1a8] sm:$0xff]  }
  0x59   : > { %4053 = vmatmul.mubr.bf16.gmra.mrb[20].mxu1 %v5374_v59  ;;  %v5445_v31 = vsel %vm991_vm1, %v992_v39, %v993_v30  ;;  %v5457_v15 = vpack.c.bf16 %v1032_v10, %v1030_v23  ;;  %v5969_v19 = vunpack.c.l.bf16 %v5226_v43  ;;  %v5970_v24 = vunpack.c.h.bf16 %v5226_v43  ;;  %v4808_v10 = vld [vmem:[%s5930_s1 + $0x1b0] sm:$0xff]  }
  0x5a   : > { %4277 = vmatmul.mubr.bf16.gmra.mrb[4].mxu0 %v5378_v60  ;;  %4056 = vmatprep.mubr.bf16.mxu1 %v5380_v57  ;;  %5968 = vst [vmem:[#allocation5_spill] sm:$0xff] %v5447_v5  ;;  %v5455_v16 = vsel %vm991_vm1, %v995_v4, %v997_v7  ;;  %v5971_v23 = vunpack.c.l.bf16 %v5231_v20  ;;  %v5974_v0 = vunpack.c.l.bf16 %v5251_v9 }
  0x5b   : > { %4280 = vmatprep.mubr.bf16.mxu0 %v5399_v46  ;;  %4309 = vmatpush3.bf16.msra.mxu0 %v4795_v56  ;;  %v504_v56 = vrot.slane %v5950_v11, 1  ;;  %v5452_v11 = vsel %vm991_vm1, %v993_v30, %v995_v4  ;;  %v1037_v28 = vrot.slane %v5969_v19, 2  ;;  %v1038_v7 = vrot.slane %v5970_v24, 2 }
  0x5c   : > { %4310 = vmatprep.subr.bf16.mxu0 %v4797_v50  ;;  %v1040_v39 = vrot.slane %v5971_v23, 2  ;;  %v1034_v4 = vsel %vm991_vm1, %v1031_v3, %v1033_v17  ;;  %v1036_v19 = vsel %vm991_vm1, %v1033_v17, %v1035_v25  ;;  %v1044_v3 = vrot.slane %v5974_v0, 2 }
  0x5d   : > { %v507_v30 = vsel %vm435_vm0, %v504_v56, %v506_v21  ;;  %v1039_v24 = vsel %vm991_vm1, %v1037_v28, %v1038_v7  ;;  %v5973_v21 = vunpack.c.h.bf16 %v5231_v20  ;;  %v5975_v17 = vunpack.c.l.bf16 %v5267_v38 }
  0x5e   : > { %v1041_v23 = vsel %vm991_vm1, %v1038_v7, %v1040_v39  ;;  %v5977_v7 = vunpack.c.l.bf16 %v5270_v44 }
  0x5f   : > { %4311 = vmatpush3.bf16.msra.mxu0 %v4797_v50  ;;  %v505_v50 = vsel %vm435_vm0, %v502_v2, %v504_v56  ;;  %v5487_v2 = vpack.c.bf16 %v1036_v19, %v1034_v4  ;;  %v5489_v56 = vpack.c.bf16 %v1041_v23, %v1039_v24  ;;  %v1042_v49 = vrot.slane %v5973_v21, 2  ;;  %v5515_v19 = vld [vmem:[%s5930_s1 + $0x1c0] sm:$0xff]  }
  0x60   : > { %4312 = vmatprep.subr.bf16.mxu0 %v4800_v63  ;;  %v5485_v53 = vpack.c.bf16 %v507_v30, %v505_v50  ;;  %v1046_v25 = vrot.slane %v5975_v17, 2  ;;  %v1049_v50 = vrot.slane %v5977_v7, 2  ;;  %v4812_v30 = vld [vmem:[%s5930_s1 + $0x1b8] sm:$0xff]   ;;  %v5979_v23 = vunpack.c.l.bf16 %v5320_v34 }
  0x61   : > { %4057 = vmatmul.mubr.bf16.gmra.mrb[24].mxu1 %v5440_v8  ;;  %v1043_v9 = vsel %vm991_vm1, %v1040_v39, %v1042_v49  ;;  %v1045_v0 = vsel %vm991_vm1, %v1042_v49, %v1044_v3  ;;  %v1051_v39 = vrot.slane %v346_v35, 2  ;;  %v5978_v49 = vunpack.c.l.bf16 %v5313_v1  ;;  %v5537_v1 = vld [vmem:[%s5016_s29 + $0xa0] sm:$0xff]   ;;  %v5540_v35 = vld [vmem:[%s5016_s29 + $0xa8] sm:$0xff]  }
  0x62   : > { %4281 = vmatmul.mubr.bf16.gmra.mrb[8].mxu0 %v5442_v22  ;;  %4060 = vmatprep.mubr.bf16.mxu1 %v5447_v5  ;;  %5972 = vst [vmem:[#allocation6_spill] sm:$0xff] %v5485_v53  ;;  %v1055_v21 = vrot.slane %v5979_v23, 2  ;;  %v5980_v3 = vunpack.c.h.bf16 %v5320_v34  ;;  %v5983_v23 = vunpack.c.l.bf16 %v5387_v42  ;;  %v307_v5 = vld [vmem:[%s5016_s29 + $0xb0] sm:$0x1] }
  0x63   : > { %4284 = vmatprep.mubr.bf16.mxu0 %v5457_v15  ;;  %4313 = vmatpush3.bf16.msra.mxu0 %v4800_v63  ;;  %v5976_v63 = vunpack.c.h.bf16 %v5267_v38  ;;  %v1052_v7 = vsel %vm991_vm1, %v1049_v50, %v1051_v39 }
  0x64   : > { %4314 = vmatprep.subr.bf16.mxu0 %v4804_v51  ;;  %v1056_v17 = vrot.slane %v5980_v3, 2 }
  0x65   : > { %v1047_v28 = vrot.slane %v5976_v63, 2  ;;  %v5981_v63 = vunpack.c.l.bf16 %v5349_v52 }
  0x67   : > { %4315 = vmatpush3.bf16.msra.mxu0 %v4804_v51  ;;  %v1048_v51 = vsel %vm991_vm1, %v1046_v25, %v1047_v28  ;;  %v1050_v4 = vsel %vm991_vm1, %v1047_v28, %v1049_v50  ;;  %v4803_v25 = vld [vmem:[%s5930_s1 + $0x88] sm:$0xff]   ;;  %v1058_v28 = vrot.slane %v5981_v63, 2 }
  0x68   : > { %4316 = vmatprep.subr.bf16.mxu0 %v4808_v10  ;;  %v5521_v24 = vpack.c.bf16 %v1050_v4, %v1048_v51  ;;  %v354_v51 = vunpack.c.h.bf16 %v5537_v1  ;;  %v355_v4 = vunpack.c.l.bf16 %v5540_v35 }
  0x69   : > { %4061 = vmatmul.mubr.bf16.gmra.mrb[28].mxu1 %v5485_v53  ;;  %v4811_v53 = vld [vmem:[%s5930_s1 + $0x98] sm:$0xff]  }
  0x6a   : > { %4285 = vmatmul.mubr.bf16.gmra.mrb[12].mxu0 %v5487_v2  ;;  %4080 = vmatprep.mubr.bf16.mxu1 %v5025_v12  ;;  %v5517_v12 = vpack.c.bf16 %v1045_v0, %v1043_v9  ;;  %v1057_v9 = vsel %vm991_vm1, %v1055_v21, %v1056_v17  ;;  %v1059_v0 = vsel %vm991_vm1, %v1056_v17, %v1058_v28  ;;  %v1062_v21 = vrot.slane %v5983_v23, 2 }
  0x6b   : > { %4288 = vmatprep.mubr.bf16.mxu0 %v5489_v56  ;;  %4317 = vmatpush3.bf16.msra.mxu0 %v4808_v10  ;;  %v1053_v10 = vrot.slane %v5978_v49, 2  ;;  %v5558_v50 = vpack.c.bf16 %v1059_v0, %v1057_v9  ;;  %v1909_v17 = vrot.slane %v354_v51, 2  ;;  %v1911_v63 = vrot.slane %v355_v4, 2 }
  0x6c   : > { %4318 = vmatprep.subr.bf16.mxu0 %v4812_v30  ;;  %v1638_v42 = vrot.slane %v355_v4, 1 }
  0x6d   : > { %v1912_v8 = vsel %vm991_vm1, %v1909_v17, %v1911_v63 }
  0x6f   : > { %4319 = vmatpush3.bf16.msra.mxu0 %v4812_v30  ;;  %v1054_v30 = vsel %vm991_vm1, %v1051_v39, %v1053_v10  ;;  %v5982_v39 = vunpack.c.h.bf16 %v5349_v52 }
  0x70   : > { %4352 = vmatprep.subr.bf16.mxu0 %v5515_v19  ;;  %v5556_v49 = vpack.c.bf16 %v1054_v30, %v1052_v7  ;;  %v1636_v30 = vrot.slane %v354_v51, 1 }
  0x71   : > { %4081 = vmatmul.mubr.bf16.vlgmr.msra.gmra.mrb[0].mxu1 %v5028_v13  ;;  %v4807_v13 = vld [vmem:[%s5930_s1 + $0x90] sm:$0xff]   ;;  %v1060_v10 = vrot.slane %v5982_v39, 2  ;;  %v357_v39 = vunpack.c.l.bf16 %v307_v5 }
  0x72   : > { %4289 = vmatmul.mubr.bf16.gmra.mrb[16].mxu0 %v5517_v12  ;;  %4113 = vmatpush3.bf16.msra.mxu1 %v5325_v26  ;;  %v353_v26 = vunpack.c.l.bf16 %v5537_v1  ;;  %v1639_v51 = vsel %vm435_vm0, %v1636_v30, %v1638_v42 }
  0x73   : > { %4084 = vmatprep.mubr.bf16.mxu1 %v5031_v14  ;;  %4292 = vmatprep.mubr.bf16.mxu0 %v5521_v24  ;;  %v1061_v9 = vsel %vm991_vm1, %v1058_v28, %v1060_v10  ;;  %v1063_v0 = vsel %vm991_vm1, %v1060_v10, %v1062_v21  ;;  %v1642_v57 = vrot.slane %v357_v39, 1  ;;  %v1915_v21 = vrot.slane %v357_v39, 2  ;;  %v4832_v39 = vld [vmem:[%s5930_s1 + $0x1e8] sm:$0xff]  }
  0x74   : > { %4114 = vmatprep.subr.bf16.mxu1 %v4803_v25  ;;  %v1908_v3 = vrot.slane %v353_v26, 2  ;;  %v1635_v7 = vrot.slane %v353_v26, 1  ;;  %v5584_v10 = vpack.c.bf16 %v1063_v0, %v1061_v9  ;;  %v4824_v9 = vld [vmem:[%s5930_s1 + $0x1d0] sm:$0xff]   ;;  %v4828_v0 = vld [vmem:[%s5930_s1 + $0x1d8] sm:$0xff]  }
  0x76   : > { %4115 = vmatpush3.bf16.msra.mxu1 %v4803_v25  ;;  %v356_v25 = vunpack.c.h.bf16 %v5540_v35  ;;  %v1910_v23 = vsel %vm991_vm1, %v1908_v3, %v1909_v17  ;;  %v1637_v26 = vsel %vm435_vm0, %v1635_v7, %v1636_v30  ;;  %v4819_v7 = vld [vmem:[%s5930_s1 + $0xa8] sm:$0xff]  }
  0x77   : > { %4116 = vmatprep.subr.bf16.mxu1 %v4807_v13  ;;  %v5582_v4 = vpack.c.bf16 %v1639_v51, %v1637_v26  ;;  %v4840_v26 = vld [vmem:[%s5930_s1 + $0x1f8] sm:$0xff]   ;;  %v5984_v51 = vpack.c.bf16 %v5452_v11, %v5445_v31  ;;  %v5985_v11 = vpack.c.bf16 %v5438_v48, %v5455_v16  ;;  %v4834_v31 = vld [vmem:[%s5930_s1 + $0xd0] sm:$0xff]  }
  0x78   : > { %v1640_v28 = vrot.slane %v356_v25, 1  ;;  %v1913_v5 = vrot.slane %v356_v25, 2  ;;  %v4838_v48 = vld [vmem:[%s5930_s1 + $0xd8] sm:$0xff]  }
  0x79   : > { %4085 = vmatmul.mubr.bf16.gmra.mrb[4].mxu1 %v5037_v18  ;;  %v4815_v18 = vld [vmem:[%s5930_s1 + $0xa0] sm:$0xff]  }
  0x7a   : > { %4293 = vmatmul.mubr.bf16.gmra.mrb[20].mxu0 %v5556_v49  ;;  %4088 = vmatprep.mubr.bf16.mxu1 %v5075_v40  ;;  %v1641_v3 = vsel %vm435_vm0, %v1638_v42, %v1640_v28  ;;  %v1643_v17 = vsel %vm435_vm0, %v1640_v28, %v1642_v57  ;;  %v4823_v57 = vld [vmem:[%s5930_s1 + $0xb0] sm:$0xff]   ;;  %v4827_v42 = vld [vmem:[%s5930_s1 + $0xb8] sm:$0xff]   ;;  %v5659_v28 = vld [vmem:[%s5930_s1 + $0x200] sm:$0xff]  }
  0x7b   : > { %4296 = vmatprep.mubr.bf16.mxu0 %v5558_v50  ;;  %4117 = vmatpush3.bf16.msra.mxu1 %v4807_v13  ;;  %v5586_v13 = vpack.c.bf16 %v1912_v8, %v1910_v23  ;;  %v5593_v30 = vpack.c.bf16 %v1643_v17, %v1641_v3  ;;  %v1914_v8 = vsel %vm991_vm1, %v1911_v63, %v1913_v5  ;;  %v4820_v63 = vld [vmem:[%s5930_s1 + $0x1c8] sm:$0xff]   ;;  %v4836_v23 = vld [vmem:[%s5930_s1 + $0x1f0] sm:$0xff]   ;;  %v5685_v16 = vld [vmem:[%s5016_s29 + $0xbc] sm:$0xff]  }
  0x7c   : > { %4118 = vmatprep.subr.bf16.mxu1 %v4811_v53  ;;  %v360_v17 = vunpack.c.l.bf16 %v5685_v16 }
  0x7f   : > { %4119 = vmatpush3.bf16.msra.mxu1 %v4811_v53  ;;  %v1916_v53 = vsel %vm991_vm1, %v1913_v5, %v1915_v21  ;;  %v4831_v5 = vld [vmem:[%s5930_s1 + $0xc8] sm:$0xff]  }
  0x80   : > { %4120 = vmatprep.subr.bf16.mxu1 %v4815_v18  ;;  %v5604_v25 = vpack.c.bf16 %v1916_v53, %v1914_v8  ;;  %v2722_v53 = vrot.slane %v360_v17, 2 }
  0x81   : > { %4089 = vmatmul.mubr.bf16.gmra.mrb[8].mxu1 %v5078_v41 }
  0x82   : > { %4297 = vmatmul.mubr.bf16.gmra.mrb[24].mxu0 %v5584_v10  ;;  %4092 = vmatprep.mubr.bf16.mxu1 %v5111_v61 }
  0x83   : > { %4300 = vmatprep.mubr.bf16.mxu0 %v5586_v13  ;;  %4121 = vmatpush3.bf16.msra.mxu1 %v4815_v18  ;;  %v4829_v18 = vld [vmem:[%s5930_s1 + $0xc0] sm:$0xff]  }
  0x84   : > { %4122 = vmatprep.subr.bf16.mxu1 %v4819_v7 }
  0x87   : > { %4123 = vmatpush3.bf16.msra.mxu1 %v4819_v7 }
  0x88   : > { %4124 = vmatprep.subr.bf16.mxu1 %v4823_v57 }
  0x89   : > { %4093 = vmatmul.mubr.bf16.gmra.mrb[12].mxu1 %v5114_v62 }
  0x8a   : > { %4301 = vmatmul.mubr.bf16.gmra.mrb[28].mxu0 %v5604_v25  ;;  %4096 = vmatprep.mubr.bf16.mxu1 %v5151_v32 }
  0x8b   : > { %4320 = vmatprep.mubr.bf16.mxu0 %v5075_v40  ;;  %4125 = vmatpush3.bf16.msra.mxu1 %v4823_v57  ;;  %v4843_v57 = vld [vmem:[%s5930_s1 + $0xe8] sm:$0xff]  }
  0x8c   : > { %4126 = vmatprep.subr.bf16.mxu1 %v4827_v42 }
  0x8f   : > { %4127 = vmatpush3.bf16.msra.mxu1 %v4827_v42  ;;  %v5703_v42 = vld [vmem:[%s5016_s29 + $0xc4] sm:$0x1] }
  0x90   : > { %4160 = vmatprep.subr.bf16.mxu1 %v4829_v18 }
  0x91   : > { %4097 = vmatmul.mubr.bf16.gmra.mrb[16].mxu1 %v5154_v33 }
  0x92   : > { %4321 = vmatmul.mubr.bf16.vlgmr.msra.gmra.mrb[0].mxu0 %v5078_v41  ;;  %4100 = vmatprep.mubr.bf16.mxu1 %v5226_v43 }
  0x93   : > { %4353 = vmatpush3.bf16.msra.mxu0 %v5515_v19  ;;  %4324 = vmatprep.mubr.bf16.mxu0 %v5111_v61  ;;  %v4830_v19 = vld [vmem:[%s5930_s1 + $0x1e0] sm:$0xff]  }
  0x94   : > { %4354 = vmatprep.subr.bf16.mxu0 %v4820_v63 }
  0x97   : > { %4355 = vmatpush3.bf16.msra.mxu0 %v4820_v63 }
  0x98   : > { %4356 = vmatprep.subr.bf16.mxu0 %v4824_v9 }
  0x99   : > { %4101 = vmatmul.mubr.bf16.gmra.mrb[20].mxu1 %v5231_v20 }
  0x9a   : > { %4325 = vmatmul.mubr.bf16.gmra.mrb[4].mxu0 %v5114_v62  ;;  %4104 = vmatprep.mubr.bf16.mxu1 %v5267_v38 }
  0x9b   : > { %4328 = vmatprep.mubr.bf16.mxu0 %v5151_v32  ;;  %4357 = vmatpush3.bf16.msra.mxu0 %v4824_v9 }
  0x9c   : > { %4358 = vmatprep.subr.bf16.mxu0 %v4828_v0 }
  0x9f   : > { %4359 = vmatpush3.bf16.msra.mxu0 %v4828_v0 }
  0xa0   : > { %4360 = vmatprep.subr.bf16.mxu0 %v4830_v19 }
  0xa1   : > { %4105 = vmatmul.mubr.bf16.gmra.mrb[24].mxu1 %v5270_v44 }
  0xa2   : > { %4329 = vmatmul.mubr.bf16.gmra.mrb[8].mxu0 %v5154_v33  ;;  %4108 = vmatprep.mubr.bf16.mxu1 %v5320_v34 }
  0xa3   : > { %4332 = vmatprep.mubr.bf16.mxu0 %v5226_v43  ;;  %4361 = vmatpush3.bf16.msra.mxu0 %v4830_v19  ;;  %v362_v19 = vunpack.c.l.bf16 %v5703_v42  ;;  %v4878_v42 = vld [vmem:[%s5930_s1 + $0x128] sm:$0xff]  }
  0xa4   : > { %4362 = vmatprep.subr.bf16.mxu0 %v4832_v39 }
  0xa7   : > { %4363 = vmatpush3.bf16.msra.mxu0 %v4832_v39 }
  0xa8   : > { %4364 = vmatprep.subr.bf16.mxu0 %v4836_v23 }
  0xa9   : > { %4109 = vmatmul.mubr.bf16.gmra.mrb[28].mxu1 %v5349_v52 }
  0xaa   : > { %4333 = vmatmul.mubr.bf16.gmra.mrb[12].mxu0 %v5231_v20  ;;  %4128 = vmatprep.mubr.bf16.mxu1 %v5984_v51 }
  0xab   : > { %4336 = vmatprep.mubr.bf16.mxu0 %v5267_v38  ;;  %4365 = vmatpush3.bf16.msra.mxu0 %v4836_v23  ;;  %v4845_v23 = vld [vmem:[%s5930_s1 + $0xf0] sm:$0xff]  }
  0xac   : > { %4366 = vmatprep.subr.bf16.mxu0 %v4840_v26 }
  0xaf   : > { %4367 = vmatpush3.bf16.msra.mxu0 %v4840_v26  ;;  %v2726_v26 = vrot.slane %v362_v19, 2 }
  0xb0   : > { %4400 = vmatprep.subr.bf16.mxu0 %v5659_v28 }
  0xb1   : > { %4129 = vmatmul.mubr.bf16.vlgmr.msra.gmra.mrb[0].mxu1 %v5985_v11  ;;  %v4847_v11 = vld [vmem:[%s5930_s1 + $0xf8] sm:$0xff]  }
  0xb2   : > { %4337 = vmatmul.mubr.bf16.gmra.mrb[16].mxu0 %v5270_v44  ;;  %4161 = vmatpush3.bf16.msra.mxu1 %v4829_v18  ;;  %v361_v18 = vunpack.c.h.bf16 %v5685_v16 }
  0xb3   : > { %4132 = vmatprep.mubr.bf16.mxu1 %v5272_v45  ;;  %4340 = vmatprep.mubr.bf16.mxu0 %v5320_v34  ;;  %v5682_v45 = vld [vmem:[%s5016_s29 + $0xb4] sm:$0xff]   ;;  %s5883_s29 = scalar_lea.vmem %s5931_s2, %s3412_s16 }
  0xb4   : > { %4162 = vmatprep.subr.bf16.mxu1 %v4831_v5  ;;  %v358_v21 = vunpack.c.l.bf16 %v5682_v45  ;;  %v359_v3 = vunpack.c.h.bf16 %v5682_v45  ;;  %v2724_v0 = vrot.slane %v361_v18, 2 }
  0xb6   : > { %4163 = vmatpush3.bf16.msra.mxu1 %v4831_v5  ;;  %v2719_v7 = vrot.slane %v358_v21, 2  ;;  %v2720_v8 = vrot.slane %v359_v3, 2  ;;  %v5727_v51 = vsel %vm991_vm1, %v2722_v53, %v2724_v0  ;;  %v5730_v5 = vsel %vm991_vm1, %v2724_v0, %v2726_v26  ;;  %v5990_v26 = vld [vmem:[#allocation6_spill] sm:$0xff] }
  0xb7   : > { %4164 = vmatprep.subr.bf16.mxu1 %v4834_v31  ;;  %v2446_v0 = vrot.slane %v358_v21, 1  ;;  %v2451_v21 = vrot.slane %v361_v18, 1 }
  0xb8   : > { %v5710_v63 = vsel %vm991_vm1, %v2719_v7, %v2720_v8  ;;  %v5713_v9 = vsel %vm991_vm1, %v2720_v8, %v2722_v53  ;;  %v4848_v7 = vld [vmem:[%s5930_s1 + $0x218] sm:$0xff]   ;;  %v5988_v8 = vld [vmem:[#allocation4_spill] sm:$0xff] }
  0xb9   : > { %4133 = vmatmul.mubr.bf16.gmra.mrb[4].mxu1 %v5327_v47  ;;  %v4841_v47 = vld [vmem:[%s5930_s1 + $0xe0] sm:$0xff]   ;;  %v2732_v39 = vpack.c.bf16 %v5713_v9, %v5710_v63  ;;  %v5989_v53 = vld [vmem:[#allocation5_spill] sm:$0xff] }
  0xba   : > { %4341 = vmatmul.mubr.bf16.gmra.mrb[20].mxu0 %v5349_v52  ;;  %4136 = vmatprep.mubr.bf16.mxu1 %v5338_v6 }
  0xbb   : > { %4344 = vmatprep.mubr.bf16.mxu0 %v5537_v1  ;;  %4165 = vmatpush3.bf16.msra.mxu1 %v4834_v31  ;;  %v2733_v31 = vpack.c.bf16 %v5730_v5, %v5727_v51 }
  0xbc   : > { %4166 = vmatprep.subr.bf16.mxu1 %v4838_v48 }
  0xbf   : > { %4167 = vmatpush3.bf16.msra.mxu1 %v4838_v48  ;;  %v4844_v48 = vld [vmem:[%s5930_s1 + $0x208] sm:$0xff]  }
  0xc0   : > { %4168 = vmatprep.subr.bf16.mxu1 %v4841_v47 }
  0xc1   : > { %4137 = vmatmul.mubr.bf16.gmra.mrb[8].mxu1 %v5378_v60 }
  0xc2   : > { %4345 = vmatmul.mubr.bf16.gmra.mrb[24].mxu0 %v5540_v35  ;;  %4140 = vmatprep.mubr.bf16.mxu1 %v5399_v46 }
  0xc3   : > { %4348 = vmatprep.mubr.bf16.mxu0 %v5682_v45  ;;  %4169 = vmatpush3.bf16.msra.mxu1 %v4841_v47  ;;  %v4873_v47 = vld [vmem:[%s5930_s1 + $0x100] sm:$0xff]   ;;  %v4876_v45 = vld [vmem:[%s5930_s1 + $0x118] sm:$0xff]  }
  0xc4   : > { %4170 = vmatprep.subr.bf16.mxu1 %v4843_v57 }
  0xc7   : > { %4171 = vmatpush3.bf16.msra.mxu1 %v4843_v57  ;;  %v4874_v57 = vld [vmem:[%s5930_s1 + $0x108] sm:$0xff]  }
  0xc8   : > { %4172 = vmatprep.subr.bf16.mxu1 %v4845_v23 }
  0xc9   : > { %4141 = vmatmul.mubr.bf16.gmra.mrb[12].mxu1 %v5442_v22 }
  0xca   : > { %4349 = vmatmul.mubr.bf16.gmra.mrb[28].mxu0 %v5685_v16  ;;  %4144 = vmatprep.mubr.bf16.mxu1 %v5457_v15 }
  0xcb   : > { %4368 = vmatprep.mubr.bf16.mxu0 %v5143_v29  ;;  %4173 = vmatpush3.bf16.msra.mxu1 %v4845_v23  ;;  %v4846_v29 = vld [vmem:[%s5930_s1 + $0x210] sm:$0xff]   ;;  %v2447_v23 = vrot.slane %v359_v3, 1  ;;  %v2453_v3 = vrot.slane %v362_v19, 1 }
  0xcc   : > { %4174 = vmatprep.subr.bf16.mxu1 %v4847_v11 }
  0xcf   : > { %4175 = vmatpush3.bf16.msra.mxu1 %v4847_v11  ;;  %v2448_v11 = vsel %vm435_vm0, %v2446_v0, %v2447_v23 }
  0xd0   : > { %4448 = vmatprep.subr.bf16.mxu1 %v4873_v47 }
  0xd1   : > { %4145 = vmatmul.mubr.bf16.gmra.mrb[16].mxu1 %v5487_v2 }
  0xd2   : > { %4369 = vmatmul.mubr.bf16.vlgmr.msra.gmra.mrb[0].mxu0 %v5172_v54  ;;  %4148 = vmatprep.mubr.bf16.mxu1 %v5489_v56  ;;  %v4849_v54 = vld [vmem:[%s5930_s1 + $0x220] sm:$0xff]  }
  0xd3   : > { %4401 = vmatpush3.bf16.msra.mxu0 %v5659_v28  ;;  %4372 = vmatprep.mubr.bf16.mxu0 %v5174_v55  ;;  %v4850_v55 = vld [vmem:[%s5930_s1 + $0x228] sm:$0xff]   ;;  %v5987_v28 = vld [vmem:[#allocation2_spill] sm:$0xff] }
  0xd4   : > { %4402 = vmatprep.subr.bf16.mxu0 %v4844_v48 }
  0xd7   : > { %4403 = vmatpush3.bf16.msra.mxu0 %v4844_v48 }
  0xd8   : > { %4404 = vmatprep.subr.bf16.mxu0 %v4846_v29 }
  0xd9   : > { %4149 = vmatmul.mubr.bf16.gmra.mrb[20].mxu1 %v5517_v12 }
  0xda   : > { %4373 = vmatmul.mubr.bf16.gmra.mrb[4].mxu0 %v5210_v27  ;;  %4152 = vmatprep.mubr.bf16.mxu1 %v5521_v24  ;;  %v4851_v27 = vld [vmem:[%s5930_s1 + $0x230] sm:$0xff]  }
  0xdb   : > { %4376 = vmatprep.mubr.bf16.mxu0 %v5217_v36  ;;  %4405 = vmatpush3.bf16.msra.mxu0 %v4846_v29  ;;  %v4852_v36 = vld [vmem:[%s5930_s1 + $0x238] sm:$0xff]  }
  0xdc   : > { %4406 = vmatprep.subr.bf16.mxu0 %v4848_v7 }
  0xdf   : > { %4407 = vmatpush3.bf16.msra.mxu0 %v4848_v7 }
  0xe0   : > { %4408 = vmatprep.subr.bf16.mxu0 %v4849_v54 }
  0xe1   : > { %4153 = vmatmul.mubr.bf16.gmra.mrb[24].mxu1 %v5556_v49 }
  0xe2   : > { %4377 = vmatmul.mubr.bf16.gmra.mrb[8].mxu0 %v5260_v37  ;;  %4156 = vmatprep.mubr.bf16.mxu1 %v5558_v50  ;;  %v5986_v37 = vld [vmem:[#allocation3_spill] sm:$0xff] }
  0xe3   : > { %4380 = vmatprep.mubr.bf16.mxu0 %v5329_v58  ;;  %4409 = vmatpush3.bf16.msra.mxu0 %v4849_v54 }
  0xe4   : > { %4410 = vmatprep.subr.bf16.mxu0 %v4850_v55 }
  0xe7   : > { %4411 = vmatpush3.bf16.msra.mxu0 %v4850_v55 }
  0xe8   : > { %4412 = vmatprep.subr.bf16.mxu0 %v4851_v27 }
  0xe9   : > { %4157 = vmatmul.mubr.bf16.gmra.mrb[28].mxu1 %v5584_v10 }
  0xea   : > { %4381 = vmatmul.mubr.bf16.gmra.mrb[12].mxu0 %v5374_v59  ;;  %4176 = vmatprep.mubr.bf16.mxu1 %v5031_v14  ;;  %v4875_v14 = vld [vmem:[%s5930_s1 + $0x110] sm:$0xff]  }
  0xeb   : > { %4384 = vmatprep.mubr.bf16.mxu0 %v5986_v37  ;;  %4413 = vmatpush3.bf16.msra.mxu0 %v4851_v27 }
  0xec   : > { %4414 = vmatprep.subr.bf16.mxu0 %v4852_v36 }
  0xef   : > { %4415 = vmatpush3.bf16.msra.mxu0 %v4852_v36 }
  0xf1   : > { %4177 = vmatmul.mubr.bf16.vlgmr.msra.gmra.mrb[0].mxu1 %v5987_v28 }
  0xf2   : > { %4385 = vmatmul.mubr.bf16.gmra.mrb[16].mxu0 %v5988_v8  ;;  %4456 = vmatpush3.bf16.msra.mxu1 %v4873_v47 }
  0xf3   : > { %4180 = vmatprep.mubr.bf16.mxu1 %v5075_v40  ;;  %4388 = vmatprep.mubr.bf16.mxu0 %v5989_v53  ;;  %v2449_v40 = vrot.slane %v360_v17, 1  ;;  %v2454_v17 = vsel %vm435_vm0, %v2451_v21, %v2453_v3 }
  0xf4   : > { %4449 = vmatprep.subr.bf16.mxu1 %v4874_v57 }
  0xf5   : > { %v2450_v48 = vsel %vm435_vm0, %v2447_v23, %v2449_v40  ;;  %v2452_v16 = vsel %vm435_vm0, %v2449_v40, %v2451_v21 }
  0xf6   : > { %4457 = vmatpush3.bf16.msra.mxu1 %v4874_v57  ;;  %v2460_v18 = vpack.c.bf16 %v2454_v17, %v2452_v16 }
  0xf7   : > { %4450 = vmatprep.subr.bf16.mxu1 %v4875_v14 }
  0xf9   : > { %4181 = vmatmul.mubr.bf16.gmra.mrb[4].mxu1 %v5078_v41  ;;  %v2459_v41 = vpack.c.bf16 %v2450_v48, %v2448_v11 }
  0xfa   : > { %4389 = vmatmul.mubr.bf16.gmra.mrb[20].mxu0 %v5990_v26  ;;  %4184 = vmatprep.mubr.bf16.mxu1 %v5111_v61  ;;  %v4877_v61 = vld [vmem:[%s5930_s1 + $0x120] sm:$0xff]  }
  0xfb   : > { %4392 = vmatprep.mubr.bf16.mxu0 %v5582_v4  ;;  %4458 = vmatpush3.bf16.msra.mxu1 %v4875_v14 }
  0xfc   : > { %4451 = vmatprep.subr.bf16.mxu1 %v4876_v45 }
  0xff   : > { %4459 = vmatpush3.bf16.msra.mxu1 %v4876_v45 }
 0x100   : > { %4452 = vmatprep.subr.bf16.mxu1 %v4877_v61 }
 0x101   : > { %4185 = vmatmul.mubr.bf16.gmra.mrb[8].mxu1 %v5114_v62  ;;  %v4879_v62 = vld [vmem:[%s5930_s1 + $0x130] sm:$0xff]  }
 0x102   : > { %4393 = vmatmul.mubr.bf16.gmra.mrb[24].mxu0 %v5593_v30  ;;  %4188 = vmatprep.mubr.bf16.mxu1 %v5151_v32  ;;  %v4880_v32 = vld [vmem:[%s5930_s1 + $0x138] sm:$0xff]  }
 0x103   : > { %4396 = vmatprep.mubr.bf16.mxu0 %v2459_v41  ;;  %4460 = vmatpush3.bf16.msra.mxu1 %v4877_v61 }
 0x104   : > { %4453 = vmatprep.subr.bf16.mxu1 %v4878_v42 }
 0x107   : > { %4461 = vmatpush3.bf16.msra.mxu1 %v4878_v42 }
 0x108   : > { %4454 = vmatprep.subr.bf16.mxu1 %v4879_v62 }
 0x109   : > { %4189 = vmatmul.mubr.bf16.gmra.mrb[12].mxu1 %v5154_v33 }
 0x10a   : > { %4397 = vmatmul.mubr.bf16.gmra.mrb[28].mxu0 %v2460_v18  ;;  %4192 = vmatprep.mubr.bf16.mxu1 %v5226_v43 }
 0x10b   : > { %4416 = vmatprep.mubr.bf16.mxu0 %v5338_v6  ;;  %4462 = vmatpush3.bf16.msra.mxu1 %v4879_v62 }
 0x10c   : > { %4455 = vmatprep.subr.bf16.mxu1 %v4880_v32 }
 0x10f   : > { %4463 = vmatpush3.bf16.msra.mxu1 %v4880_v32 }
 0x111   : > { %4193 = vmatmul.mubr.bf16.gmra.mrb[16].mxu1 %v5231_v20 }
 0x112   : > { %4417 = vmatmul.mubr.bf16.vlgmr.msra.gmra.mrb[0].mxu0 %v5378_v60  ;;  %4196 = vmatprep.mubr.bf16.mxu1 %v5267_v38 }
 0x113   : > { %4420 = vmatprep.mubr.bf16.mxu0 %v5399_v46 }
 0x119   : > { %4197 = vmatmul.mubr.bf16.gmra.mrb[20].mxu1 %v5270_v44 }
 0x11a   : > { %4421 = vmatmul.mubr.bf16.gmra.mrb[4].mxu0 %v5442_v22  ;;  %4200 = vmatprep.mubr.bf16.mxu1 %v5320_v34 }
 0x11b   : > { %4424 = vmatprep.mubr.bf16.mxu0 %v5457_v15 }
 0x121   : > { %4201 = vmatmul.mubr.bf16.gmra.mrb[24].mxu1 %v5349_v52 }
 0x122   : > { %4425 = vmatmul.mubr.bf16.gmra.mrb[8].mxu0 %v5487_v2  ;;  %4204 = vmatprep.mubr.bf16.mxu1 %v5537_v1 }
 0x123   : > { %4428 = vmatprep.mubr.bf16.mxu0 %v5489_v56 }
 0x129   : > { %4205 = vmatmul.mubr.bf16.gmra.mrb[28].mxu1 %v5540_v35 }
 0x12a   : > { %4429 = vmatmul.mubr.bf16.gmra.mrb[12].mxu0 %v5517_v12  ;;  %4240 = vmatprep.mubr.bf16.mxu1 %v5329_v58 }
 0x12b   : > { %4432 = vmatprep.mubr.bf16.mxu0 %v5521_v24 }
 0x131   : > { %4241 = vmatmul.mubr.bf16.vlgmr.msra.gmra.mrb[16].mxu1 %v5374_v59 }
 0x132   : > { %4433 = vmatmul.mubr.bf16.gmra.mrb[16].mxu0 %v5556_v49  ;;  %4244 = vmatprep.mubr.bf16.mxu1 %v5986_v37 }
 0x133   : > { %4436 = vmatprep.mubr.bf16.mxu0 %v5558_v50 }
 0x139   : > { %4245 = vmatmul.mubr.bf16.gmra.mrb[20].mxu1 %v5988_v8 }
 0x13a   : > { %4437 = vmatmul.mubr.bf16.gmra.mrb[20].mxu0 %v5584_v10  ;;  %4248 = vmatprep.mubr.bf16.mxu1 %v5989_v53 }
 0x13b   : > { %4440 = vmatprep.mubr.bf16.mxu0 %v5586_v13 }
 0x141   : > { %4249 = vmatmul.mubr.bf16.gmra.mrb[24].mxu1 %v5990_v26 }
 0x142   : > { %4441 = vmatmul.mubr.bf16.gmra.mrb[24].mxu0 %v5604_v25  ;;  %4252 = vmatprep.mubr.bf16.mxu1 %v5582_v4 }
 0x143   : > { %4444 = vmatprep.mubr.bf16.mxu0 %v2732_v39 }
 0x149   : > { %4253 = vmatmul.mubr.bf16.gmra.mrb[28].mxu1 %v5593_v30 }
 0x14a   : > { %4445 = vmatmul.mubr.bf16.gmra.mrb[28].mxu0 %v2733_v31 }
 0x1c4   : > { %v4178_v33 = vpop.f32.mrb[0].mxu1 }
 0x1c5   : > { %v1471_v43 = vpop.f32.mrb[1].mxu1 }
 0x1c6   : > { %v4179_v20 = vpop.f32.mrb[2].mxu1 }
 0x1c7   : > { %v1474_v38 = vpop.f32.mrb[3].mxu1 }
 0x1cc   : > { %v4182_v44 = vpop.f32.mrb[4].mxu1 }
 0x1cd   : > { %v1487_v58 = vpop.f32.mrb[5].mxu1 }
 0x1ce   : > { %v4183_v6 = vpop.f32.mrb[6].mxu1 }
 0x1cf   : > { %v1490_v52 = vpop.f32.mrb[7].mxu1 }
 0x1d4   : > { %v4186_v34 = vpop.f32.mrb[8].mxu1 }
 0x1d5   : > { %v1503_v22 = vpop.f32.mrb[9].mxu1 }
 0x1d6   : > { %v4187_v59 = vpop.f32.mrb[10].mxu1 }
 0x1d7   : > { %v5866_v60 = vpop.f32.mrb[11].mxu1 }
 0x1dc   : > { %v5872_v46 = vpop.f32.mrb[12].mxu1 }
 0x1dd   : > { %v5874_v15 = vpop.f32.mrb[13].mxu1 }
 0x1de   : > { %v5876_v2 = vpop.f32.mrb[14].mxu1 }
 0x1df   : > { %v5878_v56 = vpop.f32.mrb[15].mxu1 }
 0x1e5   : > { %v4418_v12 = vpop.f32.mrb[0].mxu0 }
 0x1e6   : > { %v4464_v24 = vadd.f32 %v4418_v12, %v4178_v33  ;;  %v2833_v1 = vpop.f32.mrb[1].mxu0 }
 0x1e7   : > { %v4465_v35 = vadd.f32 %v2833_v1, %v1471_v43  ;;  %v4419_v49 = vpop.f32.mrb[2].mxu0 }
 0x1e8   : > { %v4466_v50 = vadd.f32 %v4419_v49, %v4179_v20  ;;  %v2836_v4 = vpop.f32.mrb[3].mxu0  ;;  %v3192_v19 = vmul.f32 %v4464_v24, %v4464_v24 }
 0x1e9   : > { %v4467_v10 = vadd.f32 %v2836_v4, %v1474_v38  ;;  %v3190_v30 = vmul.f32 %v4465_v35, %v4465_v35 }
 0x1ea   : > { %v3713_v13 = vpack.c.bf16 %v4466_v50, %v4464_v24  ;;  %v3193_v29 = vmul.f32 %v4466_v50, %v4466_v50 }
 0x1eb   : > { %v3708_v25 = vpack.c.bf16 %v4467_v10, %v4465_v35  ;;  %v3152_v63 = vadd.f32 %v4467_v10, %v4465_v35  ;;  %v3191_v9 = vmul.f32 %v4467_v10, %v4467_v10 }
 0x1ec   : > { %3785 = vst [vmem:[%s5883_s29 + $0x8] sm:$0xff] %v3713_v13  }
 0x1ed   : > { %3709 = vst [vmem:[%s5883_s29] sm:$0xff] %v3708_v25   ;;  %v3153_v39 = vadd.f32 %v4464_v24, %v3152_v63  ;;  %v3222_v51 = vadd.f32 %v3191_v9, %v3190_v30  ;;  %v4422_v5 = vpop.f32.mrb[4].mxu0 }
 0x1ee   : > { %v4468_v31 = vadd.f32 %v4422_v5, %v4182_v44  ;;  %v2849_v47 = vpop.f32.mrb[5].mxu0 }
 0x1ef   : > { %v3223_v7 = vadd.f32 %v3222_v51, %v3192_v19  ;;  %v4469_v54 = vadd.f32 %v2849_v47, %v1487_v58  ;;  %v3154_v55 = vadd.f32 %v4466_v50, %v3153_v39  ;;  %v4423_v27 = vpop.f32.mrb[6].mxu0 }
 0x1f0   : > { %v4470_v36 = vadd.f32 %v4423_v27, %v4183_v6  ;;  %v2852_v37 = vpop.f32.mrb[7].mxu0  ;;  %v3196_v11 = vmul.f32 %v4468_v31, %v4468_v31 }
 0x1f1   : > { %v3155_v28 = vadd.f32 %v4469_v54, %v3154_v55  ;;  %v3194_v8 = vmul.f32 %v4469_v54, %v4469_v54  ;;  %v3224_v53 = vadd.f32 %v3223_v7, %v3193_v29  ;;  %v4471_v57 = vadd.f32 %v2852_v37, %v1490_v52 }
 0x1f2   : > { %v3723_v14 = vpack.c.bf16 %v4470_v36, %v4468_v31  ;;  %v3197_v61 = vmul.f32 %v4470_v36, %v4470_v36 }
 0x1f3   : > { %v3225_v0 = vadd.f32 %v3224_v53, %v3194_v8  ;;  %v3718_v23 = vpack.c.bf16 %v4471_v57, %v4469_v54  ;;  %v3156_v40 = vadd.f32 %v4471_v57, %v3155_v28  ;;  %v3195_v26 = vmul.f32 %v4471_v57, %v4471_v57 }
 0x1f4   : > { %3787 = vst [vmem:[%s5883_s29 + $0x18] sm:$0xff] %v3723_v14  }
 0x1f5   : > { %3786 = vst [vmem:[%s5883_s29 + $0x10] sm:$0xff] %v3718_v23   ;;  %v3157_v48 = vadd.f32 %v4468_v31, %v3156_v40  ;;  %v3226_v45 = vadd.f32 %v3225_v0, %v3195_v26  ;;  %v4426_v21 = vpop.f32.mrb[8].mxu0 }
 0x1f6   : > { %v4472_v41 = vadd.f32 %v4426_v21, %v4186_v34  ;;  %v2865_v3 = vpop.f32.mrb[9].mxu0 }
 0x1f7   : > { %v3227_v16 = vadd.f32 %v3226_v45, %v3196_v11  ;;  %v4473_v17 = vadd.f32 %v2865_v3, %v1503_v22  ;;  %v3158_v42 = vadd.f32 %v4470_v36, %v3157_v48  ;;  %v4427_v18 = vpop.f32.mrb[10].mxu0 }
 0x1f8   : > { %v4474_v62 = vadd.f32 %v4427_v18, %v4187_v59  ;;  %v2868_v32 = vpop.f32.mrb[11].mxu0  ;;  %v3200_v12 = vmul.f32 %v4472_v41, %v4472_v41 }
 0x1f9   : > { %v3159_v33 = vadd.f32 %v4473_v17, %v3158_v42  ;;  %v3198_v43 = vmul.f32 %v4473_v17, %v4473_v17  ;;  %v3228_v20 = vadd.f32 %v3227_v16, %v3197_v61  ;;  %v4475_v38 = vadd.f32 %v2868_v32, %v5866_v60 }
 0x1fa   : > { %v3733_v44 = vpack.c.bf16 %v4474_v62, %v4472_v41  ;;  %v3201_v49 = vmul.f32 %v4474_v62, %v4474_v62 }
 0x1fb   : > { %v3229_v58 = vadd.f32 %v3228_v20, %v3198_v43  ;;  %v3728_v6 = vpack.c.bf16 %v4475_v38, %v4473_v17  ;;  %v3160_v52 = vadd.f32 %v4475_v38, %v3159_v33  ;;  %v3199_v34 = vmul.f32 %v4475_v38, %v4475_v38 }
 0x1fc   : > { %3789 = vst [vmem:[%s5883_s29 + $0x28] sm:$0xff] %v3733_v44  }
 0x1fd   : > { %3788 = vst [vmem:[%s5883_s29 + $0x20] sm:$0xff] %v3728_v6   ;;  %v3161_v24 = vadd.f32 %v4472_v41, %v3160_v52  ;;  %v3230_v22 = vadd.f32 %v3229_v58, %v3199_v34  ;;  %v4430_v1 = vpop.f32.mrb[12].mxu0 }
 0x1fe   : > { %v4476_v35 = vadd.f32 %v4430_v1, %v5872_v46  ;;  %v2881_v59 = vpop.f32.mrb[13].mxu0 }
 0x1ff   : > { %v3231_v50 = vadd.f32 %v3230_v22, %v3200_v12  ;;  %v4477_v4 = vadd.f32 %v2881_v59, %v5874_v15  ;;  %v3162_v60 = vadd.f32 %v4474_v62, %v3161_v24  ;;  %v4431_v10 = vpop.f32.mrb[14].mxu0 }
 0x200   : > { %v4478_v13 = vadd.f32 %v4431_v10, %v5876_v2  ;;  %v2884_v30 = vpop.f32.mrb[15].mxu0  ;;  %v3204_v29 = vmul.f32 %v4476_v35, %v4476_v35 }
 0x201   : > { %v3163_v25 = vadd.f32 %v4477_v4, %v3162_v60  ;;  %v3202_v63 = vmul.f32 %v4477_v4, %v4477_v4  ;;  %v3232_v9 = vadd.f32 %v3231_v50, %v3201_v49  ;;  %v4479_v19 = vadd.f32 %v2884_v30, %v5878_v56 }
 0x202   : > { %v3743_v39 = vpack.c.bf16 %v4478_v13, %v4476_v35  ;;  %v3205_v37 = vmul.f32 %v4478_v13, %v4478_v13 }
 0x203   : > { %v3233_v51 = vadd.f32 %v3232_v9, %v3202_v63  ;;  %v3738_v46 = vpack.c.bf16 %v4479_v19, %v4477_v4  ;;  %v3164_v5 = vadd.f32 %v4479_v19, %v3163_v25  ;;  %v3203_v31 = vmul.f32 %v4479_v19, %v4479_v19 }
 0x204   : > { %3791 = vst [vmem:[%s5883_s29 + $0x38] sm:$0xff] %v3743_v39   ;;  %v4242_v47 = vpop.f32.mrb[16].mxu1 }
 0x205   : > { %3790 = vst [vmem:[%s5883_s29 + $0x30] sm:$0xff] %v3738_v46   ;;  %v3165_v15 = vadd.f32 %v4476_v35, %v3164_v5  ;;  %v3234_v7 = vadd.f32 %v3233_v51, %v3203_v31  ;;  %v4434_v54 = vpop.f32.mrb[16].mxu0  ;;  %v1813_v55 = vpop.f32.mrb[17].mxu1 }
 0x206   : > { %v4480_v2 = vadd.f32 %v4434_v54, %v4242_v47  ;;  %v2897_v27 = vpop.f32.mrb[17].mxu0  ;;  %v4243_v36 = vpop.f32.mrb[18].mxu1 }
 0x207   : > { %v3235_v28 = vadd.f32 %v3234_v7, %v3204_v29  ;;  %v4481_v56 = vadd.f32 %v2897_v27, %v1813_v55  ;;  %v3166_v8 = vadd.f32 %v4478_v13, %v3165_v15  ;;  %v4435_v53 = vpop.f32.mrb[18].mxu0  ;;  %v1816_v57 = vpop.f32.mrb[19].mxu1 }
 0x208   : > { %v4482_v14 = vadd.f32 %v4435_v53, %v4243_v36  ;;  %v2900_v0 = vpop.f32.mrb[19].mxu0  ;;  %v3208_v16 = vmul.f32 %v4480_v2, %v4480_v2 }
 0x209   : > { %v3167_v23 = vadd.f32 %v4481_v56, %v3166_v8  ;;  %v3206_v40 = vmul.f32 %v4481_v56, %v4481_v56  ;;  %v3236_v26 = vadd.f32 %v3235_v28, %v3205_v37  ;;  %v4483_v11 = vadd.f32 %v2900_v0, %v1816_v57 }
 0x20a   : > { %v3753_v48 = vpack.c.bf16 %v4482_v14, %v4480_v2  ;;  %v3209_v20 = vmul.f32 %v4482_v14, %v4482_v14 }
 0x20b   : > { %v3237_v45 = vadd.f32 %v3236_v26, %v3206_v40  ;;  %v3748_v21 = vpack.c.bf16 %v4483_v11, %v4481_v56  ;;  %v3168_v41 = vadd.f32 %v4483_v11, %v3167_v23  ;;  %v3207_v3 = vmul.f32 %v4483_v11, %v4483_v11 }
 0x20c   : > { %3793 = vst [vmem:[%s5883_s29 + $0x48] sm:$0xff] %v3753_v48   ;;  %v4246_v61 = vpop.f32.mrb[20].mxu1 }
 0x20d   : > { %3792 = vst [vmem:[%s5883_s29 + $0x40] sm:$0xff] %v3748_v21   ;;  %v3169_v17 = vadd.f32 %v4480_v2, %v3168_v41  ;;  %v3238_v42 = vadd.f32 %v3237_v45, %v3207_v3  ;;  %v4438_v18 = vpop.f32.mrb[20].mxu0  ;;  %v1829_v62 = vpop.f32.mrb[21].mxu1 }
 0x20e   : > { %v4484_v32 = vadd.f32 %v4438_v18, %v4246_v61  ;;  %v2913_v33 = vpop.f32.mrb[21].mxu0  ;;  %v4247_v43 = vpop.f32.mrb[22].mxu1 }
 0x20f   : > { %v3239_v38 = vadd.f32 %v3238_v42, %v3208_v16  ;;  %v4485_v44 = vadd.f32 %v2913_v33, %v1829_v62  ;;  %v3170_v58 = vadd.f32 %v4482_v14, %v3169_v17  ;;  %v4439_v6 = vpop.f32.mrb[22].mxu0  ;;  %v1832_v52 = vpop.f32.mrb[23].mxu1 }
 0x210   : > { %v4486_v34 = vadd.f32 %v4439_v6, %v4247_v43  ;;  %v2916_v12 = vpop.f32.mrb[23].mxu0  ;;  %v3212_v13 = vmul.f32 %v4484_v32, %v4484_v32 }
 0x211   : > { %v3171_v24 = vadd.f32 %v4485_v44, %v3170_v58  ;;  %v3210_v22 = vmul.f32 %v4485_v44, %v4485_v44  ;;  %v3240_v1 = vadd.f32 %v3239_v38, %v3209_v20  ;;  %v4487_v35 = vadd.f32 %v2916_v12, %v1832_v52 }
 0x212   : > { %v3763_v59 = vpack.c.bf16 %v4486_v34, %v4484_v32  ;;  %v3213_v46 = vmul.f32 %v4486_v34, %v4486_v34 }
 0x213   : > { %v3241_v49 = vadd.f32 %v3240_v1, %v3210_v22  ;;  %v3758_v50 = vpack.c.bf16 %v4487_v35, %v4485_v44  ;;  %v3172_v4 = vadd.f32 %v4487_v35, %v3171_v24  ;;  %v3211_v60 = vmul.f32 %v4487_v35, %v4487_v35 }
 0x214   : > { %3795 = vst [vmem:[%s5883_s29 + $0x58] sm:$0xff] %v3763_v59   ;;  %v4250_v10 = vpop.f32.mrb[24].mxu1 }
 0x215   : > { %3794 = vst [vmem:[%s5883_s29 + $0x50] sm:$0xff] %v3758_v50   ;;  %v3173_v30 = vadd.f32 %v4484_v32, %v3172_v4  ;;  %v3242_v25 = vadd.f32 %v3241_v49, %v3211_v60  ;;  %v4442_v63 = vpop.f32.mrb[24].mxu0  ;;  %v1845_v9 = vpop.f32.mrb[25].mxu1 }
 0x216   : > { %v4488_v19 = vadd.f32 %v4442_v63, %v4250_v10  ;;  %v2929_v39 = vpop.f32.mrb[25].mxu0  ;;  %v4251_v51 = vpop.f32.mrb[26].mxu1 }
 0x217   : > { %v3243_v5 = vadd.f32 %v3242_v25, %v3212_v13  ;;  %v4489_v31 = vadd.f32 %v2929_v39, %v1845_v9  ;;  %v3174_v47 = vadd.f32 %v4486_v34, %v3173_v30  ;;  %v4443_v29 = vpop.f32.mrb[26].mxu0  ;;  %v1848_v15 = vpop.f32.mrb[27].mxu1 }
 0x218   : > { %v4490_v7 = vadd.f32 %v4443_v29, %v4251_v51  ;;  %v2932_v54 = vpop.f32.mrb[27].mxu0  ;;  %v3216_v14 = vmul.f32 %v4488_v19, %v4488_v19 }
 0x219   : > { %v3175_v55 = vadd.f32 %v4489_v31, %v3174_v47  ;;  %v3214_v2 = vmul.f32 %v4489_v31, %v4489_v31  ;;  %v3244_v27 = vadd.f32 %v3243_v5, %v3213_v46  ;;  %v4491_v36 = vadd.f32 %v2932_v54, %v1848_v15 }
 0x21a   : > { %v3773_v37 = vpack.c.bf16 %v4490_v7, %v4488_v19  ;;  %v3217_v21 = vmul.f32 %v4490_v7, %v4490_v7 }
 0x21b   : > { %v3245_v28 = vadd.f32 %v3244_v27, %v3214_v2  ;;  %v3768_v56 = vpack.c.bf16 %v4491_v36, %v4489_v31  ;;  %v3176_v8 = vadd.f32 %v4491_v36, %v3175_v55  ;;  %v3215_v53 = vmul.f32 %v4491_v36, %v4491_v36 }
 0x21c   : > { %3797 = vst [vmem:[%s5883_s29 + $0x68] sm:$0xff] %v3773_v37   ;;  %v4254_v57 = vpop.f32.mrb[28].mxu1 }
 0x21d   : > { %3796 = vst [vmem:[%s5883_s29 + $0x60] sm:$0xff] %v3768_v56   ;;  %v3177_v0 = vadd.f32 %v4488_v19, %v3176_v8  ;;  %v3246_v23 = vadd.f32 %v3245_v28, %v3215_v53  ;;  %v4446_v40 = vpop.f32.mrb[28].mxu0  ;;  %v1861_v26 = vpop.f32.mrb[29].mxu1 }
 0x21e   : > { %v4492_v11 = vadd.f32 %v4446_v40, %v4254_v57  ;;  %v2945_v48 = vpop.f32.mrb[29].mxu0  ;;  %v4255_v45 = vpop.f32.mrb[30].mxu1 }
 0x21f   : > { %v3247_v41 = vadd.f32 %v3246_v23, %v3216_v14  ;;  %v4493_v3 = vadd.f32 %v2945_v48, %v1861_v26  ;;  %v3178_v61 = vadd.f32 %v4490_v7, %v3177_v0  ;;  %v4447_v16 = vpop.f32.mrb[30].mxu0  ;;  %v1864_v17 = vpop.f32.mrb[31].mxu1 }
 0x220   : > { %v4494_v42 = vadd.f32 %v4447_v16, %v4255_v45  ;;  %v2948_v18 = vpop.f32.mrb[31].mxu0  ;;  %v3220_v52 = vmul.f32 %v4492_v11, %v4492_v11 }
 0x221   : > { %v3179_v62 = vadd.f32 %v4493_v3, %v3178_v61  ;;  %v3218_v32 = vmul.f32 %v4493_v3, %v4493_v3  ;;  %v3248_v33 = vadd.f32 %v3247_v41, %v3217_v21  ;;  %v4495_v43 = vadd.f32 %v2948_v18, %v1864_v17 }
 0x222   : > { %v3783_v20 = vpack.c.bf16 %v4494_v42, %v4492_v11  ;;  %v3221_v24 = vmul.f32 %v4494_v42, %v4494_v42 }
 0x223   : > { %v3249_v38 = vadd.f32 %v3248_v33, %v3218_v32  ;;  %v3778_v44 = vpack.c.bf16 %v4495_v43, %v4493_v3  ;;  %v3180_v58 = vadd.f32 %v4495_v43, %v3179_v62  ;;  %v3219_v6 = vmul.f32 %v4495_v43, %v4495_v43 }
 0x224   : > { %3799 = vst [vmem:[%s5883_s29 + $0x78] sm:$0xff] %v3783_v20  }
 0x225   : > { %3798 = vst [vmem:[%s5883_s29 + $0x70] sm:$0xff] %v3778_v44   ;;  %v3181_v34 = vadd.f32 %v4492_v11, %v3180_v58  ;;  %v3250_v12 = vadd.f32 %v3249_v38, %v3219_v6 }
 0x227   : > { %v3182_v22 = vadd.f32 %v4494_v42, %v3181_v34  ;;  %v3251_v1 = vadd.f32 %v3250_v12, %v3220_v52 }
 0x229   : > { %v3183_v35 = vrot.slane %v3182_v22, 4  ;;  %v3252_v59 = vadd.f32 %v3251_v1, %v3221_v24 }
 0x22b   : > { %v3184_v49 = vadd.f32 %v3183_v35, %v3182_v22  ;;  %v3253_v50 = vrot.slane %v3252_v59, 4 }
 0x22d   : > { %v3185_v4 = vrot.slane %v3184_v49, 2  ;;  %v3254_v60 = vadd.f32 %v3253_v50, %v3252_v59 }
 0x22f   : > { %v3186_v10 = vadd.f32 %v3185_v4, %v3184_v49  ;;  %v3255_v13 = vrot.slane %v3254_v60, 2 }
 0x231   : > { %v3187_v30 = vrot.slane %v3186_v10, 1  ;;  %v3256_v25 = vadd.f32 %v3255_v13, %v3254_v60 }
 0x233   : > { %v3188_v63 = vadd.f32 %v3187_v30, %v3186_v10  ;;  %v3257_v9 = vrot.slane %v3256_v25, 1 }
 0x235   : > { %3189 = vst [vmem:[%s248_s30] sm:$0x1] %v3188_v63  ;;  %v3258_v19 = vadd.f32 %v3257_v9, %v3256_v25 }
 0x237   : > { %3259 = vst [vmem:[%s255_s7] sm:$0x1] %v3258_v19 }
 0x238 PF: > { %s15_s19 = sadd.s32 1, %s4919_s19   ;;  %s5991_s15 = smov %s4911_s17 }
 0x239   : > { %p12_p8 = scmp.ge.s32.totalorder %s15_s19, 10   ;;  %s5992_s16 = smov %s4915_s18 }
 0x23a   : > { %s5993_s17 = smov %s5996_s20  ;;  %s5994_s18 = smov %s6000_s21 }
 0x23b   :  { %14 = sbr.rel (!%p12_p8) target bundleno = 3 (0x3), region = 91 }

// kernel: _lambda_.27
= control target key start
LH: loop header
LB: loop body
LE: loop exit
PB: predicated region body
PF: predicated region fallthrough
CT: control target
= control target key end

     0   :  { %s1044_s21 = smov 0   ;;  %s1165_s0 = inlined_call_operand.vmem [shape: bf16[512,128], index: 0, kind: input, shape index: {}]   ;;  %s1166_s1 = inlined_call_operand.vmem [shape: bf16[128,128], index: 1, kind: input, shape index: {}]   ;;  %s1167_s2 = inlined_call_operand.vmem [shape: f32[1,128], index: 2, kind: input, shape index: {}]   ;;  %s1168_s3 = inlined_call_operand.vmem [shape: f32[1,128], index: 3, kind: input, shape index: {}]   ;;  %s1169_s4 = inlined_call_operand.vmem [shape: bf16[512,128], index: 4, kind: output, shape index: {0}]   ;;  %s1170_s5 = inlined_call_operand.vmem [shape: f32[4,1,128], index: 5, kind: output, shape index: {1}]   ;;  %s1171_s6 = inlined_call_operand.vmem [shape: f32[4,1,128], index: 6, kind: output, shape index: {2}]  }
   0x1 LB: > { %s1050_s22 = sadd.s32 4294967295, %s1007_s21   ;;  %p786_p0 = scmp.ge.s32.totalorder %s1007_s21, 1  ;;  %s1007_s21 = sphi %s1044_s21, %s17_s21  }
   0x2   : > { %p218_p1 = scmp.lt.s32.totalorder %s1007_s21, 5 }
   0x4   : > { %p219_p2 = pnand %p786_p0, %p218_p1 }
   0x5   : > { %v993_v0 = vld [vmem:[%s1166_s1] sm:$0xff] (!%p219_p2)   ;;  %s787_s25 = sshll.u32 (!%p219_p2), %s1050_s22, 4  ;;  %v994_v1 = vld [vmem:[%s1166_s1 + $0x8] sm:$0xff] (!%p219_p2)   ;;  %v995_v2 = vld [vmem:[%s1166_s1 + $0x10] sm:$0xff] (!%p219_p2)   ;;  %p266_p4 = scmp.lt.s32.totalorder (!%p219_p2), %s1050_s22, 3 }
   0x6   : > { %222 = sbr.rel (%p219_p2) target bundleno = 299 (0x12b), region = 36  ;;  %p255_p3 = scmp.lt.s32.totalorder (!%p219_p2), %s787_s25, 63  ;;  %937 = vmatprep.subr.bf16.mxu0 (!%p219_p2), %v993_v0  ;;  %969 = vmatprep.subr.bf16.mxu1 (!%p219_p2), %v993_v0  ;;  %v996_v3 = vld [vmem:[%s1166_s1 + $0x18] sm:$0xff] (!%p219_p2)   ;;  %v1081_v5 = vld [vmem:[%s1167_s2] ss:$0 sm:$0xff] (!%p219_p2)  ;;  %v998_v28 = vld [vmem:[%s1166_s1 + $0x28] sm:$0xff] (!%p219_p2)  }
   0x7   : > { %938 = vmatpush3.bf16.msra.mxu0 (!%p219_p2), %v993_v0  ;;  %977 = vmatpush3.bf16.msra.mxu1 (!%p219_p2), %v993_v0  ;;  %v1088_v10 = vld [vmem:[%s1168_s3] ss:$0 sm:$0xff] (!%p219_p2)  ;;  %v999_v44 = vld [vmem:[%s1166_s1 + $0x30] sm:$0xff] (!%p219_p2)   ;;  %v1000_v61 = vld [vmem:[%s1166_s1 + $0x38] sm:$0xff] (!%p219_p2)  }
   0x8   : > { %939 = vmatprep.subr.bf16.mxu0 (!%p219_p2), %v994_v1  ;;  %970 = vmatprep.subr.bf16.mxu1 (!%p219_p2), %v994_v1  ;;  %v997_v16 = vld [vmem:[%s1166_s1 + $0x20] sm:$0xff] (!%p219_p2)  }
   0xb   : > { %940 = vmatpush3.bf16.msra.mxu0 (!%p219_p2), %v994_v1  ;;  %978 = vmatpush3.bf16.msra.mxu1 (!%p219_p2), %v994_v1 }
   0xc   : > { %941 = vmatprep.subr.bf16.mxu0 (!%p219_p2), %v995_v2  ;;  %971 = vmatprep.subr.bf16.mxu1 (!%p219_p2), %v995_v2 }
   0xd   : > { %s1173_s25 = smov (!%p255_p3, %s787_s25), 63  ;;  %s1175_s22 = smov (!%p266_p4, %s1050_s22), 3 }
   0xe   : > { %s788_s30 = sshll.u32 %s1173_s25, 2  ;;  %s268_s7 = scalar_lea.vmem %s1170_s5, %s1175_s22 }
   0xf   : > { %s1072_s9 = scalar_lea.vmem %s1165_s0, %s788_s30  ;;  %942 = vmatpush3.bf16.msra.mxu0 %v995_v2  ;;  %979 = vmatpush3.bf16.msra.mxu1 %v995_v2  ;;  %s1144_s29 = scalar_lea.vmem %s1169_s4, %s788_s30 }
  0x10   : > { %v836_v4 = vld [vmem:[%s1072_s9] sm:$0xff]   ;;  %v907_v8 = vld [vmem:[%s1072_s9 + $0x8] sm:$0xff]   ;;  %v908_v9 = vld [vmem:[%s1072_s9 + $0x10] sm:$0xff]   ;;  %943 = vmatprep.subr.bf16.mxu0 %v996_v3  ;;  %972 = vmatprep.subr.bf16.mxu1 %v996_v3  ;;  %s271_s10 = scalar_lea.vmem %s1171_s6, %s1175_s22 }
  0x11   : > { %v837_v6 = vunpack.c.l.bf16 %v836_v4  ;;  %v838_v7 = vunpack.c.h.bf16 %v836_v4  ;;  %v841_v11 = vunpack.c.l.bf16 %v907_v8  ;;  %v842_v14 = vunpack.c.h.bf16 %v907_v8  ;;  %v910_v15 = vld [vmem:[%s1072_s9 + $0x20] sm:$0xff]   ;;  %v909_v22 = vld [vmem:[%s1072_s9 + $0x18] sm:$0xff]   ;;  %v911_v27 = vld [vmem:[%s1072_s9 + $0x28] sm:$0xff]  }
  0x12   : > { %v845_v17 = vunpack.c.l.bf16 %v908_v9  ;;  %v846_v21 = vunpack.c.h.bf16 %v908_v9  ;;  %v853_v23 = vunpack.c.l.bf16 %v910_v15  ;;  %v912_v30 = vld [vmem:[%s1072_s9 + $0x30] sm:$0xff]   ;;  %v849_v32 = vunpack.c.l.bf16 %v909_v22  ;;  %v913_v39 = vld [vmem:[%s1072_s9 + $0x38] sm:$0xff]  }
  0x13   : > { %v312_v12 = vmul.f32 %v837_v6, %v1081_v5  ;;  %v313_v13 = vmul.f32 %v838_v7, %v1081_v5  ;;  %v314_v20 = vmul.f32 %v841_v11, %v1081_v5  ;;  %944 = vmatpush3.bf16.msra.mxu0 %v996_v3  ;;  %980 = vmatpush3.bf16.msra.mxu1 %v996_v3  ;;  %v850_v33 = vunpack.c.h.bf16 %v909_v22 }
  0x14   : > { %v315_v26 = vmul.f32 %v842_v14, %v1081_v5  ;;  %945 = vmatprep.subr.bf16.mxu0 %v997_v16  ;;  %973 = vmatprep.subr.bf16.mxu1 %v997_v16  ;;  %v316_v29 = vmul.f32 %v845_v17, %v1081_v5  ;;  %v854_v34 = vunpack.c.h.bf16 %v910_v15  ;;  %v317_v36 = vmul.f32 %v846_v21, %v1081_v5 }
  0x15   : > { %v335_v18 = vadd.f32 %v1088_v10, %v312_v12  ;;  %v336_v19 = vadd.f32 %v1088_v10, %v313_v13  ;;  %v337_v35 = vadd.f32 %v1088_v10, %v314_v20  ;;  %v320_v37 = vmul.f32 %v853_v23, %v1081_v5 }
  0x16   : > { %v857_v38 = vunpack.c.l.bf16 %v911_v27  ;;  %v338_v40 = vadd.f32 %v1088_v10, %v315_v26  ;;  %v321_v41 = vmul.f32 %v854_v34, %v1081_v5  ;;  %v858_v42 = vunpack.c.h.bf16 %v911_v27 }
  0x17   : > { %v351_v24 = vmax.f32 %v335_v18, 0.0  ;;  %v352_v25 = vmax.f32 %v336_v19, 0.0  ;;  %946 = vmatpush3.bf16.msra.mxu0 %v997_v16  ;;  %981 = vmatpush3.bf16.msra.mxu1 %v997_v16  ;;  %v861_v43 = vunpack.c.l.bf16 %v912_v30  ;;  %v339_v45 = vadd.f32 %v1088_v10, %v316_v29 }
  0x18   : > { %947 = vmatprep.subr.bf16.mxu0 %v998_v28  ;;  %v343_v46 = vadd.f32 %v1088_v10, %v320_v37  ;;  %v322_v47 = vmul.f32 %v857_v38, %v1081_v5  ;;  %v862_v48 = vunpack.c.h.bf16 %v912_v30  ;;  %974 = vmatprep.subr.bf16.mxu1 %v998_v28  ;;  %v344_v49 = vadd.f32 %v1088_v10, %v321_v41 }
  0x19   : > { %v367_v31 = vpack.c.bf16 %v352_v25, %v351_v24  ;;  %v323_v50 = vmul.f32 %v858_v42, %v1081_v5  ;;  %v324_v51 = vmul.f32 %v861_v43, %v1081_v5  ;;  %v865_v52 = vunpack.c.l.bf16 %v913_v39 }
  0x1a   : > { %v359_v53 = vmax.f32 %v343_v46, 0.0  ;;  %v345_v54 = vadd.f32 %v1088_v10, %v322_v47  ;;  %v325_v55 = vmul.f32 %v862_v48, %v1081_v5  ;;  %v866_v56 = vunpack.c.h.bf16 %v913_v39 }
  0x1b   : > { %953 = vmatprep.mubr.bf16.mxu0 %v367_v31  ;;  %948 = vmatpush3.bf16.msra.mxu0 %v998_v28  ;;  %v340_v57 = vadd.f32 %v1088_v10, %v317_v36  ;;  %v360_v58 = vmax.f32 %v344_v49, 0.0  ;;  %v346_v59 = vadd.f32 %v1088_v10, %v323_v50  ;;  %v347_v60 = vadd.f32 %v1088_v10, %v324_v51 }
  0x1c   : > { %982 = vmatpush3.bf16.msra.mxu1 %v998_v28  ;;  %949 = vmatprep.subr.bf16.mxu0 %v999_v44  ;;  %v318_v62 = vmul.f32 %v849_v32, %v1081_v5  ;;  %v348_v63 = vadd.f32 %v1088_v10, %v325_v55  ;;  %v353_v0 = vmax.f32 %v337_v35, 0.0  ;;  %v354_v1 = vmax.f32 %v338_v40, 0.0 }
  0x1d   : > { %975 = vmatprep.subr.bf16.mxu1 %v999_v44  ;;  %v319_v2 = vmul.f32 %v850_v33, %v1081_v5  ;;  %v371_v3 = vpack.c.bf16 %v360_v58, %v359_v53  ;;  %v361_v4 = vmax.f32 %v345_v54, 0.0  ;;  %v362_v6 = vmax.f32 %v346_v59, 0.0 }
  0x1e   : > { %v326_v7 = vmul.f32 %v865_v52, %v1081_v5  ;;  %v327_v8 = vmul.f32 %v866_v56, %v1081_v5  ;;  %v355_v9 = vmax.f32 %v339_v45, 0.0  ;;  %v356_v11 = vmax.f32 %v340_v57, 0.0 }
  0x1f   : > { %950 = vmatpush3.bf16.msra.mxu0 %v999_v44  ;;  %v363_v12 = vmax.f32 %v347_v60, 0.0  ;;  %v364_v13 = vmax.f32 %v348_v63, 0.0  ;;  %v341_v14 = vadd.f32 %v1088_v10, %v318_v62  ;;  %v342_v15 = vadd.f32 %v1088_v10, %v319_v2  ;;  %961 = vmatprep.mubr.bf16.mxu1 %v371_v3 }
  0x20   : > { %983 = vmatpush3.bf16.msra.mxu1 %v999_v44  ;;  %951 = vmatprep.subr.bf16.mxu0 %v1000_v61  ;;  %v368_v16 = vpack.c.bf16 %v354_v1, %v353_v0  ;;  %v372_v17 = vpack.c.bf16 %v362_v6, %v361_v4  ;;  %v349_v18 = vadd.f32 %v1088_v10, %v326_v7 }
  0x21   : > { %976 = vmatprep.subr.bf16.mxu1 %v1000_v61  ;;  %v350_v19 = vadd.f32 %v1088_v10, %v327_v8  ;;  %v369_v5 = vpack.c.bf16 %v356_v11, %v355_v9  ;;  %v373_v20 = vpack.c.bf16 %v364_v13, %v363_v12  ;;  %v357_v21 = vmax.f32 %v341_v14, 0.0 }
  0x22   : > { %v358_v22 = vmax.f32 %v342_v15, 0.0  ;;  %v365_v23 = vmax.f32 %v349_v18, 0.0 }
  0x23   : > { %952 = vmatpush3.bf16.msra.mxu0 %v1000_v61  ;;  %v366_v24 = vmax.f32 %v350_v19, 0.0 }
  0x24   : > { %984 = vmatpush3.bf16.msra.mxu1 %v1000_v61  ;;  %v370_v25 = vpack.c.bf16 %v358_v22, %v357_v21 }
  0x25   : > { %v374_v26 = vpack.c.bf16 %v366_v24, %v365_v23 }
  0x26   : > { %954 = vmatmul.mubr.bf16.vlgmr.msra.gmra.mrb[0].mxu0 %v368_v16 }
  0x27   : > { %962 = vmatmul.mubr.bf16.vlgmr.msra.gmra.mrb[0].mxu1 %v372_v17  ;;  %957 = vmatprep.mubr.bf16.mxu0 %v369_v5 }
  0x28   : > { %965 = vmatprep.mubr.bf16.mxu1 %v373_v20 }
  0x2e   : > { %958 = vmatmul.mubr.bf16.gmra.mrb[4].mxu0 %v370_v25 }
  0x2f   : > { %966 = vmatmul.mubr.bf16.gmra.mrb[4].mxu1 %v374_v26 }
  0xf9   : > { %v955_v27 = vpop.f32.mrb[0].mxu0 }
  0xfa   : > { %v963_v28 = vpop.f32.mrb[0].mxu1  ;;  %v473_v10 = vpop.f32.mrb[1].mxu0  ;;  %v640_v41 = vmul.f32 %v955_v27, %v955_v27 }
  0xfb   : > { %v505_v29 = vpop.f32.mrb[1].mxu1  ;;  %v956_v30 = vpop.f32.mrb[2].mxu0  ;;  %v638_v32 = vmul.f32 %v473_v10, %v473_v10  ;;  %v648_v15 = vmul.f32 %v963_v28, %v963_v28 }
  0xfc   : > { %v964_v31 = vpop.f32.mrb[2].mxu1  ;;  %v875_v33 = vpack.c.bf16 %v956_v30, %v955_v27  ;;  %v476_v34 = vpop.f32.mrb[3].mxu0  ;;  %v641_v44 = vmul.f32 %v956_v30, %v956_v30  ;;  %v646_v8 = vmul.f32 %v505_v29, %v505_v29 }
  0xfd   : > { %v895_v35 = vpack.c.bf16 %v964_v31, %v963_v28  ;;  %v508_v36 = vpop.f32.mrb[3].mxu1  ;;  %v870_v37 = vpack.c.bf16 %v476_v34, %v473_v10  ;;  %v616_v38 = vadd.f32 %v476_v34, %v473_v10  ;;  %v639_v39 = vmul.f32 %v476_v34, %v476_v34 }
  0xfe   : > { %v890_v40 = vpack.c.bf16 %v508_v36, %v505_v29  ;;  %914 = vst [vmem:[%s1144_s29 + $0x8] sm:$0xff] %v875_v33   ;;  %v647_v14 = vmul.f32 %v508_v36, %v508_v36  ;;  %v649_v18 = vmul.f32 %v964_v31, %v964_v31 }
  0xff   : > { %918 = vst [vmem:[%s1144_s29 + $0x28] sm:$0xff] %v895_v35   ;;  %871 = vst [vmem:[%s1144_s29] sm:$0xff] %v870_v37   ;;  %v617_v42 = vadd.f32 %v955_v27, %v616_v38  ;;  %v654_v43 = vadd.f32 %v639_v39, %v638_v32 }
 0x100   : > { %917 = vst [vmem:[%s1144_s29 + $0x20] sm:$0xff] %v890_v40  }
 0x101   : > { %v655_v45 = vadd.f32 %v654_v43, %v640_v41  ;;  %v959_v46 = vpop.f32.mrb[4].mxu0  ;;  %v618_v47 = vadd.f32 %v956_v30, %v617_v42 }
 0x102   : > { %v967_v48 = vpop.f32.mrb[4].mxu1  ;;  %v489_v49 = vpop.f32.mrb[5].mxu0  ;;  %v644_v1 = vmul.f32 %v959_v46, %v959_v46 }
 0x103   : > { %v521_v50 = vpop.f32.mrb[5].mxu1  ;;  %v619_v51 = vadd.f32 %v618_v47, %v489_v49  ;;  %v642_v52 = vmul.f32 %v489_v49, %v489_v49  ;;  %v656_v53 = vadd.f32 %v655_v45, %v641_v44  ;;  %v960_v54 = vpop.f32.mrb[6].mxu0  ;;  %v652_v26 = vmul.f32 %v967_v48, %v967_v48 }
 0x104   : > { %v968_v55 = vpop.f32.mrb[6].mxu1  ;;  %v885_v56 = vpack.c.bf16 %v960_v54, %v959_v46  ;;  %v492_v57 = vpop.f32.mrb[7].mxu0  ;;  %v645_v4 = vmul.f32 %v960_v54, %v960_v54  ;;  %v650_v20 = vmul.f32 %v521_v50, %v521_v50 }
 0x105   : > { %v905_v58 = vpack.c.bf16 %v968_v55, %v967_v48  ;;  %v524_v59 = vpop.f32.mrb[7].mxu1  ;;  %v657_v60 = vadd.f32 %v656_v53, %v642_v52  ;;  %v880_v61 = vpack.c.bf16 %v492_v57, %v489_v49  ;;  %v620_v62 = vadd.f32 %v619_v51, %v492_v57 }
 0x106   : > { %v643_v63 = vmul.f32 %v492_v57, %v492_v57  ;;  %916 = vst [vmem:[%s1144_s29 + $0x18] sm:$0xff] %v885_v56   ;;  %v900_v0 = vpack.c.bf16 %v524_v59, %v521_v50  ;;  %v651_v25 = vmul.f32 %v524_v59, %v524_v59 }
 0x107   : > { %920 = vst [vmem:[%s1144_s29 + $0x38] sm:$0xff] %v905_v58   ;;  %915 = vst [vmem:[%s1144_s29 + $0x10] sm:$0xff] %v880_v61   ;;  %v621_v2 = vadd.f32 %v959_v46, %v620_v62 }
 0x108   : > { %v658_v3 = vadd.f32 %v657_v60, %v643_v63  ;;  %919 = vst [vmem:[%s1144_s29 + $0x30] sm:$0xff] %v900_v0  }
 0x109   : > { %v622_v7 = vadd.f32 %v960_v54, %v621_v2 }
 0x10a   : > { %v659_v6 = vadd.f32 %v658_v3, %v644_v1 }
 0x10b   : > { %v623_v9 = vadd.f32 %v622_v7, %v505_v29  ;;  %v653_v29 = vmul.f32 %v968_v55, %v968_v55 }
 0x10c   : > { %v660_v11 = vadd.f32 %v659_v6, %v645_v4 }
 0x10d   : > { %v624_v13 = vadd.f32 %v623_v9, %v508_v36 }
 0x10e   : > { %v661_v12 = vadd.f32 %v660_v11, %v646_v8 }
 0x10f   : > { %v625_v16 = vadd.f32 %v963_v28, %v624_v13 }
 0x110   : > { %v662_v17 = vadd.f32 %v661_v12, %v647_v14 }
 0x111   : > { %v626_v5 = vadd.f32 %v964_v31, %v625_v16 }
 0x112   : > { %v663_v19 = vadd.f32 %v662_v17, %v648_v15 }
 0x113   : > { %v627_v21 = vadd.f32 %v626_v5, %v521_v50 }
 0x114   : > { %v664_v22 = vadd.f32 %v663_v19, %v649_v18 }
 0x115   : > { %v628_v24 = vadd.f32 %v627_v21, %v524_v59 }
 0x116   : > { %v665_v23 = vadd.f32 %v664_v22, %v650_v20 }
 0x117   : > { %v629_v27 = vadd.f32 %v967_v48, %v628_v24 }
 0x118   : > { %v666_v10 = vadd.f32 %v665_v23, %v651_v25 }
 0x119   : > { %v630_v30 = vadd.f32 %v968_v55, %v629_v27 }
 0x11a   : > { %v667_v32 = vadd.f32 %v666_v10, %v652_v26 }
 0x11b   : > { %v631_v33 = vrot.slane %v630_v30, 4 }
 0x11c   : > { %v668_v28 = vadd.f32 %v667_v32, %v653_v29 }
 0x11d   : > { %v632_v34 = vadd.f32 %v631_v33, %v630_v30 }
 0x11e   : > { %v669_v35 = vrot.slane %v668_v28, 4 }
 0x11f   : > { %v633_v36 = vrot.slane %v632_v34, 2 }
 0x120   : > { %v670_v31 = vadd.f32 %v669_v35, %v668_v28 }
 0x121   : > { %v634_v37 = vadd.f32 %v633_v36, %v632_v34 }
 0x122   : > { %v671_v38 = vrot.slane %v670_v31, 2 }
 0x123   : > { %v635_v39 = vrot.slane %v634_v37, 1 }
 0x124   : > { %v672_v40 = vadd.f32 %v671_v38, %v670_v31 }
 0x125   : > { %v636_v41 = vadd.f32 %v635_v39, %v634_v37 }
 0x126   : > { %v673_v42 = vrot.slane %v672_v40, 1 }
 0x127   : > { %637 = vst [vmem:[%s268_s7] sm:$0x1] %v636_v41 }
 0x128   : > { %v674_v43 = vadd.f32 %v673_v42, %v672_v40 }
 0x12a   : > { %675 = vst [vmem:[%s271_s10] sm:$0x1] %v674_v43 }
 0x12b PF: > { %s17_s21 = sadd.s32 1, %s1007_s21  }
 0x12c   : > { %p14_p5 = scmp.ge.s32.totalorder %s17_s21, 6  }
 0x12e   :  { %16 = sbr.rel (!%p14_p5) target bundleno = 1 (0x1), region = 90 }

// kernel: _lambda_.26
= control target key start
LH: loop header
LB: loop body
LE: loop exit
PB: predicated region body
PF: predicated region fallthrough
CT: control target
= control target key end

     0   :  { %s3644_s15 = smov 0   ;;  %s3646_s16 = smov 0   ;;  %s4206_s0 = inlined_call_operand.vmem [shape: bf16[2,4,17,17,128], index: 0, kind: input, shape index: {}]   ;;  %s4207_s1 = inlined_call_operand.vmem [shape: bf16[9,128,128], index: 1, kind: input, shape index: {}]   ;;  %s4208_s2 = inlined_call_operand.vmem [shape: bf16[512,128], index: 2, kind: output, shape index: {0}]   ;;  %s4209_s3 = inlined_call_operand.vmem [shape: f32[4,1,128], index: 3, kind: output, shape index: {1}]   ;;  %s4210_s4 = inlined_call_operand.vmem [shape: f32[4,1,128], index: 4, kind: output, shape index: {2}]  }
   0x1   :  { %s3648_s17 = smov 0   ;;  %s3650_s18 = smov 0  }
   0x2   :  { %s3652_s19 = smov 0  }
   0x3 LB: > { %s24_s20 = sadd.s32 1, %s3609_s17  ;;  %s27_s21 = sadd.s32 1, %s3613_s18  ;;  %s3617_s19 = sphi %s3652_s19, %s15_s19   ;;  %s3613_s18 = sphi %s3650_s18, %s4214_s18   ;;  %s3609_s17 = sphi %s3648_s17, %s4213_s17   ;;  %s3605_s16 = sphi %s3646_s16, %s4212_s16   ;;  %s3601_s15 = sphi %s3644_s15, %s4211_s15  }
   0x4   : > { %p25_p0 = scmp.ge.s32.totalorder %s24_s20, 2  ;;  %p2512_p1 = scmp.ge.s32.totalorder %s3617_s19, 1 }
   0x5   : > { %p191_p2 = scmp.lt.s32.totalorder %s3617_s19, 5 }
   0x6   : > { %s4216_s20 = smov (%p25_p0, %s24_s20), 0  ;;  %s4218_s21 = smov (!%p25_p0, %s27_s21), %s3613_s18 }
   0x7   : > { %p192_p3 = pnand %p2512_p1, %p191_p2  ;;  %p29_p4 = scmp.ge.s32.totalorder %s4218_s21, 2 }
   0x8   : > { %v3455_v0 = vld [vmem:[%s4207_s1 + $0x40] sm:$0xff] (!%p192_p3)   ;;  %p229_p5 = scmp.lt.s32.totalorder (!%p192_p3), %s3605_s16, 1  ;;  %v3457_v2 = vld [vmem:[%s4207_s1 + $0x48] sm:$0xff] (!%p192_p3)   ;;  %v3459_v4 = vld [vmem:[%s4207_s1 + $0x50] sm:$0xff] (!%p192_p3)   ;;  %s2774_s14 = smul.u32 (!%p192_p3), 96, %s3601_s15  ;;  %vm796_vm0 = vcmask (!%p192_p3), 1046528  }
   0x9   : > { %s4220_s21 = smov (%p29_p4, %s4218_s21), 0  ;;  %195 = sbr.rel (%p192_p3) target bundleno = 433 (0x1b1), region = 28 }
   0xa   : > { %v3456_v1 = vld [vmem:[%s4207_s1 + $0x100] sm:$0xff] (!%p192_p3)   ;;  %2982 = vmatprep.subr.bf16.mxu1 (!%p192_p3), %v3455_v0  ;;  %v3458_v3 = vld [vmem:[%s4207_s1 + $0x108] sm:$0xff] (!%p192_p3)   ;;  %v3460_v5 = vld [vmem:[%s4207_s1 + $0x110] sm:$0xff] (!%p192_p3)  }
   0xb   : > { %3110 = vmatprep.subr.bf16.mxu0 (!%p192_p3), %v3456_v1  ;;  %2983 = vmatpush3.bf16.msra.mxu1 (!%p192_p3), %v3455_v0  ;;  %v3461_v6 = vld [vmem:[%s4207_s1 + $0x58] sm:$0xff] (!%p192_p3)   ;;  %v3463_v8 = vld [vmem:[%s4207_s1 + $0x60] sm:$0xff] (!%p192_p3)   ;;  %v3465_v10 = vld [vmem:[%s4207_s1 + $0x68] sm:$0xff] (!%p192_p3)  }
   0xc   : > { %3111 = vmatpush3.bf16.msra.mxu0 (!%p192_p3), %v3456_v1  ;;  %2984 = vmatprep.subr.bf16.mxu1 (!%p192_p3), %v3457_v2  ;;  %v3462_v7 = vld [vmem:[%s4207_s1 + $0x118] sm:$0xff] (!%p192_p3)   ;;  %v3464_v9 = vld [vmem:[%s4207_s1 + $0x120] sm:$0xff] (!%p192_p3)   ;;  %v3466_v11 = vld [vmem:[%s4207_s1 + $0x128] sm:$0xff] (!%p192_p3)  }
   0xd   : > { %3112 = vmatprep.subr.bf16.mxu0 (!%p192_p3), %v3458_v3  ;;  %v3467_v14 = vld [vmem:[%s4207_s1 + $0x70] sm:$0xff] (!%p192_p3)   ;;  %v3469_v16 = vld [vmem:[%s4207_s1 + $0x78] sm:$0xff] (!%p192_p3)   ;;  %v3474_v19 = vld [vmem:[%s4207_s1] sm:$0xff] (!%p192_p3)  }
   0xe   : > { %v3468_v15 = vld [vmem:[%s4207_s1 + $0x130] sm:$0xff] (!%p192_p3)   ;;  %v3470_v17 = vld [vmem:[%s4207_s1 + $0x138] sm:$0xff] (!%p192_p3)   ;;  %v3476_v20 = vld [vmem:[%s4207_s1 + $0x140] sm:$0xff] (!%p192_p3)  }
   0xf   : > { %2985 = vmatpush3.bf16.msra.mxu1 (!%p192_p3), %v3457_v2  ;;  %v3477_v22 = vld [vmem:[%s4207_s1 + $0x8] sm:$0xff] (!%p192_p3)   ;;  %v3482_v27 = vld [vmem:[%s4207_s1 + $0x10] sm:$0xff] (!%p192_p3)   ;;  %v3485_v30 = vld [vmem:[%s4207_s1 + $0x18] sm:$0xff] (!%p192_p3)  }
  0x10   : > { %s230_s28 = scalar_select %p229_p5, %s3605_s16, 1  ;;  %3113 = vmatpush3.bf16.msra.mxu0 %v3458_v3  ;;  %2986 = vmatprep.subr.bf16.mxu1 %v3459_v4  ;;  %v3478_v23 = vld [vmem:[%s4207_s1 + $0x148] sm:$0xff]   ;;  %v3484_v28 = vld [vmem:[%s4207_s1 + $0x150] sm:$0xff]   ;;  %v3486_v31 = vld [vmem:[%s4207_s1 + $0x158] sm:$0xff]  }
  0x11   : > { %3114 = vmatprep.subr.bf16.mxu0 %v3460_v5  ;;  %v3490_v35 = vld [vmem:[%s4207_s1 + $0x20] sm:$0xff]   ;;  %v3493_v38 = vld [vmem:[%s4207_s1 + $0x28] sm:$0xff]   ;;  %v3498_v51 = vld [vmem:[%s4207_s1 + $0x30] sm:$0xff]  }
  0x12   : > { %s3414_s9 = smul.u32 816, %s230_s28  ;;  %v3492_v36 = vld [vmem:[%s4207_s1 + $0x160] sm:$0xff]   ;;  %v3494_v39 = vld [vmem:[%s4207_s1 + $0x168] sm:$0xff]   ;;  %v3500_v54 = vld [vmem:[%s4207_s1 + $0x170] sm:$0xff]  }
  0x13   : > { %2987 = vmatpush3.bf16.msra.mxu1 %v3459_v4  ;;  %v3501_v61 = vld [vmem:[%s4207_s1 + $0x38] sm:$0xff]  }
  0x14   : > { %s233_s24 = scalar_lea.vmem %s4206_s0, %s3414_s9  ;;  %3115 = vmatpush3.bf16.msra.mxu0 %v3460_v5  ;;  %2988 = vmatprep.subr.bf16.mxu1 %v3461_v6  ;;  %v3502_v5 = vld [vmem:[%s4207_s1 + $0x178] sm:$0xff]  }
  0x15   : > { %3116 = vmatprep.subr.bf16.mxu0 %v3462_v7  ;;  %s3714_s29 = scalar_lea.vmem %s233_s24, %s2774_s14 }
  0x16   : > { %v3471_v12 = vld [vmem:[%s3714_s29 + $0xcc] sm:$0xff]   ;;  %v3472_v13 = vld [vmem:[%s3714_s29 + $0x264] sm:$0xff]   ;;  %v3473_v18 = vld [vmem:[%s3714_s29 + $0xd8] sm:$0xff]  }
  0x17   : > { %2989 = vmatpush3.bf16.msra.mxu1 %v3461_v6  ;;  %2998 = vmatprep.mubr.bf16.mxu1 %v3471_v12  ;;  %v3475_v21 = vld [vmem:[%s3714_s29 + $0x270] sm:$0xff]   ;;  %v3751_v24 = vld [vmem:[%s3714_s29 + $0xe4] sm:$0xff]   ;;  %v3480_v25 = vld [vmem:[%s3714_s29 + $0x27c] sm:$0xff]  }
  0x18   : > { %3117 = vmatpush3.bf16.msra.mxu0 %v3462_v7  ;;  %2990 = vmatprep.subr.bf16.mxu1 %v3463_v8  ;;  %v3755_v26 = vld [vmem:[%s3714_s29 + $0xf0] sm:$0xff]   ;;  %v3483_v29 = vld [vmem:[%s3714_s29 + $0x288] sm:$0xff]   ;;  %v3772_v32 = vld [vmem:[%s3714_s29 + $0xfc] sm:$0xff]  }
  0x19   : > { %3118 = vmatprep.subr.bf16.mxu0 %v3464_v9  ;;  %3126 = vmatprep.mubr.bf16.mxu0 %v3472_v13  ;;  %v3488_v33 = vld [vmem:[%s3714_s29 + $0x294] sm:$0xff]   ;;  %v3777_v34 = vld [vmem:[%s3714_s29 + $0x108] sm:$0xff]   ;;  %v3491_v37 = vld [vmem:[%s3714_s29 + $0x2a0] sm:$0xff]  }
  0x1a   : > { %v3794_v40 = vld [vmem:[%s3714_s29 + $0x198] sm:$0xff]   ;;  %v310_v41 = vld [vmem:[%s3714_s29 + $0x1a0] sm:$0x1]  ;;  %v3496_v44 = vld [vmem:[%s3714_s29 + $0x2ac] sm:$0xff]  }
  0x1b   : > { %2991 = vmatpush3.bf16.msra.mxu1 %v3463_v8  ;;  %v3798_v42 = vld [vmem:[%s3714_s29 + $0x114] sm:$0xff]   ;;  %v393_v43 = vunpack.c.l.bf16 %v3794_v40  ;;  %v394_v45 = vunpack.c.h.bf16 %v3794_v40  ;;  %v395_v46 = vunpack.c.l.bf16 %v310_v41  ;;  %v3805_v47 = vld [vmem:[%s3714_s29 + $0x1a4] sm:$0xff]   ;;  %v313_v48 = vld [vmem:[%s3714_s29 + $0x1ac] sm:$0x1] }
  0x1c   : > { %3119 = vmatpush3.bf16.msra.mxu0 %v3464_v9  ;;  %2992 = vmatprep.subr.bf16.mxu1 %v3465_v10  ;;  %v3809_v50 = vld [vmem:[%s3714_s29 + $0x120] sm:$0xff]   ;;  %v396_v55 = vunpack.c.l.bf16 %v3805_v47  ;;  %v397_v56 = vunpack.c.h.bf16 %v3805_v47  ;;  %v398_v57 = vunpack.c.l.bf16 %v313_v48  ;;  %v3499_v60 = vld [vmem:[%s3714_s29 + $0x2b8] sm:$0xff]   ;;  %v3830_v2 = vld [vmem:[%s3714_s29 + $0x1b0] sm:$0xff]  }
  0x1d   : > { %3120 = vmatprep.subr.bf16.mxu0 %v3466_v11  ;;  %v1435_v49 = vrot.slane %v393_v43, 1  ;;  %v1436_v52 = vrot.slane %v394_v45, 1  ;;  %v1438_v53 = vrot.slane %v395_v46, 1  ;;  %v3821_v58 = vld [vmem:[%s3714_s29] sm:$0xff]   ;;  %v316_v3 = vld [vmem:[%s3714_s29 + $0x1b8] sm:$0x1]  ;;  %v399_v4 = vunpack.c.l.bf16 %v3830_v2 }
  0x1e   : > { %v1440_v63 = vrot.slane %v396_v55, 1  ;;  %v1441_v0 = vrot.slane %v397_v56, 1  ;;  %v1443_v1 = vrot.slane %v398_v57, 1  ;;  %v400_v6 = vunpack.c.h.bf16 %v3830_v2  ;;  %v3839_v8 = vld [vmem:[%s3714_s29 + $0x1bc] sm:$0xff]   ;;  %v319_v9 = vld [vmem:[%s3714_s29 + $0x1c4] sm:$0x1] }
  0x1f   : > { %2993 = vmatpush3.bf16.msra.mxu1 %v3465_v10  ;;  %v1437_v59 = vsel %vm796_vm0, %v1435_v49, %v1436_v52  ;;  %v1439_v62 = vsel %vm796_vm0, %v1436_v52, %v1438_v53  ;;  %v401_v7 = vunpack.c.l.bf16 %v316_v3  ;;  %v1445_v12 = vrot.slane %v399_v4, 1  ;;  %v3875_v41 = vld [vmem:[%s3714_s29 + $0x1d4] sm:$0xff]   ;;  %v325_v43 = vld [vmem:[%s3714_s29 + $0x1dc] sm:$0x1]  ;;  %v3880_v48 = vld [vmem:[%s3714_s29 + $0x24] sm:$0xff]  }
  0x20   : > { %3121 = vmatpush3.bf16.msra.mxu0 %v3466_v11  ;;  %2994 = vmatprep.subr.bf16.mxu1 %v3467_v14  ;;  %v1491_v10 = vpack.c.bf16 %v1439_v62, %v1437_v59  ;;  %v3844_v11 = vld [vmem:[%s3714_s29 + $0xc] sm:$0xff]   ;;  %v1442_v13 = vsel %vm796_vm0, %v1440_v63, %v1441_v0  ;;  %v409_v55 = vunpack.c.h.bf16 %v3875_v41  ;;  %v410_v56 = vunpack.c.l.bf16 %v325_v43  ;;  %v3894_v59 = vld [vmem:[%s3714_s29 + $0x1e0] sm:$0xff]  }
  0x21   : > { %3122 = vmatprep.subr.bf16.mxu0 %v3468_v15  ;;  %v3511_v53 = vld [vmem:[%s4207_s1 + $0x90] sm:$0xff]   ;;  %v411_v4 = vunpack.c.l.bf16 %v3894_v59 }
  0x22   : > { %v3512_v57 = vld [vmem:[%s4207_s1 + $0x190] sm:$0xff]  }
  0x23   : > { %2995 = vmatpush3.bf16.msra.mxu1 %v3467_v14  ;;  %v1444_v14 = vsel %vm796_vm0, %v1441_v0, %v1443_v1  ;;  %v3898_v62 = vld [vmem:[%s3714_s29 + $0x30] sm:$0xff]   ;;  %v3513_v0 = vld [vmem:[%s4207_s1 + $0x98] sm:$0xff]  }
  0x24   : > { %3123 = vmatpush3.bf16.msra.mxu0 %v3468_v15  ;;  %2996 = vmatprep.subr.bf16.mxu1 %v3469_v16  ;;  %v1446_v15 = vrot.slane %v400_v6, 1  ;;  %v3514_v1 = vld [vmem:[%s4207_s1 + $0x198] sm:$0xff]  }
  0x25   : > { %3124 = vmatprep.subr.bf16.mxu0 %v3470_v17 }
  0x27   : > { %2997 = vmatpush3.bf16.msra.mxu1 %v3469_v16  ;;  %v1448_v16 = vrot.slane %v401_v7, 1 }
  0x28   : > { %3125 = vmatpush3.bf16.msra.mxu0 %v3470_v17  ;;  %3014 = vmatprep.subr.bf16.mxu1 %v3474_v19  ;;  %v3505_v17 = vld [vmem:[%s4207_s1 + $0x80] sm:$0xff]  }
  0x29   : > { %3142 = vmatprep.subr.bf16.mxu0 %v3476_v20 }
  0x2a   : > { %2999 = vmatmul.mubr.bf16.vlgmr.msra.gmra.mrb[0].mxu1 %v3473_v18  ;;  %v402_v18 = vunpack.c.l.bf16 %v3839_v8 }
  0x2b   : > { %3127 = vmatmul.mubr.bf16.vlgmr.msra.gmra.mrb[0].mxu0 %v3475_v21  ;;  %3015 = vmatpush3.bf16.msra.mxu1 %v3474_v19  ;;  %v403_v19 = vunpack.c.h.bf16 %v3839_v8  ;;  %v3506_v21 = vld [vmem:[%s4207_s1 + $0x180] sm:$0xff]  }
  0x2c   : > { %3143 = vmatpush3.bf16.msra.mxu0 %v3476_v20  ;;  %3016 = vmatprep.subr.bf16.mxu1 %v3477_v22  ;;  %v404_v20 = vunpack.c.l.bf16 %v319_v9  ;;  %v1461_v9 = vrot.slane %v409_v55, 1 }
  0x2d   : > { %3144 = vmatprep.subr.bf16.mxu0 %v3478_v23  ;;  %3002 = vmatprep.mubr.bf16.mxu1 %v3751_v24 }
  0x2e   : > { %3130 = vmatprep.mubr.bf16.mxu0 %v3480_v25  ;;  %v1447_v25 = vsel %vm796_vm0, %v1445_v12, %v1446_v15  ;;  %v3911_v12 = vld [vmem:[%s3714_s29 + $0x1ec] sm:$0xff]  }
  0x2f   : > { %3017 = vmatpush3.bf16.msra.mxu1 %v3477_v22  ;;  %v1492_v22 = vpack.c.bf16 %v1444_v14, %v1442_v13  ;;  %v348_v13 = vunpack.c.l.bf16 %v3821_v58  ;;  %v331_v14 = vld [vmem:[%s3714_s29 + $0x1f4] sm:$0x1] }
  0x30   : > { %3145 = vmatpush3.bf16.msra.mxu0 %v3478_v23  ;;  %3018 = vmatprep.subr.bf16.mxu1 %v3482_v27  ;;  %v3858_v23 = vld [vmem:[%s3714_s29 + $0x18] sm:$0xff]  }
  0x31   : > { %3146 = vmatprep.subr.bf16.mxu0 %v3484_v28 }
  0x32   : > { %3003 = vmatmul.mubr.bf16.gmra.mrb[4].mxu1 %v3755_v26 }
  0x33   : > { %3131 = vmatmul.mubr.bf16.gmra.mrb[4].mxu0 %v3483_v29  ;;  %3019 = vmatpush3.bf16.msra.mxu1 %v3482_v27  ;;  %v1450_v27 = vrot.slane %v402_v18, 1  ;;  %v322_v29 = vld [vmem:[%s3714_s29 + $0x1d0] sm:$0x1] }
  0x34   : > { %3147 = vmatpush3.bf16.msra.mxu0 %v3484_v28  ;;  %3020 = vmatprep.subr.bf16.mxu1 %v3485_v30  ;;  %v3862_v28 = vld [vmem:[%s3714_s29 + $0x1c8] sm:$0xff]  }
  0x35   : > { %3148 = vmatprep.subr.bf16.mxu0 %v3486_v31  ;;  %3006 = vmatprep.mubr.bf16.mxu1 %v3772_v32 }
  0x36   : > { %3134 = vmatprep.mubr.bf16.mxu0 %v3488_v33  ;;  %v1453_v33 = vrot.slane %v404_v20, 1  ;;  %v414_v20 = vunpack.c.l.bf16 %v3911_v12 }
  0x37   : > { %3021 = vmatpush3.bf16.msra.mxu1 %v3485_v30  ;;  %v1449_v30 = vsel %vm796_vm0, %v1446_v15, %v1448_v16  ;;  %v3917_v16 = vld [vmem:[%s3714_s29 + $0x3c] sm:$0xff]  }
  0x38   : > { %3149 = vmatpush3.bf16.msra.mxu0 %v3486_v31  ;;  %3022 = vmatprep.subr.bf16.mxu1 %v3490_v35  ;;  %v1451_v31 = vrot.slane %v403_v19, 1 }
  0x39   : > { %3150 = vmatprep.subr.bf16.mxu0 %v3492_v36 }
  0x3a   : > { %3007 = vmatmul.mubr.bf16.gmra.mrb[8].mxu1 %v3777_v34  ;;  %v1452_v49 = vsel %vm796_vm0, %v1450_v27, %v1451_v31  ;;  %v3518_v27 = vld [vmem:[%s4207_s1 + $0x1a0] sm:$0xff]  }
  0x3b   : > { %3135 = vmatmul.mubr.bf16.gmra.mrb[8].mxu0 %v3491_v37  ;;  %3023 = vmatpush3.bf16.msra.mxu1 %v3490_v35  ;;  %v405_v35 = vunpack.c.l.bf16 %v3862_v28  ;;  %v3508_v37 = vld [vmem:[%s4207_s1 + $0x188] sm:$0xff]  }
  0x3c   : > { %3151 = vmatpush3.bf16.msra.mxu0 %v3492_v36  ;;  %3024 = vmatprep.subr.bf16.mxu1 %v3493_v38  ;;  %v3507_v36 = vld [vmem:[%s4207_s1 + $0x88] sm:$0xff]  }
  0x3d   : > { %3152 = vmatprep.subr.bf16.mxu0 %v3494_v39  ;;  %3010 = vmatprep.mubr.bf16.mxu1 %v3798_v42  ;;  %v1455_v45 = vrot.slane %v405_v35, 1  ;;  %v797_v35 = vrot.slane %v348_v13, 1 }
  0x3e   : > { %3138 = vmatprep.mubr.bf16.mxu0 %v3496_v44  ;;  %v1493_v44 = vpack.c.bf16 %v1449_v30, %v1447_v25  ;;  %v416_v30 = vunpack.c.l.bf16 %v331_v14 }
  0x3f   : > { %3025 = vmatpush3.bf16.msra.mxu1 %v3493_v38  ;;  %v406_v38 = vunpack.c.h.bf16 %v3862_v28 }
  0x40   : > { %3153 = vmatpush3.bf16.msra.mxu0 %v3494_v39  ;;  %3026 = vmatprep.subr.bf16.mxu1 %v3498_v51  ;;  %v407_v39 = vunpack.c.l.bf16 %v322_v29  ;;  %v415_v29 = vunpack.c.h.bf16 %v3911_v12 }
  0x41   : > { %3154 = vmatprep.subr.bf16.mxu0 %v3500_v54  ;;  %v1456_v46 = vrot.slane %v406_v38, 1 }
  0x42   : > { %3011 = vmatmul.mubr.bf16.gmra.mrb[12].mxu1 %v3809_v50  ;;  %v1458_v52 = vrot.slane %v407_v39, 1  ;;  %v3519_v39 = vld [vmem:[%s4207_s1 + $0xa8] sm:$0xff]  }
  0x43   : > { %3139 = vmatmul.mubr.bf16.gmra.mrb[12].mxu0 %v3499_v60  ;;  %3027 = vmatpush3.bf16.msra.mxu1 %v3498_v51  ;;  %v1454_v51 = vsel %vm796_vm0, %v1451_v31, %v1453_v33  ;;  %v328_v60 = vld [vmem:[%s3714_s29 + $0x1e8] sm:$0x1]  ;;  %v1457_v63 = vsel %vm796_vm0, %v1455_v45, %v1456_v46  ;;  %v349_v33 = vunpack.c.h.bf16 %v3821_v58  ;;  %v1471_v45 = vrot.slane %v415_v29, 1 }
  0x44   : > { %3155 = vmatpush3.bf16.msra.mxu0 %v3500_v54  ;;  %3028 = vmatprep.subr.bf16.mxu1 %v3501_v61  ;;  %v408_v54 = vunpack.c.l.bf16 %v3875_v41  ;;  %v1459_v3 = vsel %vm796_vm0, %v1456_v46, %v1458_v52  ;;  %v413_v6 = vunpack.c.l.bf16 %v328_v60  ;;  %v265_v31 = vld [vmem:[%s3714_s29 + $0x8] sm:$0x1]  ;;  %v1473_v46 = vrot.slane %v416_v30, 1 }
  0x45   : > { %3156 = vmatprep.subr.bf16.mxu0 %v3502_v5  ;;  %3030 = vmatprep.mubr.bf16.mxu1 %v3821_v58  ;;  %v1495_v15 = vpack.c.bf16 %v1459_v3, %v1457_v63  ;;  %v351_v52 = vunpack.c.l.bf16 %v3844_v11  ;;  %v3523_v63 = vld [vmem:[%s4207_s1 + $0xb0] sm:$0xff]  }
  0x46   : > { %3158 = vmatprep.mubr.bf16.mxu0 %v1491_v10  ;;  %v1460_v7 = vrot.slane %v408_v54, 1  ;;  %v1463_v10 = vrot.slane %v410_v56, 1  ;;  %v1468_v19 = vrot.slane %v413_v6, 1  ;;  %v3520_v54 = vld [vmem:[%s4207_s1 + $0x1a8] sm:$0xff]   ;;  %v3948_v56 = vld [vmem:[%s3714_s29 + $0x54] sm:$0xff]  }
  0x47   : > { %3029 = vmatpush3.bf16.msra.mxu1 %v3501_v61  ;;  %v1494_v61 = vpack.c.bf16 %v1454_v51, %v1452_v49  ;;  %v268_v49 = vld [vmem:[%s3714_s29 + $0x14] sm:$0x1]  ;;  %v798_v51 = vrot.slane %v349_v33, 1  ;;  %v802_v3 = vrot.slane %v351_v52, 1  ;;  %v3529_v52 = vld [vmem:[%s4207_s1 + $0xc8] sm:$0xff]  }
  0x48   : > { %3157 = vmatpush3.bf16.msra.mxu0 %v3502_v5  ;;  %3046 = vmatprep.subr.bf16.mxu1 %v3505_v17  ;;  %v412_v5 = vunpack.c.h.bf16 %v3894_v59  ;;  %v1464_v25 = vsel %vm796_vm0, %v1461_v9, %v1463_v10  ;;  %v353_v60 = vunpack.c.l.bf16 %v268_v49  ;;  %v3524_v6 = vld [vmem:[%s4207_s1 + $0x1b0] sm:$0xff]  }
  0x49   : > { %3174 = vmatprep.subr.bf16.mxu0 %v3506_v21 }
  0x4a   : > { %3031 = vmatmul.mubr.bf16.vlgmr.msra.gmra.mrb[0].mxu1 %v3844_v11  ;;  %v1466_v18 = vrot.slane %v412_v5, 1  ;;  %v354_v5 = vunpack.c.l.bf16 %v3858_v23 }
  0x4b   : > { %3159 = vmatmul.mubr.bf16.vlgmr.msra.gmra.mrb[0].mxu0 %v1492_v22  ;;  %3047 = vmatpush3.bf16.msra.mxu1 %v3505_v17  ;;  %v1465_v17 = vrot.slane %v411_v4, 1  ;;  %v1462_v22 = vsel %vm796_vm0, %v1460_v7, %v1461_v9  ;;  %v799_v7 = vsel %vm796_vm0, %v797_v35, %v798_v51  ;;  %v355_v9 = vunpack.c.h.bf16 %v3858_v23  ;;  %v277_v35 = vld [vmem:[%s3714_s29 + $0x38] sm:$0x1] }
  0x4c   : > { %3175 = vmatpush3.bf16.msra.mxu0 %v3506_v21  ;;  %3048 = vmatprep.subr.bf16.mxu1 %v3507_v36  ;;  %v3517_v21 = vld [vmem:[%s4207_s1 + $0xa0] sm:$0xff]   ;;  %v1496_v38 = vpack.c.bf16 %v1464_v25, %v1462_v22  ;;  %v1469_v58 = vsel %vm796_vm0, %v1466_v18, %v1468_v19  ;;  %v357_v19 = vunpack.c.l.bf16 %v3880_v48  ;;  %v807_v25 = vrot.slane %v354_v5, 1  ;;  %v283_v5 = vld [vmem:[%s3714_s29 + $0x50] sm:$0x1] }
  0x4d   : > { %3176 = vmatprep.subr.bf16.mxu0 %v3508_v37  ;;  %3034 = vmatprep.mubr.bf16.mxu1 %v3858_v23  ;;  %v1467_v43 = vsel %vm796_vm0, %v1465_v17, %v1466_v18  ;;  %v805_v17 = vrot.slane %v353_v60, 1  ;;  %v274_v18 = vld [vmem:[%s3714_s29 + $0x2c] sm:$0x1] }
  0x4e   : > { %3162 = vmatprep.mubr.bf16.mxu0 %v1493_v44  ;;  %v1470_v44 = vrot.slane %v414_v20, 1  ;;  %v1497_v55 = vpack.c.bf16 %v1469_v58, %v1467_v43  ;;  %v358_v20 = vunpack.c.h.bf16 %v3880_v48  ;;  %v359_v33 = vunpack.c.l.bf16 %v274_v18 }
  0x4f   : > { %3049 = vmatpush3.bf16.msra.mxu1 %v3507_v36  ;;  %v3933_v36 = vld [vmem:[%s3714_s29 + $0x48] sm:$0xff]   ;;  %v360_v43 = vunpack.c.l.bf16 %v3898_v62  ;;  %v361_v58 = vunpack.c.h.bf16 %v3898_v62 }
  0x50   : > { %3177 = vmatpush3.bf16.msra.mxu0 %v3508_v37  ;;  %3050 = vmatprep.subr.bf16.mxu1 %v3511_v53  ;;  %v350_v37 = vunpack.c.l.bf16 %v265_v31 }
  0x51   : > { %3178 = vmatprep.subr.bf16.mxu0 %v3512_v57 }
  0x52   : > { %3035 = vmatmul.mubr.bf16.gmra.mrb[4].mxu1 %v3880_v48 }
  0x53   : > { %3163 = vmatmul.mubr.bf16.gmra.mrb[4].mxu0 %v1494_v61  ;;  %3051 = vmatpush3.bf16.msra.mxu1 %v3511_v53  ;;  %v352_v53 = vunpack.c.h.bf16 %v3844_v11  ;;  %v271_v61 = vld [vmem:[%s3714_s29 + $0x20] sm:$0x1] }
  0x54   : > { %3179 = vmatpush3.bf16.msra.mxu0 %v3512_v57  ;;  %3052 = vmatprep.subr.bf16.mxu1 %v3513_v0  ;;  %v800_v57 = vrot.slane %v350_v37, 1  ;;  %v356_v13 = vunpack.c.l.bf16 %v271_v61  ;;  %v3527_v37 = vld [vmem:[%s4207_s1 + $0xc0] sm:$0xff]   ;;  %v818_v61 = vrot.slane %v361_v58, 1 }
  0x55   : > { %3180 = vmatprep.subr.bf16.mxu0 %v3514_v1  ;;  %3038 = vmatprep.mubr.bf16.mxu1 %v3898_v62  ;;  %v803_v4 = vrot.slane %v352_v53, 1  ;;  %v815_v53 = vrot.slane %v359_v33, 1 }
  0x56   : > { %3166 = vmatprep.mubr.bf16.mxu0 %v1495_v15  ;;  %v801_v10 = vsel %vm796_vm0, %v798_v51, %v800_v57  ;;  %v3525_v15 = vld [vmem:[%s4207_s1 + $0xb8] sm:$0xff]   ;;  %v810_v29 = vrot.slane %v356_v13, 1  ;;  %v362_v51 = vunpack.c.l.bf16 %v277_v35  ;;  %v3530_v57 = vld [vmem:[%s4207_s1 + $0x1c8] sm:$0xff]  }
  0x57   : > { %3053 = vmatpush3.bf16.msra.mxu1 %v3513_v0  ;;  %v1472_v0 = vsel %vm796_vm0, %v1470_v44, %v1471_v45  ;;  %v853_v22 = vpack.c.bf16 %v801_v10, %v799_v7  ;;  %v804_v30 = vsel %vm796_vm0, %v802_v3, %v803_v4  ;;  %v806_v31 = vsel %vm796_vm0, %v803_v4, %v805_v17  ;;  %v3528_v44 = vld [vmem:[%s4207_s1 + $0x1c0] sm:$0xff]  }
  0x58   : > { %3181 = vmatpush3.bf16.msra.mxu0 %v3514_v1  ;;  %3054 = vmatprep.subr.bf16.mxu1 %v3517_v21  ;;  %v1474_v1 = vsel %vm796_vm0, %v1471_v45, %v1473_v46  ;;  %v3986_v45 = vpack.c.bf16 %v806_v31, %v804_v30  ;;  %v367_v10 = vunpack.c.h.bf16 %v3933_v36  ;;  %v368_v17 = vunpack.c.l.bf16 %v283_v5 }
  0x59   : > { %3182 = vmatprep.subr.bf16.mxu0 %v3518_v27  ;;  %v1498_v14 = vpack.c.bf16 %v1474_v1, %v1472_v0  ;;  %v364_v0 = vunpack.c.h.bf16 %v3917_v16  ;;  %v370_v31 = vunpack.c.h.bf16 %v3948_v56 }
  0x5a   : > { %3039 = vmatmul.mubr.bf16.gmra.mrb[8].mxu1 %v3917_v16  ;;  %v830_v30 = vrot.slane %v368_v17, 1 }
  0x5b   : > { %3167 = vmatmul.mubr.bf16.gmra.mrb[8].mxu0 %v1496_v38  ;;  %3055 = vmatpush3.bf16.msra.mxu1 %v3517_v21  ;;  %v3526_v21 = vld [vmem:[%s4207_s1 + $0x1b8] sm:$0xff]   ;;  %v812_v38 = vrot.slane %v357_v19, 1  ;;  %v823_v18 = vrot.slane %v364_v0, 1 }
  0x5c   : > { %3183 = vmatpush3.bf16.msra.mxu0 %v3518_v27  ;;  %3056 = vmatprep.subr.bf16.mxu1 %v3519_v39  ;;  %v808_v27 = vrot.slane %v355_v9, 1  ;;  %v366_v9 = vunpack.c.l.bf16 %v3933_v36  ;;  %v3578_v0 = vld [vmem:[%s3714_s29 + $0xd8] sm:$0xff]  }
  0x5d   : > { %3184 = vmatprep.subr.bf16.mxu0 %v3520_v54  ;;  %3042 = vmatprep.mubr.bf16.mxu1 %v3933_v36 }
  0x5e   : > { %3170 = vmatprep.mubr.bf16.mxu0 %v1497_v55  ;;  %v809_v46 = vsel %vm796_vm0, %v807_v25, %v808_v27  ;;  %v811_v49 = vsel %vm796_vm0, %v808_v27, %v810_v29  ;;  %v817_v55 = vrot.slane %v360_v43, 1  ;;  %v827_v25 = vrot.slane %v366_v9, 1 }
  0x5f   : > { %3057 = vmatpush3.bf16.msra.mxu1 %v3519_v39  ;;  %v813_v39 = vrot.slane %v358_v20, 1  ;;  %v3998_v60 = vpack.c.bf16 %v811_v49, %v809_v46  ;;  %v3533_v20 = vld [vmem:[%s4207_s1 + $0xd8] sm:$0xff]   ;;  %v828_v27 = vrot.slane %v367_v10, 1  ;;  %v369_v29 = vunpack.c.l.bf16 %v3948_v56 }
  0x60   : > { %3185 = vmatpush3.bf16.msra.mxu0 %v3520_v54  ;;  %3058 = vmatprep.subr.bf16.mxu1 %v3523_v63  ;;  %v280_v54 = vld [vmem:[%s3714_s29 + $0x44] sm:$0x1]  ;;  %v833_v46 = vrot.slane %v370_v31, 1 }
  0x61   : > { %3186 = vmatprep.subr.bf16.mxu0 %v3524_v6  ;;  %v814_v1 = vsel %vm796_vm0, %v812_v38, %v813_v39  ;;  %v816_v3 = vsel %vm796_vm0, %v813_v39, %v815_v53  ;;  %v365_v4 = vunpack.c.l.bf16 %v280_v54  ;;  %v3535_v38 = vld [vmem:[%s4207_s1 + $0xe0] sm:$0xff]   ;;  %v829_v43 = vsel %vm796_vm0, %v827_v25, %v828_v27 }
  0x62   : > { %3043 = vmatmul.mubr.bf16.gmra.mrb[12].mxu1 %v3948_v56  ;;  %v4016_v13 = vpack.c.bf16 %v816_v3, %v814_v1  ;;  %v3536_v39 = vld [vmem:[%s4207_s1 + $0x1e0] sm:$0xff]   ;;  %v831_v58 = vsel %vm796_vm0, %v828_v27, %v830_v30  ;;  %v3547_v1 = vld [vmem:[%s4207_s1 + $0x208] sm:$0xff]  }
  0x63   : > { %3171 = vmatmul.mubr.bf16.gmra.mrb[12].mxu0 %v1498_v14  ;;  %3059 = vmatpush3.bf16.msra.mxu1 %v3523_v63  ;;  %v820_v63 = vrot.slane %v362_v51, 1  ;;  %v819_v14 = vsel %vm796_vm0, %v817_v55, %v818_v61  ;;  %v825_v19 = vrot.slane %v365_v4, 1  ;;  %v3537_v51 = vld [vmem:[%s4207_s1 + $0xe8] sm:$0xff]   ;;  %v3539_v55 = vld [vmem:[%s4207_s1 + $0xf0] sm:$0xff]  }
  0x64   : > { %3187 = vmatpush3.bf16.msra.mxu0 %v3524_v6  ;;  %3060 = vmatprep.subr.bf16.mxu1 %v3525_v15  ;;  %v3531_v6 = vld [vmem:[%s4207_s1 + $0xd0] sm:$0xff]  }
  0x65   : > { %3188 = vmatprep.subr.bf16.mxu0 %v3526_v21  ;;  %3062 = vmatprep.mubr.bf16.mxu1 %v853_v22  ;;  %v826_v35 = vsel %vm796_vm0, %v823_v18, %v825_v19 }
  0x66   : > { %3190 = vmatprep.mubr.bf16.mxu0 %v3844_v11  ;;  %v363_v11 = vunpack.c.l.bf16 %v3917_v16 }
  0x67   : > { %3061 = vmatpush3.bf16.msra.mxu1 %v3525_v15  ;;  %v821_v15 = vsel %vm796_vm0, %v818_v61, %v820_v63  ;;  %v3542_v61 = vld [vmem:[%s4207_s1 + $0xf8] sm:$0xff]  }
  0x68   : > { %3189 = vmatpush3.bf16.msra.mxu0 %v3526_v21  ;;  %3078 = vmatprep.subr.bf16.mxu1 %v3527_v37  ;;  %v822_v7 = vrot.slane %v363_v11, 1  ;;  %v286_v21 = vld [vmem:[%s3714_s29 + $0x5c] sm:$0x1]  ;;  %v4027_v22 = vpack.c.bf16 %v821_v15, %v819_v14  ;;  %v4063_v11 = vld [vmem:[%s3714_s29 + $0x60] sm:$0xff]  }
  0x69   : > { %3206 = vmatprep.subr.bf16.mxu0 %v3528_v44  ;;  %v3543_v63 = vld [vmem:[%s4207_s1 + $0x1f8] sm:$0xff]  }
  0x6a   : > { %3063 = vmatmul.mubr.bf16.vlgmr.msra.gmra.mrb[0].mxu1 %v3986_v45  ;;  %v824_v33 = vsel %vm796_vm0, %v822_v7, %v823_v18 }
  0x6b   : > { %3191 = vmatmul.mubr.bf16.vlgmr.msra.gmra.mrb[0].mxu0 %v3858_v23  ;;  %3079 = vmatpush3.bf16.msra.mxu1 %v3527_v37  ;;  %v3532_v23 = vld [vmem:[%s4207_s1 + $0x1d0] sm:$0xff]   ;;  %v371_v37 = vunpack.c.l.bf16 %v286_v21 }
  0x6c   : > { %3207 = vmatpush3.bf16.msra.mxu0 %v3528_v44  ;;  %3080 = vmatprep.subr.bf16.mxu1 %v3529_v52  ;;  %v832_v44 = vrot.slane %v369_v29, 1 }
  0x6d   : > { %3208 = vmatprep.subr.bf16.mxu0 %v3530_v57  ;;  %3066 = vmatprep.mubr.bf16.mxu1 %v3998_v60  ;;  %v835_v49 = vrot.slane %v371_v37, 1 }
  0x6e   : > { %3194 = vmatprep.mubr.bf16.mxu0 %v3880_v48  ;;  %v3534_v48 = vld [vmem:[%s4207_s1 + $0x1d8] sm:$0xff]   ;;  %v834_v53 = vsel %vm796_vm0, %v832_v44, %v833_v46 }
  0x6f   : > { %3081 = vmatpush3.bf16.msra.mxu1 %v3529_v52  ;;  %v4053_v52 = vpack.c.bf16 %v831_v58, %v829_v43  ;;  %v836_v54 = vsel %vm796_vm0, %v833_v46, %v835_v49 }
  0x70   : > { %3209 = vmatpush3.bf16.msra.mxu0 %v3530_v57  ;;  %3082 = vmatprep.subr.bf16.mxu1 %v3531_v6  ;;  %v4070_v57 = vpack.c.bf16 %v836_v54, %v834_v53 }
  0x71   : > { %3210 = vmatprep.subr.bf16.mxu0 %v3532_v23 }
  0x72   : > { %3067 = vmatmul.mubr.bf16.gmra.mrb[4].mxu1 %v4016_v13 }
  0x73   : > { %3195 = vmatmul.mubr.bf16.gmra.mrb[4].mxu0 %v3898_v62  ;;  %3083 = vmatpush3.bf16.msra.mxu1 %v3531_v6  ;;  %v4043_v62 = vpack.c.bf16 %v826_v35, %v824_v33 }
  0x74   : > { %3211 = vmatpush3.bf16.msra.mxu0 %v3532_v23  ;;  %3084 = vmatprep.subr.bf16.mxu1 %v3533_v20 }
  0x75   : > { %3212 = vmatprep.subr.bf16.mxu0 %v3534_v48  ;;  %3070 = vmatprep.mubr.bf16.mxu1 %v4027_v22 }
  0x76   : > { %3198 = vmatprep.mubr.bf16.mxu0 %v3917_v16  ;;  %v3538_v16 = vld [vmem:[%s4207_s1 + $0x1e8] sm:$0xff]  }
  0x77   : > { %3085 = vmatpush3.bf16.msra.mxu1 %v3533_v20 }
  0x78   : > { %3213 = vmatpush3.bf16.msra.mxu0 %v3534_v48  ;;  %3086 = vmatprep.subr.bf16.mxu1 %v3535_v38 }
  0x79   : > { %3214 = vmatprep.subr.bf16.mxu0 %v3536_v39 }
  0x7a   : > { %3071 = vmatmul.mubr.bf16.gmra.mrb[8].mxu1 %v4043_v62 }
  0x7b   : > { %3199 = vmatmul.mubr.bf16.gmra.mrb[8].mxu0 %v3933_v36  ;;  %3087 = vmatpush3.bf16.msra.mxu1 %v3535_v38  ;;  %v3541_v36 = vld [vmem:[%s4207_s1 + $0x1f0] sm:$0xff]  }
  0x7c   : > { %3215 = vmatpush3.bf16.msra.mxu0 %v3536_v39  ;;  %3088 = vmatprep.subr.bf16.mxu1 %v3537_v51 }
  0x7d   : > { %3216 = vmatprep.subr.bf16.mxu0 %v3538_v16  ;;  %3074 = vmatprep.mubr.bf16.mxu1 %v4053_v52 }
  0x7e   : > { %3202 = vmatprep.mubr.bf16.mxu0 %v3948_v56  ;;  %v3546_v56 = vld [vmem:[%s4207_s1 + $0x200] sm:$0xff]  }
  0x7f   : > { %3089 = vmatpush3.bf16.msra.mxu1 %v3537_v51 }
  0x80   : > { %3217 = vmatpush3.bf16.msra.mxu0 %v3538_v16  ;;  %3090 = vmatprep.subr.bf16.mxu1 %v3539_v55 }
  0x81   : > { %3218 = vmatprep.subr.bf16.mxu0 %v3541_v36 }
  0x82   : > { %3075 = vmatmul.mubr.bf16.gmra.mrb[12].mxu1 %v4070_v57 }
  0x83   : > { %3203 = vmatmul.mubr.bf16.gmra.mrb[12].mxu0 %v4063_v11  ;;  %3091 = vmatpush3.bf16.msra.mxu1 %v3539_v55 }
  0x84   : > { %3219 = vmatpush3.bf16.msra.mxu0 %v3541_v36  ;;  %3092 = vmatprep.subr.bf16.mxu1 %v3542_v61 }
  0x85   : > { %3220 = vmatprep.subr.bf16.mxu0 %v3543_v63  ;;  %3094 = vmatprep.mubr.bf16.mxu1 %v3794_v40  ;;  %v3550_v40 = vld [vmem:[%s4207_s1 + $0x210] sm:$0xff]  }
  0x86   : > { %3222 = vmatprep.mubr.bf16.mxu0 %v3578_v0 }
  0x87   : > { %3093 = vmatpush3.bf16.msra.mxu1 %v3542_v61 }
  0x88   : > { %3221 = vmatpush3.bf16.msra.mxu0 %v3543_v63  ;;  %3270 = vmatprep.subr.bf16.mxu1 %v3546_v56 }
  0x89   : > { %3238 = vmatprep.subr.bf16.mxu0 %v3546_v56 }
  0x8a   : > { %3095 = vmatmul.mubr.bf16.vlgmr.msra.gmra.mrb[0].mxu1 %v3805_v47  ;;  %v3551_v47 = vld [vmem:[%s4207_s1 + $0x218] sm:$0xff]  }
  0x8b   : > { %3223 = vmatmul.mubr.bf16.vlgmr.msra.gmra.mrb[0].mxu0 %v3751_v24  ;;  %3278 = vmatpush3.bf16.msra.mxu1 %v3546_v56  ;;  %v3554_v24 = vld [vmem:[%s4207_s1 + $0x220] sm:$0xff]  }
  0x8c   : > { %3239 = vmatpush3.bf16.msra.mxu0 %v3546_v56  ;;  %3271 = vmatprep.subr.bf16.mxu1 %v3547_v1 }
  0x8d   : > { %3240 = vmatprep.subr.bf16.mxu0 %v3547_v1  ;;  %3098 = vmatprep.mubr.bf16.mxu1 %v3830_v2  ;;  %v289_v2 = vld [vmem:[%s3714_s29 + $0x68] sm:$0x1] }
  0x8e   : > { %3226 = vmatprep.mubr.bf16.mxu0 %v3755_v26  ;;  %v3555_v26 = vld [vmem:[%s4207_s1 + $0x228] sm:$0xff]  }
  0x8f   : > { %3279 = vmatpush3.bf16.msra.mxu1 %v3547_v1 }
  0x90   : > { %3241 = vmatpush3.bf16.msra.mxu0 %v3547_v1  ;;  %3272 = vmatprep.subr.bf16.mxu1 %v3550_v40 }
  0x91   : > { %3242 = vmatprep.subr.bf16.mxu0 %v3550_v40 }
  0x92   : > { %3099 = vmatmul.mubr.bf16.gmra.mrb[4].mxu1 %v3839_v8  ;;  %v372_v8 = vunpack.c.l.bf16 %v4063_v11 }
  0x93   : > { %3227 = vmatmul.mubr.bf16.gmra.mrb[4].mxu0 %v3772_v32  ;;  %3280 = vmatpush3.bf16.msra.mxu1 %v3550_v40  ;;  %v3559_v32 = vld [vmem:[%s4207_s1 + $0x230] sm:$0xff]  }
  0x94   : > { %3243 = vmatpush3.bf16.msra.mxu0 %v3550_v40  ;;  %3273 = vmatprep.subr.bf16.mxu1 %v3551_v47 }
  0x95   : > { %3244 = vmatprep.subr.bf16.mxu0 %v3551_v47  ;;  %3102 = vmatprep.mubr.bf16.mxu1 %v3862_v28  ;;  %v373_v28 = vunpack.c.h.bf16 %v4063_v11 }
  0x96   : > { %3230 = vmatprep.mubr.bf16.mxu0 %v3777_v34  ;;  %v3558_v34 = vld [vmem:[%s3714_s29 + $0x12c] sm:$0xff]   ;;  %s2514_s29 = sshll.u32 %s3605_s16, 1 }
  0x97   : > { %3281 = vmatpush3.bf16.msra.mxu1 %v3551_v47  ;;  %s4142_s27 = sadd.s32 %s3601_s15, %s2514_s29 }
  0x98   : > { %3245 = vmatpush3.bf16.msra.mxu0 %v3551_v47  ;;  %3274 = vmatprep.subr.bf16.mxu1 %v3554_v24  ;;  %s2515_s28 = sshll.u32 %s4142_s27, 4  ;;  %p246_p7 = scmp.lt.s32.totalorder %s4142_s27, 3 }
  0x99   : > { %3246 = vmatprep.subr.bf16.mxu0 %v3554_v24  ;;  %p237_p6 = scmp.lt.s32.totalorder %s2515_s28, 63 }
  0x9a   : > { %3103 = vmatmul.mubr.bf16.gmra.mrb[8].mxu1 %v3875_v41  ;;  %v374_v41 = vunpack.c.l.bf16 %v289_v2  ;;  %s4224_s27 = smov (!%p246_p7, %s4142_s27), 3 }
  0x9b   : > { %3231 = vmatmul.mubr.bf16.gmra.mrb[8].mxu0 %v3798_v42  ;;  %3282 = vmatpush3.bf16.msra.mxu1 %v3554_v24  ;;  %v3560_v42 = vld [vmem:[%s4207_s1 + $0x238] sm:$0xff]   ;;  %s4222_s28 = smov (!%p237_p6, %s2515_s28), 63  ;;  %s248_s8 = scalar_lea.vmem %s4209_s3, %s4224_s27 }
  0x9c   : > { %3247 = vmatpush3.bf16.msra.mxu0 %v3554_v24  ;;  %3275 = vmatprep.subr.bf16.mxu1 %v3555_v26  ;;  %v2041_v3 = vrot.slane %v374_v41, 1  ;;  %s2516_s15 = sshll.u32 %s4222_s28, 2  ;;  %s255_s11 = scalar_lea.vmem %s4210_s4, %s4224_s27 }
  0x9d   : > { %3248 = vmatprep.subr.bf16.mxu0 %v3555_v26  ;;  %3106 = vmatprep.mubr.bf16.mxu1 %v3894_v59  ;;  %v2039_v59 = vrot.slane %v373_v28, 1  ;;  %s4156_s5 = scalar_lea.vmem %s4208_s2, %s2516_s15 }
  0x9e   : > { %3234 = vmatprep.mubr.bf16.mxu0 %v3809_v50  ;;  %v2038_v50 = vrot.slane %v372_v8, 1 }
  0x9f   : > { %3283 = vmatpush3.bf16.msra.mxu1 %v3555_v26  ;;  %v2042_v4 = vsel %vm796_vm0, %v2039_v59, %v2041_v3 }
  0xa0   : > { %3249 = vmatpush3.bf16.msra.mxu0 %v3555_v26  ;;  %3276 = vmatprep.subr.bf16.mxu1 %v3559_v32 }
  0xa1   : > { %3250 = vmatprep.subr.bf16.mxu0 %v3559_v32 }
  0xa2   : > { %3107 = vmatmul.mubr.bf16.gmra.mrb[12].mxu1 %v3911_v12  ;;  %v2040_v12 = vsel %vm796_vm0, %v2038_v50, %v2039_v59 }
  0xa3   : > { %3235 = vmatmul.mubr.bf16.gmra.mrb[12].mxu0 %v3558_v34  ;;  %3284 = vmatpush3.bf16.msra.mxu1 %v3559_v32 }
  0xa4   : > { %3251 = vmatpush3.bf16.msra.mxu0 %v3559_v32  ;;  %3277 = vmatprep.subr.bf16.mxu1 %v3560_v42 }
  0xa5   : > { %3252 = vmatprep.subr.bf16.mxu0 %v3560_v42  ;;  %3254 = vmatprep.mubr.bf16.mxu0 %v3986_v45  ;;  %v2045_v45 = vpack.c.bf16 %v2042_v4, %v2040_v12 }
  0xa6   : > { %3262 = vmatprep.mubr.bf16.mxu1 %v4043_v62 }
  0xa7   : > { %3285 = vmatpush3.bf16.msra.mxu1 %v3560_v42 }
  0xa8   : > { %3253 = vmatpush3.bf16.msra.mxu0 %v3560_v42 }
  0xaa   : > { %3263 = vmatmul.mubr.bf16.vlgmr.msra.gmra.mrb[16].mxu1 %v4053_v52 }
  0xab   : > { %3255 = vmatmul.mubr.bf16.vlgmr.msra.gmra.mrb[0].mxu0 %v3998_v60  ;;  %3266 = vmatprep.mubr.bf16.mxu1 %v4070_v57 }
  0xac   : > { %3258 = vmatprep.mubr.bf16.mxu0 %v4016_v13 }
  0xb2   : > { %3267 = vmatmul.mubr.bf16.gmra.mrb[20].mxu1 %v2045_v45 }
  0xb3   : > { %3259 = vmatmul.mubr.bf16.gmra.mrb[4].mxu0 %v4027_v22 }
 0x15d   : > { %v3096_v5 = vpop.f32.mrb[0].mxu1 }
 0x15e   : > { %v1146_v6 = vpop.f32.mrb[1].mxu1 }
 0x15f   : > { %v3097_v7 = vpop.f32.mrb[2].mxu1 }
 0x160   : > { %v1149_v9 = vpop.f32.mrb[3].mxu1 }
 0x165   : > { %v4132_v10 = vpop.f32.mrb[4].mxu1 }
 0x166   : > { %v4134_v60 = vpop.f32.mrb[5].mxu1 }
 0x167   : > { %v4136_v23 = vpop.f32.mrb[6].mxu1 }
 0x168   : > { %v4138_v14 = vpop.f32.mrb[7].mxu1 }
 0x16d   : > { %v3104_v15 = vpop.f32.mrb[8].mxu1 }
 0x16e   : > { %v3232_v13 = vpop.f32.mrb[8].mxu0  ;;  %v1178_v17 = vpop.f32.mrb[9].mxu1 }
 0x16f   : > { %v3294_v18 = vadd.f32 %v3232_v13, %v3104_v15  ;;  %v1988_v19 = vpop.f32.mrb[9].mxu0  ;;  %v3105_v20 = vpop.f32.mrb[10].mxu1 }
 0x170   : > { %v3296_v21 = vadd.f32 %v1988_v19, %v1178_v17  ;;  %v3233_v48 = vpop.f32.mrb[10].mxu0  ;;  %v1181_v22 = vpop.f32.mrb[11].mxu1 }
 0x171   : > { %v3298_v25 = vadd.f32 %v3233_v48, %v3105_v20  ;;  %v1991_v27 = vpop.f32.mrb[11].mxu0 }
 0x172   : > { %v3300_v29 = vadd.f32 %v1991_v27, %v1181_v22 }
 0x175   : > { %v3108_v30 = vpop.f32.mrb[12].mxu1 }
 0x176   : > { %v3236_v31 = vpop.f32.mrb[12].mxu0  ;;  %v1194_v33 = vpop.f32.mrb[13].mxu1 }
 0x177   : > { %v3302_v35 = vadd.f32 %v3236_v31, %v3108_v30  ;;  %v2004_v37 = vpop.f32.mrb[13].mxu0  ;;  %v3109_v38 = vpop.f32.mrb[14].mxu1 }
 0x178   : > { %v3304_v39 = vadd.f32 %v2004_v37, %v1194_v33  ;;  %v3237_v62 = vpop.f32.mrb[14].mxu0  ;;  %v1197_v43 = vpop.f32.mrb[15].mxu1 }
 0x179   : > { %v3306_v58 = vadd.f32 %v3237_v62, %v3109_v38  ;;  %v2007_v44 = vpop.f32.mrb[15].mxu0 }
 0x17a   : > { %v4145_v46 = vadd.f32 %v2007_v44, %v1197_v43 }
 0x17d   : > { %v3264_v49 = vpop.f32.mrb[16].mxu1 }
 0x17e   : > { %v3256_v51 = vpop.f32.mrb[0].mxu0  ;;  %v4147_v16 = vadd.f32 %v3294_v18, %v3264_v49  ;;  %v2177_v52 = vpop.f32.mrb[17].mxu1 }
 0x17f   : > { %v3286_v53 = vadd.f32 %v3256_v51, %v3096_v5  ;;  %v2145_v54 = vpop.f32.mrb[1].mxu0  ;;  %v4149_v55 = vadd.f32 %v3296_v21, %v2177_v52  ;;  %v3265_v11 = vpop.f32.mrb[18].mxu1 }
 0x180   : > { %v3287_v36 = vadd.f32 %v2145_v54, %v1146_v6  ;;  %v3257_v57 = vpop.f32.mrb[2].mxu0  ;;  %v4151_v61 = vadd.f32 %v3298_v25, %v3265_v11  ;;  %v2180_v63 = vpop.f32.mrb[19].mxu1 }
 0x181   : > { %v3288_v56 = vadd.f32 %v3257_v57, %v3097_v7  ;;  %v2148_v0 = vpop.f32.mrb[3].mxu0  ;;  %v3301_v1 = vadd.f32 %v3300_v29, %v2180_v63  ;;  %v2328_v28 = vmul.f32 %v3286_v53, %v3286_v53 }
 0x182   : > { %v2819_v40 = vpack.c.bf16 %v4151_v61, %v4147_v16  ;;  %v3289_v47 = vadd.f32 %v2148_v0, %v1149_v9  ;;  %v2326_v32 = vmul.f32 %v3287_v36, %v3287_v36 }
 0x183   : > { %v2799_v24 = vpack.c.bf16 %v3288_v56, %v3286_v53  ;;  %v2814_v26 = vpack.c.bf16 %v3301_v1, %v4149_v55  ;;  %v2329_v7 = vmul.f32 %v3288_v56, %v3288_v56  ;;  %v2335_v51 = vmul.f32 %v3301_v1, %v3301_v1 }
 0x184   : > { %2835 = vst [vmem:[%s4156_s5 + $0x28] sm:$0xff] %v2819_v40   ;;  %v2794_v34 = vpack.c.bf16 %v3289_v47, %v3287_v36  ;;  %v2304_v42 = vadd.f32 %v3289_v47, %v3287_v36  ;;  %v2327_v2 = vmul.f32 %v3289_v47, %v3289_v47  ;;  %v2337_v36 = vmul.f32 %v4151_v61, %v4151_v61 }
 0x185   : > { %2831 = vst [vmem:[%s4156_s5 + $0x8] sm:$0xff] %v2799_v24   ;;  %2834 = vst [vmem:[%s4156_s5 + $0x20] sm:$0xff] %v2814_v26   ;;  %v3268_v8 = vpop.f32.mrb[20].mxu1 }
 0x186   : > { %2795 = vst [vmem:[%s4156_s5] sm:$0xff] %v2794_v34   ;;  %v2305_v41 = vadd.f32 %v3286_v53, %v2304_v42  ;;  %v2342_v50 = vadd.f32 %v2327_v2, %v2326_v32  ;;  %v3260_v59 = vpop.f32.mrb[4].mxu0  ;;  %v3303_v3 = vadd.f32 %v3302_v35, %v3268_v8  ;;  %v2193_v12 = vpop.f32.mrb[21].mxu1 }
 0x187   : > { %v3290_v4 = vadd.f32 %v3260_v59, %v4132_v10  ;;  %v2161_v45 = vpop.f32.mrb[5].mxu0  ;;  %v3305_v5 = vadd.f32 %v3304_v39, %v2193_v12  ;;  %v3269_v6 = vpop.f32.mrb[22].mxu1 }
 0x188   : > { %v2343_v9 = vadd.f32 %v2342_v50, %v2328_v28  ;;  %v3291_v15 = vadd.f32 %v2161_v45, %v4134_v60  ;;  %v2306_v13 = vadd.f32 %v3288_v56, %v2305_v41  ;;  %v3261_v17 = vpop.f32.mrb[6].mxu0  ;;  %v2196_v18 = vpop.f32.mrb[23].mxu1  ;;  %v3307_v20 = vadd.f32 %v3306_v58, %v3269_v6 }
 0x189   : > { %v3292_v19 = vadd.f32 %v3261_v17, %v4136_v23  ;;  %v2164_v21 = vpop.f32.mrb[7].mxu0  ;;  %v3309_v35 = vadd.f32 %v4145_v46, %v2196_v18  ;;  %v2332_v23 = vmul.f32 %v3290_v4, %v3290_v4  ;;  %v2336_v46 = vmul.f32 %v4147_v16, %v4147_v16 }
 0x18a   : > { %v2307_v48 = vadd.f32 %v3291_v15, %v2306_v13  ;;  %v2330_v22 = vmul.f32 %v3291_v15, %v3291_v15  ;;  %v2344_v10 = vadd.f32 %v2343_v9, %v2329_v7  ;;  %v3293_v25 = vadd.f32 %v2164_v21, %v4138_v14 }
 0x18b   : > { %v2809_v27 = vpack.c.bf16 %v3292_v19, %v3290_v4  ;;  %v2829_v29 = vpack.c.bf16 %v3307_v20, %v3303_v3  ;;  %v2824_v39 = vpack.c.bf16 %v3309_v35, %v3305_v5  ;;  %v2333_v62 = vmul.f32 %v3292_v19, %v3292_v19 }
 0x18c   : > { %v2345_v30 = vadd.f32 %v2344_v10, %v2330_v22  ;;  %v2804_v60 = vpack.c.bf16 %v3293_v25, %v3291_v15  ;;  %v2308_v31 = vadd.f32 %v3293_v25, %v2307_v48  ;;  %v2331_v33 = vmul.f32 %v3293_v25, %v3293_v25 }
 0x18d   : > { %2833 = vst [vmem:[%s4156_s5 + $0x18] sm:$0xff] %v2809_v27   ;;  %2837 = vst [vmem:[%s4156_s5 + $0x38] sm:$0xff] %v2829_v29   ;;  %v2334_v14 = vmul.f32 %v4149_v55, %v4149_v55  ;;  %v2338_v56 = vmul.f32 %v3305_v5, %v3305_v5  ;;  %v2339_v47 = vmul.f32 %v3309_v35, %v3309_v35 }
 0x18e   : > { %2832 = vst [vmem:[%s4156_s5 + $0x10] sm:$0xff] %v2804_v60   ;;  %v2309_v37 = vadd.f32 %v3290_v4, %v2308_v31  ;;  %v2346_v38 = vadd.f32 %v2345_v30, %v2331_v33  ;;  %2836 = vst [vmem:[%s4156_s5 + $0x30] sm:$0xff] %v2824_v39   ;;  %v2340_v24 = vmul.f32 %v3303_v3, %v3303_v3 }
 0x18f   : > { %v2341_v34 = vmul.f32 %v3307_v20, %v3307_v20 }
 0x190   : > { %v2310_v43 = vadd.f32 %v3292_v19, %v2309_v37  ;;  %v2347_v58 = vadd.f32 %v2346_v38, %v2332_v23 }
 0x192   : > { %v2311_v44 = vadd.f32 %v4149_v55, %v2310_v43  ;;  %v2348_v49 = vadd.f32 %v2347_v58, %v2333_v62 }
 0x194   : > { %v2349_v52 = vadd.f32 %v2348_v49, %v2334_v14  ;;  %v2312_v53 = vadd.f32 %v3301_v1, %v2311_v44 }
 0x196   : > { %v2313_v54 = vadd.f32 %v4147_v16, %v2312_v53  ;;  %v2350_v11 = vadd.f32 %v2349_v52, %v2335_v51 }
 0x198   : > { %v2314_v57 = vadd.f32 %v4151_v61, %v2313_v54  ;;  %v2351_v63 = vadd.f32 %v2350_v11, %v2336_v46 }
 0x19a   : > { %v2315_v0 = vadd.f32 %v3305_v5, %v2314_v57  ;;  %v2352_v55 = vadd.f32 %v2351_v63, %v2337_v36 }
 0x19c   : > { %v2316_v40 = vadd.f32 %v3309_v35, %v2315_v0  ;;  %v2353_v1 = vadd.f32 %v2352_v55, %v2338_v56 }
 0x19e   : > { %v2317_v26 = vadd.f32 %v3303_v3, %v2316_v40  ;;  %v2354_v32 = vadd.f32 %v2353_v1, %v2339_v47 }
 0x1a0   : > { %v2318_v16 = vadd.f32 %v3307_v20, %v2317_v26  ;;  %v2355_v42 = vadd.f32 %v2354_v32, %v2340_v24 }
 0x1a2   : > { %v2319_v2 = vrot.slane %v2318_v16, 4  ;;  %v2356_v8 = vadd.f32 %v2355_v42, %v2341_v34 }
 0x1a4   : > { %v2320_v28 = vadd.f32 %v2319_v2, %v2318_v16  ;;  %v2357_v61 = vrot.slane %v2356_v8, 4 }
 0x1a6   : > { %v2321_v41 = vrot.slane %v2320_v28, 2  ;;  %v2358_v50 = vadd.f32 %v2357_v61, %v2356_v8 }
 0x1a8   : > { %v2322_v59 = vadd.f32 %v2321_v41, %v2320_v28  ;;  %v2359_v12 = vrot.slane %v2358_v50, 2 }
 0x1aa   : > { %v2323_v4 = vrot.slane %v2322_v59, 1  ;;  %v2360_v45 = vadd.f32 %v2359_v12, %v2358_v50 }
 0x1ac   : > { %v2324_v3 = vadd.f32 %v2323_v4, %v2322_v59  ;;  %v2361_v5 = vrot.slane %v2360_v45, 1 }
 0x1ae   : > { %2325 = vst [vmem:[%s248_s8] sm:$0x1] %v2324_v3  ;;  %v2362_v6 = vadd.f32 %v2361_v5, %v2360_v45 }
 0x1b0   : > { %2363 = vst [vmem:[%s255_s11] sm:$0x1] %v2362_v6 }
 0x1b1 PF: > { %s15_s19 = sadd.s32 1, %s3617_s19   ;;  %s4211_s15 = smov %s3609_s17 }
 0x1b2   : > { %p12_p8 = scmp.ge.s32.totalorder %s15_s19, 6   ;;  %s4212_s16 = smov %s3613_s18 }
 0x1b3   : > { %s4213_s17 = smov %s4216_s20  ;;  %s4214_s18 = smov %s4220_s21 }
 0x1b4   :  { %14 = sbr.rel (!%p12_p8) target bundleno = 3 (0x3), region = 91 }

// kernel: _lambda_.29
= control target key start
LH: loop header
LB: loop body
LE: loop exit
PB: predicated region body
PF: predicated region fallthrough
CT: control target
= control target key end

     0   :  { %s838_s21 = smov 0   ;;  %s977_s0 = inlined_call_operand.vmem [shape: bf16[512,128], index: 0, kind: input, shape index: {}]   ;;  %s978_s1 = inlined_call_operand.vmem [shape: f32[1,128], index: 1, kind: input, shape index: {}]   ;;  %s979_s2 = inlined_call_operand.vmem [shape: f32[1,128], index: 2, kind: input, shape index: {}]   ;;  %s980_s3 = inlined_call_operand.vmem [shape: bf16[512,128], index: 3, kind: input, shape index: {}]   ;;  %s981_s4 = inlined_call_operand.vmem [shape: f32[1,128], index: 4, kind: input, shape index: {}]   ;;  %s982_s5 = inlined_call_operand.vmem [shape: f32[1,128], index: 5, kind: input, shape index: {}]   ;;  %s983_s6 = inlined_call_operand.vmem [shape: bf16[512,128], index: 6, kind: output, shape index: {}]  }
   0x1 LB: > { %s613_s22 = sadd.s32 4294967295, %s801_s21   ;;  %p617_p0 = scmp.ge.s32.totalorder %s801_s21, 1  ;;  %s801_s21 = sphi %s838_s21, %s16_s21  }
   0x2   : > { %p224_p1 = scmp.lt.s32.totalorder %s801_s21, 5 }
   0x4   : > { %p225_p2 = pnand %p617_p0, %p224_p1 }
   0x5   : > { %s618_s23 = sshll.u32 (!%p225_p2), %s613_s22, 4  ;;  %v863_v0 = vld [vmem:[%s978_s1] ss:$0 sm:$0xff] (!%p225_p2) }
   0x6   : > { %228 = sbr.rel (%p225_p2) target bundleno = 59 (0x3b), region = 44  ;;  %p260_p3 = scmp.lt.s32.totalorder (!%p225_p2), %s618_s23, 63  ;;  %v868_v1 = vld [vmem:[%s981_s4] ss:$0 sm:$0xff] (!%p225_p2) }
   0x7   : > { %v877_v10 = vld [vmem:[%s979_s2] ss:$0 sm:$0xff] (!%p225_p2) }
   0x8   : > { %v882_v11 = vld [vmem:[%s982_s5] ss:$0 sm:$0xff] (!%p225_p2) }
   0xd   : > { %s985_s23 = smov (!%p260_p3, %s618_s23), 63 }
   0xe   : > { %s846_s24 = sshll.u32 %s985_s23, 2 }
   0xf   : > { %s852_s27 = scalar_lea.vmem %s977_s0, %s846_s24  ;;  %s858_s30 = scalar_lea.vmem %s980_s3, %s846_s24 }
  0x10   : > { %v663_v2 = vld [vmem:[%s852_s27] sm:$0xff]   ;;  %v766_v4 = vld [vmem:[%s852_s27 + $0x8] sm:$0xff]   ;;  %v767_v24 = vld [vmem:[%s852_s27 + $0x10] sm:$0xff]   ;;  %s909_s17 = scalar_lea.vmem %s983_s6, %s846_s24 }
  0x11   : > { %v695_v3 = vld [vmem:[%s858_s30] sm:$0xff]   ;;  %v664_v5 = vunpack.c.l.bf16 %v663_v2  ;;  %v665_v6 = vunpack.c.h.bf16 %v663_v2  ;;  %v773_v9 = vld [vmem:[%s858_s30 + $0x8] sm:$0xff]   ;;  %v668_v12 = vunpack.c.l.bf16 %v766_v4  ;;  %v669_v13 = vunpack.c.h.bf16 %v766_v4  ;;  %v774_v29 = vld [vmem:[%s858_s30 + $0x10] sm:$0xff]  }
  0x12   : > { %v696_v7 = vunpack.c.l.bf16 %v695_v3  ;;  %v697_v8 = vunpack.c.h.bf16 %v695_v3  ;;  %v700_v14 = vunpack.c.l.bf16 %v773_v9  ;;  %v701_v15 = vunpack.c.h.bf16 %v773_v9  ;;  %v768_v42 = vld [vmem:[%s852_s27 + $0x18] sm:$0xff]   ;;  %v769_v52 = vld [vmem:[%s852_s27 + $0x20] sm:$0xff]  }
  0x13   : > { %v316_v16 = vmul.f32 %v664_v5, %v863_v0  ;;  %v317_v17 = vmul.f32 %v665_v6, %v863_v0  ;;  %v318_v20 = vmul.f32 %v668_v12, %v863_v0  ;;  %v319_v21 = vmul.f32 %v669_v13, %v863_v0  ;;  %v775_v51 = vld [vmem:[%s858_s30 + $0x18] sm:$0xff]  }
  0x14   : > { %v394_v18 = vmul.f32 %v696_v7, %v868_v1  ;;  %v395_v19 = vmul.f32 %v697_v8, %v868_v1  ;;  %v396_v22 = vmul.f32 %v700_v14, %v868_v1  ;;  %v397_v23 = vmul.f32 %v701_v15, %v868_v1  ;;  %v776_v7 = vld [vmem:[%s858_s30 + $0x20] sm:$0xff]   ;;  %v770_v14 = vld [vmem:[%s852_s27 + $0x28] sm:$0xff]  }
  0x15   : > { %v339_v25 = vadd.f32 %v877_v10, %v316_v16  ;;  %v340_v26 = vadd.f32 %v877_v10, %v317_v17  ;;  %v341_v30 = vadd.f32 %v877_v10, %v318_v20  ;;  %v342_v31 = vadd.f32 %v877_v10, %v319_v21 }
  0x16   : > { %v417_v27 = vadd.f32 %v882_v11, %v394_v18  ;;  %v418_v28 = vadd.f32 %v882_v11, %v395_v19  ;;  %v419_v32 = vadd.f32 %v882_v11, %v396_v22  ;;  %v420_v33 = vadd.f32 %v882_v11, %v397_v23  ;;  %v777_v23 = vld [vmem:[%s858_s30 + $0x28] sm:$0xff]  }
  0x17   : > { %v672_v36 = vunpack.c.l.bf16 %v767_v24  ;;  %v673_v37 = vunpack.c.h.bf16 %v767_v24  ;;  %v704_v40 = vunpack.c.l.bf16 %v774_v29  ;;  %v705_v41 = vunpack.c.h.bf16 %v774_v29 }
  0x18   : > { %v433_v34 = vadd.f32 %v417_v27, %v339_v25  ;;  %v434_v35 = vadd.f32 %v418_v28, %v340_v26  ;;  %v435_v38 = vadd.f32 %v419_v32, %v341_v30  ;;  %v436_v39 = vadd.f32 %v420_v33, %v342_v31 }
  0x19   : > { %v320_v45 = vmul.f32 %v672_v36, %v863_v0  ;;  %v321_v46 = vmul.f32 %v673_v37, %v863_v0  ;;  %v398_v49 = vmul.f32 %v704_v40, %v868_v1  ;;  %v399_v50 = vmul.f32 %v705_v41, %v868_v1  ;;  %v771_v36 = vld [vmem:[%s852_s27 + $0x30] sm:$0xff]  }
  0x1a   : > { %v449_v43 = vmax.f32 %v433_v34, 0.0  ;;  %v450_v44 = vmax.f32 %v434_v35, 0.0  ;;  %v451_v47 = vmax.f32 %v435_v38, 0.0  ;;  %v452_v48 = vmax.f32 %v436_v39, 0.0 }
  0x1b   : > { %v343_v54 = vadd.f32 %v877_v10, %v320_v45  ;;  %v344_v55 = vadd.f32 %v877_v10, %v321_v46  ;;  %v676_v56 = vunpack.c.l.bf16 %v768_v42  ;;  %v421_v58 = vadd.f32 %v882_v11, %v398_v49  ;;  %v778_v45 = vld [vmem:[%s858_s30 + $0x30] sm:$0xff]  }
  0x1c   : > { %v729_v53 = vpack.c.bf16 %v450_v44, %v449_v43  ;;  %v734_v57 = vpack.c.bf16 %v452_v48, %v451_v47  ;;  %v422_v59 = vadd.f32 %v882_v11, %v399_v50  ;;  %v677_v60 = vunpack.c.h.bf16 %v768_v42 }
  0x1d   : > { %v322_v61 = vmul.f32 %v676_v56, %v863_v0  ;;  %v708_v62 = vunpack.c.l.bf16 %v775_v51  ;;  %v709_v63 = vunpack.c.h.bf16 %v775_v51  ;;  %v680_v2 = vunpack.c.l.bf16 %v769_v52 }
  0x1e   : > { %730 = vst [vmem:[%s909_s17] sm:$0xff] %v729_v53   ;;  %780 = vst [vmem:[%s909_s17 + $0x8] sm:$0xff] %v734_v57   ;;  %v437_v3 = vadd.f32 %v421_v58, %v343_v54  ;;  %v438_v4 = vadd.f32 %v422_v59, %v344_v55  ;;  %v323_v5 = vmul.f32 %v677_v60, %v863_v0  ;;  %v681_v6 = vunpack.c.h.bf16 %v769_v52  ;;  %v772_v54 = vld [vmem:[%s852_s27 + $0x38] sm:$0xff]  }
  0x1f   : > { %v345_v8 = vadd.f32 %v877_v10, %v322_v61  ;;  %v400_v9 = vmul.f32 %v708_v62, %v868_v1  ;;  %v401_v12 = vmul.f32 %v709_v63, %v868_v1  ;;  %v324_v13 = vmul.f32 %v680_v2, %v863_v0 }
  0x20   : > { %v453_v15 = vmax.f32 %v437_v3, 0.0  ;;  %v454_v16 = vmax.f32 %v438_v4, 0.0  ;;  %v346_v17 = vadd.f32 %v877_v10, %v323_v5  ;;  %v325_v18 = vmul.f32 %v681_v6, %v863_v0  ;;  %v779_v5 = vld [vmem:[%s858_s30 + $0x38] sm:$0xff]  }
  0x21   : > { %v423_v19 = vadd.f32 %v882_v11, %v400_v9  ;;  %v424_v20 = vadd.f32 %v882_v11, %v401_v12  ;;  %v347_v21 = vadd.f32 %v877_v10, %v324_v13  ;;  %v712_v22 = vunpack.c.l.bf16 %v776_v7 }
  0x22   : > { %v739_v24 = vpack.c.bf16 %v454_v16, %v453_v15  ;;  %v348_v25 = vadd.f32 %v877_v10, %v325_v18  ;;  %v713_v26 = vunpack.c.h.bf16 %v776_v7  ;;  %v684_v27 = vunpack.c.l.bf16 %v770_v14 }
  0x23   : > { %v439_v28 = vadd.f32 %v423_v19, %v345_v8  ;;  %v440_v29 = vadd.f32 %v424_v20, %v346_v17  ;;  %v402_v30 = vmul.f32 %v712_v22, %v868_v1  ;;  %v685_v31 = vunpack.c.h.bf16 %v770_v14 }
  0x24   : > { %781 = vst [vmem:[%s909_s17 + $0x10] sm:$0xff] %v739_v24   ;;  %v403_v32 = vmul.f32 %v713_v26, %v868_v1  ;;  %v326_v33 = vmul.f32 %v684_v27, %v863_v0  ;;  %v716_v34 = vunpack.c.l.bf16 %v777_v23  ;;  %v717_v35 = vunpack.c.h.bf16 %v777_v23 }
  0x25   : > { %v455_v37 = vmax.f32 %v439_v28, 0.0  ;;  %v456_v38 = vmax.f32 %v440_v29, 0.0  ;;  %v425_v39 = vadd.f32 %v882_v11, %v402_v30  ;;  %v327_v40 = vmul.f32 %v685_v31, %v863_v0 }
  0x26   : > { %v426_v41 = vadd.f32 %v882_v11, %v403_v32  ;;  %v349_v42 = vadd.f32 %v877_v10, %v326_v33  ;;  %v404_v43 = vmul.f32 %v716_v34, %v868_v1  ;;  %v405_v44 = vmul.f32 %v717_v35, %v868_v1 }
  0x27   : > { %v744_v46 = vpack.c.bf16 %v456_v38, %v455_v37  ;;  %v441_v47 = vadd.f32 %v425_v39, %v347_v21  ;;  %v350_v48 = vadd.f32 %v877_v10, %v327_v40  ;;  %v688_v49 = vunpack.c.l.bf16 %v771_v36 }
  0x28   : > { %v442_v50 = vadd.f32 %v426_v41, %v348_v25  ;;  %v427_v51 = vadd.f32 %v882_v11, %v404_v43  ;;  %v428_v52 = vadd.f32 %v882_v11, %v405_v44  ;;  %v689_v53 = vunpack.c.h.bf16 %v771_v36 }
  0x29   : > { %782 = vst [vmem:[%s909_s17 + $0x18] sm:$0xff] %v744_v46   ;;  %v457_v55 = vmax.f32 %v441_v47, 0.0  ;;  %v328_v56 = vmul.f32 %v688_v49, %v863_v0  ;;  %v720_v57 = vunpack.c.l.bf16 %v778_v45  ;;  %v721_v58 = vunpack.c.h.bf16 %v778_v45 }
  0x2a   : > { %v458_v59 = vmax.f32 %v442_v50, 0.0  ;;  %v443_v60 = vadd.f32 %v427_v51, %v349_v42  ;;  %v444_v61 = vadd.f32 %v428_v52, %v350_v48  ;;  %v329_v62 = vmul.f32 %v689_v53, %v863_v0 }
  0x2b   : > { %v351_v63 = vadd.f32 %v877_v10, %v328_v56  ;;  %v406_v2 = vmul.f32 %v720_v57, %v868_v1  ;;  %v407_v3 = vmul.f32 %v721_v58, %v868_v1  ;;  %v692_v4 = vunpack.c.l.bf16 %v772_v54 }
  0x2c   : > { %v749_v6 = vpack.c.bf16 %v458_v59, %v457_v55  ;;  %v459_v7 = vmax.f32 %v443_v60, 0.0  ;;  %v460_v8 = vmax.f32 %v444_v61, 0.0  ;;  %v352_v9 = vadd.f32 %v877_v10, %v329_v62 }
  0x2d   : > { %v429_v12 = vadd.f32 %v882_v11, %v406_v2  ;;  %v430_v13 = vadd.f32 %v882_v11, %v407_v3  ;;  %v693_v14 = vunpack.c.h.bf16 %v772_v54  ;;  %v330_v15 = vmul.f32 %v692_v4, %v863_v0 }
  0x2e   : > { %783 = vst [vmem:[%s909_s17 + $0x20] sm:$0xff] %v749_v6   ;;  %v754_v16 = vpack.c.bf16 %v460_v8, %v459_v7  ;;  %v724_v17 = vunpack.c.l.bf16 %v779_v5  ;;  %v725_v18 = vunpack.c.h.bf16 %v779_v5 }
  0x2f   : > { %v445_v19 = vadd.f32 %v429_v12, %v351_v63  ;;  %v446_v20 = vadd.f32 %v430_v13, %v352_v9  ;;  %v331_v21 = vmul.f32 %v693_v14, %v863_v0  ;;  %v353_v22 = vadd.f32 %v877_v10, %v330_v15 }
  0x30   : > { %784 = vst [vmem:[%s909_s17 + $0x28] sm:$0xff] %v754_v16   ;;  %v408_v23 = vmul.f32 %v724_v17, %v868_v1  ;;  %v409_v24 = vmul.f32 %v725_v18, %v868_v1 }
  0x31   : > { %v461_v25 = vmax.f32 %v445_v19, 0.0  ;;  %v462_v26 = vmax.f32 %v446_v20, 0.0  ;;  %v354_v27 = vadd.f32 %v877_v10, %v331_v21 }
  0x32   : > { %v431_v28 = vadd.f32 %v882_v11, %v408_v23  ;;  %v432_v29 = vadd.f32 %v882_v11, %v409_v24 }
  0x33   : > { %v759_v30 = vpack.c.bf16 %v462_v26, %v461_v25 }
  0x34   : > { %v447_v31 = vadd.f32 %v431_v28, %v353_v22  ;;  %v448_v32 = vadd.f32 %v432_v29, %v354_v27 }
  0x35   : > { %785 = vst [vmem:[%s909_s17 + $0x30] sm:$0xff] %v759_v30  }
  0x36   : > { %v463_v0 = vmax.f32 %v447_v31, 0.0  ;;  %v464_v33 = vmax.f32 %v448_v32, 0.0 }
  0x38   : > { %v764_v34 = vpack.c.bf16 %v464_v33, %v463_v0 }
  0x3a   : > { %786 = vst [vmem:[%s909_s17 + $0x38] sm:$0xff] %v764_v34  }
  0x3b PF: > { %s16_s21 = sadd.s32 1, %s801_s21  }
  0x3c   : > { %p13_p4 = scmp.ge.s32.totalorder %s16_s21, 6  }
  0x3e   :  { %15 = sbr.rel (!%p13_p4) target bundleno = 1 (0x1), region = 77 }

// kernel: _lambda_.33
= control target key start
LH: loop header
LB: loop body
LE: loop exit
PB: predicated region body
PF: predicated region fallthrough
CT: control target
= control target key end

     0   :  { %s686_s1 = inlined_call_operand.vmem [shape: bf16[128,128], index: 1, kind: input, shape index: {}]   ;;  %s687_s2 = inlined_call_operand.vmem [shape: f32[1,128], index: 2, kind: input, shape index: {}]   ;;  %s688_s3 = inlined_call_operand.vmem [shape: f32[1,128], index: 3, kind: input, shape index: {}]   ;;  %s689_s0 = inlined_call_operand.vmem [shape: bf16[128,128], index: 0, kind: input, shape index: {}]   ;;  %s690_s4 = inlined_call_operand.vmem [shape: bf16[128,128], index: 4, kind: output, shape index: {0}]   ;;  %s691_s5 = inlined_call_operand.vmem [shape: f32[1,1,128], index: 5, kind: output, shape index: {1}]   ;;  %s692_s6 = inlined_call_operand.vmem [shape: f32[1,1,128], index: 6, kind: output, shape index: {2}]  }
   0x1   :  { %v557_v0 = vld [vmem:[%s686_s1] sm:$0xff]   ;;  %v558_v1 = vld [vmem:[%s686_s1 + $0x8] sm:$0xff]   ;;  %v559_v2 = vld [vmem:[%s686_s1 + $0x10] sm:$0xff]  }
   0x2   :  { %509 = vmatprep.subr.bf16.mxu0 %v557_v0  ;;  %541 = vmatprep.subr.bf16.mxu1 %v557_v0  ;;  %v560_v3 = vld [vmem:[%s686_s1 + $0x18] sm:$0xff]   ;;  %v565_v4 = vld [vmem:[%s689_s0] sm:$0xff]   ;;  %v562_v7 = vld [vmem:[%s686_s1 + $0x28] sm:$0xff]  }
   0x3   :  { %510 = vmatpush3.bf16.msra.mxu0 %v557_v0  ;;  %549 = vmatpush3.bf16.msra.mxu1 %v557_v0  ;;  %v561_v5 = vld [vmem:[%s686_s1 + $0x20] sm:$0xff]   ;;  %v563_v8 = vld [vmem:[%s686_s1 + $0x30] sm:$0xff]   ;;  %v564_v9 = vld [vmem:[%s686_s1 + $0x38] sm:$0xff]  }
   0x4   :  { %511 = vmatprep.subr.bf16.mxu0 %v558_v1  ;;  %542 = vmatprep.subr.bf16.mxu1 %v558_v1  ;;  %v569_v6 = vld [vmem:[%s689_s0 + $0x20] sm:$0xff]   ;;  %v566_v10 = vld [vmem:[%s689_s0 + $0x8] sm:$0xff]   ;;  %v567_v12 = vld [vmem:[%s689_s0 + $0x10] sm:$0xff]  }
   0x5   :  { %525 = vmatprep.mubr.bf16.mxu0 %v565_v4  ;;  %533 = vmatprep.mubr.bf16.mxu1 %v569_v6  ;;  %v570_v11 = vld [vmem:[%s689_s0 + $0x28] sm:$0xff]   ;;  %v571_v13 = vld [vmem:[%s689_s0 + $0x30] sm:$0xff]   ;;  %v568_v14 = vld [vmem:[%s689_s0 + $0x18] sm:$0xff]  }
   0x6   :  { %v572_v15 = vld [vmem:[%s689_s0 + $0x38] sm:$0xff]  }
   0x7   :  { %512 = vmatpush3.bf16.msra.mxu0 %v558_v1  ;;  %550 = vmatpush3.bf16.msra.mxu1 %v558_v1 }
   0x8   :  { %513 = vmatprep.subr.bf16.mxu0 %v559_v2  ;;  %543 = vmatprep.subr.bf16.mxu1 %v559_v2 }
   0xb   :  { %514 = vmatpush3.bf16.msra.mxu0 %v559_v2  ;;  %551 = vmatpush3.bf16.msra.mxu1 %v559_v2 }
   0xc   :  { %515 = vmatprep.subr.bf16.mxu0 %v560_v3  ;;  %544 = vmatprep.subr.bf16.mxu1 %v560_v3 }
   0xf   :  { %516 = vmatpush3.bf16.msra.mxu0 %v560_v3  ;;  %552 = vmatpush3.bf16.msra.mxu1 %v560_v3 }
  0x10   :  { %517 = vmatprep.subr.bf16.mxu0 %v561_v5  ;;  %545 = vmatprep.subr.bf16.mxu1 %v561_v5 }
  0x13   :  { %518 = vmatpush3.bf16.msra.mxu0 %v561_v5  ;;  %553 = vmatpush3.bf16.msra.mxu1 %v561_v5 }
  0x14   :  { %519 = vmatprep.subr.bf16.mxu0 %v562_v7  ;;  %546 = vmatprep.subr.bf16.mxu1 %v562_v7 }
  0x17   :  { %520 = vmatpush3.bf16.msra.mxu0 %v562_v7  ;;  %554 = vmatpush3.bf16.msra.mxu1 %v562_v7 }
  0x18   :  { %521 = vmatprep.subr.bf16.mxu0 %v563_v8  ;;  %547 = vmatprep.subr.bf16.mxu1 %v563_v8 }
  0x1b   :  { %522 = vmatpush3.bf16.msra.mxu0 %v563_v8  ;;  %555 = vmatpush3.bf16.msra.mxu1 %v563_v8 }
  0x1c   :  { %523 = vmatprep.subr.bf16.mxu0 %v564_v9  ;;  %548 = vmatprep.subr.bf16.mxu1 %v564_v9 }
  0x1f   :  { %524 = vmatpush3.bf16.msra.mxu0 %v564_v9  ;;  %556 = vmatpush3.bf16.msra.mxu1 %v564_v9 }
  0x22   :  { %526 = vmatmul.mubr.bf16.vlgmr.msra.gmra.mrb[0].mxu0 %v566_v10  ;;  %534 = vmatmul.mubr.bf16.vlgmr.msra.gmra.mrb[0].mxu1 %v570_v11 }
  0x23   :  { %529 = vmatprep.mubr.bf16.mxu0 %v567_v12  ;;  %537 = vmatprep.mubr.bf16.mxu1 %v571_v13 }
  0x2a   :  { %530 = vmatmul.mubr.bf16.gmra.mrb[4].mxu0 %v568_v14  ;;  %538 = vmatmul.mubr.bf16.gmra.mrb[4].mxu1 %v572_v15 }
  0xf5   :  { %v527_v16 = vpop.f32.mrb[0].mxu0  ;;  %v535_v17 = vpop.f32.mrb[0].mxu1 }
  0xf6   :  { %v183_v18 = vpop.f32.mrb[1].mxu0  ;;  %v215_v19 = vpop.f32.mrb[1].mxu1  ;;  %v350_v31 = vmul.f32 %v527_v16, %v527_v16  ;;  %v358_v3 = vmul.f32 %v535_v17, %v535_v17 }
  0xf7   :  { %v528_v20 = vpop.f32.mrb[2].mxu0  ;;  %v536_v21 = vpop.f32.mrb[2].mxu1  ;;  %v348_v22 = vmul.f32 %v183_v18, %v183_v18  ;;  %v356_v61 = vmul.f32 %v215_v19, %v215_v19 }
  0xf8   :  { %v454_v23 = vpack.c.bf16 %v528_v20, %v527_v16  ;;  %v186_v24 = vpop.f32.mrb[3].mxu0  ;;  %v474_v25 = vpack.c.bf16 %v536_v21, %v535_v17  ;;  %v218_v26 = vpop.f32.mrb[3].mxu1  ;;  %v351_v34 = vmul.f32 %v528_v20, %v528_v20  ;;  %v359_v6 = vmul.f32 %v536_v21, %v536_v21 }
  0xf9   :  { %v449_v27 = vpack.c.bf16 %v186_v24, %v183_v18  ;;  %v326_v28 = vadd.f32 %v186_v24, %v183_v18  ;;  %v349_v29 = vmul.f32 %v186_v24, %v186_v24  ;;  %v469_v30 = vpack.c.bf16 %v218_v26, %v215_v19 }
  0xfa   :  { %486 = vst [vmem:[%s690_s4 + $0x8] sm:$0xff] %v454_v23   ;;  %490 = vst [vmem:[%s690_s4 + $0x28] sm:$0xff] %v474_v25   ;;  %v357_v2 = vmul.f32 %v218_v26, %v218_v26 }
  0xfb   :  { %450 = vst [vmem:[%s690_s4] sm:$0xff] %v449_v27   ;;  %v327_v32 = vadd.f32 %v527_v16, %v326_v28  ;;  %v364_v33 = vadd.f32 %v349_v29, %v348_v22  ;;  %489 = vst [vmem:[%s690_s4 + $0x20] sm:$0xff] %v469_v30  }
  0xfd   :  { %v365_v35 = vadd.f32 %v364_v33, %v350_v31  ;;  %v531_v36 = vpop.f32.mrb[4].mxu0  ;;  %v328_v37 = vadd.f32 %v528_v20, %v327_v32  ;;  %v539_v38 = vpop.f32.mrb[4].mxu1 }
  0xfe   :  { %v199_v39 = vpop.f32.mrb[5].mxu0  ;;  %v231_v40 = vpop.f32.mrb[5].mxu1  ;;  %v354_v55 = vmul.f32 %v531_v36, %v531_v36  ;;  %v362_v15 = vmul.f32 %v539_v38, %v539_v38 }
  0xff   :  { %v329_v41 = vadd.f32 %v328_v37, %v199_v39  ;;  %v352_v42 = vmul.f32 %v199_v39, %v199_v39  ;;  %v366_v43 = vadd.f32 %v365_v35, %v351_v34  ;;  %v532_v44 = vpop.f32.mrb[6].mxu0  ;;  %v540_v45 = vpop.f32.mrb[6].mxu1  ;;  %v360_v9 = vmul.f32 %v231_v40, %v231_v40 }
 0x100   :  { %v464_v46 = vpack.c.bf16 %v532_v44, %v531_v36  ;;  %v202_v47 = vpop.f32.mrb[7].mxu0  ;;  %v484_v48 = vpack.c.bf16 %v540_v45, %v539_v38  ;;  %v234_v49 = vpop.f32.mrb[7].mxu1  ;;  %v355_v58 = vmul.f32 %v532_v44, %v532_v44 }
 0x101   :  { %v367_v50 = vadd.f32 %v366_v43, %v352_v42  ;;  %v459_v51 = vpack.c.bf16 %v202_v47, %v199_v39  ;;  %v330_v52 = vadd.f32 %v329_v41, %v202_v47  ;;  %v353_v53 = vmul.f32 %v202_v47, %v202_v47 }
 0x102   :  { %488 = vst [vmem:[%s690_s4 + $0x18] sm:$0xff] %v464_v46   ;;  %492 = vst [vmem:[%s690_s4 + $0x38] sm:$0xff] %v484_v48   ;;  %v479_v54 = vpack.c.bf16 %v234_v49, %v231_v40  ;;  %v361_v14 = vmul.f32 %v234_v49, %v234_v49 }
 0x103   :  { %487 = vst [vmem:[%s690_s4 + $0x10] sm:$0xff] %v459_v51   ;;  %v331_v56 = vadd.f32 %v531_v36, %v330_v52  ;;  %v368_v57 = vadd.f32 %v367_v50, %v353_v53 }
 0x104   :  { %491 = vst [vmem:[%s690_s4 + $0x30] sm:$0xff] %v479_v54  }
 0x105   :  { %v369_v59 = vadd.f32 %v368_v57, %v354_v55  ;;  %v332_v60 = vadd.f32 %v532_v44, %v331_v56 }
 0x107   :  { %v333_v62 = vadd.f32 %v332_v60, %v215_v19  ;;  %v370_v63 = vadd.f32 %v369_v59, %v355_v58  ;;  %v363_v19 = vmul.f32 %v540_v45, %v540_v45 }
 0x109   :  { %v371_v0 = vadd.f32 %v370_v63, %v356_v61  ;;  %v334_v1 = vadd.f32 %v333_v62, %v218_v26 }
 0x10b   :  { %v335_v4 = vadd.f32 %v535_v17, %v334_v1  ;;  %v372_v5 = vadd.f32 %v371_v0, %v357_v2 }
 0x10d   :  { %v373_v7 = vadd.f32 %v372_v5, %v358_v3  ;;  %v336_v8 = vadd.f32 %v536_v21, %v335_v4 }
 0x10f   :  { %v337_v10 = vadd.f32 %v336_v8, %v231_v40  ;;  %v374_v11 = vadd.f32 %v373_v7, %v359_v6 }
 0x111   :  { %v375_v12 = vadd.f32 %v374_v11, %v360_v9  ;;  %v338_v13 = vadd.f32 %v337_v10, %v234_v49 }
 0x113   :  { %v339_v16 = vadd.f32 %v539_v38, %v338_v13  ;;  %v376_v18 = vadd.f32 %v375_v12, %v361_v14 }
 0x115   :  { %v340_v20 = vadd.f32 %v540_v45, %v339_v16  ;;  %v377_v22 = vadd.f32 %v376_v18, %v362_v15 }
 0x117   :  { %v341_v23 = vrot.slane %v340_v20, 4  ;;  %v378_v24 = vadd.f32 %v377_v22, %v363_v19 }
 0x119   :  { %v342_v25 = vadd.f32 %v341_v23, %v340_v20  ;;  %v379_v17 = vrot.slane %v378_v24, 4 }
 0x11b   :  { %v343_v26 = vrot.slane %v342_v25, 2  ;;  %v380_v27 = vadd.f32 %v379_v17, %v378_v24 }
 0x11d   :  { %v344_v28 = vadd.f32 %v343_v26, %v342_v25  ;;  %v381_v21 = vrot.slane %v380_v27, 2 }
 0x11f   :  { %v345_v29 = vrot.slane %v344_v28, 1  ;;  %v382_v30 = vadd.f32 %v381_v21, %v380_v27 }
 0x121   :  { %v346_v31 = vadd.f32 %v345_v29, %v344_v28  ;;  %v383_v32 = vrot.slane %v382_v30, 1 }
 0x123   :  { %347 = vst [vmem:[%s691_s5] sm:$0x1] %v346_v31  ;;  %v384_v33 = vadd.f32 %v383_v32, %v382_v30 }
 0x125   :  { %385 = vst [vmem:[%s692_s6] sm:$0x1] %v384_v33 }

// kernel: _lambda_.32
= control target key start
LH: loop header
LB: loop body
LE: loop exit
PB: predicated region body
PF: predicated region fallthrough
CT: control target
= control target key end

     0   :  { %s791_s1 = inlined_call_operand.vmem [shape: bf16[128,128], index: 1, kind: input, shape index: {}]   ;;  %s792_s0 = inlined_call_operand.vmem [shape: bf16[128,128], index: 0, kind: input, shape index: {}]   ;;  %s793_s2 = inlined_call_operand.vmem [shape: f32[1,128], index: 2, kind: input, shape index: {}]   ;;  %s794_s3 = inlined_call_operand.vmem [shape: f32[1,128], index: 3, kind: input, shape index: {}]   ;;  %s795_s4 = inlined_call_operand.vmem [shape: bf16[128,128], index: 4, kind: output, shape index: {0}]   ;;  %s796_s5 = inlined_call_operand.vmem [shape: f32[1,1,128], index: 5, kind: output, shape index: {1}]   ;;  %s797_s6 = inlined_call_operand.vmem [shape: f32[1,1,128], index: 6, kind: output, shape index: {2}]  }
   0x1   :  { %v628_v0 = vld [vmem:[%s791_s1] sm:$0xff]   ;;  %v629_v1 = vld [vmem:[%s791_s1 + $0x8] sm:$0xff]   ;;  %v630_v2 = vld [vmem:[%s791_s1 + $0x10] sm:$0xff]  }
   0x2   :  { %580 = vmatprep.subr.bf16.mxu0 %v628_v0  ;;  %612 = vmatprep.subr.bf16.mxu1 %v628_v0  ;;  %v631_v3 = vld [vmem:[%s791_s1 + $0x18] sm:$0xff]   ;;  %v479_v4 = vld [vmem:[%s792_s0] sm:$0xff]   ;;  %v550_v8 = vld [vmem:[%s792_s0 + $0x8] sm:$0xff]  }
   0x3   :  { %581 = vmatpush3.bf16.msra.mxu0 %v628_v0  ;;  %620 = vmatpush3.bf16.msra.mxu1 %v628_v0  ;;  %v689_v5 = vld [vmem:[%s793_s2] ss:$0 sm:$0xff]  ;;  %v480_v6 = vunpack.c.l.bf16 %v479_v4  ;;  %v481_v7 = vunpack.c.h.bf16 %v479_v4  ;;  %v551_v9 = vld [vmem:[%s792_s0 + $0x10] sm:$0xff]   ;;  %v484_v11 = vunpack.c.l.bf16 %v550_v8  ;;  %v485_v14 = vunpack.c.h.bf16 %v550_v8  ;;  %v552_v22 = vld [vmem:[%s792_s0 + $0x18] sm:$0xff]  }
   0x4   :  { %582 = vmatprep.subr.bf16.mxu0 %v629_v1  ;;  %613 = vmatprep.subr.bf16.mxu1 %v629_v1  ;;  %v700_v10 = vld [vmem:[%s794_s3] ss:$0 sm:$0xff]  ;;  %v488_v17 = vunpack.c.l.bf16 %v551_v9  ;;  %v489_v21 = vunpack.c.h.bf16 %v551_v9  ;;  %v554_v27 = vld [vmem:[%s792_s0 + $0x28] sm:$0xff]   ;;  %v555_v30 = vld [vmem:[%s792_s0 + $0x30] sm:$0xff]   ;;  %v492_v32 = vunpack.c.l.bf16 %v552_v22  ;;  %v493_v33 = vunpack.c.h.bf16 %v552_v22 }
   0x5   :  { %v60_v12 = vmul.f32 %v480_v6, %v689_v5  ;;  %v61_v13 = vmul.f32 %v481_v7, %v689_v5  ;;  %v553_v15 = vld [vmem:[%s792_s0 + $0x20] sm:$0xff]   ;;  %v62_v20 = vmul.f32 %v484_v11, %v689_v5  ;;  %v63_v26 = vmul.f32 %v485_v14, %v689_v5  ;;  %v633_v28 = vld [vmem:[%s791_s1 + $0x28] sm:$0xff]   ;;  %v556_v39 = vld [vmem:[%s792_s0 + $0x38] sm:$0xff]  }
   0x6   :  { %v632_v16 = vld [vmem:[%s791_s1 + $0x20] sm:$0xff]   ;;  %v496_v23 = vunpack.c.l.bf16 %v553_v15  ;;  %v64_v29 = vmul.f32 %v488_v17, %v689_v5  ;;  %v497_v34 = vunpack.c.h.bf16 %v553_v15  ;;  %v65_v36 = vmul.f32 %v489_v21, %v689_v5  ;;  %v634_v44 = vld [vmem:[%s791_s1 + $0x30] sm:$0xff]   ;;  %v635_v61 = vld [vmem:[%s791_s1 + $0x38] sm:$0xff]  }
   0x7   :  { %583 = vmatpush3.bf16.msra.mxu0 %v629_v1  ;;  %621 = vmatpush3.bf16.msra.mxu1 %v629_v1  ;;  %v83_v18 = vadd.f32 %v700_v10, %v60_v12  ;;  %v84_v19 = vadd.f32 %v700_v10, %v61_v13  ;;  %v85_v35 = vadd.f32 %v700_v10, %v62_v20  ;;  %v500_v38 = vunpack.c.l.bf16 %v554_v27 }
   0x8   :  { %584 = vmatprep.subr.bf16.mxu0 %v630_v2  ;;  %614 = vmatprep.subr.bf16.mxu1 %v630_v2  ;;  %v68_v37 = vmul.f32 %v496_v23, %v689_v5  ;;  %v86_v40 = vadd.f32 %v700_v10, %v63_v26  ;;  %v69_v41 = vmul.f32 %v497_v34, %v689_v5  ;;  %v501_v42 = vunpack.c.h.bf16 %v554_v27 }
   0x9   :  { %v99_v24 = vmax.f32 %v83_v18, 0.0  ;;  %v100_v25 = vmax.f32 %v84_v19, 0.0  ;;  %v504_v43 = vunpack.c.l.bf16 %v555_v30  ;;  %v87_v45 = vadd.f32 %v700_v10, %v64_v29 }
   0xa   :  { %v91_v46 = vadd.f32 %v700_v10, %v68_v37  ;;  %v70_v47 = vmul.f32 %v500_v38, %v689_v5  ;;  %v505_v48 = vunpack.c.h.bf16 %v555_v30  ;;  %v92_v49 = vadd.f32 %v700_v10, %v69_v41 }
   0xb   :  { %585 = vmatpush3.bf16.msra.mxu0 %v630_v2  ;;  %622 = vmatpush3.bf16.msra.mxu1 %v630_v2  ;;  %v115_v31 = vpack.c.bf16 %v100_v25, %v99_v24  ;;  %v71_v50 = vmul.f32 %v501_v42, %v689_v5  ;;  %v72_v51 = vmul.f32 %v504_v43, %v689_v5  ;;  %v508_v52 = vunpack.c.l.bf16 %v556_v39 }
   0xc   :  { %586 = vmatprep.subr.bf16.mxu0 %v631_v3  ;;  %615 = vmatprep.subr.bf16.mxu1 %v631_v3  ;;  %v107_v53 = vmax.f32 %v91_v46, 0.0  ;;  %v93_v54 = vadd.f32 %v700_v10, %v70_v47  ;;  %v73_v55 = vmul.f32 %v505_v48, %v689_v5  ;;  %v509_v56 = vunpack.c.h.bf16 %v556_v39 }
   0xd   :  { %596 = vmatprep.mubr.bf16.mxu0 %v115_v31  ;;  %v88_v57 = vadd.f32 %v700_v10, %v65_v36  ;;  %v108_v58 = vmax.f32 %v92_v49, 0.0  ;;  %v94_v59 = vadd.f32 %v700_v10, %v71_v50  ;;  %v95_v60 = vadd.f32 %v700_v10, %v72_v51 }
   0xe   :  { %v66_v62 = vmul.f32 %v492_v32, %v689_v5  ;;  %v96_v63 = vadd.f32 %v700_v10, %v73_v55  ;;  %v101_v0 = vmax.f32 %v85_v35, 0.0  ;;  %v102_v1 = vmax.f32 %v86_v40, 0.0 }
   0xf   :  { %587 = vmatpush3.bf16.msra.mxu0 %v631_v3  ;;  %623 = vmatpush3.bf16.msra.mxu1 %v631_v3  ;;  %v67_v2 = vmul.f32 %v493_v33, %v689_v5  ;;  %v119_v3 = vpack.c.bf16 %v108_v58, %v107_v53  ;;  %v109_v4 = vmax.f32 %v93_v54, 0.0  ;;  %v110_v6 = vmax.f32 %v94_v59, 0.0 }
  0x10   :  { %588 = vmatprep.subr.bf16.mxu0 %v632_v16  ;;  %616 = vmatprep.subr.bf16.mxu1 %v632_v16  ;;  %v74_v7 = vmul.f32 %v508_v52, %v689_v5  ;;  %v75_v8 = vmul.f32 %v509_v56, %v689_v5  ;;  %v103_v9 = vmax.f32 %v87_v45, 0.0  ;;  %v104_v11 = vmax.f32 %v88_v57, 0.0 }
  0x11   :  { %v111_v12 = vmax.f32 %v95_v60, 0.0  ;;  %v112_v13 = vmax.f32 %v96_v63, 0.0  ;;  %v89_v14 = vadd.f32 %v700_v10, %v66_v62  ;;  %v90_v15 = vadd.f32 %v700_v10, %v67_v2  ;;  %604 = vmatprep.mubr.bf16.mxu1 %v119_v3 }
  0x12   :  { %v120_v17 = vpack.c.bf16 %v110_v6, %v109_v4  ;;  %v97_v18 = vadd.f32 %v700_v10, %v74_v7  ;;  %v98_v19 = vadd.f32 %v700_v10, %v75_v8  ;;  %v117_v5 = vpack.c.bf16 %v104_v11, %v103_v9 }
  0x13   :  { %589 = vmatpush3.bf16.msra.mxu0 %v632_v16  ;;  %624 = vmatpush3.bf16.msra.mxu1 %v632_v16  ;;  %v116_v16 = vpack.c.bf16 %v102_v1, %v101_v0  ;;  %v121_v20 = vpack.c.bf16 %v112_v13, %v111_v12  ;;  %v105_v21 = vmax.f32 %v89_v14, 0.0  ;;  %v106_v22 = vmax.f32 %v90_v15, 0.0 }
  0x14   :  { %590 = vmatprep.subr.bf16.mxu0 %v633_v28  ;;  %617 = vmatprep.subr.bf16.mxu1 %v633_v28  ;;  %v113_v23 = vmax.f32 %v97_v18, 0.0  ;;  %v114_v24 = vmax.f32 %v98_v19, 0.0 }
  0x15   :  { %v118_v25 = vpack.c.bf16 %v106_v22, %v105_v21 }
  0x16   :  { %v122_v26 = vpack.c.bf16 %v114_v24, %v113_v23 }
  0x17   :  { %591 = vmatpush3.bf16.msra.mxu0 %v633_v28  ;;  %625 = vmatpush3.bf16.msra.mxu1 %v633_v28 }
  0x18   :  { %592 = vmatprep.subr.bf16.mxu0 %v634_v44  ;;  %618 = vmatprep.subr.bf16.mxu1 %v634_v44 }
  0x1b   :  { %593 = vmatpush3.bf16.msra.mxu0 %v634_v44  ;;  %626 = vmatpush3.bf16.msra.mxu1 %v634_v44 }
  0x1c   :  { %594 = vmatprep.subr.bf16.mxu0 %v635_v61  ;;  %619 = vmatprep.subr.bf16.mxu1 %v635_v61 }
  0x1f   :  { %595 = vmatpush3.bf16.msra.mxu0 %v635_v61  ;;  %627 = vmatpush3.bf16.msra.mxu1 %v635_v61 }
  0x22   :  { %597 = vmatmul.mubr.bf16.vlgmr.msra.gmra.mrb[0].mxu0 %v116_v16  ;;  %605 = vmatmul.mubr.bf16.vlgmr.msra.gmra.mrb[0].mxu1 %v120_v17 }
  0x23   :  { %600 = vmatprep.mubr.bf16.mxu0 %v117_v5  ;;  %608 = vmatprep.mubr.bf16.mxu1 %v121_v20 }
  0x2a   :  { %601 = vmatmul.mubr.bf16.gmra.mrb[4].mxu0 %v118_v25  ;;  %609 = vmatmul.mubr.bf16.gmra.mrb[4].mxu1 %v122_v26 }
  0xf5   :  { %v598_v27 = vpop.f32.mrb[0].mxu0  ;;  %v606_v28 = vpop.f32.mrb[0].mxu1 }
  0xf6   :  { %v221_v29 = vpop.f32.mrb[1].mxu0  ;;  %v253_v10 = vpop.f32.mrb[1].mxu1  ;;  %v388_v41 = vmul.f32 %v598_v27, %v598_v27  ;;  %v396_v15 = vmul.f32 %v606_v28, %v606_v28 }
  0xf7   :  { %v599_v30 = vpop.f32.mrb[2].mxu0  ;;  %v607_v31 = vpop.f32.mrb[2].mxu1  ;;  %v386_v32 = vmul.f32 %v221_v29, %v221_v29  ;;  %v394_v8 = vmul.f32 %v253_v10, %v253_v10 }
  0xf8   :  { %v518_v33 = vpack.c.bf16 %v599_v30, %v598_v27  ;;  %v224_v34 = vpop.f32.mrb[3].mxu0  ;;  %v538_v35 = vpack.c.bf16 %v607_v31, %v606_v28  ;;  %v256_v36 = vpop.f32.mrb[3].mxu1  ;;  %v389_v44 = vmul.f32 %v599_v30, %v599_v30  ;;  %v397_v18 = vmul.f32 %v607_v31, %v607_v31 }
  0xf9   :  { %v513_v37 = vpack.c.bf16 %v224_v34, %v221_v29  ;;  %v364_v38 = vadd.f32 %v224_v34, %v221_v29  ;;  %v387_v39 = vmul.f32 %v224_v34, %v224_v34  ;;  %v533_v40 = vpack.c.bf16 %v256_v36, %v253_v10 }
  0xfa   :  { %557 = vst [vmem:[%s795_s4 + $0x8] sm:$0xff] %v518_v33   ;;  %561 = vst [vmem:[%s795_s4 + $0x28] sm:$0xff] %v538_v35   ;;  %v395_v14 = vmul.f32 %v256_v36, %v256_v36 }
  0xfb   :  { %514 = vst [vmem:[%s795_s4] sm:$0xff] %v513_v37   ;;  %v365_v42 = vadd.f32 %v598_v27, %v364_v38  ;;  %v402_v43 = vadd.f32 %v387_v39, %v386_v32  ;;  %560 = vst [vmem:[%s795_s4 + $0x20] sm:$0xff] %v533_v40  }
  0xfd   :  { %v403_v45 = vadd.f32 %v402_v43, %v388_v41  ;;  %v602_v46 = vpop.f32.mrb[4].mxu0  ;;  %v366_v47 = vadd.f32 %v599_v30, %v365_v42  ;;  %v610_v48 = vpop.f32.mrb[4].mxu1 }
  0xfe   :  { %v237_v49 = vpop.f32.mrb[5].mxu0  ;;  %v269_v50 = vpop.f32.mrb[5].mxu1  ;;  %v392_v1 = vmul.f32 %v602_v46, %v602_v46  ;;  %v400_v26 = vmul.f32 %v610_v48, %v610_v48 }
  0xff   :  { %v367_v51 = vadd.f32 %v366_v47, %v237_v49  ;;  %v390_v52 = vmul.f32 %v237_v49, %v237_v49  ;;  %v404_v53 = vadd.f32 %v403_v45, %v389_v44  ;;  %v603_v54 = vpop.f32.mrb[6].mxu0  ;;  %v611_v55 = vpop.f32.mrb[6].mxu1  ;;  %v398_v20 = vmul.f32 %v269_v50, %v269_v50 }
 0x100   :  { %v528_v56 = vpack.c.bf16 %v603_v54, %v602_v46  ;;  %v240_v57 = vpop.f32.mrb[7].mxu0  ;;  %v548_v58 = vpack.c.bf16 %v611_v55, %v610_v48  ;;  %v272_v59 = vpop.f32.mrb[7].mxu1  ;;  %v393_v4 = vmul.f32 %v603_v54, %v603_v54 }
 0x101   :  { %v405_v60 = vadd.f32 %v404_v53, %v390_v52  ;;  %v523_v61 = vpack.c.bf16 %v240_v57, %v237_v49  ;;  %v368_v62 = vadd.f32 %v367_v51, %v240_v57  ;;  %v391_v63 = vmul.f32 %v240_v57, %v240_v57 }
 0x102   :  { %559 = vst [vmem:[%s795_s4 + $0x18] sm:$0xff] %v528_v56   ;;  %563 = vst [vmem:[%s795_s4 + $0x38] sm:$0xff] %v548_v58   ;;  %v543_v0 = vpack.c.bf16 %v272_v59, %v269_v50  ;;  %v399_v25 = vmul.f32 %v272_v59, %v272_v59 }
 0x103   :  { %558 = vst [vmem:[%s795_s4 + $0x10] sm:$0xff] %v523_v61   ;;  %v369_v2 = vadd.f32 %v602_v46, %v368_v62  ;;  %v406_v3 = vadd.f32 %v405_v60, %v391_v63 }
 0x104   :  { %562 = vst [vmem:[%s795_s4 + $0x30] sm:$0xff] %v543_v0  }
 0x105   :  { %v407_v6 = vadd.f32 %v406_v3, %v392_v1  ;;  %v370_v7 = vadd.f32 %v603_v54, %v369_v2 }
 0x107   :  { %v371_v9 = vadd.f32 %v370_v7, %v253_v10  ;;  %v408_v11 = vadd.f32 %v407_v6, %v393_v4  ;;  %v401_v10 = vmul.f32 %v611_v55, %v611_v55 }
 0x109   :  { %v409_v12 = vadd.f32 %v408_v11, %v394_v8  ;;  %v372_v13 = vadd.f32 %v371_v9, %v256_v36 }
 0x10b   :  { %v373_v16 = vadd.f32 %v606_v28, %v372_v13  ;;  %v410_v17 = vadd.f32 %v409_v12, %v395_v14 }
 0x10d   :  { %v411_v19 = vadd.f32 %v410_v17, %v396_v15  ;;  %v374_v5 = vadd.f32 %v607_v31, %v373_v16 }
 0x10f   :  { %v375_v21 = vadd.f32 %v374_v5, %v269_v50  ;;  %v412_v22 = vadd.f32 %v411_v19, %v397_v18 }
 0x111   :  { %v413_v23 = vadd.f32 %v412_v22, %v398_v20  ;;  %v376_v24 = vadd.f32 %v375_v21, %v272_v59 }
 0x113   :  { %v377_v27 = vadd.f32 %v610_v48, %v376_v24  ;;  %v414_v29 = vadd.f32 %v413_v23, %v399_v25 }
 0x115   :  { %v378_v30 = vadd.f32 %v611_v55, %v377_v27  ;;  %v415_v32 = vadd.f32 %v414_v29, %v400_v26 }
 0x117   :  { %v379_v33 = vrot.slane %v378_v30, 4  ;;  %v416_v34 = vadd.f32 %v415_v32, %v401_v10 }
 0x119   :  { %v380_v35 = vadd.f32 %v379_v33, %v378_v30  ;;  %v417_v28 = vrot.slane %v416_v34, 4 }
 0x11b   :  { %v381_v36 = vrot.slane %v380_v35, 2  ;;  %v418_v37 = vadd.f32 %v417_v28, %v416_v34 }
 0x11d   :  { %v382_v38 = vadd.f32 %v381_v36, %v380_v35  ;;  %v419_v31 = vrot.slane %v418_v37, 2 }
 0x11f   :  { %v383_v39 = vrot.slane %v382_v38, 1  ;;  %v420_v40 = vadd.f32 %v419_v31, %v418_v37 }
 0x121   :  { %v384_v41 = vadd.f32 %v383_v39, %v382_v38  ;;  %v421_v42 = vrot.slane %v420_v40, 1 }
 0x123   :  { %385 = vst [vmem:[%s796_s5] sm:$0x1] %v384_v41  ;;  %v422_v43 = vadd.f32 %v421_v42, %v420_v40 }
 0x125   :  { %423 = vst [vmem:[%s797_s6] sm:$0x1] %v422_v43 }

// kernel: _lambda_.31
= control target key start
LH: loop header
LB: loop body
LE: loop exit
PB: predicated region body
PF: predicated region fallthrough
CT: control target
= control target key end

     0   :  { %s2372_s15 = smov 0   ;;  %s2374_s16 = smov 0   ;;  %s2766_s0 = inlined_call_operand.vmem [shape: bf16[2,4,9,9,128], index: 0, kind: input, shape index: {}]   ;;  %s2767_s1 = inlined_call_operand.vmem [shape: bf16[9,128,128], index: 1, kind: input, shape index: {}]   ;;  %s2768_s2 = inlined_call_operand.vmem [shape: bf16[128,128], index: 2, kind: output, shape index: {0}]   ;;  %s2769_s3 = inlined_call_operand.vmem [shape: f32[4,1,128], index: 3, kind: output, shape index: {1}]   ;;  %s2770_s4 = inlined_call_operand.vmem [shape: f32[4,1,128], index: 4, kind: output, shape index: {2}]  }
   0x1   :  { %s2376_s17 = smov 0   ;;  %s2378_s18 = smov 0  }
   0x2   :  { %s2380_s19 = smov 0  }
   0x3 LB: > { %s24_s20 = sadd.s32 1, %s2337_s17  ;;  %s27_s21 = sadd.s32 1, %s2341_s18  ;;  %s2345_s19 = sphi %s2380_s19, %s15_s19   ;;  %s2341_s18 = sphi %s2378_s18, %s2774_s18   ;;  %s2337_s17 = sphi %s2376_s17, %s2773_s17   ;;  %s2333_s16 = sphi %s2374_s16, %s2772_s16   ;;  %s2329_s15 = sphi %s2372_s15, %s2771_s15  }
   0x4   : > { %p25_p0 = scmp.ge.s32.totalorder %s24_s20, 2  ;;  %p1635_p1 = scmp.ge.s32.totalorder %s2345_s19, 1 }
   0x5   : > { %p191_p2 = scmp.lt.s32.totalorder %s2345_s19, 5 }
   0x6   : > { %s2776_s20 = smov (%p25_p0, %s24_s20), 0  ;;  %s2778_s21 = smov (!%p25_p0, %s27_s21), %s2341_s18 }
   0x7   : > { %p192_p3 = pnand %p1635_p1, %p191_p2  ;;  %p29_p4 = scmp.ge.s32.totalorder %s2778_s21, 2 }
   0x8   : > { %v2223_v0 = vld [vmem:[%s2767_s1 + $0x40] sm:$0xff] (!%p192_p3)   ;;  %p229_p5 = scmp.lt.s32.totalorder (!%p192_p3), %s2333_s16, 1  ;;  %v2225_v2 = vld [vmem:[%s2767_s1 + $0x48] sm:$0xff] (!%p192_p3)   ;;  %v2227_v4 = vld [vmem:[%s2767_s1 + $0x50] sm:$0xff] (!%p192_p3)   ;;  %s1864_s24 = sshll.u32 (!%p192_p3), %s2329_s15, 5  ;;  %vm556_vm0 = vcmask (!%p192_p3), 1046528  }
   0x9   : > { %s2780_s21 = smov (%p29_p4, %s2778_s21), 0  ;;  %195 = sbr.rel (%p192_p3) target bundleno = 409 (0x199), region = 28 }
   0xa   : > { %v2224_v1 = vld [vmem:[%s2767_s1 + $0x100] sm:$0xff] (!%p192_p3)   ;;  %1970 = vmatprep.subr.bf16.mxu1 (!%p192_p3), %v2223_v0  ;;  %v2226_v3 = vld [vmem:[%s2767_s1 + $0x108] sm:$0xff] (!%p192_p3)   ;;  %v2228_v5 = vld [vmem:[%s2767_s1 + $0x110] sm:$0xff] (!%p192_p3)   ;;  %s1637_s26 = sshll.u32 (!%p192_p3), %s2333_s16, 1 }
   0xb   : > { %2050 = vmatprep.subr.bf16.mxu0 (!%p192_p3), %v2224_v1  ;;  %1971 = vmatpush3.bf16.msra.mxu1 (!%p192_p3), %v2223_v0  ;;  %v2229_v6 = vld [vmem:[%s2767_s1 + $0x58] sm:$0xff] (!%p192_p3)   ;;  %v2231_v8 = vld [vmem:[%s2767_s1 + $0x60] sm:$0xff] (!%p192_p3)   ;;  %v2233_v10 = vld [vmem:[%s2767_s1 + $0x68] sm:$0xff] (!%p192_p3)   ;;  %s2737_s27 = sadd.s32 (!%p192_p3), %s2329_s15, %s1637_s26 }
   0xc   : > { %2051 = vmatpush3.bf16.msra.mxu0 (!%p192_p3), %v2224_v1  ;;  %1972 = vmatprep.subr.bf16.mxu1 (!%p192_p3), %v2225_v2  ;;  %v2230_v7 = vld [vmem:[%s2767_s1 + $0x118] sm:$0xff] (!%p192_p3)   ;;  %v2232_v9 = vld [vmem:[%s2767_s1 + $0x120] sm:$0xff] (!%p192_p3)   ;;  %v2234_v14 = vld [vmem:[%s2767_s1 + $0x128] sm:$0xff] (!%p192_p3)   ;;  %p246_p7 = scmp.lt.s32.totalorder (!%p192_p3), %s2737_s27, 3 }
   0xd   : > { %2052 = vmatprep.subr.bf16.mxu0 (!%p192_p3), %v2226_v3  ;;  %v2235_v18 = vld [vmem:[%s2767_s1 + $0x70] sm:$0xff] (!%p192_p3)   ;;  %v2237_v20 = vld [vmem:[%s2767_s1 + $0x78] sm:$0xff] (!%p192_p3)   ;;  %v2241_v23 = vld [vmem:[%s2767_s1] sm:$0xff] (!%p192_p3)  }
   0xe   : > { %v2236_v19 = vld [vmem:[%s2767_s1 + $0x130] sm:$0xff] (!%p192_p3)   ;;  %v2238_v21 = vld [vmem:[%s2767_s1 + $0x138] sm:$0xff] (!%p192_p3)   ;;  %v2243_v24 = vld [vmem:[%s2767_s1 + $0x140] sm:$0xff] (!%p192_p3)  }
   0xf   : > { %1973 = vmatpush3.bf16.msra.mxu1 (!%p192_p3), %v2225_v2  ;;  %v2247_v27 = vld [vmem:[%s2767_s1 + $0x8] sm:$0xff] (!%p192_p3)   ;;  %v2249_v29 = vld [vmem:[%s2767_s1 + $0x10] sm:$0xff] (!%p192_p3)   ;;  %v2251_v42 = vld [vmem:[%s2767_s1 + $0x18] sm:$0xff] (!%p192_p3)  }
  0x10   : > { %s230_s28 = scalar_select %p229_p5, %s2333_s16, 1  ;;  %2053 = vmatpush3.bf16.msra.mxu0 %v2226_v3  ;;  %1974 = vmatprep.subr.bf16.mxu1 %v2227_v4  ;;  %v2248_v28 = vld [vmem:[%s2767_s1 + $0x148] sm:$0xff]   ;;  %v2250_v32 = vld [vmem:[%s2767_s1 + $0x150] sm:$0xff]   ;;  %v2252_v45 = vld [vmem:[%s2767_s1 + $0x158] sm:$0xff]  }
  0x11   : > { %2054 = vmatprep.subr.bf16.mxu0 %v2228_v5  ;;  %v2253_v49 = vld [vmem:[%s2767_s1 + $0x20] sm:$0xff]   ;;  %v2255_v56 = vld [vmem:[%s2767_s1 + $0x28] sm:$0xff]   ;;  %v2257_v62 = vld [vmem:[%s2767_s1 + $0x30] sm:$0xff]  }
  0x12   : > { %s2182_s9 = smul.u32 288, %s230_s28  ;;  %v2254_v54 = vld [vmem:[%s2767_s1 + $0x160] sm:$0xff]   ;;  %v2256_v57 = vld [vmem:[%s2767_s1 + $0x168] sm:$0xff]   ;;  %v2258_v1 = vld [vmem:[%s2767_s1 + $0x170] sm:$0xff]   ;;  %s1638_s28 = sshll.u32 %s2737_s27, 2 }
  0x13   : > { %1975 = vmatpush3.bf16.msra.mxu1 %v2227_v4  ;;  %v2259_v2 = vld [vmem:[%s2767_s1 + $0x38] sm:$0xff]   ;;  %p237_p6 = scmp.lt.s32.totalorder %s1638_s28, 15  ;;  %s2784_s27 = smov (!%p246_p7, %s2737_s27), 3 }
  0x14   : > { %s233_s23 = scalar_lea.vmem %s2766_s0, %s2182_s9  ;;  %2055 = vmatpush3.bf16.msra.mxu0 %v2228_v5  ;;  %1976 = vmatprep.subr.bf16.mxu1 %v2229_v6  ;;  %v2260_v5 = vld [vmem:[%s2767_s1 + $0x178] sm:$0xff]   ;;  %s255_s10 = scalar_lea.vmem %s2770_s4, %s2784_s27 }
  0x15   : > { %2056 = vmatprep.subr.bf16.mxu0 %v2230_v7  ;;  %s2442_s29 = scalar_lea.vmem %s233_s23, %s1864_s24  ;;  %s2782_s28 = smov (!%p237_p6, %s1638_s28), 15 }
  0x16   : > { %v273_v11 = vld [vmem:[%s2442_s29 + $0x48] sm:$0xf]  ;;  %v2449_v12 = vld [vmem:[%s2442_s29 + $0x50] sm:$0xf]  ;;  %v2452_v13 = vld [vmem:[%s2442_s29 + $0x58] sm:$0xf] }
  0x17   : > { %1977 = vmatpush3.bf16.msra.mxu1 %v2229_v6  ;;  %v1647_v15 = vcombine.low %v273_v11, %v2449_v12  ;;  %v1807_v16 = vcombine.low %v2449_v12, %v2452_v13  ;;  %v2242_v17 = vld [vmem:[%s2442_s29 + $0xd8] ss:$8 sps:$4 sm:$0xff]   ;;  %v2246_v26 = vld [vmem:[%s2442_s29 + $0xe8] ss:$8 sps:$4 sm:$0xff]   ;;  %v279_v35 = vld [vmem:[%s2442_s29 + $0x94] sm:$0x1] }
  0x18   : > { %2057 = vmatpush3.bf16.msra.mxu0 %v2230_v7  ;;  %1978 = vmatprep.subr.bf16.mxu1 %v2231_v8  ;;  %v2474_v22 = vld [vmem:[%s2442_s29 + $0x60] sm:$0xf]  ;;  %v2498_v31 = vld [vmem:[%s2442_s29 + $0x8] sm:$0xf]  ;;  %v2506_v34 = vld [vmem:[%s2442_s29 + $0x90] sm:$0xf]  ;;  %v306_v39 = vunpack.c.l.bf16 %v279_v35 }
  0x19   : > { %2058 = vmatprep.subr.bf16.mxu0 %v2232_v9  ;;  %1986 = vmatprep.mubr.bf16.mxu1 %v1647_v15  ;;  %v1648_v25 = vcombine.low %v2452_v13, %v2474_v22  ;;  %v2495_v30 = vld [vmem:[%s2442_s29] sm:$0xf]  ;;  %v2510_v36 = vld [vmem:[%s2442_s29 + $0x98] sm:$0xf]  ;;  %v281_v37 = vld [vmem:[%s2442_s29 + $0x9c] sm:$0x1]  ;;  %v305_v38 = vunpack.c.l.bf16 %v2506_v34  ;;  %v292_v4 = vunpack.c.l.bf16 %v2498_v31 }
  0x1a   : > { %2066 = vmatprep.mubr.bf16.mxu0 %v2242_v17  ;;  %v1645_v33 = vcombine.low %v2495_v30, %v2498_v31  ;;  %v307_v40 = vunpack.c.l.bf16 %v2510_v36  ;;  %v308_v41 = vunpack.c.l.bf16 %v281_v37  ;;  %v942_v44 = vrot.slane %v306_v39, 1  ;;  %v2527_v52 = vld [vmem:[%s2442_s29 + $0xa0] sm:$0xf]  ;;  %v2530_v53 = vld [vmem:[%s2442_s29 + $0xa8] sm:$0xf]  ;;  %v2267_v39 = vld [vmem:[%s2767_s1 + $0x90] sm:$0xff]  }
  0x1b   : > { %1979 = vmatpush3.bf16.msra.mxu1 %v2231_v8  ;;  %v941_v43 = vrot.slane %v305_v38, 1  ;;  %v1706_v55 = vcombine.low %v2527_v52, %v2530_v53  ;;  %v283_v58 = vld [vmem:[%s2442_s29 + $0xa4] sm:$0x1]  ;;  %v285_v59 = vld [vmem:[%s2442_s29 + $0xac] sm:$0x1]  ;;  %v309_v60 = vunpack.c.l.bf16 %v2527_v52  ;;  %v311_v63 = vunpack.c.l.bf16 %v2530_v53  ;;  %s1639_s30 = sshll.u32 %s2782_s28, 2 }
  0x1c   : > { %2059 = vmatpush3.bf16.msra.mxu0 %v2232_v9  ;;  %1980 = vmatprep.subr.bf16.mxu1 %v2233_v10  ;;  %v944_v46 = vrot.slane %v307_v40, 1  ;;  %v945_v47 = vrot.slane %v308_v41, 1  ;;  %v310_v61 = vunpack.c.l.bf16 %v283_v58  ;;  %v312_v0 = vunpack.c.l.bf16 %v285_v59  ;;  %v266_v11 = vld [vmem:[%s2442_s29 + $0xc] sm:$0x1]  ;;  %v2268_v40 = vld [vmem:[%s2767_s1 + $0x190] sm:$0xff]   ;;  %v2270_v41 = vld [vmem:[%s2767_s1 + $0x198] sm:$0xff]   ;;  %s240_s7 = scalar_lea.vmem %s2768_s2, %s1639_s30 }
  0x1d   : > { %2060 = vmatprep.subr.bf16.mxu0 %v2234_v14  ;;  %v943_v48 = vsel %vm556_vm0, %v941_v43, %v942_v44  ;;  %v290_v3 = vunpack.c.l.bf16 %v2495_v30  ;;  %v947_v6 = vrot.slane %v309_v60, 1  ;;  %v950_v8 = vrot.slane %v311_v63, 1  ;;  %v2266_v35 = vld [vmem:[%s2767_s1 + $0x188] sm:$0xff]   ;;  %v270_v43 = vld [vmem:[%s2442_s29 + $0x1c] sm:$0x1]  ;;  %v2272_v44 = vld [vmem:[%s2767_s1 + $0x1a0] sm:$0xff]  }
  0x1e   : > { %v946_v50 = vsel %vm556_vm0, %v944_v46, %v945_v47  ;;  %v948_v7 = vrot.slane %v310_v61, 1  ;;  %v951_v9 = vrot.slane %v312_v0, 1  ;;  %v560_v17 = vrot.slane %v292_v4, 1  ;;  %v271_v46 = vld [vmem:[%s2442_s29 + $0x20] sm:$0xf]  ;;  %v2273_v47 = vld [vmem:[%s2767_s1 + $0xa8] sm:$0xff]  }
  0x1f   : > { %1981 = vmatpush3.bf16.msra.mxu1 %v2233_v10  ;;  %v957_v51 = vpack.c.bf16 %v946_v50, %v943_v48  ;;  %v264_v10 = vld [vmem:[%s2442_s29 + $0x4] sm:$0x1]  ;;  %v557_v15 = vrot.slane %v290_v3, 1  ;;  %v297_v48 = vunpack.c.l.bf16 %v270_v43  ;;  %v268_v50 = vld [vmem:[%s2442_s29 + $0x14] sm:$0x1]  ;;  %v2304_v53 = vld [vmem:[%s2767_s1 + $0x228] sm:$0xff]  }
  0x20   : > { %2061 = vmatpush3.bf16.msra.mxu0 %v2234_v14  ;;  %1982 = vmatprep.subr.bf16.mxu1 %v2235_v18  ;;  %v291_v14 = vunpack.c.l.bf16 %v264_v10  ;;  %v295_v58 = vunpack.c.l.bf16 %v268_v50  ;;  %v2276_v63 = vld [vmem:[%s2767_s1 + $0x1b0] sm:$0xff]   ;;  %v2281_v10 = vld [vmem:[%s2767_s1 + $0x1c0] sm:$0xff]  }
  0x21   : > { %2062 = vmatprep.subr.bf16.mxu0 %v2236_v19  ;;  %v567_v59 = vrot.slane %v297_v48, 1  ;;  %v2289_v12 = vld [vmem:[%s2767_s1 + $0xe0] sm:$0xff]  }
  0x22   : > { %v2290_v13 = vld [vmem:[%s2767_s1 + $0x1e0] sm:$0xff]  }
  0x23   : > { %1983 = vmatpush3.bf16.msra.mxu1 %v2235_v18  ;;  %v293_v18 = vunpack.c.l.bf16 %v266_v11  ;;  %v2303_v52 = vld [vmem:[%s2767_s1 + $0x220] sm:$0xff]  }
  0x24   : > { %2063 = vmatpush3.bf16.msra.mxu0 %v2236_v19  ;;  %1984 = vmatprep.subr.bf16.mxu1 %v2237_v20  ;;  %v2564_v19 = vld [vmem:[%s2442_s29 + $0x10] sm:$0xf] }
  0x25   : > { %2064 = vmatprep.subr.bf16.mxu0 %v2238_v21  ;;  %v1781_v38 = vcombine.low %v2498_v31, %v2564_v19  ;;  %v2269_v31 = vld [vmem:[%s2767_s1 + $0x98] sm:$0xff]  }
  0x27   : > { %1985 = vmatpush3.bf16.msra.mxu1 %v2237_v20  ;;  %v2567_v20 = vld [vmem:[%s2442_s29 + $0x18] sm:$0xf] }
  0x28   : > { %2065 = vmatpush3.bf16.msra.mxu0 %v2238_v21  ;;  %1990 = vmatprep.subr.bf16.mxu1 %v2241_v23  ;;  %v558_v21 = vrot.slane %v291_v14, 1  ;;  %v1782_v14 = vcombine.low %v2567_v20, %v271_v46 }
  0x29   : > { %2070 = vmatprep.subr.bf16.mxu0 %v2243_v24 }
  0x2a   : > { %1987 = vmatmul.mubr.bf16.vlgmr.msra.gmra.mrb[0].mxu1 %v1648_v25  ;;  %v949_v25 = vsel %vm556_vm0, %v947_v6, %v948_v7  ;;  %v2278_v7 = vld [vmem:[%s2767_s1 + $0x1b8] sm:$0xff]  }
  0x2b   : > { %1991 = vmatpush3.bf16.msra.mxu1 %v2241_v23  ;;  %2067 = vmatmul.mubr.bf16.vlgmr.msra.gmra.mrb[0].mxu0 %v2246_v26  ;;  %v2262_v23 = vld [vmem:[%s2767_s1 + $0x80] sm:$0xff]   ;;  %v952_v26 = vsel %vm556_vm0, %v950_v8, %v951_v9 }
  0x2c   : > { %2071 = vmatpush3.bf16.msra.mxu0 %v2243_v24  ;;  %1992 = vmatprep.subr.bf16.mxu1 %v2247_v27  ;;  %v2263_v24 = vld [vmem:[%s2767_s1 + $0x180] sm:$0xff]  }
  0x2d   : > { %2072 = vmatprep.subr.bf16.mxu0 %v2248_v28  ;;  %2006 = vmatprep.mubr.bf16.mxu1 %v1645_v33  ;;  %v2265_v33 = vld [vmem:[%s2767_s1 + $0x88] sm:$0xff]   ;;  %v2279_v9 = vld [vmem:[%s2767_s1 + $0xc0] sm:$0xff]  }
  0x2e   : > { %2086 = vmatprep.mubr.bf16.mxu0 %v957_v51  ;;  %v2274_v51 = vld [vmem:[%s2767_s1 + $0x1a8] sm:$0xff]  }
  0x2f   : > { %1993 = vmatpush3.bf16.msra.mxu1 %v2247_v27  ;;  %v561_v27 = vrot.slane %v293_v18, 1  ;;  %v1705_v18 = vcombine.low %v2506_v34, %v2510_v36  ;;  %v2287_v34 = vld [vmem:[%s2767_s1 + $0xd8] sm:$0xff]  }
  0x30   : > { %2073 = vmatpush3.bf16.msra.mxu0 %v2248_v28  ;;  %1994 = vmatprep.subr.bf16.mxu1 %v2249_v29  ;;  %v1646_v28 = vcombine.low %v2564_v19, %v2567_v20  ;;  %v2288_v36 = vld [vmem:[%s2767_s1 + $0x1d8] sm:$0xff]  }
  0x31   : > { %2074 = vmatprep.subr.bf16.mxu0 %v2250_v32  ;;  %v2581_v30 = vsel %vm556_vm0, %v560_v17, %v561_v27  ;;  %v2284_v17 = vld [vmem:[%s2767_s1 + $0x1c8] sm:$0xff]  }
  0x32   : > { %v277_v27 = vld [vmem:[%s2442_s29 + $0x68] sm:$0xf] }
  0x33   : > { %1995 = vmatpush3.bf16.msra.mxu1 %v2249_v29  ;;  %v559_v29 = vsel %vm556_vm0, %v557_v15, %v558_v21  ;;  %v2283_v15 = vld [vmem:[%s2767_s1 + $0xc8] sm:$0xff]  }
  0x34   : > { %2075 = vmatpush3.bf16.msra.mxu0 %v2250_v32  ;;  %1996 = vmatprep.subr.bf16.mxu1 %v2251_v42  ;;  %v958_v32 = vpack.c.bf16 %v952_v26, %v949_v25  ;;  %v573_v37 = vpack.c.bf16 %v2581_v30, %v559_v29  ;;  %v2292_v21 = vld [vmem:[%s2767_s1 + $0x1e8] sm:$0xff]   ;;  %v2295_v25 = vld [vmem:[%s2767_s1 + $0xf8] sm:$0xff]   ;;  %v1808_v29 = vcombine.low %v2474_v22, %v277_v27  ;;  %v2301_v22 = vld [vmem:[%s2767_s1 + $0x210] sm:$0xff]  }
  0x35   : > { %2076 = vmatprep.subr.bf16.mxu0 %v2252_v45  ;;  %v2296_v26 = vld [vmem:[%s2767_s1 + $0x1f8] sm:$0xff]  }
  0x37   : > { %1997 = vmatpush3.bf16.msra.mxu1 %v2251_v42  ;;  %v2271_v42 = vld [vmem:[%s2767_s1 + $0xa0] sm:$0xff]  }
  0x38   : > { %2077 = vmatpush3.bf16.msra.mxu0 %v2252_v45  ;;  %1998 = vmatprep.subr.bf16.mxu1 %v2253_v49  ;;  %v296_v45 = vunpack.c.l.bf16 %v2567_v20  ;;  %v2286_v20 = vld [vmem:[%s2767_s1 + $0x1d0] sm:$0xff]  }
  0x39   : > { %2078 = vmatprep.subr.bf16.mxu0 %v2254_v54 }
  0x3b   : > { %1999 = vmatpush3.bf16.msra.mxu1 %v2253_v49  ;;  %v298_v49 = vunpack.c.l.bf16 %v271_v46 }
  0x3c   : > { %2079 = vmatpush3.bf16.msra.mxu0 %v2254_v54  ;;  %2000 = vmatprep.subr.bf16.mxu1 %v2255_v56  ;;  %v294_v54 = vunpack.c.l.bf16 %v2564_v19  ;;  %v2285_v19 = vld [vmem:[%s2767_s1 + $0xd0] sm:$0xff]  }
  0x3d   : > { %2080 = vmatprep.subr.bf16.mxu0 %v2256_v57  ;;  %v1319_v60 = vrot.slane %v298_v49, 1 }
  0x3f   : > { %2001 = vmatpush3.bf16.msra.mxu1 %v2255_v56  ;;  %v566_v56 = vrot.slane %v296_v45, 1 }
  0x40   : > { %2081 = vmatpush3.bf16.msra.mxu0 %v2256_v57  ;;  %2002 = vmatprep.subr.bf16.mxu1 %v2257_v62  ;;  %v272_v57 = vld [vmem:[%s2442_s29 + $0x24] sm:$0x1]  ;;  %s248_s29 = scalar_lea.vmem %s2769_s3, %s2784_s27 }
  0x41   : > { %2082 = vmatprep.subr.bf16.mxu0 %v2258_v1  ;;  %v299_v61 = vunpack.c.l.bf16 %v272_v57  ;;  %v2629_v3 = vsel %vm556_vm0, %v566_v56, %v567_v59 }
  0x43   : > { %2003 = vmatpush3.bf16.msra.mxu1 %v2257_v62  ;;  %v2275_v62 = vld [vmem:[%s2767_s1 + $0xb0] sm:$0xff]   ;;  %v1320_v0 = vrot.slane %v299_v61, 1 }
  0x44   : > { %2083 = vmatpush3.bf16.msra.mxu0 %v2258_v1  ;;  %2004 = vmatprep.subr.bf16.mxu1 %v2259_v2  ;;  %v563_v1 = vrot.slane %v294_v54, 1 }
  0x45   : > { %2084 = vmatprep.subr.bf16.mxu0 %v2260_v5  ;;  %v2632_v4 = vsel %vm556_vm0, %v1319_v60, %v1320_v0 }
  0x46   : > { %v1324_v6 = vpack.c.bf16 %v2632_v4, %v2629_v3 }
  0x47   : > { %2005 = vmatpush3.bf16.msra.mxu1 %v2259_v2  ;;  %v564_v2 = vrot.slane %v295_v58, 1 }
  0x48   : > { %2085 = vmatpush3.bf16.msra.mxu0 %v2260_v5  ;;  %2010 = vmatprep.subr.bf16.mxu1 %v2262_v23  ;;  %v2277_v5 = vld [vmem:[%s2767_s1 + $0xb8] sm:$0xff]  }
  0x49   : > { %2090 = vmatprep.subr.bf16.mxu0 %v2263_v24  ;;  %v2643_v8 = vsel %vm556_vm0, %v563_v1, %v564_v2 }
  0x4a   : > { %2007 = vmatmul.mubr.bf16.vlgmr.msra.gmra.mrb[0].mxu1 %v1646_v28  ;;  %v574_v11 = vpack.c.bf16 %v2629_v3, %v2643_v8  ;;  %v2299_v28 = vld [vmem:[%s2767_s1 + $0x200] sm:$0xff]  }
  0x4b   : > { %2011 = vmatpush3.bf16.msra.mxu1 %v2262_v23  ;;  %2087 = vmatmul.mubr.bf16.vlgmr.msra.gmra.mrb[0].mxu0 %v958_v32  ;;  %v2293_v23 = vld [vmem:[%s2767_s1 + $0xf0] sm:$0xff]   ;;  %v1323_v32 = vpack.c.bf16 %v2643_v8, %v2581_v30  ;;  %v2302_v30 = vld [vmem:[%s2767_s1 + $0x218] sm:$0xff]  }
  0x4c   : > { %2091 = vmatpush3.bf16.msra.mxu0 %v2263_v24  ;;  %2012 = vmatprep.subr.bf16.mxu1 %v2265_v33  ;;  %v2294_v24 = vld [vmem:[%s2767_s1 + $0x1f0] sm:$0xff]  }
  0x4d   : > { %2092 = vmatprep.subr.bf16.mxu0 %v2266_v35  ;;  %2026 = vmatprep.mubr.bf16.mxu1 %v573_v37 }
  0x4e   : > { %2106 = vmatprep.mubr.bf16.mxu0 %v1781_v38 }
  0x4f   : > { %2013 = vmatpush3.bf16.msra.mxu1 %v2265_v33  ;;  %v2300_v33 = vld [vmem:[%s2767_s1 + $0x208] sm:$0xff]  }
  0x50   : > { %2093 = vmatpush3.bf16.msra.mxu0 %v2266_v35  ;;  %2014 = vmatprep.subr.bf16.mxu1 %v2267_v39  ;;  %v2306_v35 = vld [vmem:[%s2767_s1 + $0x238] sm:$0xff]  }
  0x51   : > { %2094 = vmatprep.subr.bf16.mxu0 %v2268_v40 }
  0x53   : > { %2015 = vmatpush3.bf16.msra.mxu1 %v2267_v39 }
  0x54   : > { %2095 = vmatpush3.bf16.msra.mxu0 %v2268_v40  ;;  %2016 = vmatprep.subr.bf16.mxu1 %v2269_v31 }
  0x55   : > { %2096 = vmatprep.subr.bf16.mxu0 %v2270_v41 }
  0x57   : > { %2017 = vmatpush3.bf16.msra.mxu1 %v2269_v31 }
  0x58   : > { %2097 = vmatpush3.bf16.msra.mxu0 %v2270_v41  ;;  %2018 = vmatprep.subr.bf16.mxu1 %v2271_v42 }
  0x59   : > { %2098 = vmatprep.subr.bf16.mxu0 %v2272_v44 }
  0x5b   : > { %2019 = vmatpush3.bf16.msra.mxu1 %v2271_v42 }
  0x5c   : > { %2099 = vmatpush3.bf16.msra.mxu0 %v2272_v44  ;;  %2020 = vmatprep.subr.bf16.mxu1 %v2273_v47 }
  0x5d   : > { %2100 = vmatprep.subr.bf16.mxu0 %v2274_v51 }
  0x5f   : > { %2021 = vmatpush3.bf16.msra.mxu1 %v2273_v47 }
  0x60   : > { %2101 = vmatpush3.bf16.msra.mxu0 %v2274_v51  ;;  %2022 = vmatprep.subr.bf16.mxu1 %v2275_v62 }
  0x61   : > { %2102 = vmatprep.subr.bf16.mxu0 %v2276_v63 }
  0x63   : > { %2023 = vmatpush3.bf16.msra.mxu1 %v2275_v62 }
  0x64   : > { %2103 = vmatpush3.bf16.msra.mxu0 %v2276_v63  ;;  %2024 = vmatprep.subr.bf16.mxu1 %v2277_v5 }
  0x65   : > { %2104 = vmatprep.subr.bf16.mxu0 %v2278_v7 }
  0x67   : > { %2025 = vmatpush3.bf16.msra.mxu1 %v2277_v5 }
  0x68   : > { %2105 = vmatpush3.bf16.msra.mxu0 %v2278_v7  ;;  %2030 = vmatprep.subr.bf16.mxu1 %v2279_v9 }
  0x69   : > { %2110 = vmatprep.subr.bf16.mxu0 %v2281_v10 }
  0x6a   : > { %2027 = vmatmul.mubr.bf16.vlgmr.msra.gmra.mrb[0].mxu1 %v574_v11 }
  0x6b   : > { %2031 = vmatpush3.bf16.msra.mxu1 %v2279_v9  ;;  %2107 = vmatmul.mubr.bf16.vlgmr.msra.gmra.mrb[0].mxu0 %v1782_v14 }
  0x6c   : > { %2111 = vmatpush3.bf16.msra.mxu0 %v2281_v10  ;;  %2032 = vmatprep.subr.bf16.mxu1 %v2283_v15 }
  0x6d   : > { %2112 = vmatprep.subr.bf16.mxu0 %v2284_v17  ;;  %2046 = vmatprep.mubr.bf16.mxu1 %v1705_v18 }
  0x6e   : > { %2126 = vmatprep.mubr.bf16.mxu0 %v1807_v16  ;;  %v2291_v16 = vld [vmem:[%s2767_s1 + $0xe8] sm:$0xff]  }
  0x6f   : > { %2033 = vmatpush3.bf16.msra.mxu1 %v2283_v15 }
  0x70   : > { %2113 = vmatpush3.bf16.msra.mxu0 %v2284_v17  ;;  %2034 = vmatprep.subr.bf16.mxu1 %v2285_v19 }
  0x71   : > { %2114 = vmatprep.subr.bf16.mxu0 %v2286_v20 }
  0x73   : > { %2035 = vmatpush3.bf16.msra.mxu1 %v2285_v19 }
  0x74   : > { %2115 = vmatpush3.bf16.msra.mxu0 %v2286_v20  ;;  %2036 = vmatprep.subr.bf16.mxu1 %v2287_v34 }
  0x75   : > { %2116 = vmatprep.subr.bf16.mxu0 %v2288_v36 }
  0x77   : > { %2037 = vmatpush3.bf16.msra.mxu1 %v2287_v34 }
  0x78   : > { %2117 = vmatpush3.bf16.msra.mxu0 %v2288_v36  ;;  %2038 = vmatprep.subr.bf16.mxu1 %v2289_v12 }
  0x79   : > { %2118 = vmatprep.subr.bf16.mxu0 %v2290_v13 }
  0x7b   : > { %2039 = vmatpush3.bf16.msra.mxu1 %v2289_v12 }
  0x7c   : > { %2119 = vmatpush3.bf16.msra.mxu0 %v2290_v13  ;;  %2040 = vmatprep.subr.bf16.mxu1 %v2291_v16 }
  0x7d   : > { %2120 = vmatprep.subr.bf16.mxu0 %v2292_v21 }
  0x7f   : > { %2041 = vmatpush3.bf16.msra.mxu1 %v2291_v16 }
  0x80   : > { %2121 = vmatpush3.bf16.msra.mxu0 %v2292_v21  ;;  %2042 = vmatprep.subr.bf16.mxu1 %v2293_v23 }
  0x81   : > { %2122 = vmatprep.subr.bf16.mxu0 %v2294_v24 }
  0x83   : > { %2043 = vmatpush3.bf16.msra.mxu1 %v2293_v23 }
  0x84   : > { %2123 = vmatpush3.bf16.msra.mxu0 %v2294_v24  ;;  %2044 = vmatprep.subr.bf16.mxu1 %v2295_v25 }
  0x85   : > { %2124 = vmatprep.subr.bf16.mxu0 %v2296_v26 }
  0x87   : > { %2045 = vmatpush3.bf16.msra.mxu1 %v2295_v25 }
  0x88   : > { %2125 = vmatpush3.bf16.msra.mxu0 %v2296_v26 }
  0x89   : > { %2130 = vmatprep.subr.bf16.mxu0 %v2299_v28 }
  0x8a   : > { %2047 = vmatmul.mubr.bf16.vlgmr.msra.gmra.mrb[0].mxu1 %v1706_v55  ;;  %v2305_v55 = vld [vmem:[%s2767_s1 + $0x230] sm:$0xff]  }
  0x8b   : > { %2127 = vmatmul.mubr.bf16.vlgmr.msra.gmra.mrb[0].mxu0 %v1808_v29 }
  0x8c   : > { %2131 = vmatpush3.bf16.msra.mxu0 %v2299_v28  ;;  %2146 = vmatprep.mubr.bf16.mxu0 %v1323_v32 }
  0x8d   : > { %2132 = vmatprep.subr.bf16.mxu0 %v2300_v33 }
  0x90   : > { %2133 = vmatpush3.bf16.msra.mxu0 %v2300_v33 }
  0x91   : > { %2134 = vmatprep.subr.bf16.mxu0 %v2301_v22 }
  0x94   : > { %2135 = vmatpush3.bf16.msra.mxu0 %v2301_v22 }
  0x95   : > { %2136 = vmatprep.subr.bf16.mxu0 %v2302_v30 }
  0x98   : > { %2137 = vmatpush3.bf16.msra.mxu0 %v2302_v30 }
  0x99   : > { %2138 = vmatprep.subr.bf16.mxu0 %v2303_v52 }
  0x9c   : > { %2139 = vmatpush3.bf16.msra.mxu0 %v2303_v52 }
  0x9d   : > { %2140 = vmatprep.subr.bf16.mxu0 %v2304_v53 }
  0xa0   : > { %2141 = vmatpush3.bf16.msra.mxu0 %v2304_v53 }
  0xa1   : > { %2142 = vmatprep.subr.bf16.mxu0 %v2305_v55 }
  0xa4   : > { %2143 = vmatpush3.bf16.msra.mxu0 %v2305_v55 }
  0xa5   : > { %2144 = vmatprep.subr.bf16.mxu0 %v2306_v35 }
  0xa8   : > { %2145 = vmatpush3.bf16.msra.mxu0 %v2306_v35 }
  0xab   : > { %2147 = vmatmul.mubr.bf16.vlgmr.msra.gmra.mrb[0].mxu0 %v1324_v6 }
 0x15d   : > { %v2048_v37 = vpop.f32.mrb[0].mxu1 }
 0x15e   : > { %v794_v38 = vpop.f32.mrb[1].mxu1 }
 0x15f   : > { %v2049_v39 = vpop.f32.mrb[2].mxu1 }
 0x160   : > { %v797_v40 = vpop.f32.mrb[3].mxu1 }
 0x17e   : > { %v2148_v31 = vpop.f32.mrb[0].mxu0 }
 0x17f   : > { %v2150_v41 = vadd.f32 %v2148_v31, %v2048_v37  ;;  %v1424_v42 = vpop.f32.mrb[1].mxu0 }
 0x180   : > { %v2151_v43 = vadd.f32 %v1424_v42, %v794_v38  ;;  %v2149_v44 = vpop.f32.mrb[2].mxu0 }
 0x181   : > { %v2152_v45 = vadd.f32 %v2149_v44, %v2049_v39  ;;  %v1427_v46 = vpop.f32.mrb[3].mxu0  ;;  %v1475_v56 = vmul.f32 %v2150_v41, %v2150_v41 }
 0x182   : > { %v2153_v47 = vadd.f32 %v1427_v46, %v797_v40  ;;  %v1473_v49 = vmul.f32 %v2151_v43, %v2151_v43 }
 0x183   : > { %v1877_v48 = vpack.c.bf16 %v2152_v45, %v2150_v41  ;;  %v1476_v59 = vmul.f32 %v2152_v45, %v2152_v45 }
 0x184   : > { %v1872_v50 = vpack.c.bf16 %v2153_v47, %v2151_v43  ;;  %v1463_v51 = vadd.f32 %v2153_v47, %v2151_v43  ;;  %v1474_v54 = vmul.f32 %v2153_v47, %v2153_v47 }
 0x185   : > { %1879 = vst [vmem:[%s240_s7 + $0x8] sm:$0xff] %v1877_v48  }
 0x186   : > { %1873 = vst [vmem:[%s240_s7] sm:$0xff] %v1872_v50   ;;  %v1464_v57 = vadd.f32 %v2150_v41, %v1463_v51  ;;  %v1477_v58 = vadd.f32 %v1474_v54, %v1473_v49 }
 0x188   : > { %v1465_v60 = vadd.f32 %v2152_v45, %v1464_v57  ;;  %v1478_v61 = vadd.f32 %v1477_v58, %v1475_v56 }
 0x18a   : > { %v1466_v62 = vrot.slane %v1465_v60, 4  ;;  %v1479_v63 = vadd.f32 %v1478_v61, %v1476_v59 }
 0x18c   : > { %v1467_v0 = vadd.f32 %v1466_v62, %v1465_v60  ;;  %v1480_v1 = vrot.slane %v1479_v63, 4 }
 0x18e   : > { %v1468_v2 = vrot.slane %v1467_v0, 2  ;;  %v1481_v3 = vadd.f32 %v1480_v1, %v1479_v63 }
 0x190   : > { %v1469_v4 = vadd.f32 %v1468_v2, %v1467_v0  ;;  %v1482_v5 = vrot.slane %v1481_v3, 2 }
 0x192   : > { %v1470_v6 = vrot.slane %v1469_v4, 1  ;;  %v1483_v7 = vadd.f32 %v1482_v5, %v1481_v3 }
 0x194   : > { %v1471_v8 = vadd.f32 %v1470_v6, %v1469_v4  ;;  %v1484_v9 = vrot.slane %v1483_v7, 1 }
 0x196   : > { %1472 = vst [vmem:[%s248_s29] sm:$0x1] %v1471_v8  ;;  %v1485_v10 = vadd.f32 %v1484_v9, %v1483_v7 }
 0x198   : > { %1486 = vst [vmem:[%s255_s10] sm:$0x1] %v1485_v10 }
 0x199 PF: > { %s15_s19 = sadd.s32 1, %s2345_s19   ;;  %s2771_s15 = smov %s2337_s17 }
 0x19a   : > { %p12_p8 = scmp.ge.s32.totalorder %s15_s19, 6   ;;  %s2772_s16 = smov %s2341_s18 }
 0x19b   : > { %s2773_s17 = smov %s2776_s20  ;;  %s2774_s18 = smov %s2780_s21 }
 0x19c   :  { %14 = sbr.rel (!%p12_p8) target bundleno = 3 (0x3), region = 91 }

// kernel: _lambda_.34
= control target key start
LH: loop header
LB: loop body
LE: loop exit
PB: predicated region body
PF: predicated region fallthrough
CT: control target
= control target key end

     0   :  { %s647_s0 = inlined_call_operand.vmem [shape: bf16[128,128], index: 0, kind: input, shape index: {}]   ;;  %s648_s1 = inlined_call_operand.vmem [shape: f32[1,128], index: 1, kind: input, shape index: {}]   ;;  %s649_s2 = inlined_call_operand.vmem [shape: f32[1,128], index: 2, kind: input, shape index: {}]   ;;  %s650_s3 = inlined_call_operand.vmem [shape: bf16[128,128], index: 3, kind: input, shape index: {}]   ;;  %s651_s4 = inlined_call_operand.vmem [shape: f32[1,128], index: 4, kind: input, shape index: {}]   ;;  %s652_s5 = inlined_call_operand.vmem [shape: f32[1,128], index: 5, kind: input, shape index: {}]   ;;  %s653_s6 = inlined_call_operand.vmem [shape: bf16[128,128], index: 6, kind: output, shape index: {}]  }
   0x1   :  { %v332_v0 = vld [vmem:[%s647_s0] sm:$0xff]   ;;  %v435_v9 = vld [vmem:[%s647_s0 + $0x8] sm:$0xff]   ;;  %v436_v20 = vld [vmem:[%s647_s0 + $0x10] sm:$0xff]  }
   0x2   :  { %v497_v1 = vld [vmem:[%s648_s1] ss:$0 sm:$0xff]  ;;  %v333_v2 = vunpack.c.l.bf16 %v332_v0  ;;  %v334_v3 = vunpack.c.h.bf16 %v332_v0  ;;  %v442_v10 = vld [vmem:[%s650_s3 + $0x8] sm:$0xff]   ;;  %v337_v14 = vunpack.c.l.bf16 %v435_v9  ;;  %v338_v15 = vunpack.c.h.bf16 %v435_v9  ;;  %v443_v29 = vld [vmem:[%s650_s3 + $0x10] sm:$0xff]  }
   0x3   :  { %v364_v4 = vld [vmem:[%s650_s3] sm:$0xff]   ;;  %v369_v18 = vunpack.c.l.bf16 %v442_v10  ;;  %v370_v19 = vunpack.c.h.bf16 %v442_v10  ;;  %v341_v32 = vunpack.c.l.bf16 %v436_v20  ;;  %v342_v33 = vunpack.c.h.bf16 %v436_v20  ;;  %v437_v42 = vld [vmem:[%s647_s0 + $0x18] sm:$0xff]  }
   0x4   :  { %v505_v5 = vld [vmem:[%s651_s4] ss:$0 sm:$0xff]  ;;  %v365_v7 = vunpack.c.l.bf16 %v364_v4  ;;  %v366_v8 = vunpack.c.h.bf16 %v364_v4  ;;  %v62_v11 = vmul.f32 %v333_v2, %v497_v1  ;;  %v63_v12 = vmul.f32 %v334_v3, %v497_v1  ;;  %v444_v47 = vld [vmem:[%s650_s3 + $0x18] sm:$0xff]  }
   0x5   :  { %v510_v6 = vld [vmem:[%s649_s2] ss:$0 sm:$0xff]  ;;  %v64_v23 = vmul.f32 %v337_v14, %v497_v1  ;;  %v65_v24 = vmul.f32 %v338_v15, %v497_v1  ;;  %v142_v27 = vmul.f32 %v369_v18, %v505_v5  ;;  %v143_v28 = vmul.f32 %v370_v19, %v505_v5  ;;  %v439_v14 = vld [vmem:[%s647_s0 + $0x28] sm:$0xff]  }
   0x6   :  { %v523_v13 = vld [vmem:[%s652_s5] ss:$0 sm:$0xff]  ;;  %v140_v16 = vmul.f32 %v365_v7, %v505_v5  ;;  %v141_v17 = vmul.f32 %v366_v8, %v505_v5  ;;  %v85_v21 = vadd.f32 %v510_v6, %v62_v11  ;;  %v86_v22 = vadd.f32 %v510_v6, %v63_v12 }
   0x7   :  { %v87_v30 = vadd.f32 %v510_v6, %v64_v23  ;;  %v88_v31 = vadd.f32 %v510_v6, %v65_v24  ;;  %v165_v36 = vadd.f32 %v523_v13, %v142_v27  ;;  %v166_v37 = vadd.f32 %v523_v13, %v143_v28  ;;  %v438_v52 = vld [vmem:[%s647_s0 + $0x20] sm:$0xff]   ;;  %v446_v23 = vld [vmem:[%s650_s3 + $0x28] sm:$0xff]  }
   0x8   :  { %v163_v25 = vadd.f32 %v523_v13, %v140_v16  ;;  %v164_v26 = vadd.f32 %v523_v13, %v141_v17  ;;  %v66_v38 = vmul.f32 %v341_v32, %v497_v1  ;;  %v67_v39 = vmul.f32 %v342_v33, %v497_v1  ;;  %v445_v8 = vld [vmem:[%s650_s3 + $0x20] sm:$0xff]   ;;  %v440_v32 = vld [vmem:[%s647_s0 + $0x30] sm:$0xff]  }
   0x9   :  { %v373_v40 = vunpack.c.l.bf16 %v443_v29  ;;  %v374_v41 = vunpack.c.h.bf16 %v443_v29  ;;  %v181_v45 = vadd.f32 %v165_v36, %v87_v30  ;;  %v182_v46 = vadd.f32 %v166_v37, %v88_v31 }
   0xa   :  { %v179_v34 = vadd.f32 %v163_v25, %v85_v21  ;;  %v180_v35 = vadd.f32 %v164_v26, %v86_v22  ;;  %v89_v48 = vadd.f32 %v510_v6, %v66_v38  ;;  %v90_v49 = vadd.f32 %v510_v6, %v67_v39 }
   0xb   :  { %v144_v50 = vmul.f32 %v373_v40, %v505_v5  ;;  %v145_v51 = vmul.f32 %v374_v41, %v505_v5  ;;  %v197_v54 = vmax.f32 %v181_v45, 0.0  ;;  %v198_v55 = vmax.f32 %v182_v46, 0.0  ;;  %v447_v45 = vld [vmem:[%s650_s3 + $0x30] sm:$0xff]  }
   0xc   :  { %v195_v43 = vmax.f32 %v179_v34, 0.0  ;;  %v196_v44 = vmax.f32 %v180_v35, 0.0  ;;  %v345_v56 = vunpack.c.l.bf16 %v437_v42  ;;  %v346_v59 = vunpack.c.h.bf16 %v437_v42 }
   0xd   :  { %v167_v57 = vadd.f32 %v523_v13, %v144_v50  ;;  %v168_v58 = vadd.f32 %v523_v13, %v145_v51  ;;  %v377_v60 = vunpack.c.l.bf16 %v444_v47  ;;  %v403_v61 = vpack.c.bf16 %v198_v55, %v197_v54  ;;  %v441_v54 = vld [vmem:[%s647_s0 + $0x38] sm:$0xff]  }
   0xe   :  { %v398_v53 = vpack.c.bf16 %v196_v44, %v195_v43  ;;  %v68_v62 = vmul.f32 %v345_v56, %v497_v1  ;;  %v378_v63 = vunpack.c.h.bf16 %v444_v47  ;;  %v349_v0 = vunpack.c.l.bf16 %v438_v52 }
   0xf   :  { %v183_v2 = vadd.f32 %v167_v57, %v89_v48  ;;  %v184_v3 = vadd.f32 %v168_v58, %v90_v49  ;;  %v69_v4 = vmul.f32 %v346_v59, %v497_v1  ;;  %v146_v7 = vmul.f32 %v377_v60, %v505_v5  ;;  %449 = vst [vmem:[%s653_s6 + $0x8] sm:$0xff] %v403_v61  }
  0x10   :  { %399 = vst [vmem:[%s653_s6] sm:$0xff] %v398_v53   ;;  %v91_v9 = vadd.f32 %v510_v6, %v68_v62  ;;  %v147_v10 = vmul.f32 %v378_v63, %v505_v5  ;;  %v350_v11 = vunpack.c.h.bf16 %v438_v52  ;;  %v70_v12 = vmul.f32 %v349_v0, %v497_v1 }
  0x11   :  { %v199_v15 = vmax.f32 %v183_v2, 0.0  ;;  %v200_v16 = vmax.f32 %v184_v3, 0.0  ;;  %v92_v17 = vadd.f32 %v510_v6, %v69_v4  ;;  %v169_v18 = vadd.f32 %v523_v13, %v146_v7  ;;  %v448_v4 = vld [vmem:[%s650_s3 + $0x38] sm:$0xff]  }
  0x12   :  { %v170_v19 = vadd.f32 %v523_v13, %v147_v10  ;;  %v71_v20 = vmul.f32 %v350_v11, %v497_v1  ;;  %v93_v21 = vadd.f32 %v510_v6, %v70_v12  ;;  %v381_v22 = vunpack.c.l.bf16 %v445_v8 }
  0x13   :  { %v408_v24 = vpack.c.bf16 %v200_v16, %v199_v15  ;;  %v185_v25 = vadd.f32 %v169_v18, %v91_v9  ;;  %v382_v26 = vunpack.c.h.bf16 %v445_v8  ;;  %v353_v27 = vunpack.c.l.bf16 %v439_v14 }
  0x14   :  { %v186_v28 = vadd.f32 %v170_v19, %v92_v17  ;;  %v94_v29 = vadd.f32 %v510_v6, %v71_v20  ;;  %v148_v30 = vmul.f32 %v381_v22, %v505_v5  ;;  %v354_v31 = vunpack.c.h.bf16 %v439_v14 }
  0x15   :  { %450 = vst [vmem:[%s653_s6 + $0x10] sm:$0xff] %v408_v24   ;;  %v201_v33 = vmax.f32 %v185_v25, 0.0  ;;  %v149_v34 = vmul.f32 %v382_v26, %v505_v5  ;;  %v72_v35 = vmul.f32 %v353_v27, %v497_v1  ;;  %v385_v36 = vunpack.c.l.bf16 %v446_v23 }
  0x16   :  { %v202_v37 = vmax.f32 %v186_v28, 0.0  ;;  %v171_v38 = vadd.f32 %v523_v13, %v148_v30  ;;  %v73_v39 = vmul.f32 %v354_v31, %v497_v1  ;;  %v386_v40 = vunpack.c.h.bf16 %v446_v23 }
  0x17   :  { %v172_v41 = vadd.f32 %v523_v13, %v149_v34  ;;  %v95_v42 = vadd.f32 %v510_v6, %v72_v35  ;;  %v150_v43 = vmul.f32 %v385_v36, %v505_v5  ;;  %v357_v44 = vunpack.c.l.bf16 %v440_v32 }
  0x18   :  { %v413_v46 = vpack.c.bf16 %v202_v37, %v201_v33  ;;  %v187_v47 = vadd.f32 %v171_v38, %v93_v21  ;;  %v96_v48 = vadd.f32 %v510_v6, %v73_v39  ;;  %v151_v49 = vmul.f32 %v386_v40, %v505_v5 }
  0x19   :  { %v188_v50 = vadd.f32 %v172_v41, %v94_v29  ;;  %v173_v51 = vadd.f32 %v523_v13, %v150_v43  ;;  %v358_v52 = vunpack.c.h.bf16 %v440_v32  ;;  %v74_v53 = vmul.f32 %v357_v44, %v497_v1 }
  0x1a   :  { %451 = vst [vmem:[%s653_s6 + $0x18] sm:$0xff] %v413_v46   ;;  %v203_v55 = vmax.f32 %v187_v47, 0.0  ;;  %v174_v56 = vadd.f32 %v523_v13, %v151_v49  ;;  %v389_v57 = vunpack.c.l.bf16 %v447_v45  ;;  %v390_v58 = vunpack.c.h.bf16 %v447_v45 }
  0x1b   :  { %v204_v59 = vmax.f32 %v188_v50, 0.0  ;;  %v189_v60 = vadd.f32 %v173_v51, %v95_v42  ;;  %v75_v61 = vmul.f32 %v358_v52, %v497_v1  ;;  %v97_v62 = vadd.f32 %v510_v6, %v74_v53 }
  0x1c   :  { %v190_v63 = vadd.f32 %v174_v56, %v96_v48  ;;  %v152_v0 = vmul.f32 %v389_v57, %v505_v5  ;;  %v153_v2 = vmul.f32 %v390_v58, %v505_v5  ;;  %v361_v3 = vunpack.c.l.bf16 %v441_v54 }
  0x1d   :  { %v418_v7 = vpack.c.bf16 %v204_v59, %v203_v55  ;;  %v205_v8 = vmax.f32 %v189_v60, 0.0  ;;  %v98_v9 = vadd.f32 %v510_v6, %v75_v61  ;;  %v362_v10 = vunpack.c.h.bf16 %v441_v54 }
  0x1e   :  { %v206_v11 = vmax.f32 %v190_v63, 0.0  ;;  %v175_v12 = vadd.f32 %v523_v13, %v152_v0  ;;  %v176_v14 = vadd.f32 %v523_v13, %v153_v2  ;;  %v76_v15 = vmul.f32 %v361_v3, %v497_v1 }
  0x1f   :  { %452 = vst [vmem:[%s653_s6 + $0x20] sm:$0xff] %v418_v7   ;;  %v77_v16 = vmul.f32 %v362_v10, %v497_v1  ;;  %v393_v17 = vunpack.c.l.bf16 %v448_v4  ;;  %v394_v18 = vunpack.c.h.bf16 %v448_v4 }
  0x20   :  { %v423_v19 = vpack.c.bf16 %v206_v11, %v205_v8  ;;  %v191_v20 = vadd.f32 %v175_v12, %v97_v62  ;;  %v192_v21 = vadd.f32 %v176_v14, %v98_v9  ;;  %v99_v22 = vadd.f32 %v510_v6, %v76_v15 }
  0x21   :  { %v100_v23 = vadd.f32 %v510_v6, %v77_v16  ;;  %v154_v24 = vmul.f32 %v393_v17, %v505_v5  ;;  %v155_v25 = vmul.f32 %v394_v18, %v505_v5 }
  0x22   :  { %453 = vst [vmem:[%s653_s6 + $0x28] sm:$0xff] %v423_v19   ;;  %v207_v26 = vmax.f32 %v191_v20, 0.0  ;;  %v208_v27 = vmax.f32 %v192_v21, 0.0 }
  0x23   :  { %v177_v1 = vadd.f32 %v523_v13, %v154_v24  ;;  %v178_v28 = vadd.f32 %v523_v13, %v155_v25 }
  0x24   :  { %v428_v29 = vpack.c.bf16 %v208_v27, %v207_v26 }
  0x25   :  { %v193_v30 = vadd.f32 %v177_v1, %v99_v22  ;;  %v194_v31 = vadd.f32 %v178_v28, %v100_v23 }
  0x26   :  { %454 = vst [vmem:[%s653_s6 + $0x30] sm:$0xff] %v428_v29  }
  0x27   :  { %v209_v6 = vmax.f32 %v193_v30, 0.0  ;;  %v210_v32 = vmax.f32 %v194_v31, 0.0 }
  0x29   :  { %v433_v5 = vpack.c.bf16 %v210_v32, %v209_v6 }
  0x2b   :  { %455 = vst [vmem:[%s653_s6 + $0x38] sm:$0xff] %v433_v5  }

// kernel: _lambda_.35
= control target key start
LH: loop header
LB: loop body
LE: loop exit
PB: predicated region body
PF: predicated region fallthrough
CT: control target
= control target key end

     0   :  { %v325_v1 = vmov 0.0   ;;  %vm326_vm0 = vmmov 0   ;;  %s411_s0 = inlined_call_operand.vmem [shape: bf16[128,128], index: 0, kind: input, shape index: {}]   ;;  %s412_s1 = inlined_call_operand.vmem [shape: bf16[128,128], index: 1, kind: input, shape index: {}]   ;;  %s413_s2 = inlined_call_operand.vmem [shape: f32[1,128], index: 2, kind: input, shape index: {}]   ;;  %s414_s3 = inlined_call_operand.hbm [shape: f32[2,128], index: 3, kind: output, shape index: {}]  }
   0x1   :  { %v293_v0 = vld [vmem:[%s412_s1] sm:$0xff]   ;;  %270 = vmatprep.subr.bf16.mxu0 %v325_v1  ;;  %v294_v2 = vld [vmem:[%s412_s1 + $0x8] sm:$0xff]   ;;  %286 = vmatprep.mubr.msk.bf16.mxu0 %vm326_vm0, %v325_v1  ;;  %v295_v3 = vld [vmem:[%s412_s1 + $0x10] sm:$0xff]  }
   0x2   :  { %271 = vmatpush3.bf16.msra.mxu0 %v293_v0  ;;  %v223_v4 = vld [vmem:[%s411_s0] sm:$0xff]   ;;  %v254_v5 = vld [vmem:[%s411_s0 + $0x8] sm:$0xff]   ;;  %v296_v10 = vld [vmem:[%s412_s1 + $0x18] sm:$0xff]  }
   0x3   :  { %272 = vmatprep.subr.bf16.mxu0 %v325_v1  ;;  %v224_v6 = vunpack.c.l.bf16 %v223_v4  ;;  %v225_v7 = vunpack.c.h.bf16 %v223_v4  ;;  %v257_v8 = vld [vmem:[%s411_s0 + $0x20] sm:$0xff]   ;;  %v258_v9 = vld [vmem:[%s411_s0 + $0x28] sm:$0xff]   ;;  %v228_v11 = vunpack.c.l.bf16 %v254_v5 }
   0x4   :  { %v240_v12 = vunpack.c.l.bf16 %v257_v8  ;;  %v241_v13 = vunpack.c.h.bf16 %v257_v8  ;;  %v244_v14 = vunpack.c.l.bf16 %v258_v9 }
   0x6   :  { %273 = vmatpush3.bf16.msra.mxu0 %v294_v2 }
   0x7   :  { %274 = vmatprep.subr.bf16.mxu0 %v325_v1 }
   0xa   :  { %275 = vmatpush3.bf16.msra.mxu0 %v295_v3 }
   0xb   :  { %276 = vmatprep.subr.bf16.mxu0 %v325_v1 }
   0xc   :  { %8 = vsyncpa [#allocation3], 0  ;;  %v255_v15 = vld [vmem:[%s411_s0 + $0x10] sm:$0xff]   ;;  %v229_v17 = vunpack.c.h.bf16 %v254_v5  ;;  %v245_v18 = vunpack.c.h.bf16 %v258_v9  ;;  %v48_v19 = vadd.f32 %v225_v7, %v224_v6  ;;  %v61_v20 = vadd.f32 %v241_v13, %v240_v12  ;;  %v297_v21 = vld [vmem:[%s412_s1 + $0x20] sm:$0xff]   ;;  %s327_s17 = smov [#allocation2]  }
   0xd   :  { %v259_v16 = vld [vmem:[%s411_s0 + $0x30] sm:$0xff]   ;;  %v232_v22 = vunpack.c.l.bf16 %v255_v15  ;;  %v256_v26 = vld [vmem:[%s411_s0 + $0x18] sm:$0xff]   ;;  %v233_v28 = vunpack.c.h.bf16 %v255_v15  ;;  %v298_v32 = vld [vmem:[%s412_s1 + $0x28] sm:$0xff]   ;;  %vm106_vm1 = vcmask 1041409   ;;  %s205_s18 = sshll.u32 %s327_s17, 4  ;;  %s206_s18 = int_to_ptr.vmem [resolvable:$true] %s205_s18 }
   0xe   :  { %277 = vmatpush3.bf16.msra.mxu0 %v296_v10  ;;  %v248_v23 = vunpack.c.l.bf16 %v259_v16  ;;  %v49_v24 = vadd.f32 %v228_v11, %v48_v19  ;;  %v62_v25 = vadd.f32 %v244_v14, %v61_v20  ;;  %v260_v27 = vld [vmem:[%s411_s0 + $0x38] sm:$0xff]   ;;  %v249_v29 = vunpack.c.h.bf16 %v259_v16  ;;  %v299_v41 = vld [vmem:[%s412_s1 + $0x30] sm:$0xff]   ;;  %v213_v3 = vld [vmem:[%s413_s2] ss:$0 sm:$0xff]  ;;  %s301_s19 = scalar_lea.vmem %s206_s18, 32  ;;  %p306_p1 = scmp.lt.s32.totalorder %s206_s18, %s206_s18 }
   0xf   :  { %278 = vmatprep.subr.bf16.mxu0 %v325_v1  ;;  %v236_v33 = vunpack.c.l.bf16 %v256_v26  ;;  %v252_v34 = vunpack.c.l.bf16 %v260_v27  ;;  %v237_v37 = vunpack.c.h.bf16 %v256_v26  ;;  %v253_v38 = vunpack.c.h.bf16 %v260_v27  ;;  %v300_v46 = vld [vmem:[%s412_s1 + $0x38] sm:$0xff]   ;;  %p302_p0 = scmp.ne.s32.totalorder %s206_s18, %s301_s19  ;;  %p307_p2 = scmp.lt.s32.totalorder %s301_s19, %s301_s19 }
  0x10   :  { %v50_v30 = vadd.f32 %v229_v17, %v49_v24  ;;  %v63_v31 = vadd.f32 %v245_v18, %v62_v25 }
  0x11   :  { %p308_p3 = por %p307_p2, %p306_p1 }
  0x12   :  { %279 = vmatpush3.bf16.msra.mxu0 %v297_v21  ;;  %v51_v35 = vadd.f32 %v232_v22, %v50_v30  ;;  %v64_v36 = vadd.f32 %v248_v23, %v63_v31 }
  0x13   :  { %280 = vmatprep.subr.bf16.mxu0 %v325_v1  ;;  %p309_p4 = pnand %p308_p3, %p302_p0 }
  0x14   :  { %v52_v39 = vadd.f32 %v233_v28, %v51_v35  ;;  %v65_v40 = vadd.f32 %v249_v29, %v64_v36 }
  0x16   :  { %281 = vmatpush3.bf16.msra.mxu0 %v298_v32  ;;  %v53_v42 = vadd.f32 %v236_v33, %v52_v39  ;;  %v66_v43 = vadd.f32 %v252_v34, %v65_v40 }
  0x17   :  { %282 = vmatprep.subr.bf16.mxu0 %v325_v1 }
  0x18   :  { %v54_v44 = vadd.f32 %v237_v37, %v53_v42  ;;  %v67_v45 = vadd.f32 %v253_v38, %v66_v43 }
  0x1a   :  { %283 = vmatpush3.bf16.msra.mxu0 %v299_v41  ;;  %v55_v47 = vrot.slane %v54_v44, 4  ;;  %v68_v48 = vrot.slane %v67_v45, 4 }
  0x1b   :  { %284 = vmatprep.subr.bf16.mxu0 %v325_v1 }
  0x1c   :  { %v56_v49 = vadd.f32 %v55_v47, %v54_v44  ;;  %v69_v50 = vadd.f32 %v68_v48, %v67_v45 }
  0x1e   :  { %285 = vmatpush3.bf16.msra.mxu0 %v300_v46  ;;  %v57_v51 = vrot.slane %v56_v49, 2  ;;  %v70_v52 = vrot.slane %v69_v50, 2 }
  0x20   :  { %v58_v53 = vadd.f32 %v57_v51, %v56_v49  ;;  %v71_v54 = vadd.f32 %v70_v52, %v69_v50 }
  0x22   :  { %v59_v55 = vrot.slane %v58_v53, 1  ;;  %v72_v56 = vrot.slane %v71_v54, 1 }
  0x24   :  { %v60_v57 = vadd.f32 %v59_v55, %v58_v53  ;;  %v73_v58 = vadd.f32 %v72_v56, %v71_v54 }
  0x26   :  { %v75_v59 = vmul.f32 0.015625, %v60_v57  ;;  %v76_v60 = vmul.f32 0.015625, %v73_v58 }
  0x28   :  { %v77_v61 = vpack.c.bf16 %v75_v59, %v75_v59  ;;  %v78_v62 = vpack.c.bf16 %v76_v60, %v76_v60 }
  0x2a   :  { %v104_v63 = vunpack.c.l.b16 %v77_v61  ;;  %v105_v0 = vunpack.c.l.b16 %v78_v62 }
  0x2c   :  { %v107_v1 = vsel %vm106_vm1, %v105_v0, %v104_v63 }
  0x2d   :  { %v108_v2 = vpack.c.b16 %v107_v1, %v107_v1 }
  0x2f   :  { %287 = vmatmul.mubr.bf16.vlgmr.msra.gmra.mrb[0].mxu0 %v108_v2 }
 0x102   :  { %v192_v4 = vpop.f32.mrb[0].mxu0 }
 0x103   :  { %v193_v5 = vadd.f32 %v213_v3, %v192_v4  ;;  %v288_v6 = vpop.f32.mrb[1].mxu0 }
 0x104   :  { %v195_v7 = vpop.f32.mrb[2].mxu0 }
 0x105   :  { %198 = vst [vmem:[#allocation2] sm:$0x3] %v193_v5  ;;  %v289_v8 = vpop.f32.mrb[3].mxu0 }
 0x106   :  { %312 = shalt.err (!%p309_p4)
}
 0x107   :  { %s313_s2 = scalar_lea.hbm %s414_s3, 32 }
 0x108   :  { %p314_p5 = scmp.ne.s32.totalorder %s414_s3, %s313_s2  ;;  %p317_p6 = scmp.lt.u32.totalorder %s313_s2, %s414_s3 }
 0x10a   :  { %p319_p7 = pnand %p317_p6, %p314_p5 }
 0x10c   :  { %322 = shalt.err (!%p319_p7)
}
 0x10d   :  { %208 = dma.vmem_to_hbm [thread:$0]  %s206_s18, 32, %s414_s3, [#allocation3]  }
 0x10e   :  { %323 = dma.done.wait [#allocation3], 32  }
 0x10f   :  { %324 = vsyncadd [#allocation3], 4294967264 }
 0x110   :  { %212 = vsyncpa [#allocation3], 1 }

</bundles_post_ra>
